<compile_context>
chip_gen: v5e
topology: v5e:2x2
jax: 0.10.0
libtpu: 0.0.40
codegen_flags: <defaults>
</compile_context>

<pallas_src>
import functools

import jax
import jax.numpy as jnp
from jax.experimental import pallas as pl
from jax.experimental.pallas import tpu as pltpu


# (name, kernel_size, padding) — matches the nn.Conv1d declarations in the PyTorch module.
CONV_CFG = [("conv1", 21, 11), ("conv2", 11, 6), ("conv3", 3, 2),
            ("conv4", 3, 2), ("conv5", 3, 2)]


def _round_up(x, m):
    return ((x + m - 1) // m) * m


# ------------------------------ fused kernel ------------------------------- #

def _conv_relu_pool(act, w_ref, b_ref, pad_buf, col_buf, y_buf,
                    *, k, pad, L_in, Cin, Cout):
    """Conv1d(stride=1, padding=pad) + ReLU + MaxPool1d(3,3) for one sample, fully in VMEM.

    act:     (L_in, Cin) float32 value
    w_ref:   (k*Cin, Cout) bfloat16 VMEM ref  (weights reshaped at trace time)
    b_ref:   (1, Cout) float32 VMEM ref
    pad_buf: (>=L_in+2*pad, 128) f32 scratch   — zero-padded activation
    col_buf: (>=L_out, >=k*Cin)  f32 scratch   — im2col rows
    y_buf:   (>=L_out, >=Cout)   f32 scratch   — ReLU output, pooled via strided reads
    returns: (L_out // 3, Cout) float32 pooled activation
    """
    Lpad = L_in + 2 * pad
    L_out = Lpad - k + 1
    Lp = L_out // 3
    KC = k * Cin

    # Zero only the pad margins (the bottom margin holds stale rows from the previous,
    # longer layer and MUST be re-cleared), then drop the activation into the window.
    margin = jnp.zeros((pad, pad_buf.shape[1]), pad_buf.dtype)
    pad_buf[pl.ds(0, pad), :] = margin
    pad_buf[pl.ds(pad + L_in, pad), :] = margin
    pad_buf[pl.ds(pad, L_in), pl.ds(0, Cin)] = act

    # im2col: k shifted (L_out, Cin) copies -> (L_out, k*Cin) rows, then ONE MXU matmul
    # (bf16 operands, f32 accumulation) instead of k tiny K=Cin matmuls + an add chain.
    for j in range(k):
        col_buf[pl.ds(0, L_out), pl.ds(j * Cin, Cin)] = \
            pad_buf[pl.ds(j, L_out), pl.ds(0, Cin)]
    cols = col_buf[pl.ds(0, L_out), pl.ds(0, KC)].astype(jnp.bfloat16)
    y = jnp.dot(cols, w_ref[...], preferred_element_type=jnp.float32) + b_ref[...]
    y = jnp.maximum(y, 0.0)                                   # bias + ReLU, f32

    # MaxPool1d(kernel=3, stride=3): stash y, read the 3 pool phases with sublane-strided
    # slices, combine with elementwise max on the VPU.  No MXU work, no reshapes.
    y_buf[pl.ds(0, L_out), pl.ds(0, Cout)] = y
    p0 = y_buf[pl.ds(0, Lp, stride=3), pl.ds(0, Cout)]
    p1 = y_buf[pl.ds(1, Lp, stride=3), pl.ds(0, Cout)]
    p2 = y_buf[pl.ds(2, Lp, stride=3), pl.ds(0, Cout)]
    return jnp.maximum(jnp.maximum(p0, p1), p2)


def _wei_kernel(*refs, dims):
    n_conv = len(dims)
    x_ref = refs[0]
    conv_refs = refs[1:1 + 2 * n_conv]
    lw1, lb1, lw2, lb2 = refs[1 + 2 * n_conv:5 + 2 * n_conv]
    o_ref = refs[5 + 2 * n_conv]
    pad_buf, col_buf, y_buf = refs[6 + 2 * n_conv:]

    # One sample per grid step (the batch axis is the "parallel" grid dimension).
    act = x_ref[0].astype(jnp.float32)                        # (L0, Cin)
    for li, d in enumerate(dims):
        act = _conv_relu_pool(act, conv_refs[2 * li], conv_refs[2 * li + 1],
                              pad_buf, col_buf, y_buf, **d)

    # torch.mean(x, dim=2): mean over the remaining length axis; Dropout = identity (eval).
    feat = jnp.mean(act, axis=0, keepdims=True)               # (1, 128) f32

    # Classifier head, fused into the per-sample grid body.
    h = jnp.dot(feat.astype(jnp.bfloat16), lw1[...],
                preferred_element_type=jnp.float32) + lb1[...]
    h = jnp.maximum(h, 0.0).astype(jnp.bfloat16)
    logits = jnp.dot(h, lw2[...], preferred_element_type=jnp.float32) + lb2[...]
    o_ref[0] = logits.astype(o_ref.dtype)                     # (1, 2)


def wei_baseline_forward(params, x_ncl):
    """Forward pass of WeiBaseline.  x_ncl: (B, C_in, L) float32 -> (B, 2) float32."""
    x = jnp.transpose(x_ncl, (0, 2, 1)).astype(jnp.bfloat16)  # NCL -> NLC, bf16 MXU operand
    B, L, C = x.shape

    dims = []
    l, c = L, C
    for name, k, pad in CONV_CFG:
        cout = params[name][0].shape[2]
        l_out = l + 2 * pad - k + 1
        lp = l_out // 3
        assert lp >= 1, "input length too short for 5 conv/pool stages"
        dims.append(dict(k=k, pad=pad, L_in=l, Cin=c, Cout=cout))
        l, c = lp, cout

    pad_rows = _round_up(max(d["L_in"] + 2 * d["pad"] for d in dims), 8)
    pad_cols = _round_up(max(d["Cin"] for d in dims), 128)
    col_rows = _round_up(max(d["L_in"] + 2 * d["pad"] - d["k"] + 1 for d in dims), 8)
    col_cols = _round_up(max(d["k"] * d["Cin"] for d in dims), 128)
    y_cols = _round_up(max(d["Cout"] for d in dims), 128)

    # Inputs: per-sample x block + weights (conv weights reshaped to (k*Cin, Cout) at trace
    # time so the kernel does a single big-K dot per layer).
    flat = [x]
    for name, _, _ in CONV_CFG:
        w, b = params[name]                                   # (k, Cin, Cout) bf16, (1, Cout) f32
        flat.append(w.reshape(-1, w.shape[-1]))               # (k*Cin, Cout) bf16
        flat.append(b)
    flat += list(params["linear1"]) + list(params["linear2"])

    const2 = lambda b: (0, 0)                                 # weights: whole array, fetched once
    in_specs = [pl.BlockSpec((1, L, C), lambda b: (b, 0, 0))]
    in_specs += [pl.BlockSpec(a.shape, const2) for a in flat[1:]]
    out_specs = pl.BlockSpec((1, 1, 2), lambda b: (b, 0, 0))

    out = pl.pallas_call(
        functools.partial(_wei_kernel, dims=tuple(dims)),
        out_shape=jax.ShapeDtypeStruct((B, 1, 2), jnp.float32),
        grid_spec=pltpu.PrefetchScalarGridSpec(
            num_scalar_prefetch=0,
            grid=(B,),
            in_specs=in_specs,
            out_specs=out_specs,
            scratch_shapes=[
                pltpu.VMEM((pad_rows, pad_cols), jnp.float32),   # zero-padded conv input
                pltpu.VMEM((col_rows, col_cols), jnp.float32),   # im2col rows
                pltpu.VMEM((col_rows, y_cols), jnp.float32),     # ReLU output for pooling
            ]),
        compiler_params=pltpu.CompilerParams(
            dimension_semantics=("parallel",)),
    )(*flat)
    return out.reshape(B, 2)


# ------------------------------ params / reference -------------------------- #

def init_params(key, c_in):
    conv_shapes = [("conv1", c_in, 32, 21), ("conv2", 32, 64, 11), ("conv3", 64, 128, 3),
                   ("conv4", 128, 128, 3), ("conv5", 128, 128, 3)]
    lin_shapes = [("linear1", 128, 128), ("linear2", 128, 2)]
    keys = jax.random.split(key, len(conv_shapes) + len(lin_shapes))
    params = {}
    for kk, (name, cin, cout, ksz) in zip(keys[:len(conv_shapes)], conv_shapes):
        k1, k2 = jax.random.split(kk)
        bound = 1.0 / (cin * ksz) ** 0.5
        w = jax.random.uniform(k1, (ksz, cin, cout), jnp.float32, -bound, bound)
        b = jax.random.uniform(k2, (1, cout), jnp.float32, -bound, bound)
        params[name] = (w.astype(jnp.bfloat16), b)            # bf16 weights: MXU-native operands
    for kk, (name, din, dout) in zip(keys[len(conv_shapes):], lin_shapes):
        k1, k2 = jax.random.split(kk)
        bound = 1.0 / din ** 0.5
        w = jax.random.uniform(k1, (din, dout), jnp.float32, -bound, bound)
        b = jax.random.uniform(k2, (1, dout), jnp.float32, -bound, bound)
        params[name] = (w.astype(jnp.bfloat16), b)
    return params


def reference_forward(params, x_ncl):
    """Pure-JAX (XLA) reference using the same bf16-operand / f32-accumulate matmul math."""
    x = jnp.transpose(x_ncl, (0, 2, 1)).astype(jnp.float32)   # (B, L, C)
    for name, k, pad in CONV_CFG:
        w, b = params[name]                                   # (k, Cin, Cout) bf16, (1, Cout) f32
        B, L, Cin = x.shape
        cout = w.shape[2]
        xp = jnp.pad(x, ((0, 0), (pad, pad), (0, 0)))
        L_out = L + 2 * pad - k + 1
        cols = jnp.concatenate([xp[:, j:j + L_out, :] for j in range(k)], axis=2)
        y = jnp.einsum("blc,co->blo", cols.astype(jnp.bfloat16), w.reshape(-1, cout),
                       preferred_element_type=jnp.float32) + b
        y = jnp.maximum(y, 0.0)
        Lp = L_out // 3
        x = y[:, :3 * Lp, :].reshape(B, Lp, 3, cout).max(axis=2)
    x = x.mean(axis=1)                                        # (B, 128) f32
    w1, b1 = params["linear1"]
    w2, b2 = params["linear2"]
    h = jnp.maximum(jnp.dot(x.astype(jnp.bfloat16), w1,
                            preferred_element_type=jnp.float32) + b1, 0.0)
    return jnp.dot(h.astype(jnp.bfloat16), w2, preferred_element_type=jnp.float32) + b2


if __name__ == "__main__":
    key = jax.random.PRNGKey(0)
    pkey, xkey = jax.random.split(key)
    B, C_IN, L = 2, 4, 250           # d_in = (4, 250): small, survives the 5 pool stages
    params = init_params(pkey, C_IN)
    x = jax.random.normal(xkey, (B, C_IN, L), jnp.float32)

    out = jax.block_until_ready(jax.jit(wei_baseline_forward)(params, x))
    ref = jax.block_until_ready(jax.jit(reference_forward)(params, x))

    assert out.shape == (B, 2), out.shape
    assert jnp.allclose(out, ref, atol=2e-3, rtol=2e-3), (out, ref)
    print("KERNEL_OK")
</pallas_src>

<mosaic_0001>
module attributes {stable_mosaic.version = 11 : i64} {
  func.func @_wei_kernel(%arg0: i32, %arg1: memref<1x250x4xbf16, #tpu.memory_space<vmem>>, %arg2: memref<84x32xbf16, #tpu.memory_space<vmem>>, %arg3: memref<1x32xf32, #tpu.memory_space<vmem>>, %arg4: memref<352x64xbf16, #tpu.memory_space<vmem>>, %arg5: memref<1x64xf32, #tpu.memory_space<vmem>>, %arg6: memref<192x128xbf16, #tpu.memory_space<vmem>>, %arg7: memref<1x128xf32, #tpu.memory_space<vmem>>, %arg8: memref<384x128xbf16, #tpu.memory_space<vmem>>, %arg9: memref<1x128xf32, #tpu.memory_space<vmem>>, %arg10: memref<384x128xbf16, #tpu.memory_space<vmem>>, %arg11: memref<1x128xf32, #tpu.memory_space<vmem>>, %arg12: memref<128x128xbf16, #tpu.memory_space<vmem>>, %arg13: memref<1x128xf32, #tpu.memory_space<vmem>>, %arg14: memref<128x2xbf16, #tpu.memory_space<vmem>>, %arg15: memref<1x2xf32, #tpu.memory_space<vmem>>, %arg16: memref<1x1x2xf32, #tpu.memory_space<vmem>>, %arg17: memref<272x128xf32, #tpu.memory_space<vmem>>, %arg18: memref<256x384xf32, #tpu.memory_space<vmem>>, %arg19: memref<256x128xf32, #tpu.memory_space<vmem>>) attributes {dimension_semantics = [#tpu.dimension_semantics<parallel>], iteration_bounds = array<i64: 2>, scalar_prefetch = 0 : i64, scratch_operands = 3 : i64, tpu.core_type = #tpu.core_type<tc>, window_params = [{transform_indices = @transform_0, window_bounds = array<i64: 1, 250, 4>}, {pipeline_mode = #tpu.pipeline_mode<synchronous>, transform_indices = @transform_1, window_bounds = array<i64: 84, 32>}, {pipeline_mode = #tpu.pipeline_mode<synchronous>, transform_indices = @transform_2, window_bounds = array<i64: 1, 32>}, {pipeline_mode = #tpu.pipeline_mode<synchronous>, transform_indices = @transform_3, window_bounds = array<i64: 352, 64>}, {pipeline_mode = #tpu.pipeline_mode<synchronous>, transform_indices = @transform_4, window_bounds = array<i64: 1, 64>}, {pipeline_mode = #tpu.pipeline_mode<synchronous>, transform_indices = @transform_5, window_bounds = array<i64: 192, 128>}, {pipeline_mode = #tpu.pipeline_mode<synchronous>, transform_indices = @transform_6, window_bounds = array<i64: 1, 128>}, {pipeline_mode = #tpu.pipeline_mode<synchronous>, transform_indices = @transform_7, window_bounds = array<i64: 384, 128>}, {pipeline_mode = #tpu.pipeline_mode<synchronous>, transform_indices = @transform_8, window_bounds = array<i64: 1, 128>}, {pipeline_mode = #tpu.pipeline_mode<synchronous>, transform_indices = @transform_9, window_bounds = array<i64: 384, 128>}, {pipeline_mode = #tpu.pipeline_mode<synchronous>, transform_indices = @transform_10, window_bounds = array<i64: 1, 128>}, {pipeline_mode = #tpu.pipeline_mode<synchronous>, transform_indices = @transform_11, window_bounds = array<i64: 128, 128>}, {pipeline_mode = #tpu.pipeline_mode<synchronous>, transform_indices = @transform_12, window_bounds = array<i64: 1, 128>}, {pipeline_mode = #tpu.pipeline_mode<synchronous>, transform_indices = @transform_13, window_bounds = array<i64: 128, 2>}, {pipeline_mode = #tpu.pipeline_mode<synchronous>, transform_indices = @transform_14, window_bounds = array<i64: 1, 2>}, {transform_indices = @transform_15, window_bounds = array<i64: 1, 1, 2>}]} {
    %c0 = arith.constant 0 : index
    %c0_0 = arith.constant 0 : index
    %c0_1 = arith.constant 0 : index
    %0 = vector.load %arg1[%c0, %c0_0, %c0_1] : memref<1x250x4xbf16, #tpu.memory_space<vmem>>, vector<1x250x4xbf16>
    %1 = vector.shape_cast %0 : vector<1x250x4xbf16> to vector<250x4xbf16>
    %2 = arith.extf %1 : vector<250x4xbf16> to vector<250x4xf32>
    %cst = arith.constant 0.000000e+00 : f32
    %3 = vector.broadcast %cst : f32 to vector<11x128xf32>
    %c0_2 = arith.constant 0 : index
    %c0_3 = arith.constant 0 : index
    %4 = vector.load %arg17[%c0_2, %c0_3] : memref<272x128xf32, #tpu.memory_space<vmem>>, vector<11x128xf32>
    tpu.vector_store %arg17[%c0_2, %c0_3], %3 {strides = array<i32>} : memref<272x128xf32, #tpu.memory_space<vmem>>, vector<11x128xf32>,
    %c261 = arith.constant 261 : index
    %c0_4 = arith.constant 0 : index
    %5 = vector.load %arg17[%c261, %c0_4] : memref<272x128xf32, #tpu.memory_space<vmem>>, vector<11x128xf32>
    tpu.vector_store %arg17[%c261, %c0_4], %3 {strides = array<i32>} : memref<272x128xf32, #tpu.memory_space<vmem>>, vector<11x128xf32>,
    %c11 = arith.constant 11 : index
    %c0_5 = arith.constant 0 : index
    %6 = vector.load %arg17[%c11, %c0_5] : memref<272x128xf32, #tpu.memory_space<vmem>>, vector<250x4xf32>
    tpu.vector_store %arg17[%c11, %c0_5], %2 {strides = array<i32>} : memref<272x128xf32, #tpu.memory_space<vmem>>, vector<250x4xf32>,
    %c0_6 = arith.constant 0 : index
    %c0_7 = arith.constant 0 : index
    %7 = vector.load %arg17[%c0_6, %c0_7] : memref<272x128xf32, #tpu.memory_space<vmem>>, vector<252x4xf32>
    %c0_8 = arith.constant 0 : index
    %c0_9 = arith.constant 0 : index
    %8 = vector.load %arg18[%c0_8, %c0_9] : memref<256x384xf32, #tpu.memory_space<vmem>>, vector<252x4xf32>
    tpu.vector_store %arg18[%c0_8, %c0_9], %7 {strides = array<i32>} : memref<256x384xf32, #tpu.memory_space<vmem>>, vector<252x4xf32>,
    %c1 = arith.constant 1 : index
    %c0_10 = arith.constant 0 : index
    %9 = vector.load %arg17[%c1, %c0_10] : memref<272x128xf32, #tpu.memory_space<vmem>>, vector<252x4xf32>
    %c0_11 = arith.constant 0 : index
    %c4 = arith.constant 4 : index
    %10 = vector.load %arg18[%c0_11, %c4] : memref<256x384xf32, #tpu.memory_space<vmem>>, vector<252x4xf32>
    tpu.vector_store %arg18[%c0_11, %c4], %9 {strides = array<i32>} : memref<256x384xf32, #tpu.memory_space<vmem>>, vector<252x4xf32>,
    %c2 = arith.constant 2 : index
    %c0_12 = arith.constant 0 : index
    %11 = vector.load %arg17[%c2, %c0_12] : memref<272x128xf32, #tpu.memory_space<vmem>>, vector<252x4xf32>
    %c0_13 = arith.constant 0 : index
    %c8 = arith.constant 8 : index
    %12 = vector.load %arg18[%c0_13, %c8] : memref<256x384xf32, #tpu.memory_space<vmem>>, vector<252x4xf32>
    tpu.vector_store %arg18[%c0_13, %c8], %11 {strides = array<i32>} : memref<256x384xf32, #tpu.memory_space<vmem>>, vector<252x4xf32>,
    %c3 = arith.constant 3 : index
    %c0_14 = arith.constant 0 : index
    %13 = vector.load %arg17[%c3, %c0_14] : memref<272x128xf32, #tpu.memory_space<vmem>>, vector<252x4xf32>
    %c0_15 = arith.constant 0 : index
    %c12 = arith.constant 12 : index
    %14 = vector.load %arg18[%c0_15, %c12] : memref<256x384xf32, #tpu.memory_space<vmem>>, vector<252x4xf32>
    tpu.vector_store %arg18[%c0_15, %c12], %13 {strides = array<i32>} : memref<256x384xf32, #tpu.memory_space<vmem>>, vector<252x4xf32>,
    %c4_16 = arith.constant 4 : index
    %c0_17 = arith.constant 0 : index
    %15 = vector.load %arg17[%c4_16, %c0_17] : memref<272x128xf32, #tpu.memory_space<vmem>>, vector<252x4xf32>
    %c0_18 = arith.constant 0 : index
    %c16 = arith.constant 16 : index
    %16 = vector.load %arg18[%c0_18, %c16] : memref<256x384xf32, #tpu.memory_space<vmem>>, vector<252x4xf32>
    tpu.vector_store %arg18[%c0_18, %c16], %15 {strides = array<i32>} : memref<256x384xf32, #tpu.memory_space<vmem>>, vector<252x4xf32>,
    %c5 = arith.constant 5 : index
    %c0_19 = arith.constant 0 : index
    %17 = vector.load %arg17[%c5, %c0_19] : memref<272x128xf32, #tpu.memory_space<vmem>>, vector<252x4xf32>
    %c0_20 = arith.constant 0 : index
    %c20 = arith.constant 20 : index
    %18 = vector.load %arg18[%c0_20, %c20] : memref<256x384xf32, #tpu.memory_space<vmem>>, vector<252x4xf32>
    tpu.vector_store %arg18[%c0_20, %c20], %17 {strides = array<i32>} : memref<256x384xf32, #tpu.memory_space<vmem>>, vector<252x4xf32>,
    %c6 = arith.constant 6 : index
    %c0_21 = arith.constant 0 : index
    %19 = vector.load %arg17[%c6, %c0_21] : memref<272x128xf32, #tpu.memory_space<vmem>>, vector<252x4xf32>
    %c0_22 = arith.constant 0 : index
    %c24 = arith.constant 24 : index
    %20 = vector.load %arg18[%c0_22, %c24] : memref<256x384xf32, #tpu.memory_space<vmem>>, vector<252x4xf32>
    tpu.vector_store %arg18[%c0_22, %c24], %19 {strides = array<i32>} : memref<256x384xf32, #tpu.memory_space<vmem>>, vector<252x4xf32>,
    %c7 = arith.constant 7 : index
    %c0_23 = arith.constant 0 : index
    %21 = vector.load %arg17[%c7, %c0_23] : memref<272x128xf32, #tpu.memory_space<vmem>>, vector<252x4xf32>
    %c0_24 = arith.constant 0 : index
    %c28 = arith.constant 28 : index
    %22 = vector.load %arg18[%c0_24, %c28] : memref<256x384xf32, #tpu.memory_space<vmem>>, vector<252x4xf32>
    tpu.vector_store %arg18[%c0_24, %c28], %21 {strides = array<i32>} : memref<256x384xf32, #tpu.memory_space<vmem>>, vector<252x4xf32>,
    %c8_25 = arith.constant 8 : index
    %c0_26 = arith.constant 0 : index
    %23 = vector.load %arg17[%c8_25, %c0_26] : memref<272x128xf32, #tpu.memory_space<vmem>>, vector<252x4xf32>
    %c0_27 = arith.constant 0 : index
    %c32 = arith.constant 32 : index
    %24 = vector.load %arg18[%c0_27, %c32] : memref<256x384xf32, #tpu.memory_space<vmem>>, vector<252x4xf32>
    tpu.vector_store %arg18[%c0_27, %c32], %23 {strides = array<i32>} : memref<256x384xf32, #tpu.memory_space<vmem>>, vector<252x4xf32>,
    %c9 = arith.constant 9 : index
    %c0_28 = arith.constant 0 : index
    %25 = vector.load %arg17[%c9, %c0_28] : memref<272x128xf32, #tpu.memory_space<vmem>>, vector<252x4xf32>
    %c0_29 = arith.constant 0 : index
    %c36 = arith.constant 36 : index
    %26 = vector.load %arg18[%c0_29, %c36] : memref<256x384xf32, #tpu.memory_space<vmem>>, vector<252x4xf32>
    tpu.vector_store %arg18[%c0_29, %c36], %25 {strides = array<i32>} : memref<256x384xf32, #tpu.memory_space<vmem>>, vector<252x4xf32>,
    %c10 = arith.constant 10 : index
    %c0_30 = arith.constant 0 : index
    %27 = vector.load %arg17[%c10, %c0_30] : memref<272x128xf32, #tpu.memory_space<vmem>>, vector<252x4xf32>
    %c0_31 = arith.constant 0 : index
    %c40 = arith.constant 40 : index
    %28 = vector.load %arg18[%c0_31, %c40] : memref<256x384xf32, #tpu.memory_space<vmem>>, vector<252x4xf32>
    tpu.vector_store %arg18[%c0_31, %c40], %27 {strides = array<i32>} : memref<256x384xf32, #tpu.memory_space<vmem>>, vector<252x4xf32>,
    %c11_32 = arith.constant 11 : index
    %c0_33 = arith.constant 0 : index
    %29 = vector.load %arg17[%c11_32, %c0_33] : memref<272x128xf32, #tpu.memory_space<vmem>>, vector<252x4xf32>
    %c0_34 = arith.constant 0 : index
    %c44 = arith.constant 44 : index
    %30 = vector.load %arg18[%c0_34, %c44] : memref<256x384xf32, #tpu.memory_space<vmem>>, vector<252x4xf32>
    tpu.vector_store %arg18[%c0_34, %c44], %29 {strides = array<i32>} : memref<256x384xf32, #tpu.memory_space<vmem>>, vector<252x4xf32>,
    %c12_35 = arith.constant 12 : index
    %c0_36 = arith.constant 0 : index
    %31 = vector.load %arg17[%c12_35, %c0_36] : memref<272x128xf32, #tpu.memory_space<vmem>>, vector<252x4xf32>
    %c0_37 = arith.constant 0 : index
    %c48 = arith.constant 48 : index
    %32 = vector.load %arg18[%c0_37, %c48] : memref<256x384xf32, #tpu.memory_space<vmem>>, vector<252x4xf32>
    tpu.vector_store %arg18[%c0_37, %c48], %31 {strides = array<i32>} : memref<256x384xf32, #tpu.memory_space<vmem>>, vector<252x4xf32>,
    %c13 = arith.constant 13 : index
    %c0_38 = arith.constant 0 : index
    %33 = vector.load %arg17[%c13, %c0_38] : memref<272x128xf32, #tpu.memory_space<vmem>>, vector<252x4xf32>
    %c0_39 = arith.constant 0 : index
    %c52 = arith.constant 52 : index
    %34 = vector.load %arg18[%c0_39, %c52] : memref<256x384xf32, #tpu.memory_space<vmem>>, vector<252x4xf32>
    tpu.vector_store %arg18[%c0_39, %c52], %33 {strides = array<i32>} : memref<256x384xf32, #tpu.memory_space<vmem>>, vector<252x4xf32>,
    %c14 = arith.constant 14 : index
    %c0_40 = arith.constant 0 : index
    %35 = vector.load %arg17[%c14, %c0_40] : memref<272x128xf32, #tpu.memory_space<vmem>>, vector<252x4xf32>
    %c0_41 = arith.constant 0 : index
    %c56 = arith.constant 56 : index
    %36 = vector.load %arg18[%c0_41, %c56] : memref<256x384xf32, #tpu.memory_space<vmem>>, vector<252x4xf32>
    tpu.vector_store %arg18[%c0_41, %c56], %35 {strides = array<i32>} : memref<256x384xf32, #tpu.memory_space<vmem>>, vector<252x4xf32>,
    %c15 = arith.constant 15 : index
    %c0_42 = arith.constant 0 : index
    %37 = vector.load %arg17[%c15, %c0_42] : memref<272x128xf32, #tpu.memory_space<vmem>>, vector<252x4xf32>
    %c0_43 = arith.constant 0 : index
    %c60 = arith.constant 60 : index
    %38 = vector.load %arg18[%c0_43, %c60] : memref<256x384xf32, #tpu.memory_space<vmem>>, vector<252x4xf32>
    tpu.vector_store %arg18[%c0_43, %c60], %37 {strides = array<i32>} : memref<256x384xf32, #tpu.memory_space<vmem>>, vector<252x4xf32>,
    %c16_44 = arith.constant 16 : index
    %c0_45 = arith.constant 0 : index
    %39 = vector.load %arg17[%c16_44, %c0_45] : memref<272x128xf32, #tpu.memory_space<vmem>>, vector<252x4xf32>
    %c0_46 = arith.constant 0 : index
    %c64 = arith.constant 64 : index
    %40 = vector.load %arg18[%c0_46, %c64] : memref<256x384xf32, #tpu.memory_space<vmem>>, vector<252x4xf32>
    tpu.vector_store %arg18[%c0_46, %c64], %39 {strides = array<i32>} : memref<256x384xf32, #tpu.memory_space<vmem>>, vector<252x4xf32>,
    %c17 = arith.constant 17 : index
    %c0_47 = arith.constant 0 : index
    %41 = vector.load %arg17[%c17, %c0_47] : memref<272x128xf32, #tpu.memory_space<vmem>>, vector<252x4xf32>
    %c0_48 = arith.constant 0 : index
    %c68 = arith.constant 68 : index
    %42 = vector.load %arg18[%c0_48, %c68] : memref<256x384xf32, #tpu.memory_space<vmem>>, vector<252x4xf32>
    tpu.vector_store %arg18[%c0_48, %c68], %41 {strides = array<i32>} : memref<256x384xf32, #tpu.memory_space<vmem>>, vector<252x4xf32>,
    %c18 = arith.constant 18 : index
    %c0_49 = arith.constant 0 : index
    %43 = vector.load %arg17[%c18, %c0_49] : memref<272x128xf32, #tpu.memory_space<vmem>>, vector<252x4xf32>
    %c0_50 = arith.constant 0 : index
    %c72 = arith.constant 72 : index
    %44 = vector.load %arg18[%c0_50, %c72] : memref<256x384xf32, #tpu.memory_space<vmem>>, vector<252x4xf32>
    tpu.vector_store %arg18[%c0_50, %c72], %43 {strides = array<i32>} : memref<256x384xf32, #tpu.memory_space<vmem>>, vector<252x4xf32>,
    %c19 = arith.constant 19 : index
    %c0_51 = arith.constant 0 : index
    %45 = vector.load %arg17[%c19, %c0_51] : memref<272x128xf32, #tpu.memory_space<vmem>>, vector<252x4xf32>
    %c0_52 = arith.constant 0 : index
    %c76 = arith.constant 76 : index
    %46 = vector.load %arg18[%c0_52, %c76] : memref<256x384xf32, #tpu.memory_space<vmem>>, vector<252x4xf32>
    tpu.vector_store %arg18[%c0_52, %c76], %45 {strides = array<i32>} : memref<256x384xf32, #tpu.memory_space<vmem>>, vector<252x4xf32>,
    %c20_53 = arith.constant 20 : index
    %c0_54 = arith.constant 0 : index
    %47 = vector.load %arg17[%c20_53, %c0_54] : memref<272x128xf32, #tpu.memory_space<vmem>>, vector<252x4xf32>
    %c0_55 = arith.constant 0 : index
    %c80 = arith.constant 80 : index
    %48 = vector.load %arg18[%c0_55, %c80] : memref<256x384xf32, #tpu.memory_space<vmem>>, vector<252x4xf32>
    tpu.vector_store %arg18[%c0_55, %c80], %47 {strides = array<i32>} : memref<256x384xf32, #tpu.memory_space<vmem>>, vector<252x4xf32>,
    %c0_56 = arith.constant 0 : index
    %c0_57 = arith.constant 0 : index
    %49 = vector.load %arg18[%c0_56, %c0_57] : memref<256x384xf32, #tpu.memory_space<vmem>>, vector<252x84xf32>
    %50 = arith.truncf %49 : vector<252x84xf32> to vector<252x84xbf16>
    %c0_58 = arith.constant 0 : index
    %c0_59 = arith.constant 0 : index
    %51 = vector.load %arg2[%c0_58, %c0_59] : memref<84x32xbf16, #tpu.memory_space<vmem>>, vector<84x32xbf16>
    %cst_60 = arith.constant dense<0.000000e+00> : vector<252x32xf32>
    %52 = tpu.matmul %50, %51, %cst_60 {dimension_numbers = #tpu.dot_dimension_numbers<[1], [0], [0], [1], [0, 0, 1, 1], [], []>} : vector<252x84xbf16>, vector<84x32xbf16>, vector<252x32xf32> -> vector<252x32xf32>
    %c0_61 = arith.constant 0 : index
    %c0_62 = arith.constant 0 : index
    %53 = vector.load %arg3[%c0_61, %c0_62] : memref<1x32xf32, #tpu.memory_space<vmem>>, vector<1x32xf32>
    %54 = vector.broadcast %53 : vector<1x32xf32> to vector<252x32xf32>
    %55 = arith.addf %52, %54 : vector<252x32xf32>
    %cst_63 = arith.constant 0.000000e+00 : f32
    %56 = vector.broadcast %cst_63 : f32 to vector<252x32xf32>
    %57 = arith.maximumf %55, %56 : vector<252x32xf32>
    %c0_64 = arith.constant 0 : index
    %c0_65 = arith.constant 0 : index
    %58 = vector.load %arg19[%c0_64, %c0_65] : memref<256x128xf32, #tpu.memory_space<vmem>>, vector<252x32xf32>
    tpu.vector_store %arg19[%c0_64, %c0_65], %57 {strides = array<i32>} : memref<256x128xf32, #tpu.memory_space<vmem>>, vector<252x32xf32>,
    %c0_66 = arith.constant 0 : index
    %c0_67 = arith.constant 0 : index
    %59 = tpu.strided_load %arg19[%c0_66, %c0_67] {strides = array<i32: 3, 1>} : memref<256x128xf32, #tpu.memory_space<vmem>>, vector<84x32xf32>
    %c1_68 = arith.constant 1 : index
    %c0_69 = arith.constant 0 : index
    %60 = tpu.strided_load %arg19[%c1_68, %c0_69] {strides = array<i32: 3, 1>} : memref<256x128xf32, #tpu.memory_space<vmem>>, vector<84x32xf32>
    %c2_70 = arith.constant 2 : index
    %c0_71 = arith.constant 0 : index
    %61 = tpu.strided_load %arg19[%c2_70, %c0_71] {strides = array<i32: 3, 1>} : memref<256x128xf32, #tpu.memory_space<vmem>>, vector<84x32xf32>
    %62 = arith.maximumf %59, %60 : vector<84x32xf32>
    %63 = arith.maximumf %62, %61 : vector<84x32xf32>
    %cst_72 = arith.constant 0.000000e+00 : f32
    %64 = vector.broadcast %cst_72 : f32 to vector<6x128xf32>
    %c0_73 = arith.constant 0 : index
    %c0_74 = arith.constant 0 : index
    %65 = vector.load %arg17[%c0_73, %c0_74] : memref<272x128xf32, #tpu.memory_space<vmem>>, vector<6x128xf32>
    tpu.vector_store %arg17[%c0_73, %c0_74], %64 {strides = array<i32>} : memref<272x128xf32, #tpu.memory_space<vmem>>, vector<6x128xf32>,
    %c90 = arith.constant 90 : index
    %c0_75 = arith.constant 0 : index
    %66 = vector.load %arg17[%c90, %c0_75] : memref<272x128xf32, #tpu.memory_space<vmem>>, vector<6x128xf32>
    tpu.vector_store %arg17[%c90, %c0_75], %64 {strides = array<i32>} : memref<272x128xf32, #tpu.memory_space<vmem>>, vector<6x128xf32>,
    %c6_76 = arith.constant 6 : index
    %c0_77 = arith.constant 0 : index
    %67 = vector.load %arg17[%c6_76, %c0_77] : memref<272x128xf32, #tpu.memory_space<vmem>>, vector<84x32xf32>
    tpu.vector_store %arg17[%c6_76, %c0_77], %63 {strides = array<i32>} : memref<272x128xf32, #tpu.memory_space<vmem>>, vector<84x32xf32>,
    %c0_78 = arith.constant 0 : index
    %c0_79 = arith.constant 0 : index
    %68 = vector.load %arg17[%c0_78, %c0_79] : memref<272x128xf32, #tpu.memory_space<vmem>>, vector<86x32xf32>
    %c0_80 = arith.constant 0 : index
    %c0_81 = arith.constant 0 : index
    %69 = vector.load %arg18[%c0_80, %c0_81] : memref<256x384xf32, #tpu.memory_space<vmem>>, vector<86x32xf32>
    tpu.vector_store %arg18[%c0_80, %c0_81], %68 {strides = array<i32>} : memref<256x384xf32, #tpu.memory_space<vmem>>, vector<86x32xf32>,
    %c1_82 = arith.constant 1 : index
    %c0_83 = arith.constant 0 : index
    %70 = vector.load %arg17[%c1_82, %c0_83] : memref<272x128xf32, #tpu.memory_space<vmem>>, vector<86x32xf32>
    %c0_84 = arith.constant 0 : index
    %c32_85 = arith.constant 32 : index
    %71 = vector.load %arg18[%c0_84, %c32_85] : memref<256x384xf32, #tpu.memory_space<vmem>>, vector<86x32xf32>
    tpu.vector_store %arg18[%c0_84, %c32_85], %70 {strides = array<i32>} : memref<256x384xf32, #tpu.memory_space<vmem>>, vector<86x32xf32>,
    %c2_86 = arith.constant 2 : index
    %c0_87 = arith.constant 0 : index
    %72 = vector.load %arg17[%c2_86, %c0_87] : memref<272x128xf32, #tpu.memory_space<vmem>>, vector<86x32xf32>
    %c0_88 = arith.constant 0 : index
    %c64_89 = arith.constant 64 : index
    %73 = vector.load %arg18[%c0_88, %c64_89] : memref<256x384xf32, #tpu.memory_space<vmem>>, vector<86x32xf32>
    tpu.vector_store %arg18[%c0_88, %c64_89], %72 {strides = array<i32>} : memref<256x384xf32, #tpu.memory_space<vmem>>, vector<86x32xf32>,
    %c3_90 = arith.constant 3 : index
    %c0_91 = arith.constant 0 : index
    %74 = vector.load %arg17[%c3_90, %c0_91] : memref<272x128xf32, #tpu.memory_space<vmem>>, vector<86x32xf32>
    %c0_92 = arith.constant 0 : index
    %c96 = arith.constant 96 : index
    %75 = vector.load %arg18[%c0_92, %c96] : memref<256x384xf32, #tpu.memory_space<vmem>>, vector<86x32xf32>
    tpu.vector_store %arg18[%c0_92, %c96], %74 {strides = array<i32>} : memref<256x384xf32, #tpu.memory_space<vmem>>, vector<86x32xf32>,
    %c4_93 = arith.constant 4 : index
    %c0_94 = arith.constant 0 : index
    %76 = vector.load %arg17[%c4_93, %c0_94] : memref<272x128xf32, #tpu.memory_space<vmem>>, vector<86x32xf32>
    %c0_95 = arith.constant 0 : index
    %c128 = arith.constant 128 : index
    %77 = vector.load %arg18[%c0_95, %c128] : memref<256x384xf32, #tpu.memory_space<vmem>>, vector<86x32xf32>
    tpu.vector_store %arg18[%c0_95, %c128], %76 {strides = array<i32>} : memref<256x384xf32, #tpu.memory_space<vmem>>, vector<86x32xf32>,
    %c5_96 = arith.constant 5 : index
    %c0_97 = arith.constant 0 : index
    %78 = vector.load %arg17[%c5_96, %c0_97] : memref<272x128xf32, #tpu.memory_space<vmem>>, vector<86x32xf32>
    %c0_98 = arith.constant 0 : index
    %c160 = arith.constant 160 : index
    %79 = vector.load %arg18[%c0_98, %c160] : memref<256x384xf32, #tpu.memory_space<vmem>>, vector<86x32xf32>
    tpu.vector_store %arg18[%c0_98, %c160], %78 {strides = array<i32>} : memref<256x384xf32, #tpu.memory_space<vmem>>, vector<86x32xf32>,
    %c6_99 = arith.constant 6 : index
    %c0_100 = arith.constant 0 : index
    %80 = vector.load %arg17[%c6_99, %c0_100] : memref<272x128xf32, #tpu.memory_space<vmem>>, vector<86x32xf32>
    %c0_101 = arith.constant 0 : index
    %c192 = arith.constant 192 : index
    %81 = vector.load %arg18[%c0_101, %c192] : memref<256x384xf32, #tpu.memory_space<vmem>>, vector<86x32xf32>
    tpu.vector_store %arg18[%c0_101, %c192], %80 {strides = array<i32>} : memref<256x384xf32, #tpu.memory_space<vmem>>, vector<86x32xf32>,
    %c7_102 = arith.constant 7 : index
    %c0_103 = arith.constant 0 : index
    %82 = vector.load %arg17[%c7_102, %c0_103] : memref<272x128xf32, #tpu.memory_space<vmem>>, vector<86x32xf32>
    %c0_104 = arith.constant 0 : index
    %c224 = arith.constant 224 : index
    %83 = vector.load %arg18[%c0_104, %c224] : memref<256x384xf32, #tpu.memory_space<vmem>>, vector<86x32xf32>
    tpu.vector_store %arg18[%c0_104, %c224], %82 {strides = array<i32>} : memref<256x384xf32, #tpu.memory_space<vmem>>, vector<86x32xf32>,
    %c8_105 = arith.constant 8 : index
    %c0_106 = arith.constant 0 : index
    %84 = vector.load %arg17[%c8_105, %c0_106] : memref<272x128xf32, #tpu.memory_space<vmem>>, vector<86x32xf32>
    %c0_107 = arith.constant 0 : index
    %c256 = arith.constant 256 : index
    %85 = vector.load %arg18[%c0_107, %c256] : memref<256x384xf32, #tpu.memory_space<vmem>>, vector<86x32xf32>
    tpu.vector_store %arg18[%c0_107, %c256], %84 {strides = array<i32>} : memref<256x384xf32, #tpu.memory_space<vmem>>, vector<86x32xf32>,
    %c9_108 = arith.constant 9 : index
    %c0_109 = arith.constant 0 : index
    %86 = vector.load %arg17[%c9_108, %c0_109] : memref<272x128xf32, #tpu.memory_space<vmem>>, vector<86x32xf32>
    %c0_110 = arith.constant 0 : index
    %c288 = arith.constant 288 : index
    %87 = vector.load %arg18[%c0_110, %c288] : memref<256x384xf32, #tpu.memory_space<vmem>>, vector<86x32xf32>
    tpu.vector_store %arg18[%c0_110, %c288], %86 {strides = array<i32>} : memref<256x384xf32, #tpu.memory_space<vmem>>, vector<86x32xf32>,
    %c10_111 = arith.constant 10 : index
    %c0_112 = arith.constant 0 : index
    %88 = vector.load %arg17[%c10_111, %c0_112] : memref<272x128xf32, #tpu.memory_space<vmem>>, vector<86x32xf32>
    %c0_113 = arith.constant 0 : index
    %c320 = arith.constant 320 : index
    %89 = vector.load %arg18[%c0_113, %c320] : memref<256x384xf32, #tpu.memory_space<vmem>>, vector<86x32xf32>
    tpu.vector_store %arg18[%c0_113, %c320], %88 {strides = array<i32>} : memref<256x384xf32, #tpu.memory_space<vmem>>, vector<86x32xf32>,
    %c0_114 = arith.constant 0 : index
    %c0_115 = arith.constant 0 : index
    %90 = vector.load %arg18[%c0_114, %c0_115] : memref<256x384xf32, #tpu.memory_space<vmem>>, vector<86x352xf32>
    %91 = arith.truncf %90 : vector<86x352xf32> to vector<86x352xbf16>
    %c0_116 = arith.constant 0 : index
    %c0_117 = arith.constant 0 : index
    %92 = vector.load %arg4[%c0_116, %c0_117] : memref<352x64xbf16, #tpu.memory_space<vmem>>, vector<352x64xbf16>
    %cst_118 = arith.constant dense<0.000000e+00> : vector<86x64xf32>
    %93 = tpu.matmul %91, %92, %cst_118 {dimension_numbers = #tpu.dot_dimension_numbers<[1], [0], [0], [1], [0, 0, 1, 1], [], []>} : vector<86x352xbf16>, vector<352x64xbf16>, vector<86x64xf32> -> vector<86x64xf32>
    %c0_119 = arith.constant 0 : index
    %c0_120 = arith.constant 0 : index
    %94 = vector.load %arg5[%c0_119, %c0_120] : memref<1x64xf32, #tpu.memory_space<vmem>>, vector<1x64xf32>
    %95 = vector.broadcast %94 : vector<1x64xf32> to vector<86x64xf32>
    %96 = arith.addf %93, %95 : vector<86x64xf32>
    %cst_121 = arith.constant 0.000000e+00 : f32
    %97 = vector.broadcast %cst_121 : f32 to vector<86x64xf32>
    %98 = arith.maximumf %96, %97 : vector<86x64xf32>
    %c0_122 = arith.constant 0 : index
    %c0_123 = arith.constant 0 : index
    %99 = vector.load %arg19[%c0_122, %c0_123] : memref<256x128xf32, #tpu.memory_space<vmem>>, vector<86x64xf32>
    tpu.vector_store %arg19[%c0_122, %c0_123], %98 {strides = array<i32>} : memref<256x128xf32, #tpu.memory_space<vmem>>, vector<86x64xf32>,
    %c0_124 = arith.constant 0 : index
    %c0_125 = arith.constant 0 : index
    %100 = tpu.strided_load %arg19[%c0_124, %c0_125] {strides = array<i32: 3, 1>} : memref<256x128xf32, #tpu.memory_space<vmem>>, vector<28x64xf32>
    %c1_126 = arith.constant 1 : index
    %c0_127 = arith.constant 0 : index
    %101 = tpu.strided_load %arg19[%c1_126, %c0_127] {strides = array<i32: 3, 1>} : memref<256x128xf32, #tpu.memory_space<vmem>>, vector<28x64xf32>
    %c2_128 = arith.constant 2 : index
    %c0_129 = arith.constant 0 : index
    %102 = tpu.strided_load %arg19[%c2_128, %c0_129] {strides = array<i32: 3, 1>} : memref<256x128xf32, #tpu.memory_space<vmem>>, vector<28x64xf32>
    %103 = arith.maximumf %100, %101 : vector<28x64xf32>
    %104 = arith.maximumf %103, %102 : vector<28x64xf32>
    %cst_130 = arith.constant 0.000000e+00 : f32
    %105 = vector.broadcast %cst_130 : f32 to vector<2x128xf32>
    %c0_131 = arith.constant 0 : index
    %c0_132 = arith.constant 0 : index
    %106 = vector.load %arg17[%c0_131, %c0_132] : memref<272x128xf32, #tpu.memory_space<vmem>>, vector<2x128xf32>
    tpu.vector_store %arg17[%c0_131, %c0_132], %105 {strides = array<i32>} : memref<272x128xf32, #tpu.memory_space<vmem>>, vector<2x128xf32>,
    %c30 = arith.constant 30 : index
    %c0_133 = arith.constant 0 : index
    %107 = vector.load %arg17[%c30, %c0_133] : memref<272x128xf32, #tpu.memory_space<vmem>>, vector<2x128xf32>
    tpu.vector_store %arg17[%c30, %c0_133], %105 {strides = array<i32>} : memref<272x128xf32, #tpu.memory_space<vmem>>, vector<2x128xf32>,
    %c2_134 = arith.constant 2 : index
    %c0_135 = arith.constant 0 : index
    %108 = vector.load %arg17[%c2_134, %c0_135] : memref<272x128xf32, #tpu.memory_space<vmem>>, vector<28x64xf32>
    tpu.vector_store %arg17[%c2_134, %c0_135], %104 {strides = array<i32>} : memref<272x128xf32, #tpu.memory_space<vmem>>, vector<28x64xf32>,
    %c0_136 = arith.constant 0 : index
    %c0_137 = arith.constant 0 : index
    %109 = vector.load %arg17[%c0_136, %c0_137] : memref<272x128xf32, #tpu.memory_space<vmem>>, vector<30x64xf32>
    %c0_138 = arith.constant 0 : index
    %c0_139 = arith.constant 0 : index
    %110 = vector.load %arg18[%c0_138, %c0_139] : memref<256x384xf32, #tpu.memory_space<vmem>>, vector<30x64xf32>
    tpu.vector_store %arg18[%c0_138, %c0_139], %109 {strides = array<i32>} : memref<256x384xf32, #tpu.memory_space<vmem>>, vector<30x64xf32>,
    %c1_140 = arith.constant 1 : index
    %c0_141 = arith.constant 0 : index
    %111 = vector.load %arg17[%c1_140, %c0_141] : memref<272x128xf32, #tpu.memory_space<vmem>>, vector<30x64xf32>
    %c0_142 = arith.constant 0 : index
    %c64_143 = arith.constant 64 : index
    %112 = vector.load %arg18[%c0_142, %c64_143] : memref<256x384xf32, #tpu.memory_space<vmem>>, vector<30x64xf32>
    tpu.vector_store %arg18[%c0_142, %c64_143], %111 {strides = array<i32>} : memref<256x384xf32, #tpu.memory_space<vmem>>, vector<30x64xf32>,
    %c2_144 = arith.constant 2 : index
    %c0_145 = arith.constant 0 : index
    %113 = vector.load %arg17[%c2_144, %c0_145] : memref<272x128xf32, #tpu.memory_space<vmem>>, vector<30x64xf32>
    %c0_146 = arith.constant 0 : index
    %c128_147 = arith.constant 128 : index
    %114 = vector.load %arg18[%c0_146, %c128_147] : memref<256x384xf32, #tpu.memory_space<vmem>>, vector<30x64xf32>
    tpu.vector_store %arg18[%c0_146, %c128_147], %113 {strides = array<i32>} : memref<256x384xf32, #tpu.memory_space<vmem>>, vector<30x64xf32>,
    %c0_148 = arith.constant 0 : index
    %c0_149 = arith.constant 0 : index
    %115 = vector.load %arg18[%c0_148, %c0_149] : memref<256x384xf32, #tpu.memory_space<vmem>>, vector<30x192xf32>
    %116 = arith.truncf %115 : vector<30x192xf32> to vector<30x192xbf16>
    %c0_150 = arith.constant 0 : index
    %c0_151 = arith.constant 0 : index
    %117 = vector.load %arg6[%c0_150, %c0_151] : memref<192x128xbf16, #tpu.memory_space<vmem>>, vector<192x128xbf16>
    %cst_152 = arith.constant dense<0.000000e+00> : vector<30x128xf32>
    %118 = tpu.matmul %116, %117, %cst_152 {dimension_numbers = #tpu.dot_dimension_numbers<[1], [0], [0], [1], [0, 0, 1, 1], [], []>} : vector<30x192xbf16>, vector<192x128xbf16>, vector<30x128xf32> -> vector<30x128xf32>
    %c0_153 = arith.constant 0 : index
    %c0_154 = arith.constant 0 : index
    %119 = vector.load %arg7[%c0_153, %c0_154] : memref<1x128xf32, #tpu.memory_space<vmem>>, vector<1x128xf32>
    %120 = vector.broadcast %119 : vector<1x128xf32> to vector<30x128xf32>
    %121 = arith.addf %118, %120 : vector<30x128xf32>
    %cst_155 = arith.constant 0.000000e+00 : f32
    %122 = vector.broadcast %cst_155 : f32 to vector<30x128xf32>
    %123 = arith.maximumf %121, %122 : vector<30x128xf32>
    %c0_156 = arith.constant 0 : index
    %c0_157 = arith.constant 0 : index
    %124 = vector.load %arg19[%c0_156, %c0_157] : memref<256x128xf32, #tpu.memory_space<vmem>>, vector<30x128xf32>
    tpu.vector_store %arg19[%c0_156, %c0_157], %123 {strides = array<i32>} : memref<256x128xf32, #tpu.memory_space<vmem>>, vector<30x128xf32>,
    %c0_158 = arith.constant 0 : index
    %c0_159 = arith.constant 0 : index
    %125 = tpu.strided_load %arg19[%c0_158, %c0_159] {strides = array<i32: 3, 1>} : memref<256x128xf32, #tpu.memory_space<vmem>>, vector<10x128xf32>
    %c1_160 = arith.constant 1 : index
    %c0_161 = arith.constant 0 : index
    %126 = tpu.strided_load %arg19[%c1_160, %c0_161] {strides = array<i32: 3, 1>} : memref<256x128xf32, #tpu.memory_space<vmem>>, vector<10x128xf32>
    %c2_162 = arith.constant 2 : index
    %c0_163 = arith.constant 0 : index
    %127 = tpu.strided_load %arg19[%c2_162, %c0_163] {strides = array<i32: 3, 1>} : memref<256x128xf32, #tpu.memory_space<vmem>>, vector<10x128xf32>
    %128 = arith.maximumf %125, %126 : vector<10x128xf32>
    %129 = arith.maximumf %128, %127 : vector<10x128xf32>
    %cst_164 = arith.constant 0.000000e+00 : f32
    %130 = vector.broadcast %cst_164 : f32 to vector<2x128xf32>
    %c0_165 = arith.constant 0 : index
    %c0_166 = arith.constant 0 : index
    %131 = vector.load %arg17[%c0_165, %c0_166] : memref<272x128xf32, #tpu.memory_space<vmem>>, vector<2x128xf32>
    tpu.vector_store %arg17[%c0_165, %c0_166], %130 {strides = array<i32>} : memref<272x128xf32, #tpu.memory_space<vmem>>, vector<2x128xf32>,
    %c12_167 = arith.constant 12 : index
    %c0_168 = arith.constant 0 : index
    %132 = vector.load %arg17[%c12_167, %c0_168] : memref<272x128xf32, #tpu.memory_space<vmem>>, vector<2x128xf32>
    tpu.vector_store %arg17[%c12_167, %c0_168], %130 {strides = array<i32>} : memref<272x128xf32, #tpu.memory_space<vmem>>, vector<2x128xf32>,
    %c2_169 = arith.constant 2 : index
    %c0_170 = arith.constant 0 : index
    %133 = vector.load %arg17[%c2_169, %c0_170] : memref<272x128xf32, #tpu.memory_space<vmem>>, vector<10x128xf32>
    tpu.vector_store %arg17[%c2_169, %c0_170], %129 {strides = array<i32>} : memref<272x128xf32, #tpu.memory_space<vmem>>, vector<10x128xf32>,
    %c0_171 = arith.constant 0 : index
    %c0_172 = arith.constant 0 : index
    %134 = vector.load %arg17[%c0_171, %c0_172] : memref<272x128xf32, #tpu.memory_space<vmem>>, vector<12x128xf32>
    %c0_173 = arith.constant 0 : index
    %c0_174 = arith.constant 0 : index
    %135 = vector.load %arg18[%c0_173, %c0_174] : memref<256x384xf32, #tpu.memory_space<vmem>>, vector<12x128xf32>
    tpu.vector_store %arg18[%c0_173, %c0_174], %134 {strides = array<i32>} : memref<256x384xf32, #tpu.memory_space<vmem>>, vector<12x128xf32>,
    %c1_175 = arith.constant 1 : index
    %c0_176 = arith.constant 0 : index
    %136 = vector.load %arg17[%c1_175, %c0_176] : memref<272x128xf32, #tpu.memory_space<vmem>>, vector<12x128xf32>
    %c0_177 = arith.constant 0 : index
    %c128_178 = arith.constant 128 : index
    %137 = vector.load %arg18[%c0_177, %c128_178] : memref<256x384xf32, #tpu.memory_space<vmem>>, vector<12x128xf32>
    tpu.vector_store %arg18[%c0_177, %c128_178], %136 {strides = array<i32>} : memref<256x384xf32, #tpu.memory_space<vmem>>, vector<12x128xf32>,
    %c2_179 = arith.constant 2 : index
    %c0_180 = arith.constant 0 : index
    %138 = vector.load %arg17[%c2_179, %c0_180] : memref<272x128xf32, #tpu.memory_space<vmem>>, vector<12x128xf32>
    %c0_181 = arith.constant 0 : index
    %c256_182 = arith.constant 256 : index
    %139 = vector.load %arg18[%c0_181, %c256_182] : memref<256x384xf32, #tpu.memory_space<vmem>>, vector<12x128xf32>
    tpu.vector_store %arg18[%c0_181, %c256_182], %138 {strides = array<i32>} : memref<256x384xf32, #tpu.memory_space<vmem>>, vector<12x128xf32>,
    %c0_183 = arith.constant 0 : index
    %c0_184 = arith.constant 0 : index
    %140 = vector.load %arg18[%c0_183, %c0_184] : memref<256x384xf32, #tpu.memory_space<vmem>>, vector<12x384xf32>
    %141 = arith.truncf %140 : vector<12x384xf32> to vector<12x384xbf16>
    %c0_185 = arith.constant 0 : index
    %c0_186 = arith.constant 0 : index
    %142 = vector.load %arg8[%c0_185, %c0_186] : memref<384x128xbf16, #tpu.memory_space<vmem>>, vector<384x128xbf16>
    %cst_187 = arith.constant dense<0.000000e+00> : vector<12x128xf32>
    %143 = tpu.matmul %141, %142, %cst_187 {dimension_numbers = #tpu.dot_dimension_numbers<[1], [0], [0], [1], [0, 0, 1, 1], [], []>} : vector<12x384xbf16>, vector<384x128xbf16>, vector<12x128xf32> -> vector<12x128xf32>
    %c0_188 = arith.constant 0 : index
    %c0_189 = arith.constant 0 : index
    %144 = vector.load %arg9[%c0_188, %c0_189] : memref<1x128xf32, #tpu.memory_space<vmem>>, vector<1x128xf32>
    %145 = vector.broadcast %144 : vector<1x128xf32> to vector<12x128xf32>
    %146 = arith.addf %143, %145 : vector<12x128xf32>
    %cst_190 = arith.constant 0.000000e+00 : f32
    %147 = vector.broadcast %cst_190 : f32 to vector<12x128xf32>
    %148 = arith.maximumf %146, %147 : vector<12x128xf32>
    %c0_191 = arith.constant 0 : index
    %c0_192 = arith.constant 0 : index
    %149 = vector.load %arg19[%c0_191, %c0_192] : memref<256x128xf32, #tpu.memory_space<vmem>>, vector<12x128xf32>
    tpu.vector_store %arg19[%c0_191, %c0_192], %148 {strides = array<i32>} : memref<256x128xf32, #tpu.memory_space<vmem>>, vector<12x128xf32>,
    %c0_193 = arith.constant 0 : index
    %c0_194 = arith.constant 0 : index
    %150 = tpu.strided_load %arg19[%c0_193, %c0_194] {strides = array<i32: 3, 1>} : memref<256x128xf32, #tpu.memory_space<vmem>>, vector<4x128xf32>
    %c1_195 = arith.constant 1 : index
    %c0_196 = arith.constant 0 : index
    %151 = tpu.strided_load %arg19[%c1_195, %c0_196] {strides = array<i32: 3, 1>} : memref<256x128xf32, #tpu.memory_space<vmem>>, vector<4x128xf32>
    %c2_197 = arith.constant 2 : index
    %c0_198 = arith.constant 0 : index
    %152 = tpu.strided_load %arg19[%c2_197, %c0_198] {strides = array<i32: 3, 1>} : memref<256x128xf32, #tpu.memory_space<vmem>>, vector<4x128xf32>
    %153 = arith.maximumf %150, %151 : vector<4x128xf32>
    %154 = arith.maximumf %153, %152 : vector<4x128xf32>
    %cst_199 = arith.constant 0.000000e+00 : f32
    %155 = vector.broadcast %cst_199 : f32 to vector<2x128xf32>
    %c0_200 = arith.constant 0 : index
    %c0_201 = arith.constant 0 : index
    %156 = vector.load %arg17[%c0_200, %c0_201] : memref<272x128xf32, #tpu.memory_space<vmem>>, vector<2x128xf32>
    tpu.vector_store %arg17[%c0_200, %c0_201], %155 {strides = array<i32>} : memref<272x128xf32, #tpu.memory_space<vmem>>, vector<2x128xf32>,
    %c6_202 = arith.constant 6 : index
    %c0_203 = arith.constant 0 : index
    %157 = vector.load %arg17[%c6_202, %c0_203] : memref<272x128xf32, #tpu.memory_space<vmem>>, vector<2x128xf32>
    tpu.vector_store %arg17[%c6_202, %c0_203], %155 {strides = array<i32>} : memref<272x128xf32, #tpu.memory_space<vmem>>, vector<2x128xf32>,
    %c2_204 = arith.constant 2 : index
    %c0_205 = arith.constant 0 : index
    %158 = vector.load %arg17[%c2_204, %c0_205] : memref<272x128xf32, #tpu.memory_space<vmem>>, vector<4x128xf32>
    tpu.vector_store %arg17[%c2_204, %c0_205], %154 {strides = array<i32>} : memref<272x128xf32, #tpu.memory_space<vmem>>, vector<4x128xf32>,
    %c0_206 = arith.constant 0 : index
    %c0_207 = arith.constant 0 : index
    %159 = vector.load %arg17[%c0_206, %c0_207] : memref<272x128xf32, #tpu.memory_space<vmem>>, vector<6x128xf32>
    %c0_208 = arith.constant 0 : index
    %c0_209 = arith.constant 0 : index
    %160 = vector.load %arg18[%c0_208, %c0_209] : memref<256x384xf32, #tpu.memory_space<vmem>>, vector<6x128xf32>
    tpu.vector_store %arg18[%c0_208, %c0_209], %159 {strides = array<i32>} : memref<256x384xf32, #tpu.memory_space<vmem>>, vector<6x128xf32>,
    %c1_210 = arith.constant 1 : index
    %c0_211 = arith.constant 0 : index
    %161 = vector.load %arg17[%c1_210, %c0_211] : memref<272x128xf32, #tpu.memory_space<vmem>>, vector<6x128xf32>
    %c0_212 = arith.constant 0 : index
    %c128_213 = arith.constant 128 : index
    %162 = vector.load %arg18[%c0_212, %c128_213] : memref<256x384xf32, #tpu.memory_space<vmem>>, vector<6x128xf32>
    tpu.vector_store %arg18[%c0_212, %c128_213], %161 {strides = array<i32>} : memref<256x384xf32, #tpu.memory_space<vmem>>, vector<6x128xf32>,
    %c2_214 = arith.constant 2 : index
    %c0_215 = arith.constant 0 : index
    %163 = vector.load %arg17[%c2_214, %c0_215] : memref<272x128xf32, #tpu.memory_space<vmem>>, vector<6x128xf32>
    %c0_216 = arith.constant 0 : index
    %c256_217 = arith.constant 256 : index
    %164 = vector.load %arg18[%c0_216, %c256_217] : memref<256x384xf32, #tpu.memory_space<vmem>>, vector<6x128xf32>
    tpu.vector_store %arg18[%c0_216, %c256_217], %163 {strides = array<i32>} : memref<256x384xf32, #tpu.memory_space<vmem>>, vector<6x128xf32>,
    %c0_218 = arith.constant 0 : index
    %c0_219 = arith.constant 0 : index
    %165 = vector.load %arg18[%c0_218, %c0_219] : memref<256x384xf32, #tpu.memory_space<vmem>>, vector<6x384xf32>
    %166 = arith.truncf %165 : vector<6x384xf32> to vector<6x384xbf16>
    %c0_220 = arith.constant 0 : index
    %c0_221 = arith.constant 0 : index
    %167 = vector.load %arg10[%c0_220, %c0_221] : memref<384x128xbf16, #tpu.memory_space<vmem>>, vector<384x128xbf16>
    %cst_222 = arith.constant dense<0.000000e+00> : vector<6x128xf32>
    %168 = tpu.matmul %166, %167, %cst_222 {dimension_numbers = #tpu.dot_dimension_numbers<[1], [0], [0], [1], [0, 0, 1, 1], [], []>} : vector<6x384xbf16>, vector<384x128xbf16>, vector<6x128xf32> -> vector<6x128xf32>
    %c0_223 = arith.constant 0 : index
    %c0_224 = arith.constant 0 : index
    %169 = vector.load %arg11[%c0_223, %c0_224] : memref<1x128xf32, #tpu.memory_space<vmem>>, vector<1x128xf32>
    %170 = vector.broadcast %169 : vector<1x128xf32> to vector<6x128xf32>
    %171 = arith.addf %168, %170 : vector<6x128xf32>
    %cst_225 = arith.constant 0.000000e+00 : f32
    %172 = vector.broadcast %cst_225 : f32 to vector<6x128xf32>
    %173 = arith.maximumf %171, %172 : vector<6x128xf32>
    %c0_226 = arith.constant 0 : index
    %c0_227 = arith.constant 0 : index
    %174 = vector.load %arg19[%c0_226, %c0_227] : memref<256x128xf32, #tpu.memory_space<vmem>>, vector<6x128xf32>
    tpu.vector_store %arg19[%c0_226, %c0_227], %173 {strides = array<i32>} : memref<256x128xf32, #tpu.memory_space<vmem>>, vector<6x128xf32>,
    %c0_228 = arith.constant 0 : index
    %c0_229 = arith.constant 0 : index
    %175 = tpu.strided_load %arg19[%c0_228, %c0_229] {strides = array<i32: 3, 1>} : memref<256x128xf32, #tpu.memory_space<vmem>>, vector<2x128xf32>
    %c1_230 = arith.constant 1 : index
    %c0_231 = arith.constant 0 : index
    %176 = tpu.strided_load %arg19[%c1_230, %c0_231] {strides = array<i32: 3, 1>} : memref<256x128xf32, #tpu.memory_space<vmem>>, vector<2x128xf32>
    %c2_232 = arith.constant 2 : index
    %c0_233 = arith.constant 0 : index
    %177 = tpu.strided_load %arg19[%c2_232, %c0_233] {strides = array<i32: 3, 1>} : memref<256x128xf32, #tpu.memory_space<vmem>>, vector<2x128xf32>
    %178 = arith.maximumf %175, %176 : vector<2x128xf32>
    %179 = arith.maximumf %178, %177 : vector<2x128xf32>
    %cst_234 = arith.constant dense<0.000000e+00> : vector<128xf32>
    %180 = vector.multi_reduction <add>, %179, %cst_234 [0] : vector<2x128xf32> to vector<128xf32>
    %181 = vector.shape_cast %180 : vector<128xf32> to vector<1x128xf32>
    %cst_235 = arith.constant 2.000000e+00 : f32
    %182 = vector.broadcast %cst_235 : f32 to vector<1x128xf32>
    %183 = arith.divf %181, %182 : vector<1x128xf32>
    %184 = arith.truncf %183 : vector<1x128xf32> to vector<1x128xbf16>
    %c0_236 = arith.constant 0 : index
    %c0_237 = arith.constant 0 : index
    %185 = vector.load %arg12[%c0_236, %c0_237] : memref<128x128xbf16, #tpu.memory_space<vmem>>, vector<128x128xbf16>
    %cst_238 = arith.constant dense<0.000000e+00> : vector<1x128xf32>
    %186 = tpu.matmul %184, %185, %cst_238 {dimension_numbers = #tpu.dot_dimension_numbers<[1], [0], [0], [1], [0, 0, 1, 1], [], []>} : vector<1x128xbf16>, vector<128x128xbf16>, vector<1x128xf32> -> vector<1x128xf32>
    %c0_239 = arith.constant 0 : index
    %c0_240 = arith.constant 0 : index
    %187 = vector.load %arg13[%c0_239, %c0_240] : memref<1x128xf32, #tpu.memory_space<vmem>>, vector<1x128xf32>
    %188 = arith.addf %186, %187 : vector<1x128xf32>
    %cst_241 = arith.constant 0.000000e+00 : f32
    %189 = vector.broadcast %cst_241 : f32 to vector<1x128xf32>
    %190 = arith.maximumf %188, %189 : vector<1x128xf32>
    %191 = arith.truncf %190 : vector<1x128xf32> to vector<1x128xbf16>
    %c0_242 = arith.constant 0 : index
    %c0_243 = arith.constant 0 : index
    %192 = vector.load %arg14[%c0_242, %c0_243] : memref<128x2xbf16, #tpu.memory_space<vmem>>, vector<128x2xbf16>
    %cst_244 = arith.constant dense<0.000000e+00> : vector<1x2xf32>
    %193 = tpu.matmul %191, %192, %cst_244 {dimension_numbers = #tpu.dot_dimension_numbers<[1], [0], [0], [1], [0, 0, 1, 1], [], []>} : vector<1x128xbf16>, vector<128x2xbf16>, vector<1x2xf32> -> vector<1x2xf32>
    %c0_245 = arith.constant 0 : index
    %c0_246 = arith.constant 0 : index
    %194 = vector.load %arg15[%c0_245, %c0_246] : memref<1x2xf32, #tpu.memory_space<vmem>>, vector<1x2xf32>
    %195 = arith.addf %193, %194 : vector<1x2xf32>
    %c0_247 = arith.constant 0 : index
    %c0_248 = arith.constant 0 : index
    %c0_249 = arith.constant 0 : index
    %196 = vector.load %arg16[%c0_247, %c0_248, %c0_249] : memref<1x1x2xf32, #tpu.memory_space<vmem>>, vector<1x1x2xf32>
    %197 = vector.shape_cast %196 : vector<1x1x2xf32> to vector<1x2xf32>
    %198 = vector.shape_cast %195 : vector<1x2xf32> to vector<1x1x2xf32>
    tpu.vector_store %arg16[%c0_247, %c0_248, %c0_249], %198 {strides = array<i32>} : memref<1x1x2xf32, #tpu.memory_space<vmem>>, vector<1x1x2xf32>,
    return
  }
  func.func @transform_0(%arg0: i32) -> (i32, i32, i32) {
    %c0_i32 = arith.constant 0 : i32
    %c0_i32_0 = arith.constant 0 : i32
    %c0_i32_1 = arith.constant 0 : i32
    return %arg0, %c0_i32, %c0_i32_0 : i32, i32, i32
  }
  func.func @transform_1(%arg0: i32) -> (i32, i32) {
    %c0_i32 = arith.constant 0 : i32
    %c0_i32_0 = arith.constant 0 : i32
    %c0_i32_1 = arith.constant 0 : i32
    return %c0_i32, %c0_i32_0 : i32, i32
  }
  func.func @transform_2(%arg0: i32) -> (i32, i32) {
    %c0_i32 = arith.constant 0 : i32
    %c0_i32_0 = arith.constant 0 : i32
    %c0_i32_1 = arith.constant 0 : i32
    return %c0_i32, %c0_i32_0 : i32, i32
  }
  func.func @transform_3(%arg0: i32) -> (i32, i32) {
    %c0_i32 = arith.constant 0 : i32
    %c0_i32_0 = arith.constant 0 : i32
    %c0_i32_1 = arith.constant 0 : i32
    return %c0_i32, %c0_i32_0 : i32, i32
  }
  func.func @transform_4(%arg0: i32) -> (i32, i32) {
    %c0_i32 = arith.constant 0 : i32
    %c0_i32_0 = arith.constant 0 : i32
    %c0_i32_1 = arith.constant 0 : i32
    return %c0_i32, %c0_i32_0 : i32, i32
  }
  func.func @transform_5(%arg0: i32) -> (i32, i32) {
    %c0_i32 = arith.constant 0 : i32
    %c0_i32_0 = arith.constant 0 : i32
    %c0_i32_1 = arith.constant 0 : i32
    return %c0_i32, %c0_i32_0 : i32, i32
  }
  func.func @transform_6(%arg0: i32) -> (i32, i32) {
    %c0_i32 = arith.constant 0 : i32
    %c0_i32_0 = arith.constant 0 : i32
    %c0_i32_1 = arith.constant 0 : i32
    return %c0_i32, %c0_i32_0 : i32, i32
  }
  func.func @transform_7(%arg0: i32) -> (i32, i32) {
    %c0_i32 = arith.constant 0 : i32
    %c0_i32_0 = arith.constant 0 : i32
    %c0_i32_1 = arith.constant 0 : i32
    return %c0_i32, %c0_i32_0 : i32, i32
  }
  func.func @transform_8(%arg0: i32) -> (i32, i32) {
    %c0_i32 = arith.constant 0 : i32
    %c0_i32_0 = arith.constant 0 : i32
    %c0_i32_1 = arith.constant 0 : i32
    return %c0_i32, %c0_i32_0 : i32, i32
  }
  func.func @transform_9(%arg0: i32) -> (i32, i32) {
    %c0_i32 = arith.constant 0 : i32
    %c0_i32_0 = arith.constant 0 : i32
    %c0_i32_1 = arith.constant 0 : i32
    return %c0_i32, %c0_i32_0 : i32, i32
  }
  func.func @transform_10(%arg0: i32) -> (i32, i32) {
    %c0_i32 = arith.constant 0 : i32
    %c0_i32_0 = arith.constant 0 : i32
    %c0_i32_1 = arith.constant 0 : i32
    return %c0_i32, %c0_i32_0 : i32, i32
  }
  func.func @transform_11(%arg0: i32) -> (i32, i32) {
    %c0_i32 = arith.constant 0 : i32
    %c0_i32_0 = arith.constant 0 : i32
    %c0_i32_1 = arith.constant 0 : i32
    return %c0_i32, %c0_i32_0 : i32, i32
  }
  func.func @transform_12(%arg0: i32) -> (i32, i32) {
    %c0_i32 = arith.constant 0 : i32
    %c0_i32_0 = arith.constant 0 : i32
    %c0_i32_1 = arith.constant 0 : i32
    return %c0_i32, %c0_i32_0 : i32, i32
  }
  func.func @transform_13(%arg0: i32) -> (i32, i32) {
    %c0_i32 = arith.constant 0 : i32
    %c0_i32_0 = arith.constant 0 : i32
    %c0_i32_1 = arith.constant 0 : i32
    return %c0_i32, %c0_i32_0 : i32, i32
  }
  func.func @transform_14(%arg0: i32) -> (i32, i32) {
    %c0_i32 = arith.constant 0 : i32
    %c0_i32_0 = arith.constant 0 : i32
    %c0_i32_1 = arith.constant 0 : i32
    return %c0_i32, %c0_i32_0 : i32, i32
  }
  func.func @transform_15(%arg0: i32) -> (i32, i32, i32) {
    %c0_i32 = arith.constant 0 : i32
    %c0_i32_0 = arith.constant 0 : i32
    %c0_i32_1 = arith.constant 0 : i32
    return %arg0, %c0_i32, %c0_i32_0 : i32, i32, i32
  }
}

</mosaic_0001>

<bundles_post_ra>
// kernel: wei_baseline_forward.1
= control target key start
LH: loop header
LB: loop body
LE: loop exit
PB: predicated region body
PF: predicated region fallthrough
CT: control target
= control target key end

     0   :  { %s10431_s0 = inlined_call_operand.vmem [shape: bf16[2,250,4], index: 0, kind: input, shape index: {}]   ;;  %s10432_s1 = inlined_call_operand.vmem [shape: bf16[84,32], index: 1, kind: input, shape index: {}]   ;;  %s10433_s2 = inlined_call_operand.vmem [shape: f32[1,32], index: 2, kind: input, shape index: {}]   ;;  %s10434_s3 = inlined_call_operand.hbm [shape: bf16[352,64], index: 3, kind: input, shape index: {}]   ;;  %s10435_s4 = inlined_call_operand.vmem [shape: f32[1,64], index: 4, kind: input, shape index: {}]   ;;  %s10436_s5 = inlined_call_operand.vmem [shape: bf16[192,128], index: 5, kind: input, shape index: {}]   ;;  %s10437_s6 = inlined_call_operand.vmem [shape: f32[1,128], index: 6, kind: input, shape index: {}]   ;;  %s10438_s7 = inlined_call_operand.vmem [shape: bf16[384,128], index: 7, kind: input, shape index: {}]   ;;  %s10439_s8 = inlined_call_operand.vmem [shape: f32[1,128], index: 8, kind: input, shape index: {}]   ;;  %s10440_s9 = inlined_call_operand.hbm [shape: bf16[384,128], index: 9, kind: input, shape index: {}]   ;;  %s10441_s10 = inlined_call_operand.vmem [shape: f32[1,128], index: 10, kind: input, shape index: {}]   ;;  %s10442_s11 = inlined_call_operand.vmem [shape: bf16[128,128], index: 11, kind: input, shape index: {}]   ;;  %s10443_s12 = inlined_call_operand.vmem [shape: f32[1,128], index: 12, kind: input, shape index: {}]   ;;  %s10444_s13 = inlined_call_operand.vmem [shape: bf16[128,2], index: 13, kind: input, shape index: {}]   ;;  %s10445_s14 = inlined_call_operand.vmem [shape: f32[1,2], index: 14, kind: input, shape index: {}]   ;;  %s10446_s15 = inlined_call_operand.hbm [shape: f32[2,1,2], index: 15, kind: output, shape index: {}]  }
   0x1   :  { %10481 = sst [smem:[#allocation20_spill]] %s10431_s0 }
   0x2   :  { %10482 = sst [smem:[#allocation21_spill]] %s10432_s1 }
   0x3   :  { %10483 = sst [smem:[#allocation22_spill]] %s10434_s3 }
   0x4   :  { %10484 = sst [smem:[#allocation23_spill]] %s10440_s9 }
   0x5   :  { %20 = vsyncpa [#allocation6], 0 }
   0x6   :  { %21 = vsyncpa [#allocation9], 0 }
   0x7   :  { %22 = vsyncpa [#allocation7], 0 }
   0x8   :  { %24 = vsyncpa [#allocation7 + $0x1], 0  ;;  %s7980_s18 = smov 0   ;;  %s7982_s19 = smov 0  }
   0x9   :  { %s7984_s20 = smov 0   ;;  %s7986_s21 = smov 0  }
   0xa LB: > { %10485 = sst [smem:[#allocation14_spill]] %s7859_s18  ;;  %s8001_s22 = sadd.s32 4294967295, %s7871_s21   ;;  %s7871_s21 = sphi %s7986_s21, %s10518_s21   ;;  %s7867_s20 = sphi %s7984_s20, %s10520_s20   ;;  %s7863_s19 = sphi %s7982_s19, %s10522_s19   ;;  %s7859_s18 = sphi %s7980_s18, %s10521_s18  }
   0xb   : > { %10486 = sst [smem:[#allocation15_spill]] %s7867_s20  ;;  %s7005_s23 = sadd.s32 4294967294, %s7871_s21  }
   0xc   : > { %10487 = sst [smem:[#allocation16_spill]] %s7871_s21  ;;  %s8005_s24 = sadd.s32 1, %s7871_s21  }
   0xd   : > { %10488 = sst [smem:[#allocation17_spill]] %s8005_s24  ;;  %s357_s25 = sadd.s32 1, %s7867_s20 }
   0xe   : > { %s354_s26 = ssub.s32 %s7871_s21, %s8005_s24  ;;  %p367_p0 = scmp.ne.s32.totalorder %s7867_s20, %s7863_s19 }
   0xf   : > { %p355_p1 = scmp.eq.s32.totalorder %s354_s26, 0  ;;  %p368_p2 = scmp.eq.s32.totalorder %s8001_s22, 1 }
  0x10   : > { %p373_p3 = scmp.ne.s32.totalorder %s7863_s19, %s7859_s18  ;;  %p374_p4 = scmp.eq.s32.totalorder %s7005_s23, 1 }
  0x11   : > { %s8016_s27 = scalar_select %p355_p1, %s7867_s20, %s357_s25  }
  0x12   : > { %p8018_p5 = por %p368_p2, %p367_p0  ;;  %p8022_p6 = por %p374_p4, %p373_p3 }
  0x13   : > { %10489 = sst [smem:[#allocation18_spill]] %s8016_s27  ;;  %p7006_p7 = scmp.ge.s32.totalorder %s7871_s21, 1 }
  0x14   : > { %s10491_s29 = scalar_select %p8022_p6, 1, 0 }
  0x15   : > { %p381_p8 = scmp.lt.s32.totalorder %s7871_s21, 3  ;;  %p7664_p9 = scmp.eq.s32.totalorder %s8001_s22, 0 }
  0x16   : > { %10492 = sst [smem:[#allocation19_spill]] %s10491_s29  ;;  %s7873_s25 = smov [#allocation5]  }
  0x17   : > { %p8029_p10 = pnand %p7006_p7, %p381_p8  ;;  %s10494_s3 = sld [smem:[#allocation22_spill]] }
  0x18   : > { %s400_s26 = sshll.u32 %s7873_s25, 4  ;;  %s10495_s9 = sld [smem:[#allocation23_spill]]  ;;  %s401_s26 = int_to_ptr.vmem [resolvable:$true] %s400_s26 }
  0x19   : > { %p7653_p11 = pneg %p8029_p10  ;;  %s7874_s29 = smov 64  }
  0x1a   : > { %s7875_s18 = smov 4   ;;  %s7876_s21 = smov [#allocation8]  }
  0x1b   : > { %p7654_p12 = pnand %p7664_p9, %p7653_p11  ;;  %s429_s16 = sshll.u32 %s7876_s21, 4  ;;  %s430_s16 = int_to_ptr.vmem [resolvable:$true] %s429_s16 }
  0x1c   : > { %468 = sbr.rel (%p8029_p10) target bundleno = 3278 (0xcce), region = 80 }
  0x1d   : > { %s398_s23 = sshll.u32 %s10494_s3, 4  ;;  %s399_s23 = int_to_ptr.hbm [resolvable:$true] %s398_s23 }
  0x1e   : > { %s427_s24 = sshll.u32 %s10495_s9, 4  ;;  %s428_s24 = int_to_ptr.hbm [resolvable:$true] %s427_s24 }
  0x1f   : > { %7656 = dma.hbm_to_vmem [thread:$0]  (!%p7654_p12), %s399_s23, 2816, %s401_s26, [#allocation6], %s7874_s29, %s7874_s29, %s7875_s18  }
  0x20   : > { %7659 = dma.hbm_to_vmem [thread:$0]  (!%p7654_p12), %s428_s24, 3072, %s430_s16, [#allocation9], %s7874_s29, %s7874_s29, %s7875_s18  }
  0x21   : > { %7846 = dma.done.wait (%p7664_p9), [#allocation6], 2816  }
  0x22   : > { %7848 = vsyncadd (%p7664_p9), [#allocation6], 4294964480 }
  0x23   : > { %7850 = dma.done.wait (%p7664_p9), [#allocation9], 3072  }
  0x24   : > { %7852 = vsyncadd (%p7664_p9), [#allocation9], 4294964224  ;;  %p521_p13 = scmp.lt.s32.totalorder %s8001_s22, 1  ;;  %v7877_v0 = vmov 0.0   ;;  %vm595_vm0 = vcmask 31744   ;;  %s10496_s0 = sld [smem:[#allocation20_spill]] }
  0x25   : > { %591 = vst [vmem:[#allocation2] sm:$0xff] %v7877_v0  ;;  %s7878_s29 = smov 4   ;;  %s7879_s30 = smov 8   ;;  %vm854_vm1 = vcmask 64544   ;;  %vm692_vm2 = vcmask 27648   ;;  %vm1048_vm3 = vcmask 97344  }
  0x26   : > { %592 = vst [vmem:[#allocation2 + $0x8] sm:$0x7] %v7877_v0  ;;  %s522_s18 = scalar_select %p521_p13, %s8001_s22, 1  ;;  %vm886_vm4 = vcmask 60448   ;;  %vm1242_vm5 = vcmask 130144   ;;  %vm1080_vm6 = vcmask 93248  }
  0x27   : > { %593 = vst [vmem:[#allocation2 + $0x105] sm:$0xff] %v7877_v0  ;;  %s7880_s17 = smov 12   ;;  %s7881_s23 = smov 16   ;;  %vm1274_vm7 = vcmask 126048   ;;  %vm1436_vm8 = vcmask 162944   ;;  %vm1630_vm9 = vcmask 195744  }
  0x28   : > { %594 = vst [vmem:[#allocation2 + $0x10d] sm:$0x7] %v7877_v0  ;;  %s7453_s20 = sshll.u32 %s522_s18, 7  ;;  %s7882_s25 = smov 20   ;;  %vm1468_vm10 = vcmask 158848   ;;  %vm1824_vm11 = vcmask 228544  }
  0x29   : > { %661 = vst.msk [vmem:[#allocation3] sm:$0xff] %vm595_vm0, %v7877_v0  ;;  %s7883_s26 = smov 24   ;;  %s7884_s16 = smov 28   ;;  %vm1662_vm12 = vcmask 191648   ;;  %vm1856_vm13 = vcmask 224448   ;;  %vm2018_vm14 = vcmask 261344  }
  0x2a   : > { %s8062_s27 = scalar_lea.vmem %s10496_s0, %s7453_s20  ;;  %s10453_s18 = smov 32   ;;  %vm2212_vm15 = vcmask 294144  }
  0x2b   : > { %v7617_v1 = vld [vmem:[%s8062_s27 + $0x8] sm:$0xff]   ;;  %v7558_v2 = vld [vmem:[%s8062_s27] sm:$0xff]   ;;  %v7618_v3 = vld [vmem:[%s8062_s27 + $0x10] sm:$0xff]   ;;  %s10463_s20 = smov 36   ;;  %s10465_s21 = smov 40  }
  0x2c   : > { %v7563_v4 = vunpack.c.l.bf16 %v7617_v1  ;;  %v7564_v5 = vunpack.c.h.bf16 %v7617_v1  ;;  %v7559_v6 = vunpack.c.l.bf16 %v7558_v2  ;;  %v7619_v7 = vld [vmem:[%s8062_s27 + $0x18] sm:$0xff]   ;;  %v7560_v9 = vunpack.c.h.bf16 %v7558_v2  ;;  %v7620_v12 = vld [vmem:[%s8062_s27 + $0x20] sm:$0xff]   ;;  %v7621_v15 = vld [vmem:[%s8062_s27 + $0x28] sm:$0xff]   ;;  %s10475_s24 = smov 44   ;;  %s10498_s1 = sld [smem:[#allocation21_spill]] }
  0x2d   : > { %v694_v8 = vld [vmem:[#allocation2 + $0x1] sm:$0xff]  ;;  %v7567_v10 = vunpack.c.l.bf16 %v7618_v3  ;;  %v7568_v11 = vunpack.c.h.bf16 %v7618_v3  ;;  %v7571_v13 = vunpack.c.l.bf16 %v7619_v7  ;;  %v7572_v14 = vunpack.c.h.bf16 %v7619_v7  ;;  %v7622_v18 = vld [vmem:[%s8062_s27 + $0x30] sm:$0xff]   ;;  %v7623_v21 = vld [vmem:[%s8062_s27 + $0x38] sm:$0xff]   ;;  %s10509_s0 = smov 44  }
  0x2e   : > { %758 = vrot.lane.b32.xlu0 %v694_v8, %s7878_s29  ;;  %598 = vst.msk [vmem:[#allocation2 + $0x1b] sm:$0xff] %vm595_vm0, %v7563_v4  ;;  %v7575_v16 = vunpack.c.l.bf16 %v7620_v12  ;;  %v7576_v17 = vunpack.c.h.bf16 %v7620_v12  ;;  %v7579_v19 = vunpack.c.l.bf16 %v7621_v15  ;;  %v7580_v20 = vunpack.c.h.bf16 %v7621_v15  ;;  %v7624_v26 = vld [vmem:[%s8062_s27 + $0x40] sm:$0xff]   ;;  %v7625_v35 = vld [vmem:[%s8062_s27 + $0x48] sm:$0xff]   ;;  %v7626_v36 = vld [vmem:[%s8062_s27 + $0x50] sm:$0xff]  }
  0x2f   : > { %599 = vst.msk [vmem:[#allocation2 + $0x23] sm:$0xff] %vm595_vm0, %v7564_v5  ;;  %v7583_v23 = vunpack.c.l.bf16 %v7622_v18  ;;  %v7584_v25 = vunpack.c.h.bf16 %v7622_v18  ;;  %v7587_v28 = vunpack.c.l.bf16 %v7623_v21  ;;  %v7588_v29 = vunpack.c.h.bf16 %v7623_v21  ;;  %v7627_v43 = vld [vmem:[%s8062_s27 + $0x58] sm:$0xff]   ;;  %v7628_v50 = vld [vmem:[%s8062_s27 + $0x60] sm:$0xff]   ;;  %v7629_v51 = vld [vmem:[%s8062_s27 + $0x68] sm:$0xff]  }
  0x30   : > { %596 = vst.msk [vmem:[#allocation2 + $0xb] sm:$0xff] %vm595_vm0, %v7559_v6  ;;  %v7591_v30 = vunpack.c.l.bf16 %v7624_v26  ;;  %v7592_v31 = vunpack.c.h.bf16 %v7624_v26  ;;  %v7595_v37 = vunpack.c.l.bf16 %v7625_v35  ;;  %v7596_v38 = vunpack.c.h.bf16 %v7625_v35  ;;  %v7630_v58 = vld [vmem:[%s8062_s27 + $0x70] sm:$0xff]   ;;  %v557_v2 = vld [vmem:[%s8062_s27 + $0x78] sm:$0xf] }
  0x31   : > { %597 = vst.msk [vmem:[#allocation2 + $0x13] sm:$0xff] %vm595_vm0, %v7560_v9  ;;  %v7599_v39 = vunpack.c.l.bf16 %v7626_v36  ;;  %v7600_v44 = vunpack.c.h.bf16 %v7626_v36  ;;  %v7603_v45 = vunpack.c.l.bf16 %v7627_v43  ;;  %v7604_v46 = vunpack.c.h.bf16 %v7627_v43 }
  0x32   : > { %600 = vst.msk [vmem:[#allocation2 + $0x2b] sm:$0xff] %vm595_vm0, %v7567_v10  ;;  %v7607_v52 = vunpack.c.l.bf16 %v7628_v50  ;;  %v7608_v53 = vunpack.c.h.bf16 %v7628_v50  ;;  %v7611_v54 = vunpack.c.l.bf16 %v7629_v51  ;;  %v7612_v59 = vunpack.c.h.bf16 %v7629_v51 }
  0x33   : > { %601 = vst.msk [vmem:[#allocation2 + $0x33] sm:$0xff] %vm595_vm0, %v7568_v11  ;;  %v7615_v60 = vunpack.c.l.bf16 %v7630_v58  ;;  %v7616_v61 = vunpack.c.h.bf16 %v7630_v58  ;;  %v589_v3 = vunpack.c.l.bf16 %v557_v2 }
  0x34   : > { %602 = vst.msk [vmem:[#allocation2 + $0x3b] sm:$0xff] %vm595_vm0, %v7571_v13 }
  0x35   : > { %603 = vst.msk [vmem:[#allocation2 + $0x43] sm:$0xff] %vm595_vm0, %v7572_v14 }
  0x36   : > { %v698_v22 = vld [vmem:[#allocation2 + $0x21] sm:$0xff]  ;;  %604 = vst.msk [vmem:[#allocation2 + $0x4b] sm:$0xff] %vm595_vm0, %v7575_v16 }
  0x37   : > { %766 = vrot.lane.b32.xlu2 %v698_v22, %s7878_s29  ;;  %v695_v24 = vld [vmem:[#allocation2 + $0x9] sm:$0xff]  ;;  %605 = vst.msk [vmem:[#allocation2 + $0x53] sm:$0xff] %vm595_vm0, %v7576_v17  ;;  %v633_v10 = vld [vmem:[#allocation2 + $0x20] sm:$0xff] }
  0x38   : > { %v696_v27 = vld [vmem:[#allocation2 + $0x11] sm:$0xff]  ;;  %760 = vrot.lane.b32.xlu0 %v695_v24, %s7878_s29  ;;  %606 = vst.msk [vmem:[#allocation2 + $0x5b] sm:$0xff] %vm595_vm0, %v7579_v19  ;;  %v697_v34 = vld [vmem:[#allocation2 + $0x19] sm:$0xff]  ;;  %v888_v19 = vld [vmem:[#allocation2 + $0x2] sm:$0xff] }
  0x39   : > { %762 = vrot.lane.b32.xlu1 %v696_v27, %s7878_s29  ;;  %607 = vst.msk [vmem:[#allocation2 + $0x63] sm:$0xff] %vm595_vm0, %v7580_v20  ;;  %v699_v32 = vld [vmem:[#allocation2 + $0x29] sm:$0xff]  ;;  %v890_v27 = vld [vmem:[#allocation2 + $0x12] sm:$0xff] }
  0x3a   : > { %608 = vst.msk [vmem:[#allocation2 + $0x6b] sm:$0xff] %vm595_vm0, %v7583_v23  ;;  %v700_v33 = vld [vmem:[#allocation2 + $0x31] sm:$0xff]  ;;  %v634_v14 = vld [vmem:[#allocation2 + $0x28] sm:$0xff] }
  0x3b   : > { %609 = vst.msk [vmem:[#allocation2 + $0x73] sm:$0xff] %vm595_vm0, %v7584_v25  ;;  %v701_v42 = vld [vmem:[#allocation2 + $0x39] sm:$0xff]  ;;  %v889_v20 = vld [vmem:[#allocation2 + $0xa] sm:$0xff]  ;;  %v892_v26 = vld [vmem:[#allocation2 + $0x22] sm:$0xff] }
  0x3c   : > { %610 = vst.msk [vmem:[#allocation2 + $0x7b] sm:$0xff] %vm595_vm0, %v7587_v28  ;;  %v702_v40 = vld [vmem:[#allocation2 + $0x41] sm:$0xff]  ;;  %v631_v23 = vld [vmem:[#allocation2 + $0x10] sm:$0xff] }
  0x3d   : > { %611 = vst.msk [vmem:[#allocation2 + $0x83] sm:$0xff] %vm595_vm0, %v7588_v29  ;;  %v703_v41 = vld [vmem:[#allocation2 + $0x49] sm:$0xff]  ;;  %v637_v18 = vld [vmem:[#allocation2 + $0x40] sm:$0xff] }
  0x3e   : > { %612 = vst.msk [vmem:[#allocation2 + $0x8b] sm:$0xff] %vm595_vm0, %v7591_v30  ;;  %v704_v49 = vld [vmem:[#allocation2 + $0x51] sm:$0xff]  ;;  %v630_v24 = vld [vmem:[#allocation2 + $0x8] sm:$0xff]  ;;  %v891_v25 = vld [vmem:[#allocation2 + $0x1a] sm:$0xff] }
  0x3f   : > { %768 = vrot.lane.b32.xlu2 %v699_v32, %s7878_s29  ;;  %613 = vst.msk [vmem:[#allocation2 + $0x93] sm:$0xff] %vm595_vm0, %v7592_v31  ;;  %v705_v47 = vld [vmem:[#allocation2 + $0x59] sm:$0xff]  ;;  %v635_v31 = vld [vmem:[#allocation2 + $0x30] sm:$0xff] }
  0x40   : > { %770 = vrot.lane.b32.xlu0 %v700_v33, %s7878_s29  ;;  %614 = vst.msk [vmem:[#allocation2 + $0x9b] sm:$0xff] %vm595_vm0, %v7595_v37  ;;  %v706_v48 = vld [vmem:[#allocation2 + $0x61] sm:$0xff]  ;;  %v640_v22 = vld [vmem:[#allocation2 + $0x58] sm:$0xff] }
  0x41   : > { %764 = vrot.lane.b32.xlu1 %v697_v34, %s7878_s29  ;;  %615 = vst.msk [vmem:[#allocation2 + $0xa3] sm:$0xff] %vm595_vm0, %v7596_v38  ;;  %v707_v57 = vld [vmem:[#allocation2 + $0x69] sm:$0xff]  ;;  %v632_v30 = vld [vmem:[#allocation2 + $0x18] sm:$0xff] }
  0x42   : > { %616 = vst.msk [vmem:[#allocation2 + $0xab] sm:$0xff] %vm595_vm0, %v7599_v39  ;;  %v708_v55 = vld [vmem:[#allocation2 + $0x71] sm:$0xff]  ;;  %v895_v33 = vld [vmem:[#allocation2 + $0x3a] sm:$0xff]  ;;  %v638_v38 = vld [vmem:[#allocation2 + $0x48] sm:$0xff] }
  0x43   : > { %617 = vst.msk [vmem:[#allocation2 + $0xb3] sm:$0xff] %vm595_vm0, %v7600_v44  ;;  %v709_v56 = vld [vmem:[#allocation2 + $0x79] sm:$0xff]  ;;  %v643_v29 = vld [vmem:[#allocation2 + $0x70] sm:$0xff] }
  0x44   : > { %618 = vst.msk [vmem:[#allocation2 + $0xbb] sm:$0xff] %vm595_vm0, %v7603_v45  ;;  %v710_v1 = vld [vmem:[#allocation2 + $0x81] sm:$0xff]  ;;  %v894_v32 = vld [vmem:[#allocation2 + $0x32] sm:$0xff]  ;;  %v893_v34 = vld [vmem:[#allocation2 + $0x2a] sm:$0xff] }
  0x45   : > { %619 = vst.msk [vmem:[#allocation2 + $0xc3] sm:$0xff] %vm595_vm0, %v7604_v46  ;;  %v711_v62 = vld [vmem:[#allocation2 + $0x89] sm:$0xff]  ;;  %v636_v37 = vld [vmem:[#allocation2 + $0x38] sm:$0xff]  ;;  %v641_v46 = vld [vmem:[#allocation2 + $0x60] sm:$0xff] }
  0x46   : > { %620 = vst.msk [vmem:[#allocation2 + $0xcb] sm:$0xff] %vm595_vm0, %v7607_v52  ;;  %v712_v63 = vld [vmem:[#allocation2 + $0x91] sm:$0xff]  ;;  %v646_v36 = vld [vmem:[#allocation2 + $0x88] sm:$0xff] }
  0x47   : > { %774 = vrot.lane.b32.xlu2 %v702_v40, %s7878_s29  ;;  %621 = vst.msk [vmem:[#allocation2 + $0xd3] sm:$0xff] %vm595_vm0, %v7608_v53  ;;  %v713_v6 = vld [vmem:[#allocation2 + $0x99] sm:$0xff]  ;;  %v897_v39 = vld [vmem:[#allocation2 + $0x4a] sm:$0xff] }
  0x48   : > { %776 = vrot.lane.b32.xlu0 %v703_v41, %s7878_s29  ;;  %622 = vst.msk [vmem:[#allocation2 + $0xdb] sm:$0xff] %vm595_vm0, %v7611_v54  ;;  %v714_v4 = vld [vmem:[#allocation2 + $0xa1] sm:$0xff]  ;;  %v898_v40 = vld [vmem:[#allocation2 + $0x52] sm:$0xff] }
  0x49   : > { %772 = vrot.lane.b32.xlu1 %v701_v42, %s7878_s29  ;;  %623 = vst.msk [vmem:[#allocation2 + $0xe3] sm:$0xff] %vm595_vm0, %v7612_v59  ;;  %v715_v5 = vld [vmem:[#allocation2 + $0xa9] sm:$0xff]  ;;  %v649_v44 = vld [vmem:[#allocation2 + $0xa0] sm:$0xff]  ;;  %v902_v58 = vld [vmem:[#allocation2 + $0x72] sm:$0xff] }
  0x4a   : > { %624 = vst.msk [vmem:[#allocation2 + $0xeb] sm:$0xff] %vm595_vm0, %v7615_v60  ;;  %v716_v9 = vld [vmem:[#allocation2 + $0xb1] sm:$0xff]  ;;  %v896_v41 = vld [vmem:[#allocation2 + $0x42] sm:$0xff] }
  0x4b   : > { %625 = vst.msk [vmem:[#allocation2 + $0xf3] sm:$0xff] %vm595_vm0, %v7616_v61  ;;  %v717_v7 = vld [vmem:[#allocation2 + $0xb9] sm:$0xff]  ;;  %v639_v45 = vld [vmem:[#allocation2 + $0x50] sm:$0xff]  ;;  %v642_v54 = vld [vmem:[#allocation2 + $0x68] sm:$0xff] }
  0x4c   : > { %626 = vst.msk [vmem:[#allocation2 + $0xfb] sm:$0xff] %vm595_vm0, %v589_v3  ;;  %v718_v8 = vld [vmem:[#allocation2 + $0xc1] sm:$0xff]  ;;  %v652_v52 = vld [vmem:[#allocation2 + $0xb8] sm:$0xff]  ;;  %v647_v2 = vld [vmem:[#allocation2 + $0x90] sm:$0xff] }
  0x4d   : > { %665 = vst.msk [vmem:[#allocation3 + $0x60] sm:$0xff] %vm595_vm0, %v633_v10  ;;  %v719_v13 = vld [vmem:[#allocation2 + $0xc9] sm:$0xff]  ;;  %v907_v3 = vld [vmem:[#allocation2 + $0x9a] sm:$0xff] }
  0x4e   : > { %v720_v11 = vld [vmem:[#allocation2 + $0xd1] sm:$0xff]  ;;  %666 = vst.msk [vmem:[#allocation3 + $0x78] sm:$0xff] %vm595_vm0, %v634_v14 }
  0x4f   : > { %780 = vrot.lane.b32.xlu2 %v705_v47, %s7878_s29  ;;  %v721_v12 = vld [vmem:[#allocation2 + $0xd9] sm:$0xff]  ;;  %669 = vst.msk [vmem:[#allocation3 + $0xc0] sm:$0xff] %vm595_vm0, %v637_v18  ;;  %v900_v47 = vld [vmem:[#allocation2 + $0x62] sm:$0xff]  ;;  %v655_v61 = vld [vmem:[#allocation2 + $0xd0] sm:$0xff] }
  0x50   : > { %782 = vrot.lane.b32.xlu0 %v706_v48, %s7878_s29  ;;  %v722_v17 = vld [vmem:[#allocation2 + $0xe1] sm:$0xff]  ;;  %672 = vst.msk [vmem:[#allocation3 + $0x108] sm:$0xff] %vm595_vm0, %v640_v22  ;;  %v901_v48 = vld [vmem:[#allocation2 + $0x6a] sm:$0xff] }
  0x51   : > { %778 = vrot.lane.b32.xlu1 %v704_v49, %s7878_s29  ;;  %v723_v15 = vld [vmem:[#allocation2 + $0xe9] sm:$0xff]  ;;  %663 = vst.msk [vmem:[#allocation3 + $0x30] sm:$0xff] %vm595_vm0, %v631_v23  ;;  %v899_v49 = vld [vmem:[#allocation2 + $0x5a] sm:$0xff] }
  0x52   : > { %v724_v16 = vld [vmem:[#allocation2 + $0xf1] sm:$0xff]  ;;  %662 = vst.msk [vmem:[#allocation3 + $0x18] sm:$0xff] %vm595_vm0, %v630_v24  ;;  %v653_v18 = vld [vmem:[#allocation2 + $0xc0] sm:$0xff]  ;;  %v654_v24 = vld [vmem:[#allocation2 + $0xc8] sm:$0xff] }
  0x53   : > { %v725_v21 = vld [vmem:[#allocation2 + $0xf9] sm:$0xf]  ;;  %675 = vst.msk [vmem:[#allocation3 + $0x150] sm:$0xff] %vm595_vm0, %v643_v29  ;;  %v909_v10 = vld [vmem:[#allocation2 + $0xaa] sm:$0xff] }
  0x54   : > { %664 = vst.msk [vmem:[#allocation3 + $0x48] sm:$0xff] %vm595_vm0, %v632_v30  ;;  %v914_v29 = vld [vmem:[#allocation2 + $0xd2] sm:$0xff] }
  0x55   : > { %667 = vst.msk [vmem:[#allocation3 + $0x90] sm:$0xff] %vm595_vm0, %v635_v31 }
  0x56   : > { %678 = vst.msk [vmem:[#allocation3 + $0x198] sm:$0xff] %vm595_vm0, %v646_v36  ;;  %v919_v36 = vld [vmem:[#allocation2 + $0xfa] sm:$0xf] }
  0x57   : > { %786 = vrot.lane.b32.xlu2 %v708_v55, %s7878_s29  ;;  %668 = vst.msk [vmem:[#allocation3 + $0xa8] sm:$0xff] %vm595_vm0, %v636_v37  ;;  %v903_v55 = vld [vmem:[#allocation2 + $0x7a] sm:$0xff]  ;;  %v917_v37 = vld [vmem:[#allocation2 + $0xea] sm:$0xff] }
  0x58   : > { %788 = vrot.lane.b32.xlu0 %v709_v56, %s7878_s29  ;;  %670 = vst.msk [vmem:[#allocation3 + $0xd8] sm:$0xff] %vm595_vm0, %v638_v38  ;;  %v644_v56 = vld [vmem:[#allocation2 + $0x78] sm:$0xff] }
  0x59   : > { %784 = vrot.lane.b32.xlu1 %v707_v57, %s7878_s29  ;;  %681 = vst.msk [vmem:[#allocation3 + $0x1e0] sm:$0xff] %vm595_vm0, %v649_v44  ;;  %v904_v57 = vld [vmem:[#allocation2 + $0x82] sm:$0xff] }
  0x5a   : > { %671 = vst.msk [vmem:[#allocation3 + $0xf0] sm:$0xff] %vm595_vm0, %v639_v45  ;;  %v1082_v44 = vld [vmem:[#allocation2 + $0x3] sm:$0xff] }
  0x5b   : > { %673 = vst.msk [vmem:[#allocation3 + $0x120] sm:$0xff] %vm595_vm0, %v641_v46 }
  0x5c   : > { %684 = vst.msk [vmem:[#allocation3 + $0x228] sm:$0xff] %vm595_vm0, %v652_v52 }
  0x5d   : > { %674 = vst.msk [vmem:[#allocation3 + $0x138] sm:$0xff] %vm595_vm0, %v642_v54  ;;  %v1089_v54 = vld [vmem:[#allocation2 + $0x3b] sm:$0xff] }
  0x5e   : > { %676 = vst.msk [vmem:[#allocation3 + $0x168] sm:$0xff] %vm595_vm0, %v644_v56  ;;  %v1088_v56 = vld [vmem:[#allocation2 + $0x33] sm:$0xff] }
  0x5f   : > { %792 = vrot.lane.b32.xlu2 %v711_v62, %s7878_s29  ;;  %687 = vst.msk [vmem:[#allocation3 + $0x270] sm:$0xff] %vm595_vm0, %v655_v61  ;;  %v1093_v61 = vld [vmem:[#allocation2 + $0x5b] sm:$0xff] }
  0x60   : > { %794 = vrot.lane.b32.xlu0 %v712_v63, %s7878_s29  ;;  %v645_v63 = vld [vmem:[#allocation2 + $0x80] sm:$0xff]  ;;  %679 = vst.msk [vmem:[#allocation3 + $0x1b0] sm:$0xff] %vm595_vm0, %v647_v2 }
  0x61   : > { %790 = vrot.lane.b32.xlu1 %v710_v1, %s7878_s29  ;;  %v906_v1 = vld [vmem:[#allocation2 + $0x92] sm:$0xff]  ;;  %677 = vst.msk [vmem:[#allocation3 + $0x180] sm:$0xff] %vm595_vm0, %v645_v63 }
  0x62   : > { %685 = vst.msk [vmem:[#allocation3 + $0x240] sm:$0xff] %vm595_vm0, %v653_v18 }
  0x63   : > { %686 = vst.msk [vmem:[#allocation3 + $0x258] sm:$0xff] %vm595_vm0, %v654_v24  ;;  %v1105_v24 = vld [vmem:[#allocation2 + $0xbb] sm:$0xff] }
  0x67   : > { %798 = vrot.lane.b32.xlu2 %v714_v4, %s7878_s29  ;;  %v905_v4 = vld [vmem:[#allocation2 + $0x8a] sm:$0xff] }
  0x68   : > { %800 = vrot.lane.b32.xlu0 %v715_v5, %s7878_s29 }
  0x69   : > { %796 = vrot.lane.b32.xlu1 %v713_v6, %s7878_s29 }
  0x6f   : > { %804 = vrot.lane.b32.xlu2 %v717_v7, %s7878_s29  ;;  %v658_v7 = vld [vmem:[#allocation2 + $0xe8] sm:$0xff] }
  0x70   : > { %806 = vrot.lane.b32.xlu0 %v718_v8, %s7878_s29  ;;  %690 = vst.msk [vmem:[#allocation3 + $0x2b8] sm:$0xff] %vm595_vm0, %v658_v7 }
  0x71   : > { %802 = vrot.lane.b32.xlu1 %v716_v9, %s7878_s29  ;;  %v648_v9 = vld [vmem:[#allocation2 + $0x98] sm:$0xff] }
  0x72   : > { %680 = vst.msk [vmem:[#allocation3 + $0x1c8] sm:$0xff] %vm595_vm0, %v648_v9  ;;  %v1098_v9 = vld [vmem:[#allocation2 + $0x83] sm:$0xff] }
  0x77   : > { %810 = vrot.lane.b32.xlu2 %v720_v11, %s7878_s29  ;;  %v650_v11 = vld [vmem:[#allocation2 + $0xa8] sm:$0xff] }
  0x78   : > { %812 = vrot.lane.b32.xlu0 %v721_v12, %s7878_s29  ;;  %v910_v12 = vld [vmem:[#allocation2 + $0xb2] sm:$0xff]  ;;  %682 = vst.msk [vmem:[#allocation3 + $0x1f8] sm:$0xff] %vm595_vm0, %v650_v11  ;;  %v1097_v11 = vld [vmem:[#allocation2 + $0x7b] sm:$0xff] }
  0x79   : > { %808 = vrot.lane.b32.xlu1 %v719_v13, %s7878_s29  ;;  %v908_v13 = vld [vmem:[#allocation2 + $0xa2] sm:$0xff] }
  0x7f   : > { %816 = vrot.lane.b32.xlu2 %v723_v15, %s7878_s29 }
  0x80   : > { %818 = vrot.lane.b32.xlu0 %v724_v16, %s7878_s29  ;;  %v651_v16 = vld [vmem:[#allocation2 + $0xb0] sm:$0xff] }
  0x81   : > { %814 = vrot.lane.b32.xlu1 %v722_v17, %s7878_s29  ;;  %683 = vst.msk [vmem:[#allocation3 + $0x210] sm:$0xff] %vm595_vm0, %v651_v16  ;;  %v1102_v16 = vld [vmem:[#allocation2 + $0xa3] sm:$0xff] }
  0x87   : > { %952 = vrot.lane.b32.xlu2 %v888_v19, %s7879_s30  ;;  %v912_v19 = vld [vmem:[#allocation2 + $0xc2] sm:$0xff] }
  0x88   : > { %954 = vrot.lane.b32.xlu0 %v889_v20, %s7879_s30  ;;  %v913_v20 = vld [vmem:[#allocation2 + $0xca] sm:$0xff] }
  0x89   : > { %820 = vrot.lane.b32.xlu1 %v725_v21, %s7878_s29  ;;  %v911_v21 = vld [vmem:[#allocation2 + $0xba] sm:$0xff]  ;;  %s10467_s29 = smov 48  }
  0x8f   : > { %958 = vrot.lane.b32.xlu2 %v891_v25, %s7879_s30 }
  0x90   : > { %960 = vrot.lane.b32.xlu0 %v892_v26, %s7879_s30  ;;  %v656_v26 = vld [vmem:[#allocation2 + $0xd8] sm:$0xff] }
  0x91   : > { %956 = vrot.lane.b32.xlu1 %v890_v27, %s7879_s30  ;;  %v767_v28 = vpop.permute.xlu2 %766  ;;  %v915_v27 = vld [vmem:[#allocation2 + $0xda] sm:$0xff]  ;;  %688 = vst.msk [vmem:[#allocation3 + $0x288] sm:$0xff] %vm595_vm0, %v656_v26 }
  0x92   : > { %859 = vst.msk [vmem:[#allocation3 + $0x60] sm:$0xff] %vm854_vm1, %v767_v28  ;;  %v916_v28 = vld [vmem:[#allocation2 + $0xe2] sm:$0xff] }
  0x97   : > { %964 = vrot.lane.b32.xlu2 %v894_v32, %s7879_s30  ;;  %v657_v32 = vld [vmem:[#allocation2 + $0xe0] sm:$0xff] }
  0x98   : > { %966 = vrot.lane.b32.xlu0 %v895_v33, %s7879_s30  ;;  %689 = vst.msk [vmem:[#allocation3 + $0x2a0] sm:$0xff] %vm595_vm0, %v657_v32 }
  0x99   : > { %962 = vrot.lane.b32.xlu1 %v893_v34, %s7879_s30  ;;  %v769_v35 = vpop.permute.xlu2 %768  ;;  %v659_v34 = vld [vmem:[#allocation2 + $0xf0] sm:$0xff] }
  0x9a   : > { %860 = vst.msk [vmem:[#allocation3 + $0x78] sm:$0xff] %vm854_vm1, %v769_v35  ;;  %v918_v35 = vld [vmem:[#allocation2 + $0xf2] sm:$0xff] }
  0x9b   : > { %691 = vst.msk [vmem:[#allocation3 + $0x2d0] sm:$0xff] %vm595_vm0, %v659_v34  ;;  %v1110_v34 = vld [vmem:[#allocation2 + $0xe3] sm:$0xff]  ;;  %vm2406_vm0 = vcmask 326944  }
  0x9f   : > { %970 = vrot.lane.b32.xlu2 %v897_v39, %s7879_s30 }
  0xa0   : > { %972 = vrot.lane.b32.xlu0 %v898_v40, %s7879_s30  ;;  %v759_v42 = vpop.permute.xlu0 %758  ;;  %v660_v40 = vld [vmem:[#allocation2 + $0xf8] sm:$0xf] }
  0xa1   : > { %968 = vrot.lane.b32.xlu1 %v896_v41, %s7879_s30  ;;  %855 = vst.msk [vmem:[#allocation3] sm:$0xff] %vm854_vm1, %v759_v42  ;;  %v775_v43 = vpop.permute.xlu2 %774  ;;  %v1083_v42 = vld [vmem:[#allocation2 + $0xb] sm:$0xff] }
  0xa2   : > { %863 = vst.msk [vmem:[#allocation3 + $0xc0] sm:$0xff] %vm854_vm1, %v775_v43  ;;  %v1084_v43 = vld [vmem:[#allocation2 + $0x13] sm:$0xff] }
  0xa3   : > { %693 = vst.msk [vmem:[#allocation3 + $0x2e8] sm:$0xf] %vm692_vm2, %v660_v40  ;;  %v1113_v40 = vld [vmem:[#allocation2 + $0xfb] sm:$0xf]  ;;  %vm2600_vm2 = vcmask 359744  }
  0xa7   : > { %976 = vrot.lane.b32.xlu2 %v900_v47, %s7879_s30 }
  0xa8   : > { %978 = vrot.lane.b32.xlu0 %v901_v48, %s7879_s30  ;;  %v1086_v48 = vld [vmem:[#allocation2 + $0x23] sm:$0xff] }
  0xa9   : > { %974 = vrot.lane.b32.xlu1 %v899_v49, %s7879_s30  ;;  %v781_v50 = vpop.permute.xlu2 %780  ;;  %v1087_v49 = vld [vmem:[#allocation2 + $0x2b] sm:$0xff] }
  0xaa   : > { %866 = vst.msk [vmem:[#allocation3 + $0x108] sm:$0xff] %vm854_vm1, %v781_v50  ;;  %v761_v51 = vpop.permute.xlu0 %760  ;;  %v1085_v50 = vld [vmem:[#allocation2 + $0x1b] sm:$0xff] }
  0xab   : > { %v763_v53 = vpop.permute.xlu1 %762  ;;  %856 = vst.msk [vmem:[#allocation3 + $0x18] sm:$0xff] %vm854_vm1, %v761_v51 }
  0xac   : > { %857 = vst.msk [vmem:[#allocation3 + $0x30] sm:$0xff] %vm854_vm1, %v763_v53 }
  0xaf   : > { %982 = vrot.lane.b32.xlu2 %v903_v55, %s7879_s30  ;;  %v1090_v55 = vld [vmem:[#allocation2 + $0x43] sm:$0xff] }
  0xb0   : > { %984 = vrot.lane.b32.xlu0 %v904_v57, %s7879_s30 }
  0xb1   : > { %980 = vrot.lane.b32.xlu1 %v902_v58, %s7879_s30  ;;  %v787_v59 = vpop.permute.xlu2 %786 }
  0xb2   : > { %869 = vst.msk [vmem:[#allocation3 + $0x150] sm:$0xff] %vm854_vm1, %v787_v59  ;;  %v771_v60 = vpop.permute.xlu0 %770 }
  0xb3   : > { %v765_v62 = vpop.permute.xlu1 %764  ;;  %861 = vst.msk [vmem:[#allocation3 + $0x90] sm:$0xff] %vm854_vm1, %v771_v60  ;;  %v1092_v60 = vld [vmem:[#allocation2 + $0x53] sm:$0xff] }
  0xb4   : > { %858 = vst.msk [vmem:[#allocation3 + $0x48] sm:$0xff] %vm854_vm1, %v765_v62  ;;  %v1091_v62 = vld [vmem:[#allocation2 + $0x4b] sm:$0xff] }
  0xb7   : > { %988 = vrot.lane.b32.xlu2 %v906_v1, %s7879_s30 }
  0xb8   : > { %990 = vrot.lane.b32.xlu0 %v907_v3, %s7879_s30  ;;  %v1095_v3 = vld [vmem:[#allocation2 + $0x6b] sm:$0xff] }
  0xb9   : > { %986 = vrot.lane.b32.xlu1 %v905_v4, %s7879_s30  ;;  %v793_v5 = vpop.permute.xlu2 %792  ;;  %v1096_v4 = vld [vmem:[#allocation2 + $0x73] sm:$0xff] }
  0xba   : > { %872 = vst.msk [vmem:[#allocation3 + $0x198] sm:$0xff] %vm854_vm1, %v793_v5  ;;  %v777_v6 = vpop.permute.xlu0 %776  ;;  %v1094_v5 = vld [vmem:[#allocation2 + $0x63] sm:$0xff] }
  0xbb   : > { %v773_v8 = vpop.permute.xlu1 %772  ;;  %864 = vst.msk [vmem:[#allocation3 + $0xd8] sm:$0xff] %vm854_vm1, %v777_v6 }
  0xbc   : > { %862 = vst.msk [vmem:[#allocation3 + $0xa8] sm:$0xff] %vm854_vm1, %v773_v8 }
  0xbf   : > { %994 = vrot.lane.b32.xlu2 %v909_v10, %s7879_s30  ;;  %v1099_v10 = vld [vmem:[#allocation2 + $0x8b] sm:$0xff] }
  0xc0   : > { %996 = vrot.lane.b32.xlu0 %v910_v12, %s7879_s30 }
  0xc1   : > { %992 = vrot.lane.b32.xlu1 %v908_v13, %s7879_s30  ;;  %v799_v14 = vpop.permute.xlu2 %798 }
  0xc2   : > { %875 = vst.msk [vmem:[#allocation3 + $0x1e0] sm:$0xff] %vm854_vm1, %v799_v14  ;;  %v783_v15 = vpop.permute.xlu0 %782 }
  0xc3   : > { %v779_v17 = vpop.permute.xlu1 %778  ;;  %867 = vst.msk [vmem:[#allocation3 + $0x120] sm:$0xff] %vm854_vm1, %v783_v15  ;;  %v1101_v15 = vld [vmem:[#allocation2 + $0x9b] sm:$0xff] }
  0xc4   : > { %865 = vst.msk [vmem:[#allocation3 + $0xf0] sm:$0xff] %vm854_vm1, %v779_v17  ;;  %v1100_v17 = vld [vmem:[#allocation2 + $0x93] sm:$0xff] }
  0xc7   : > { %1000 = vrot.lane.b32.xlu2 %v912_v19, %s7879_s30 }
  0xc8   : > { %1002 = vrot.lane.b32.xlu0 %v913_v20, %s7879_s30 }
  0xc9   : > { %998 = vrot.lane.b32.xlu1 %v911_v21, %s7879_s30  ;;  %v805_v22 = vpop.permute.xlu2 %804  ;;  %v1104_v21 = vld [vmem:[#allocation2 + $0xb3] sm:$0xff] }
  0xca   : > { %878 = vst.msk [vmem:[#allocation3 + $0x228] sm:$0xff] %vm854_vm1, %v805_v22  ;;  %v789_v23 = vpop.permute.xlu0 %788  ;;  %v1276_v22 = vld [vmem:[#allocation2 + $0x4] sm:$0xff] }
  0xcb   : > { %v785_v25 = vpop.permute.xlu1 %784  ;;  %870 = vst.msk [vmem:[#allocation3 + $0x168] sm:$0xff] %vm854_vm1, %v789_v23  ;;  %v8273_v23 = vld [vmem:[#allocation2 + $0x5] sm:$0xff] }
  0xcc   : > { %868 = vst.msk [vmem:[#allocation3 + $0x138] sm:$0xff] %vm854_vm1, %v785_v25  ;;  %v1103_v25 = vld [vmem:[#allocation2 + $0xab] sm:$0xff] }
  0xcd   : > { %4965 = vst [vmem:[#allocation2] sm:$0x3f] %v7877_v0 }
  0xcf   : > { %1006 = vrot.lane.b32.xlu2 %v915_v27, %s7879_s30 }
  0xd0   : > { %1008 = vrot.lane.b32.xlu0 %v916_v28, %s7879_s30 }
  0xd1   : > { %1004 = vrot.lane.b32.xlu1 %v914_v29, %s7879_s30  ;;  %v811_v30 = vpop.permute.xlu2 %810  ;;  %v1107_v29 = vld [vmem:[#allocation2 + $0xcb] sm:$0xff] }
  0xd2   : > { %881 = vst.msk [vmem:[#allocation3 + $0x270] sm:$0xff] %vm854_vm1, %v811_v30  ;;  %v795_v31 = vpop.permute.xlu0 %794  ;;  %v1108_v30 = vld [vmem:[#allocation2 + $0xd3] sm:$0xff] }
  0xd3   : > { %v791_v33 = vpop.permute.xlu1 %790  ;;  %873 = vst.msk [vmem:[#allocation3 + $0x1b0] sm:$0xff] %vm854_vm1, %v795_v31  ;;  %v1106_v31 = vld [vmem:[#allocation2 + $0xc3] sm:$0xff] }
  0xd4   : > { %871 = vst.msk [vmem:[#allocation3 + $0x180] sm:$0xff] %vm854_vm1, %v791_v33 }
  0xd7   : > { %1012 = vrot.lane.b32.xlu2 %v918_v35, %s7879_s30  ;;  %v1111_v35 = vld [vmem:[#allocation2 + $0xeb] sm:$0xff] }
  0xd8   : > { %1014 = vrot.lane.b32.xlu0 %v919_v36, %s7879_s30  ;;  %v1109_v36 = vld [vmem:[#allocation2 + $0xdb] sm:$0xff] }
  0xd9   : > { %1010 = vrot.lane.b32.xlu1 %v917_v37, %s7879_s30  ;;  %v817_v38 = vpop.permute.xlu2 %816  ;;  %s10457_s30 = smov 52  }
  0xda   : > { %884 = vst.msk [vmem:[#allocation3 + $0x2b8] sm:$0xff] %vm854_vm1, %v817_v38  ;;  %v801_v39 = vpop.permute.xlu0 %800 }
  0xdb   : > { %v797_v41 = vpop.permute.xlu1 %796  ;;  %876 = vst.msk [vmem:[#allocation3 + $0x1f8] sm:$0xff] %vm854_vm1, %v801_v39 }
  0xdc   : > { %874 = vst.msk [vmem:[#allocation3 + $0x1c8] sm:$0xff] %vm854_vm1, %v797_v41  ;;  %v1112_v41 = vld [vmem:[#allocation2 + $0xf3] sm:$0xff] }
  0xdf   : > { %1148 = vrot.lane.b32.xlu2 %v1083_v42, %s7880_s17 }
  0xe0   : > { %1150 = vrot.lane.b32.xlu0 %v1084_v43, %s7880_s17 }
  0xe1   : > { %1146 = vrot.lane.b32.xlu1 %v1082_v44, %s7880_s17  ;;  %v953_v45 = vpop.permute.xlu2 %952 }
  0xe2   : > { %1049 = vst.msk [vmem:[#allocation3] sm:$0xff] %vm1048_vm3, %v953_v45  ;;  %v807_v46 = vpop.permute.xlu0 %806  ;;  %v1278_v45 = vld [vmem:[#allocation2 + $0x14] sm:$0xff] }
  0xe3   : > { %v803_v47 = vpop.permute.xlu1 %802  ;;  %879 = vst.msk [vmem:[#allocation3 + $0x240] sm:$0xff] %vm854_vm1, %v807_v46  ;;  %v1279_v46 = vld [vmem:[#allocation2 + $0x1c] sm:$0xff] }
  0xe4   : > { %877 = vst.msk [vmem:[#allocation3 + $0x210] sm:$0xff] %vm854_vm1, %v803_v47  ;;  %v1277_v47 = vld [vmem:[#allocation2 + $0xc] sm:$0xff] }
  0xe7   : > { %1154 = vrot.lane.b32.xlu2 %v1086_v48, %s7880_s17 }
  0xe8   : > { %1156 = vrot.lane.b32.xlu0 %v1087_v49, %s7880_s17 }
  0xe9   : > { %1152 = vrot.lane.b32.xlu1 %v1085_v50, %s7880_s17  ;;  %v959_v51 = vpop.permute.xlu2 %958 }
  0xea   : > { %1052 = vst.msk [vmem:[#allocation3 + $0x48] sm:$0xff] %vm1048_vm3, %v959_v51  ;;  %v813_v52 = vpop.permute.xlu0 %812  ;;  %v1281_v51 = vld [vmem:[#allocation2 + $0x2c] sm:$0xff] }
  0xeb   : > { %v809_v53 = vpop.permute.xlu1 %808  ;;  %882 = vst.msk [vmem:[#allocation3 + $0x288] sm:$0xff] %vm854_vm1, %v813_v52  ;;  %v1282_v52 = vld [vmem:[#allocation2 + $0x34] sm:$0xff] }
  0xec   : > { %880 = vst.msk [vmem:[#allocation3 + $0x258] sm:$0xff] %vm854_vm1, %v809_v53  ;;  %v1280_v53 = vld [vmem:[#allocation2 + $0x24] sm:$0xff] }
  0xef   : > { %1160 = vrot.lane.b32.xlu2 %v1089_v54, %s7880_s17 }
  0xf0   : > { %1162 = vrot.lane.b32.xlu0 %v1090_v55, %s7880_s17 }
  0xf1   : > { %1158 = vrot.lane.b32.xlu1 %v1088_v56, %s7880_s17  ;;  %v965_v57 = vpop.permute.xlu2 %964 }
  0xf2   : > { %1055 = vst.msk [vmem:[#allocation3 + $0x90] sm:$0xff] %vm1048_vm3, %v965_v57  ;;  %v819_v58 = vpop.permute.xlu0 %818  ;;  %v1284_v57 = vld [vmem:[#allocation2 + $0x44] sm:$0xff] }
  0xf3   : > { %v815_v59 = vpop.permute.xlu1 %814  ;;  %885 = vst.msk [vmem:[#allocation3 + $0x2d0] sm:$0xff] %vm854_vm1, %v819_v58  ;;  %v1285_v58 = vld [vmem:[#allocation2 + $0x4c] sm:$0xff] }
  0xf4   : > { %883 = vst.msk [vmem:[#allocation3 + $0x2a0] sm:$0xff] %vm854_vm1, %v815_v59  ;;  %v1283_v59 = vld [vmem:[#allocation2 + $0x3c] sm:$0xff]  ;;  %vm2050_vm1 = vcmask 257248  }
  0xf7   : > { %1166 = vrot.lane.b32.xlu2 %v1092_v60, %s7880_s17 }
  0xf8   : > { %1168 = vrot.lane.b32.xlu0 %v1093_v61, %s7880_s17 }
  0xf9   : > { %1164 = vrot.lane.b32.xlu1 %v1091_v62, %s7880_s17  ;;  %v971_v63 = vpop.permute.xlu2 %970 }
  0xfa   : > { %1058 = vst.msk [vmem:[#allocation3 + $0xd8] sm:$0xff] %vm1048_vm3, %v971_v63  ;;  %v955_v1 = vpop.permute.xlu0 %954  ;;  %v1287_v63 = vld [vmem:[#allocation2 + $0x5c] sm:$0xff] }
  0xfb   : > { %v821_v2 = vpop.permute.xlu1 %820  ;;  %1050 = vst.msk [vmem:[#allocation3 + $0x18] sm:$0xff] %vm1048_vm3, %v955_v1  ;;  %v1288_v1 = vld [vmem:[#allocation2 + $0x64] sm:$0xff] }
  0xfc   : > { %887 = vst.msk [vmem:[#allocation3 + $0x2e8] sm:$0xf] %vm886_vm4, %v821_v2  ;;  %v1286_v2 = vld [vmem:[#allocation2 + $0x54] sm:$0xff]  ;;  %vm2988_vm4 = vcmask 425344  }
  0xff   : > { %1172 = vrot.lane.b32.xlu2 %v1095_v3, %s7880_s17 }
 0x100   : > { %1174 = vrot.lane.b32.xlu0 %v1096_v4, %s7880_s17 }
 0x101   : > { %1170 = vrot.lane.b32.xlu1 %v1094_v5, %s7880_s17  ;;  %v977_v6 = vpop.permute.xlu2 %976 }
 0x102   : > { %1061 = vst.msk [vmem:[#allocation3 + $0x120] sm:$0xff] %vm1048_vm3, %v977_v6  ;;  %v961_v7 = vpop.permute.xlu0 %960  ;;  %v1290_v6 = vld [vmem:[#allocation2 + $0x74] sm:$0xff] }
 0x103   : > { %v957_v8 = vpop.permute.xlu1 %956  ;;  %1053 = vst.msk [vmem:[#allocation3 + $0x60] sm:$0xff] %vm1048_vm3, %v961_v7  ;;  %v1291_v7 = vld [vmem:[#allocation2 + $0x7c] sm:$0xff] }
 0x104   : > { %1051 = vst.msk [vmem:[#allocation3 + $0x30] sm:$0xff] %vm1048_vm3, %v957_v8  ;;  %v1289_v8 = vld [vmem:[#allocation2 + $0x6c] sm:$0xff] }
 0x107   : > { %1178 = vrot.lane.b32.xlu2 %v1098_v9, %s7880_s17 }
 0x108   : > { %1180 = vrot.lane.b32.xlu0 %v1099_v10, %s7880_s17 }
 0x109   : > { %1176 = vrot.lane.b32.xlu1 %v1097_v11, %s7880_s17  ;;  %v983_v12 = vpop.permute.xlu2 %982 }
 0x10a   : > { %1064 = vst.msk [vmem:[#allocation3 + $0x168] sm:$0xff] %vm1048_vm3, %v983_v12  ;;  %v967_v13 = vpop.permute.xlu0 %966  ;;  %v1293_v12 = vld [vmem:[#allocation2 + $0x8c] sm:$0xff] }
 0x10b   : > { %v963_v14 = vpop.permute.xlu1 %962  ;;  %1056 = vst.msk [vmem:[#allocation3 + $0xa8] sm:$0xff] %vm1048_vm3, %v967_v13  ;;  %v1294_v13 = vld [vmem:[#allocation2 + $0x94] sm:$0xff] }
 0x10c   : > { %1054 = vst.msk [vmem:[#allocation3 + $0x78] sm:$0xff] %vm1048_vm3, %v963_v14  ;;  %v1292_v14 = vld [vmem:[#allocation2 + $0x84] sm:$0xff] }
 0x10f   : > { %1184 = vrot.lane.b32.xlu2 %v1101_v15, %s7880_s17 }
 0x110   : > { %1186 = vrot.lane.b32.xlu0 %v1102_v16, %s7880_s17 }
 0x111   : > { %1182 = vrot.lane.b32.xlu1 %v1100_v17, %s7880_s17  ;;  %v989_v18 = vpop.permute.xlu2 %988 }
 0x112   : > { %1067 = vst.msk [vmem:[#allocation3 + $0x1b0] sm:$0xff] %vm1048_vm3, %v989_v18  ;;  %v973_v19 = vpop.permute.xlu0 %972  ;;  %v1296_v18 = vld [vmem:[#allocation2 + $0xa4] sm:$0xff] }
 0x113   : > { %v969_v20 = vpop.permute.xlu1 %968  ;;  %1059 = vst.msk [vmem:[#allocation3 + $0xf0] sm:$0xff] %vm1048_vm3, %v973_v19  ;;  %v1297_v19 = vld [vmem:[#allocation2 + $0xac] sm:$0xff] }
 0x114   : > { %1057 = vst.msk [vmem:[#allocation3 + $0xc0] sm:$0xff] %vm1048_vm3, %v969_v20  ;;  %v1295_v20 = vld [vmem:[#allocation2 + $0x9c] sm:$0xff] }
 0x117   : > { %1190 = vrot.lane.b32.xlu2 %v1104_v21, %s7880_s17 }
 0x118   : > { %1192 = vrot.lane.b32.xlu0 %v1105_v24, %s7880_s17 }
 0x119   : > { %1188 = vrot.lane.b32.xlu1 %v1103_v25, %s7880_s17  ;;  %v995_v26 = vpop.permute.xlu2 %994  ;;  %v1299_v25 = vld [vmem:[#allocation2 + $0xbc] sm:$0xff] }
 0x11a   : > { %1070 = vst.msk [vmem:[#allocation3 + $0x1f8] sm:$0xff] %vm1048_vm3, %v995_v26  ;;  %v979_v27 = vpop.permute.xlu0 %978  ;;  %v1300_v26 = vld [vmem:[#allocation2 + $0xc4] sm:$0xff] }
 0x11b   : > { %v975_v28 = vpop.permute.xlu1 %974  ;;  %1062 = vst.msk [vmem:[#allocation3 + $0x138] sm:$0xff] %vm1048_vm3, %v979_v27  ;;  %v1298_v27 = vld [vmem:[#allocation2 + $0xb4] sm:$0xff] }
 0x11c   : > { %1060 = vst.msk [vmem:[#allocation3 + $0x108] sm:$0xff] %vm1048_vm3, %v975_v28 }
 0x11f   : > { %1196 = vrot.lane.b32.xlu2 %v1107_v29, %s7880_s17 }
 0x120   : > { %1198 = vrot.lane.b32.xlu0 %v1108_v30, %s7880_s17 }
 0x121   : > { %1194 = vrot.lane.b32.xlu1 %v1106_v31, %s7880_s17  ;;  %v1001_v0 = vpop.permute.xlu2 %1000  ;;  %v1302_v31 = vld [vmem:[#allocation2 + $0xd4] sm:$0xff] }
 0x122   : > { %1073 = vst.msk [vmem:[#allocation3 + $0x240] sm:$0xff] %vm1048_vm3, %v1001_v0  ;;  %v985_v32 = vpop.permute.xlu0 %984  ;;  %v1303_v0 = vld [vmem:[#allocation2 + $0xdc] sm:$0xff] }
 0x123   : > { %v981_v33 = vpop.permute.xlu1 %980  ;;  %1065 = vst.msk [vmem:[#allocation3 + $0x180] sm:$0xff] %vm1048_vm3, %v985_v32  ;;  %v1301_v32 = vld [vmem:[#allocation2 + $0xcc] sm:$0xff] }
 0x124   : > { %1063 = vst.msk [vmem:[#allocation3 + $0x150] sm:$0xff] %vm1048_vm3, %v981_v33 }
 0x127   : > { %1202 = vrot.lane.b32.xlu2 %v1110_v34, %s7880_s17 }
 0x128   : > { %1204 = vrot.lane.b32.xlu0 %v1111_v35, %s7880_s17 }
 0x129   : > { %1200 = vrot.lane.b32.xlu1 %v1109_v36, %s7880_s17  ;;  %v1007_v37 = vpop.permute.xlu2 %1006  ;;  %v1305_v36 = vld [vmem:[#allocation2 + $0xec] sm:$0xff] }
 0x12a   : > { %1076 = vst.msk [vmem:[#allocation3 + $0x288] sm:$0xff] %vm1048_vm3, %v1007_v37  ;;  %v991_v38 = vpop.permute.xlu0 %990  ;;  %v1306_v37 = vld [vmem:[#allocation2 + $0xf4] sm:$0xff] }
 0x12b   : > { %v987_v39 = vpop.permute.xlu1 %986  ;;  %1068 = vst.msk [vmem:[#allocation3 + $0x1c8] sm:$0xff] %vm1048_vm3, %v991_v38  ;;  %v1304_v38 = vld [vmem:[#allocation2 + $0xe4] sm:$0xff] }
 0x12c   : > { %1066 = vst.msk [vmem:[#allocation3 + $0x198] sm:$0xff] %vm1048_vm3, %v987_v39 }
 0x12f   : > { %1208 = vrot.lane.b32.xlu2 %v1113_v40, %s7880_s17 }
 0x130   : > { %1340 = vrot.lane.b32.xlu0 %v1276_v22, %s7881_s23 }
 0x131   : > { %1206 = vrot.lane.b32.xlu1 %v1112_v41, %s7880_s17  ;;  %v1013_v42 = vpop.permute.xlu2 %1012  ;;  %s10477_s17 = smov 56  }
 0x132   : > { %1079 = vst.msk [vmem:[#allocation3 + $0x2d0] sm:$0xff] %vm1048_vm3, %v1013_v42  ;;  %v997_v43 = vpop.permute.xlu0 %996  ;;  %v8359_v42 = vld [vmem:[#allocation2 + $0xd] sm:$0xff] }
 0x133   : > { %v993_v44 = vpop.permute.xlu1 %992  ;;  %1071 = vst.msk [vmem:[#allocation3 + $0x210] sm:$0xff] %vm1048_vm3, %v997_v43  ;;  %v1307_v43 = vld [vmem:[#allocation2 + $0xfc] sm:$0xf] }
 0x134   : > { %1069 = vst.msk [vmem:[#allocation3 + $0x1e0] sm:$0xff] %vm1048_vm3, %v993_v44 }
 0x137   : > { %1344 = vrot.lane.b32.xlu2 %v1278_v45, %s7881_s23 }
 0x138   : > { %1346 = vrot.lane.b32.xlu0 %v1279_v46, %s7881_s23 }
 0x139   : > { %1342 = vrot.lane.b32.xlu1 %v1277_v47, %s7881_s23  ;;  %v1149_v48 = vpop.permute.xlu2 %1148  ;;  %v1473_v47 = vld [vmem:[#allocation2 + $0x1d] sm:$0xff] }
 0x13a   : > { %1244 = vst.msk [vmem:[#allocation3 + $0x18] sm:$0xff] %vm1242_vm5, %v1149_v48  ;;  %v1003_v49 = vpop.permute.xlu0 %1002  ;;  %v1474_v48 = vld [vmem:[#allocation2 + $0x25] sm:$0xff] }
 0x13b   : > { %v999_v50 = vpop.permute.xlu1 %998  ;;  %1074 = vst.msk [vmem:[#allocation3 + $0x258] sm:$0xff] %vm1048_vm3, %v1003_v49  ;;  %v8368_v49 = vld [vmem:[#allocation2 + $0x15] sm:$0xff] }
 0x13c   : > { %1072 = vst.msk [vmem:[#allocation3 + $0x228] sm:$0xff] %vm1048_vm3, %v999_v50 }
 0x13f   : > { %1350 = vrot.lane.b32.xlu2 %v1281_v51, %s7881_s23 }
 0x140   : > { %1352 = vrot.lane.b32.xlu0 %v1282_v52, %s7881_s23  ;;  %v1476_v52 = vld [vmem:[#allocation2 + $0x35] sm:$0xff] }
 0x141   : > { %1348 = vrot.lane.b32.xlu1 %v1280_v53, %s7881_s23  ;;  %v1155_v54 = vpop.permute.xlu2 %1154  ;;  %v1477_v53 = vld [vmem:[#allocation2 + $0x3d] sm:$0xff] }
 0x142   : > { %1247 = vst.msk [vmem:[#allocation3 + $0x60] sm:$0xff] %vm1242_vm5, %v1155_v54  ;;  %v1009_v55 = vpop.permute.xlu0 %1008  ;;  %v1475_v54 = vld [vmem:[#allocation2 + $0x2d] sm:$0xff] }
 0x143   : > { %v1005_v56 = vpop.permute.xlu1 %1004  ;;  %1077 = vst.msk [vmem:[#allocation3 + $0x2a0] sm:$0xff] %vm1048_vm3, %v1009_v55 }
 0x144   : > { %1075 = vst.msk [vmem:[#allocation3 + $0x270] sm:$0xff] %vm1048_vm3, %v1005_v56 }
 0x147   : > { %1356 = vrot.lane.b32.xlu2 %v1284_v57, %s7881_s23 }
 0x148   : > { %1358 = vrot.lane.b32.xlu0 %v1285_v58, %s7881_s23  ;;  %v1479_v58 = vld [vmem:[#allocation2 + $0x4d] sm:$0xff] }
 0x149   : > { %1354 = vrot.lane.b32.xlu1 %v1283_v59, %s7881_s23  ;;  %v1161_v60 = vpop.permute.xlu2 %1160  ;;  %v1480_v59 = vld [vmem:[#allocation2 + $0x55] sm:$0xff] }
 0x14a   : > { %1250 = vst.msk [vmem:[#allocation3 + $0xa8] sm:$0xff] %vm1242_vm5, %v1161_v60  ;;  %v1015_v61 = vpop.permute.xlu0 %1014  ;;  %v1478_v60 = vld [vmem:[#allocation2 + $0x45] sm:$0xff] }
 0x14b   : > { %v1011_v62 = vpop.permute.xlu1 %1010  ;;  %1081 = vst.msk [vmem:[#allocation3 + $0x2e8] sm:$0xf] %vm1080_vm6, %v1015_v61  ;;  %vm10479_vm6 = vcmask 1041408  }
 0x14c   : > { %1078 = vst.msk [vmem:[#allocation3 + $0x2b8] sm:$0xff] %vm1048_vm3, %v1011_v62  ;;  %vm2794_vm3 = vcmask 392544  }
 0x14f   : > { %1362 = vrot.lane.b32.xlu2 %v1287_v63, %s7881_s23 }
 0x150   : > { %1364 = vrot.lane.b32.xlu0 %v1288_v1, %s7881_s23  ;;  %v1482_v1 = vld [vmem:[#allocation2 + $0x65] sm:$0xff] }
 0x151   : > { %1360 = vrot.lane.b32.xlu1 %v1286_v2, %s7881_s23  ;;  %v1167_v3 = vpop.permute.xlu2 %1166  ;;  %v1483_v2 = vld [vmem:[#allocation2 + $0x6d] sm:$0xff] }
 0x152   : > { %1253 = vst.msk [vmem:[#allocation3 + $0xf0] sm:$0xff] %vm1242_vm5, %v1167_v3  ;;  %v1151_v4 = vpop.permute.xlu0 %1150  ;;  %v1481_v3 = vld [vmem:[#allocation2 + $0x5d] sm:$0xff] }
 0x153   : > { %v1147_v5 = vpop.permute.xlu1 %1146  ;;  %1245 = vst.msk [vmem:[#allocation3 + $0x30] sm:$0xff] %vm1242_vm5, %v1151_v4 }
 0x154   : > { %1243 = vst.msk [vmem:[#allocation3] sm:$0xff] %vm1242_vm5, %v1147_v5 }
 0x157   : > { %1368 = vrot.lane.b32.xlu2 %v1290_v6, %s7881_s23 }
 0x158   : > { %1370 = vrot.lane.b32.xlu0 %v1291_v7, %s7881_s23  ;;  %v1485_v7 = vld [vmem:[#allocation2 + $0x7d] sm:$0xff] }
 0x159   : > { %1366 = vrot.lane.b32.xlu1 %v1289_v8, %s7881_s23  ;;  %v1173_v9 = vpop.permute.xlu2 %1172  ;;  %v1486_v8 = vld [vmem:[#allocation2 + $0x85] sm:$0xff] }
 0x15a   : > { %1256 = vst.msk [vmem:[#allocation3 + $0x138] sm:$0xff] %vm1242_vm5, %v1173_v9  ;;  %v1157_v10 = vpop.permute.xlu0 %1156  ;;  %v1484_v9 = vld [vmem:[#allocation2 + $0x75] sm:$0xff] }
 0x15b   : > { %v1153_v11 = vpop.permute.xlu1 %1152  ;;  %1248 = vst.msk [vmem:[#allocation3 + $0x78] sm:$0xff] %vm1242_vm5, %v1157_v10 }
 0x15c   : > { %1246 = vst.msk [vmem:[#allocation3 + $0x48] sm:$0xff] %vm1242_vm5, %v1153_v11 }
 0x15f   : > { %1374 = vrot.lane.b32.xlu2 %v1293_v12, %s7881_s23 }
 0x160   : > { %1376 = vrot.lane.b32.xlu0 %v1294_v13, %s7881_s23  ;;  %v1488_v13 = vld [vmem:[#allocation2 + $0x95] sm:$0xff] }
 0x161   : > { %1372 = vrot.lane.b32.xlu1 %v1292_v14, %s7881_s23  ;;  %v1179_v15 = vpop.permute.xlu2 %1178  ;;  %v1489_v14 = vld [vmem:[#allocation2 + $0x9d] sm:$0xff] }
 0x162   : > { %1259 = vst.msk [vmem:[#allocation3 + $0x180] sm:$0xff] %vm1242_vm5, %v1179_v15  ;;  %v1163_v16 = vpop.permute.xlu0 %1162  ;;  %v1487_v15 = vld [vmem:[#allocation2 + $0x8d] sm:$0xff] }
 0x163   : > { %v1159_v17 = vpop.permute.xlu1 %1158  ;;  %1251 = vst.msk [vmem:[#allocation3 + $0xc0] sm:$0xff] %vm1242_vm5, %v1163_v16 }
 0x164   : > { %1249 = vst.msk [vmem:[#allocation3 + $0x90] sm:$0xff] %vm1242_vm5, %v1159_v17 }
 0x167   : > { %1380 = vrot.lane.b32.xlu2 %v1296_v18, %s7881_s23 }
 0x168   : > { %1382 = vrot.lane.b32.xlu0 %v1297_v19, %s7881_s23  ;;  %v1491_v19 = vld [vmem:[#allocation2 + $0xad] sm:$0xff] }
 0x169   : > { %1378 = vrot.lane.b32.xlu1 %v1295_v20, %s7881_s23  ;;  %v1185_v21 = vpop.permute.xlu2 %1184  ;;  %v1492_v20 = vld [vmem:[#allocation2 + $0xb5] sm:$0xff] }
 0x16a   : > { %1262 = vst.msk [vmem:[#allocation3 + $0x1c8] sm:$0xff] %vm1242_vm5, %v1185_v21  ;;  %v1169_v22 = vpop.permute.xlu0 %1168  ;;  %v1490_v21 = vld [vmem:[#allocation2 + $0xa5] sm:$0xff] }
 0x16b   : > { %v1165_v24 = vpop.permute.xlu1 %1164  ;;  %1254 = vst.msk [vmem:[#allocation3 + $0x108] sm:$0xff] %vm1242_vm5, %v1169_v22 }
 0x16c   : > { %1252 = vst.msk [vmem:[#allocation3 + $0xd8] sm:$0xff] %vm1242_vm5, %v1165_v24 }
 0x16f   : > { %1386 = vrot.lane.b32.xlu2 %v1299_v25, %s7881_s23 }
 0x170   : > { %1388 = vrot.lane.b32.xlu0 %v1300_v26, %s7881_s23  ;;  %v1494_v26 = vld [vmem:[#allocation2 + $0xc5] sm:$0xff] }
 0x171   : > { %1384 = vrot.lane.b32.xlu1 %v1298_v27, %s7881_s23  ;;  %v1191_v28 = vpop.permute.xlu2 %1190  ;;  %v1495_v27 = vld [vmem:[#allocation2 + $0xcd] sm:$0xff] }
 0x172   : > { %1265 = vst.msk [vmem:[#allocation3 + $0x210] sm:$0xff] %vm1242_vm5, %v1191_v28  ;;  %v1175_v29 = vpop.permute.xlu0 %1174  ;;  %v1493_v28 = vld [vmem:[#allocation2 + $0xbd] sm:$0xff] }
 0x173   : > { %v1171_v30 = vpop.permute.xlu1 %1170  ;;  %1257 = vst.msk [vmem:[#allocation3 + $0x150] sm:$0xff] %vm1242_vm5, %v1175_v29 }
 0x174   : > { %1255 = vst.msk [vmem:[#allocation3 + $0x120] sm:$0xff] %vm1242_vm5, %v1171_v30 }
 0x177   : > { %1392 = vrot.lane.b32.xlu2 %v1302_v31, %s7881_s23 }
 0x178   : > { %1394 = vrot.lane.b32.xlu0 %v1303_v0, %s7881_s23  ;;  %v1497_v0 = vld [vmem:[#allocation2 + $0xdd] sm:$0xff] }
 0x179   : > { %1390 = vrot.lane.b32.xlu1 %v1301_v32, %s7881_s23  ;;  %v1197_v33 = vpop.permute.xlu2 %1196  ;;  %v1498_v32 = vld [vmem:[#allocation2 + $0xe5] sm:$0xff] }
 0x17a   : > { %1268 = vst.msk [vmem:[#allocation3 + $0x258] sm:$0xff] %vm1242_vm5, %v1197_v33  ;;  %v1181_v34 = vpop.permute.xlu0 %1180  ;;  %v1496_v33 = vld [vmem:[#allocation2 + $0xd5] sm:$0xff] }
 0x17b   : > { %v1177_v35 = vpop.permute.xlu1 %1176  ;;  %1260 = vst.msk [vmem:[#allocation3 + $0x198] sm:$0xff] %vm1242_vm5, %v1181_v34 }
 0x17c   : > { %1258 = vst.msk [vmem:[#allocation3 + $0x168] sm:$0xff] %vm1242_vm5, %v1177_v35 }
 0x17f   : > { %1398 = vrot.lane.b32.xlu2 %v1305_v36, %s7881_s23 }
 0x180   : > { %1400 = vrot.lane.b32.xlu0 %v1306_v37, %s7881_s23  ;;  %v1500_v37 = vld [vmem:[#allocation2 + $0xf5] sm:$0xff] }
 0x181   : > { %1396 = vrot.lane.b32.xlu1 %v1304_v38, %s7881_s23  ;;  %v1203_v39 = vpop.permute.xlu2 %1202  ;;  %v1501_v38 = vld [vmem:[#allocation2 + $0xfd] sm:$0xf] }
 0x182   : > { %1271 = vst.msk [vmem:[#allocation3 + $0x2a0] sm:$0xff] %vm1242_vm5, %v1203_v39  ;;  %v1187_v40 = vpop.permute.xlu0 %1186  ;;  %v1499_v39 = vld [vmem:[#allocation2 + $0xed] sm:$0xff] }
 0x183   : > { %v1183_v41 = vpop.permute.xlu1 %1182  ;;  %1263 = vst.msk [vmem:[#allocation3 + $0x1e0] sm:$0xff] %vm1242_vm5, %v1187_v40 }
 0x184   : > { %1261 = vst.msk [vmem:[#allocation3 + $0x1b0] sm:$0xff] %vm1242_vm5, %v1183_v41 }
 0x187   : > { %1534 = vrot.lane.b32.xlu2 %v8273_v23, %s7882_s25 }
 0x188   : > { %1536 = vrot.lane.b32.xlu0 %v8359_v42, %s7882_s25 }
 0x189   : > { %1402 = vrot.lane.b32.xlu1 %v1307_v43, %s7881_s23  ;;  %v1209_v44 = vpop.permute.xlu2 %1208  ;;  %s10471_s23 = smov 60  }
 0x18a   : > { %1275 = vst.msk [vmem:[#allocation3 + $0x2e8] sm:$0xf] %vm1274_vm7, %v1209_v44  ;;  %v1193_v45 = vpop.permute.xlu0 %1192  ;;  %v8431_v44 = vld [vmem:[#allocation2 + $0xe] sm:$0xff]  ;;  %vm3376_vm7 = vcmask 490944  }
 0x18b   : > { %v1189_v46 = vpop.permute.xlu1 %1188  ;;  %1266 = vst.msk [vmem:[#allocation3 + $0x228] sm:$0xff] %vm1242_vm5, %v1193_v45  ;;  %v8433_v45 = vld [vmem:[#allocation2 + $0x16] sm:$0xff] }
 0x18c   : > { %1264 = vst.msk [vmem:[#allocation3 + $0x1f8] sm:$0xff] %vm1242_vm5, %v1189_v46  ;;  %v1664_v46 = vld [vmem:[#allocation2 + $0x6] sm:$0xff] }
 0x18f   : > { %1540 = vrot.lane.b32.xlu2 %v1473_v47, %s7882_s25 }
 0x190   : > { %1542 = vrot.lane.b32.xlu0 %v1474_v48, %s7882_s25 }
 0x191   : > { %1538 = vrot.lane.b32.xlu1 %v8368_v49, %s7882_s25  ;;  %v1345_v23 = vpop.permute.xlu2 %1344 }
 0x192   : > { %1439 = vst.msk [vmem:[#allocation3 + $0x30] sm:$0xff] %vm1436_vm8, %v1345_v23  ;;  %v1199_v50 = vpop.permute.xlu0 %1198 }
 0x193   : > { %v1195_v51 = vpop.permute.xlu1 %1194  ;;  %1269 = vst.msk [vmem:[#allocation3 + $0x270] sm:$0xff] %vm1242_vm5, %v1199_v50  ;;  %v8443_v50 = vld [vmem:[#allocation2 + $0x26] sm:$0xff] }
 0x194   : > { %1267 = vst.msk [vmem:[#allocation3 + $0x240] sm:$0xff] %vm1242_vm5, %v1195_v51  ;;  %v1669_v51 = vld [vmem:[#allocation2 + $0x2e] sm:$0xff] }
 0x197   : > { %1546 = vrot.lane.b32.xlu2 %v1476_v52, %s7882_s25  ;;  %v8445_v52 = vld [vmem:[#allocation2 + $0x1e] sm:$0xff] }
 0x198   : > { %1548 = vrot.lane.b32.xlu0 %v1477_v53, %s7882_s25 }
 0x199   : > { %1544 = vrot.lane.b32.xlu1 %v1475_v54, %s7882_s25  ;;  %v1351_v55 = vpop.permute.xlu2 %1350 }
 0x19a   : > { %1442 = vst.msk [vmem:[#allocation3 + $0x78] sm:$0xff] %vm1436_vm8, %v1351_v55  ;;  %v1205_v56 = vpop.permute.xlu0 %1204 }
 0x19b   : > { %v1201_v57 = vpop.permute.xlu1 %1200  ;;  %1272 = vst.msk [vmem:[#allocation3 + $0x2b8] sm:$0xff] %vm1242_vm5, %v1205_v56  ;;  %v1671_v56 = vld [vmem:[#allocation2 + $0x3e] sm:$0xff] }
 0x19c   : > { %1270 = vst.msk [vmem:[#allocation3 + $0x288] sm:$0xff] %vm1242_vm5, %v1201_v57  ;;  %v1672_v57 = vld [vmem:[#allocation2 + $0x46] sm:$0xff] }
 0x19f   : > { %1552 = vrot.lane.b32.xlu2 %v1479_v58, %s7882_s25  ;;  %v1670_v58 = vld [vmem:[#allocation2 + $0x36] sm:$0xff] }
 0x1a0   : > { %1554 = vrot.lane.b32.xlu0 %v1480_v59, %s7882_s25 }
 0x1a1   : > { %1550 = vrot.lane.b32.xlu1 %v1478_v60, %s7882_s25  ;;  %v1357_v61 = vpop.permute.xlu2 %1356 }
 0x1a2   : > { %1445 = vst.msk [vmem:[#allocation3 + $0xc0] sm:$0xff] %vm1436_vm8, %v1357_v61  ;;  %v1341_v62 = vpop.permute.xlu0 %1340 }
 0x1a3   : > { %v1207_v63 = vpop.permute.xlu1 %1206  ;;  %1437 = vst.msk [vmem:[#allocation3] sm:$0xff] %vm1436_vm8, %v1341_v62  ;;  %v1674_v62 = vld [vmem:[#allocation2 + $0x56] sm:$0xff] }
 0x1a4   : > { %1273 = vst.msk [vmem:[#allocation3 + $0x2d0] sm:$0xff] %vm1242_vm5, %v1207_v63  ;;  %v1675_v63 = vld [vmem:[#allocation2 + $0x5e] sm:$0xff]  ;;  %vm3182_vm5 = vcmask 458144  }
 0x1a7   : > { %1558 = vrot.lane.b32.xlu2 %v1482_v1, %s7882_s25  ;;  %v1673_v1 = vld [vmem:[#allocation2 + $0x4e] sm:$0xff] }
 0x1a8   : > { %1560 = vrot.lane.b32.xlu0 %v1483_v2, %s7882_s25 }
 0x1a9   : > { %1556 = vrot.lane.b32.xlu1 %v1481_v3, %s7882_s25  ;;  %v1363_v4 = vpop.permute.xlu2 %1362 }
 0x1aa   : > { %1448 = vst.msk [vmem:[#allocation3 + $0x108] sm:$0xff] %vm1436_vm8, %v1363_v4  ;;  %v1347_v5 = vpop.permute.xlu0 %1346 }
 0x1ab   : > { %v1343_v6 = vpop.permute.xlu1 %1342  ;;  %1440 = vst.msk [vmem:[#allocation3 + $0x48] sm:$0xff] %vm1436_vm8, %v1347_v5  ;;  %v1677_v5 = vld [vmem:[#allocation2 + $0x6e] sm:$0xff] }
 0x1ac   : > { %1438 = vst.msk [vmem:[#allocation3 + $0x18] sm:$0xff] %vm1436_vm8, %v1343_v6  ;;  %v1678_v6 = vld [vmem:[#allocation2 + $0x76] sm:$0xff] }
 0x1af   : > { %1564 = vrot.lane.b32.xlu2 %v1485_v7, %s7882_s25  ;;  %v1676_v7 = vld [vmem:[#allocation2 + $0x66] sm:$0xff] }
 0x1b0   : > { %1566 = vrot.lane.b32.xlu0 %v1486_v8, %s7882_s25 }
 0x1b1   : > { %1562 = vrot.lane.b32.xlu1 %v1484_v9, %s7882_s25  ;;  %v1369_v10 = vpop.permute.xlu2 %1368 }
 0x1b2   : > { %1451 = vst.msk [vmem:[#allocation3 + $0x150] sm:$0xff] %vm1436_vm8, %v1369_v10  ;;  %v1353_v11 = vpop.permute.xlu0 %1352 }
 0x1b3   : > { %v1349_v12 = vpop.permute.xlu1 %1348  ;;  %1443 = vst.msk [vmem:[#allocation3 + $0x90] sm:$0xff] %vm1436_vm8, %v1353_v11  ;;  %v1680_v11 = vld [vmem:[#allocation2 + $0x86] sm:$0xff] }
 0x1b4   : > { %1441 = vst.msk [vmem:[#allocation3 + $0x60] sm:$0xff] %vm1436_vm8, %v1349_v12  ;;  %v1681_v12 = vld [vmem:[#allocation2 + $0x8e] sm:$0xff] }
 0x1b7   : > { %1570 = vrot.lane.b32.xlu2 %v1488_v13, %s7882_s25  ;;  %v1679_v13 = vld [vmem:[#allocation2 + $0x7e] sm:$0xff] }
 0x1b8   : > { %1572 = vrot.lane.b32.xlu0 %v1489_v14, %s7882_s25 }
 0x1b9   : > { %1568 = vrot.lane.b32.xlu1 %v1487_v15, %s7882_s25  ;;  %v1375_v16 = vpop.permute.xlu2 %1374 }
 0x1ba   : > { %1454 = vst.msk [vmem:[#allocation3 + $0x198] sm:$0xff] %vm1436_vm8, %v1375_v16  ;;  %v1359_v17 = vpop.permute.xlu0 %1358 }
 0x1bb   : > { %v1355_v18 = vpop.permute.xlu1 %1354  ;;  %1446 = vst.msk [vmem:[#allocation3 + $0xd8] sm:$0xff] %vm1436_vm8, %v1359_v17  ;;  %v1683_v17 = vld [vmem:[#allocation2 + $0x9e] sm:$0xff] }
 0x1bc   : > { %1444 = vst.msk [vmem:[#allocation3 + $0xa8] sm:$0xff] %vm1436_vm8, %v1355_v18  ;;  %v1684_v18 = vld [vmem:[#allocation2 + $0xa6] sm:$0xff] }
 0x1bf   : > { %1576 = vrot.lane.b32.xlu2 %v1491_v19, %s7882_s25  ;;  %v1682_v19 = vld [vmem:[#allocation2 + $0x96] sm:$0xff] }
 0x1c0   : > { %1578 = vrot.lane.b32.xlu0 %v1492_v20, %s7882_s25 }
 0x1c1   : > { %1574 = vrot.lane.b32.xlu1 %v1490_v21, %s7882_s25  ;;  %v1381_v22 = vpop.permute.xlu2 %1380 }
 0x1c2   : > { %1457 = vst.msk [vmem:[#allocation3 + $0x1e0] sm:$0xff] %vm1436_vm8, %v1381_v22  ;;  %v1365_v24 = vpop.permute.xlu0 %1364 }
 0x1c3   : > { %v1361_v25 = vpop.permute.xlu1 %1360  ;;  %1449 = vst.msk [vmem:[#allocation3 + $0x120] sm:$0xff] %vm1436_vm8, %v1365_v24  ;;  %v1686_v24 = vld [vmem:[#allocation2 + $0xb6] sm:$0xff] }
 0x1c4   : > { %1447 = vst.msk [vmem:[#allocation3 + $0xf0] sm:$0xff] %vm1436_vm8, %v1361_v25  ;;  %v1687_v25 = vld [vmem:[#allocation2 + $0xbe] sm:$0xff] }
 0x1c7   : > { %1582 = vrot.lane.b32.xlu2 %v1494_v26, %s7882_s25  ;;  %v1685_v26 = vld [vmem:[#allocation2 + $0xae] sm:$0xff] }
 0x1c8   : > { %1584 = vrot.lane.b32.xlu0 %v1495_v27, %s7882_s25 }
 0x1c9   : > { %1580 = vrot.lane.b32.xlu1 %v1493_v28, %s7882_s25  ;;  %v1387_v29 = vpop.permute.xlu2 %1386 }
 0x1ca   : > { %1460 = vst.msk [vmem:[#allocation3 + $0x228] sm:$0xff] %vm1436_vm8, %v1387_v29  ;;  %v1371_v30 = vpop.permute.xlu0 %1370 }
 0x1cb   : > { %v1367_v31 = vpop.permute.xlu1 %1366  ;;  %1452 = vst.msk [vmem:[#allocation3 + $0x168] sm:$0xff] %vm1436_vm8, %v1371_v30  ;;  %v1689_v30 = vld [vmem:[#allocation2 + $0xce] sm:$0xff] }
 0x1cc   : > { %1450 = vst.msk [vmem:[#allocation3 + $0x138] sm:$0xff] %vm1436_vm8, %v1367_v31  ;;  %v1690_v31 = vld [vmem:[#allocation2 + $0xd6] sm:$0xff] }
 0x1cf   : > { %1588 = vrot.lane.b32.xlu2 %v1497_v0, %s7882_s25  ;;  %v1688_v0 = vld [vmem:[#allocation2 + $0xc6] sm:$0xff] }
 0x1d0   : > { %1590 = vrot.lane.b32.xlu0 %v1498_v32, %s7882_s25 }
 0x1d1   : > { %1586 = vrot.lane.b32.xlu1 %v1496_v33, %s7882_s25  ;;  %v1393_v34 = vpop.permute.xlu2 %1392 }
 0x1d2   : > { %1463 = vst.msk [vmem:[#allocation3 + $0x270] sm:$0xff] %vm1436_vm8, %v1393_v34  ;;  %v1377_v35 = vpop.permute.xlu0 %1376 }
 0x1d3   : > { %v1373_v36 = vpop.permute.xlu1 %1372  ;;  %1455 = vst.msk [vmem:[#allocation3 + $0x1b0] sm:$0xff] %vm1436_vm8, %v1377_v35  ;;  %v1692_v35 = vld [vmem:[#allocation2 + $0xe6] sm:$0xff] }
 0x1d4   : > { %1453 = vst.msk [vmem:[#allocation3 + $0x180] sm:$0xff] %vm1436_vm8, %v1373_v36  ;;  %v1693_v36 = vld [vmem:[#allocation2 + $0xee] sm:$0xff] }
 0x1d7   : > { %1594 = vrot.lane.b32.xlu2 %v1500_v37, %s7882_s25  ;;  %v1691_v37 = vld [vmem:[#allocation2 + $0xde] sm:$0xff] }
 0x1d8   : > { %1596 = vrot.lane.b32.xlu0 %v1501_v38, %s7882_s25 }
 0x1d9   : > { %1592 = vrot.lane.b32.xlu1 %v1499_v39, %s7882_s25  ;;  %v1399_v40 = vpop.permute.xlu2 %1398  ;;  %s10455_s25 = smov 64  }
 0x1da   : > { %1466 = vst.msk [vmem:[#allocation3 + $0x2b8] sm:$0xff] %vm1436_vm8, %v1399_v40  ;;  %v1383_v41 = vpop.permute.xlu0 %1382 }
 0x1db   : > { %v1379_v43 = vpop.permute.xlu1 %1378  ;;  %1458 = vst.msk [vmem:[#allocation3 + $0x1f8] sm:$0xff] %vm1436_vm8, %v1383_v41  ;;  %v1695_v41 = vld [vmem:[#allocation2 + $0xfe] sm:$0xf] }
 0x1dc   : > { %1456 = vst.msk [vmem:[#allocation3 + $0x1c8] sm:$0xff] %vm1436_vm8, %v1379_v43  ;;  %v1858_v43 = vld [vmem:[#allocation2 + $0x7] sm:$0xff] }
 0x1df   : > { %1730 = vrot.lane.b32.xlu2 %v8431_v44, %s7883_s26 }
 0x1e0   : > { %1732 = vrot.lane.b32.xlu0 %v8433_v45, %s7883_s26 }
 0x1e1   : > { %1728 = vrot.lane.b32.xlu1 %v1664_v46, %s7883_s26  ;;  %v1535_v47 = vpop.permute.xlu2 %1534  ;;  %v1694_v46 = vld [vmem:[#allocation2 + $0xf6] sm:$0xff] }
 0x1e2   : > { %1631 = vst.msk [vmem:[#allocation3] sm:$0xff] %vm1630_vm9, %v1535_v47  ;;  %v1389_v48 = vpop.permute.xlu0 %1388 }
 0x1e3   : > { %v1385_v23 = vpop.permute.xlu1 %1384  ;;  %1461 = vst.msk [vmem:[#allocation3 + $0x240] sm:$0xff] %vm1436_vm8, %v1389_v48 }
 0x1e4   : > { %1459 = vst.msk [vmem:[#allocation3 + $0x210] sm:$0xff] %vm1436_vm8, %v1385_v23 }
 0x1e7   : > { %1736 = vrot.lane.b32.xlu2 %v8443_v50, %s7883_s26 }
 0x1e8   : > { %1738 = vrot.lane.b32.xlu0 %v1669_v51, %s7883_s26  ;;  %v8508_v51 = vld [vmem:[#allocation2 + $0x17] sm:$0xff] }
 0x1e9   : > { %1734 = vrot.lane.b32.xlu1 %v8445_v52, %s7883_s26  ;;  %v1541_v53 = vpop.permute.xlu2 %1540 }
 0x1ea   : > { %1634 = vst.msk [vmem:[#allocation3 + $0x48] sm:$0xff] %vm1630_vm9, %v1541_v53  ;;  %v1395_v54 = vpop.permute.xlu0 %1394  ;;  %v8510_v53 = vld [vmem:[#allocation2 + $0x1f] sm:$0xff] }
 0x1eb   : > { %v1391_v55 = vpop.permute.xlu1 %1390  ;;  %1464 = vst.msk [vmem:[#allocation3 + $0x288] sm:$0xff] %vm1436_vm8, %v1395_v54  ;;  %v8512_v54 = vld [vmem:[#allocation2 + $0xf] sm:$0xff] }
 0x1ec   : > { %1462 = vst.msk [vmem:[#allocation3 + $0x258] sm:$0xff] %vm1436_vm8, %v1391_v55 }
 0x1ef   : > { %1742 = vrot.lane.b32.xlu2 %v1671_v56, %s7883_s26 }
 0x1f0   : > { %1744 = vrot.lane.b32.xlu0 %v1672_v57, %s7883_s26 }
 0x1f1   : > { %1740 = vrot.lane.b32.xlu1 %v1670_v58, %s7883_s26  ;;  %v1547_v59 = vpop.permute.xlu2 %1546  ;;  %v8523_v58 = vld [vmem:[#allocation2 + $0x2f] sm:$0xff] }
 0x1f2   : > { %1637 = vst.msk [vmem:[#allocation3 + $0x90] sm:$0xff] %vm1630_vm9, %v1547_v59  ;;  %v1401_v60 = vpop.permute.xlu0 %1400  ;;  %v8525_v59 = vld [vmem:[#allocation2 + $0x37] sm:$0xff] }
 0x1f3   : > { %v1397_v61 = vpop.permute.xlu1 %1396  ;;  %1467 = vst.msk [vmem:[#allocation3 + $0x2d0] sm:$0xff] %vm1436_vm8, %v1401_v60  ;;  %v8527_v60 = vld [vmem:[#allocation2 + $0x27] sm:$0xff] }
 0x1f4   : > { %1465 = vst.msk [vmem:[#allocation3 + $0x2a0] sm:$0xff] %vm1436_vm8, %v1397_v61  ;;  %vm3570_vm8 = vcmask 523744  }
 0x1f7   : > { %1748 = vrot.lane.b32.xlu2 %v1674_v62, %s7883_s26 }
 0x1f8   : > { %1750 = vrot.lane.b32.xlu0 %v1675_v63, %s7883_s26 }
 0x1f9   : > { %1746 = vrot.lane.b32.xlu1 %v1673_v1, %s7883_s26  ;;  %v1553_v2 = vpop.permute.xlu2 %1552  ;;  %v1866_v1 = vld [vmem:[#allocation2 + $0x47] sm:$0xff] }
 0x1fa   : > { %1640 = vst.msk [vmem:[#allocation3 + $0xd8] sm:$0xff] %vm1630_vm9, %v1553_v2  ;;  %v1537_v3 = vpop.permute.xlu0 %1536  ;;  %v1867_v2 = vld [vmem:[#allocation2 + $0x4f] sm:$0xff] }
 0x1fb   : > { %v1403_v4 = vpop.permute.xlu1 %1402  ;;  %1632 = vst.msk [vmem:[#allocation3 + $0x18] sm:$0xff] %vm1630_vm9, %v1537_v3  ;;  %v1865_v3 = vld [vmem:[#allocation2 + $0x3f] sm:$0xff] }
 0x1fc   : > { %1469 = vst.msk [vmem:[#allocation3 + $0x2e8] sm:$0xf] %vm1468_vm10, %v1403_v4  ;;  %vm3958_vm10 = vcmask 589344  }
 0x1ff   : > { %1754 = vrot.lane.b32.xlu2 %v1677_v5, %s7883_s26 }
 0x200   : > { %1756 = vrot.lane.b32.xlu0 %v1678_v6, %s7883_s26 }
 0x201   : > { %1752 = vrot.lane.b32.xlu1 %v1676_v7, %s7883_s26  ;;  %v1559_v8 = vpop.permute.xlu2 %1558  ;;  %v1869_v7 = vld [vmem:[#allocation2 + $0x5f] sm:$0xff] }
 0x202   : > { %1643 = vst.msk [vmem:[#allocation3 + $0x120] sm:$0xff] %vm1630_vm9, %v1559_v8  ;;  %v1543_v9 = vpop.permute.xlu0 %1542  ;;  %v1870_v8 = vld [vmem:[#allocation2 + $0x67] sm:$0xff] }
 0x203   : > { %v1539_v10 = vpop.permute.xlu1 %1538  ;;  %1635 = vst.msk [vmem:[#allocation3 + $0x60] sm:$0xff] %vm1630_vm9, %v1543_v9  ;;  %v1868_v9 = vld [vmem:[#allocation2 + $0x57] sm:$0xff] }
 0x204   : > { %1633 = vst.msk [vmem:[#allocation3 + $0x30] sm:$0xff] %vm1630_vm9, %v1539_v10 }
 0x207   : > { %1760 = vrot.lane.b32.xlu2 %v1680_v11, %s7883_s26 }
 0x208   : > { %1762 = vrot.lane.b32.xlu0 %v1681_v12, %s7883_s26 }
 0x209   : > { %1758 = vrot.lane.b32.xlu1 %v1679_v13, %s7883_s26  ;;  %v1565_v14 = vpop.permute.xlu2 %1564  ;;  %v1872_v13 = vld [vmem:[#allocation2 + $0x77] sm:$0xff] }
 0x20a   : > { %1646 = vst.msk [vmem:[#allocation3 + $0x168] sm:$0xff] %vm1630_vm9, %v1565_v14  ;;  %v1549_v15 = vpop.permute.xlu0 %1548  ;;  %v1873_v14 = vld [vmem:[#allocation2 + $0x7f] sm:$0xff] }
 0x20b   : > { %v1545_v16 = vpop.permute.xlu1 %1544  ;;  %1638 = vst.msk [vmem:[#allocation3 + $0xa8] sm:$0xff] %vm1630_vm9, %v1549_v15  ;;  %v1871_v15 = vld [vmem:[#allocation2 + $0x6f] sm:$0xff] }
 0x20c   : > { %1636 = vst.msk [vmem:[#allocation3 + $0x78] sm:$0xff] %vm1630_vm9, %v1545_v16 }
 0x20f   : > { %1766 = vrot.lane.b32.xlu2 %v1683_v17, %s7883_s26 }
 0x210   : > { %1768 = vrot.lane.b32.xlu0 %v1684_v18, %s7883_s26 }
 0x211   : > { %1764 = vrot.lane.b32.xlu1 %v1682_v19, %s7883_s26  ;;  %v1571_v20 = vpop.permute.xlu2 %1570  ;;  %v1875_v19 = vld [vmem:[#allocation2 + $0x8f] sm:$0xff] }
 0x212   : > { %1649 = vst.msk [vmem:[#allocation3 + $0x1b0] sm:$0xff] %vm1630_vm9, %v1571_v20  ;;  %v1555_v21 = vpop.permute.xlu0 %1554  ;;  %v1876_v20 = vld [vmem:[#allocation2 + $0x97] sm:$0xff] }
 0x213   : > { %v1551_v22 = vpop.permute.xlu1 %1550  ;;  %1641 = vst.msk [vmem:[#allocation3 + $0xf0] sm:$0xff] %vm1630_vm9, %v1555_v21  ;;  %v1874_v21 = vld [vmem:[#allocation2 + $0x87] sm:$0xff] }
 0x214   : > { %1639 = vst.msk [vmem:[#allocation3 + $0xc0] sm:$0xff] %vm1630_vm9, %v1551_v22 }
 0x217   : > { %1772 = vrot.lane.b32.xlu2 %v1686_v24, %s7883_s26 }
 0x218   : > { %1774 = vrot.lane.b32.xlu0 %v1687_v25, %s7883_s26 }
 0x219   : > { %1770 = vrot.lane.b32.xlu1 %v1685_v26, %s7883_s26  ;;  %v1577_v27 = vpop.permute.xlu2 %1576  ;;  %v1878_v26 = vld [vmem:[#allocation2 + $0xa7] sm:$0xff] }
 0x21a   : > { %1652 = vst.msk [vmem:[#allocation3 + $0x1f8] sm:$0xff] %vm1630_vm9, %v1577_v27  ;;  %v1561_v28 = vpop.permute.xlu0 %1560  ;;  %v1879_v27 = vld [vmem:[#allocation2 + $0xaf] sm:$0xff] }
 0x21b   : > { %v1557_v29 = vpop.permute.xlu1 %1556  ;;  %1644 = vst.msk [vmem:[#allocation3 + $0x138] sm:$0xff] %vm1630_vm9, %v1561_v28  ;;  %v1877_v28 = vld [vmem:[#allocation2 + $0x9f] sm:$0xff] }
 0x21c   : > { %1642 = vst.msk [vmem:[#allocation3 + $0x108] sm:$0xff] %vm1630_vm9, %v1557_v29 }
 0x21f   : > { %1778 = vrot.lane.b32.xlu2 %v1689_v30, %s7883_s26 }
 0x220   : > { %1780 = vrot.lane.b32.xlu0 %v1690_v31, %s7883_s26 }
 0x221   : > { %1776 = vrot.lane.b32.xlu1 %v1688_v0, %s7883_s26  ;;  %v1583_v32 = vpop.permute.xlu2 %1582  ;;  %v1881_v0 = vld [vmem:[#allocation2 + $0xbf] sm:$0xff] }
 0x222   : > { %1655 = vst.msk [vmem:[#allocation3 + $0x240] sm:$0xff] %vm1630_vm9, %v1583_v32  ;;  %v1567_v33 = vpop.permute.xlu0 %1566  ;;  %v1882_v32 = vld [vmem:[#allocation2 + $0xc7] sm:$0xff] }
 0x223   : > { %v1563_v34 = vpop.permute.xlu1 %1562  ;;  %1647 = vst.msk [vmem:[#allocation3 + $0x180] sm:$0xff] %vm1630_vm9, %v1567_v33  ;;  %v1880_v33 = vld [vmem:[#allocation2 + $0xb7] sm:$0xff] }
 0x224   : > { %1645 = vst.msk [vmem:[#allocation3 + $0x150] sm:$0xff] %vm1630_vm9, %v1563_v34 }
 0x227   : > { %1784 = vrot.lane.b32.xlu2 %v1692_v35, %s7883_s26 }
 0x228   : > { %1786 = vrot.lane.b32.xlu0 %v1693_v36, %s7883_s26 }
 0x229   : > { %1782 = vrot.lane.b32.xlu1 %v1691_v37, %s7883_s26  ;;  %v1589_v38 = vpop.permute.xlu2 %1588  ;;  %v1884_v37 = vld [vmem:[#allocation2 + $0xd7] sm:$0xff] }
 0x22a   : > { %1658 = vst.msk [vmem:[#allocation3 + $0x288] sm:$0xff] %vm1630_vm9, %v1589_v38  ;;  %v1573_v39 = vpop.permute.xlu0 %1572  ;;  %v1885_v38 = vld [vmem:[#allocation2 + $0xdf] sm:$0xff] }
 0x22b   : > { %v1569_v40 = vpop.permute.xlu1 %1568  ;;  %1650 = vst.msk [vmem:[#allocation3 + $0x1c8] sm:$0xff] %vm1630_vm9, %v1573_v39  ;;  %v1883_v39 = vld [vmem:[#allocation2 + $0xcf] sm:$0xff] }
 0x22c   : > { %1648 = vst.msk [vmem:[#allocation3 + $0x198] sm:$0xff] %vm1630_vm9, %v1569_v40 }
 0x22f   : > { %1790 = vrot.lane.b32.xlu2 %v1695_v41, %s7883_s26 }
 0x230   : > { %1922 = vrot.lane.b32.xlu0 %v1858_v43, %s7884_s16 }
 0x231   : > { %1788 = vrot.lane.b32.xlu1 %v1694_v46, %s7883_s26  ;;  %v1595_v47 = vpop.permute.xlu2 %1594  ;;  %v1887_v46 = vld [vmem:[#allocation2 + $0xef] sm:$0xff]  ;;  %s10473_s26 = smov 68  }
 0x232   : > { %1661 = vst.msk [vmem:[#allocation3 + $0x2d0] sm:$0xff] %vm1630_vm9, %v1595_v47  ;;  %v1579_v48 = vpop.permute.xlu0 %1578  ;;  %v1888_v47 = vld [vmem:[#allocation2 + $0xf7] sm:$0xff] }
 0x233   : > { %v1575_v23 = vpop.permute.xlu1 %1574  ;;  %1653 = vst.msk [vmem:[#allocation3 + $0x210] sm:$0xff] %vm1630_vm9, %v1579_v48  ;;  %v1886_v48 = vld [vmem:[#allocation2 + $0xe7] sm:$0xff] }
 0x234   : > { %1651 = vst.msk [vmem:[#allocation3 + $0x1e0] sm:$0xff] %vm1630_vm9, %v1575_v23 }
 0x237   : > { %1926 = vrot.lane.b32.xlu2 %v8508_v51, %s7884_s16 }
 0x238   : > { %1928 = vrot.lane.b32.xlu0 %v8510_v53, %s7884_s16 }
 0x239   : > { %1924 = vrot.lane.b32.xlu1 %v8512_v54, %s7884_s16  ;;  %v1731_v55 = vpop.permute.xlu2 %1730 }
 0x23a   : > { %1826 = vst.msk [vmem:[#allocation3 + $0x18] sm:$0xff] %vm1824_vm11, %v1731_v55  ;;  %v1585_v56 = vpop.permute.xlu0 %1584 }
 0x23b   : > { %v1581_v57 = vpop.permute.xlu1 %1580  ;;  %1656 = vst.msk [vmem:[#allocation3 + $0x258] sm:$0xff] %vm1630_vm9, %v1585_v56 }
 0x23c   : > { %1654 = vst.msk [vmem:[#allocation3 + $0x228] sm:$0xff] %vm1630_vm9, %v1581_v57  ;;  %v2052_v57 = vld [vmem:[#allocation2 + $0x8] sm:$0xff] }
 0x23f   : > { %1932 = vrot.lane.b32.xlu2 %v8523_v58, %s7884_s16 }
 0x240   : > { %1934 = vrot.lane.b32.xlu0 %v8525_v59, %s7884_s16 }
 0x241   : > { %1930 = vrot.lane.b32.xlu1 %v8527_v60, %s7884_s16  ;;  %v1737_v61 = vpop.permute.xlu2 %1736 }
 0x242   : > { %1829 = vst.msk [vmem:[#allocation3 + $0x60] sm:$0xff] %vm1824_vm11, %v1737_v61  ;;  %v1591_v62 = vpop.permute.xlu0 %1590  ;;  %v8585_v61 = vld [vmem:[#allocation2 + $0x10] sm:$0xff] }
 0x243   : > { %v1587_v63 = vpop.permute.xlu1 %1586  ;;  %1659 = vst.msk [vmem:[#allocation3 + $0x2a0] sm:$0xff] %vm1630_vm9, %v1591_v62  ;;  %v1889_v62 = vld [vmem:[#allocation2 + $0xff] sm:$0xf] }
 0x244   : > { %1657 = vst.msk [vmem:[#allocation3 + $0x270] sm:$0xff] %vm1630_vm9, %v1587_v63 }
 0x247   : > { %1938 = vrot.lane.b32.xlu2 %v1866_v1, %s7884_s16 }
 0x248   : > { %1940 = vrot.lane.b32.xlu0 %v1867_v2, %s7884_s16 }
 0x249   : > { %1936 = vrot.lane.b32.xlu1 %v1865_v3, %s7884_s16  ;;  %v1743_v4 = vpop.permute.xlu2 %1742  ;;  %v8593_v3 = vld [vmem:[#allocation2 + $0x20] sm:$0xff] }
 0x24a   : > { %1832 = vst.msk [vmem:[#allocation3 + $0xa8] sm:$0xff] %vm1824_vm11, %v1743_v4  ;;  %v1597_v5 = vpop.permute.xlu0 %1596  ;;  %v8595_v4 = vld [vmem:[#allocation2 + $0x28] sm:$0xff] }
 0x24b   : > { %v1593_v6 = vpop.permute.xlu1 %1592  ;;  %1663 = vst.msk [vmem:[#allocation3 + $0x2e8] sm:$0xf] %vm1662_vm12, %v1597_v5  ;;  %v8597_v5 = vld [vmem:[#allocation2 + $0x18] sm:$0xff]  ;;  %vm4346_vm12 = vcmask 654944  }
 0x24c   : > { %1660 = vst.msk [vmem:[#allocation3 + $0x2b8] sm:$0xff] %vm1630_vm9, %v1593_v6  ;;  %vm3764_vm9 = vcmask 556544  }
 0x24f   : > { %1944 = vrot.lane.b32.xlu2 %v1869_v7, %s7884_s16 }
 0x250   : > { %1946 = vrot.lane.b32.xlu0 %v1870_v8, %s7884_s16 }
 0x251   : > { %1942 = vrot.lane.b32.xlu1 %v1868_v9, %s7884_s16  ;;  %v1749_v10 = vpop.permute.xlu2 %1748  ;;  %v8608_v9 = vld [vmem:[#allocation2 + $0x38] sm:$0xff] }
 0x252   : > { %1835 = vst.msk [vmem:[#allocation3 + $0xf0] sm:$0xff] %vm1824_vm11, %v1749_v10  ;;  %v1733_v11 = vpop.permute.xlu0 %1732  ;;  %v8610_v10 = vld [vmem:[#allocation2 + $0x40] sm:$0xff] }
 0x253   : > { %v1729_v12 = vpop.permute.xlu1 %1728  ;;  %1827 = vst.msk [vmem:[#allocation3 + $0x30] sm:$0xff] %vm1824_vm11, %v1733_v11  ;;  %v8612_v11 = vld [vmem:[#allocation2 + $0x30] sm:$0xff] }
 0x254   : > { %1825 = vst.msk [vmem:[#allocation3] sm:$0xff] %vm1824_vm11, %v1729_v12 }
 0x257   : > { %1950 = vrot.lane.b32.xlu2 %v1872_v13, %s7884_s16 }
 0x258   : > { %1952 = vrot.lane.b32.xlu0 %v1873_v14, %s7884_s16 }
 0x259   : > { %1948 = vrot.lane.b32.xlu1 %v1871_v15, %s7884_s16  ;;  %v1755_v16 = vpop.permute.xlu2 %1754  ;;  %v2246_v15 = vld [vmem:[#allocation2 + $0x9] sm:$0xff] }
 0x25a   : > { %1838 = vst.msk [vmem:[#allocation3 + $0x138] sm:$0xff] %vm1824_vm11, %v1755_v16  ;;  %v1739_v17 = vpop.permute.xlu0 %1738  ;;  %v2247_v16 = vld [vmem:[#allocation2 + $0x11] sm:$0xff] }
 0x25b   : > { %v1735_v18 = vpop.permute.xlu1 %1734  ;;  %1830 = vst.msk [vmem:[#allocation3 + $0x78] sm:$0xff] %vm1824_vm11, %v1739_v17  ;;  %v8623_v17 = vld [vmem:[#allocation2 + $0x48] sm:$0xff] }
 0x25c   : > { %1828 = vst.msk [vmem:[#allocation3 + $0x48] sm:$0xff] %vm1824_vm11, %v1735_v18 }
 0x25f   : > { %1956 = vrot.lane.b32.xlu2 %v1875_v19, %s7884_s16 }
 0x260   : > { %1958 = vrot.lane.b32.xlu0 %v1876_v20, %s7884_s16 }
 0x261   : > { %1954 = vrot.lane.b32.xlu1 %v1874_v21, %s7884_s16  ;;  %v1761_v22 = vpop.permute.xlu2 %1760  ;;  %v2441_v21 = vld [vmem:[#allocation2 + $0x12] sm:$0xff] }
 0x262   : > { %1841 = vst.msk [vmem:[#allocation3 + $0x180] sm:$0xff] %vm1824_vm11, %v1761_v22  ;;  %v1745_v24 = vpop.permute.xlu0 %1744  ;;  %v2634_v22 = vld [vmem:[#allocation2 + $0xb] sm:$0xff] }
 0x263   : > { %v1741_v25 = vpop.permute.xlu1 %1740  ;;  %1833 = vst.msk [vmem:[#allocation3 + $0xc0] sm:$0xff] %vm1824_vm11, %v1745_v24  ;;  %v2440_v24 = vld [vmem:[#allocation2 + $0xa] sm:$0xff] }
 0x264   : > { %1831 = vst.msk [vmem:[#allocation3 + $0x90] sm:$0xff] %vm1824_vm11, %v1741_v25 }
 0x267   : > { %1962 = vrot.lane.b32.xlu2 %v1878_v26, %s7884_s16 }
 0x268   : > { %1964 = vrot.lane.b32.xlu0 %v1879_v27, %s7884_s16 }
 0x269   : > { %1960 = vrot.lane.b32.xlu1 %v1877_v28, %s7884_s16  ;;  %v1767_v29 = vpop.permute.xlu2 %1766  ;;  %v2828_v28 = vld [vmem:[#allocation2 + $0xc] sm:$0xff] }
 0x26a   : > { %1844 = vst.msk [vmem:[#allocation3 + $0x1c8] sm:$0xff] %vm1824_vm11, %v1767_v29  ;;  %v1751_v30 = vpop.permute.xlu0 %1750  ;;  %v2829_v29 = vld [vmem:[#allocation2 + $0x14] sm:$0xff] }
 0x26b   : > { %v1747_v31 = vpop.permute.xlu1 %1746  ;;  %1836 = vst.msk [vmem:[#allocation3 + $0x108] sm:$0xff] %vm1824_vm11, %v1751_v30  ;;  %v2635_v30 = vld [vmem:[#allocation2 + $0x13] sm:$0xff] }
 0x26c   : > { %1834 = vst.msk [vmem:[#allocation3 + $0xd8] sm:$0xff] %vm1824_vm11, %v1747_v31 }
 0x26f   : > { %1968 = vrot.lane.b32.xlu2 %v1881_v0, %s7884_s16 }
 0x270   : > { %1970 = vrot.lane.b32.xlu0 %v1882_v32, %s7884_s16 }
 0x271   : > { %1966 = vrot.lane.b32.xlu1 %v1880_v33, %s7884_s16  ;;  %v1773_v34 = vpop.permute.xlu2 %1772 }
 0x272   : > { %1847 = vst.msk [vmem:[#allocation3 + $0x210] sm:$0xff] %vm1824_vm11, %v1773_v34  ;;  %v1757_v35 = vpop.permute.xlu0 %1756 }
 0x273   : > { %v1753_v36 = vpop.permute.xlu1 %1752  ;;  %1839 = vst.msk [vmem:[#allocation3 + $0x150] sm:$0xff] %vm1824_vm11, %v1757_v35 }
 0x274   : > { %1837 = vst.msk [vmem:[#allocation3 + $0x120] sm:$0xff] %vm1824_vm11, %v1753_v36  ;;  %v3993_v36 = vld [vmem:[#allocation2 + $0x1a] sm:$0xff] }
 0x277   : > { %1974 = vrot.lane.b32.xlu2 %v1884_v37, %s7884_s16  ;;  %v3799_v37 = vld [vmem:[#allocation2 + $0x19] sm:$0xff] }
 0x278   : > { %1976 = vrot.lane.b32.xlu0 %v1885_v38, %s7884_s16 }
 0x279   : > { %1972 = vrot.lane.b32.xlu1 %v1883_v39, %s7884_s16  ;;  %v1779_v40 = vpop.permute.xlu2 %1778 }
 0x27a   : > { %1850 = vst.msk [vmem:[#allocation3 + $0x258] sm:$0xff] %vm1824_vm11, %v1779_v40  ;;  %v1763_v41 = vpop.permute.xlu0 %1762 }
 0x27b   : > { %v1759_v43 = vpop.permute.xlu1 %1758  ;;  %1842 = vst.msk [vmem:[#allocation3 + $0x198] sm:$0xff] %vm1824_vm11, %v1763_v41  ;;  %v4187_v41 = vld [vmem:[#allocation2 + $0x1b] sm:$0xff] }
 0x27c   : > { %1840 = vst.msk [vmem:[#allocation3 + $0x168] sm:$0xff] %vm1824_vm11, %v1759_v43 }
 0x27f   : > { %1980 = vrot.lane.b32.xlu2 %v1887_v46, %s7884_s16 }
 0x280   : > { %1982 = vrot.lane.b32.xlu0 %v1888_v47, %s7884_s16 }
 0x281   : > { %1978 = vrot.lane.b32.xlu1 %v1886_v48, %s7884_s16  ;;  %v1785_v23 = vpop.permute.xlu2 %1784  ;;  %v2249_v48 = vld [vmem:[#allocation2 + $0x21] sm:$0xff] }
 0x282   : > { %1853 = vst.msk [vmem:[#allocation3 + $0x2a0] sm:$0xff] %vm1824_vm11, %v1785_v23  ;;  %v1769_v55 = vpop.permute.xlu0 %1768  ;;  %v4381_v23 = vld [vmem:[#allocation2 + $0x1c] sm:$0xff] }
 0x283   : > { %v1765_v56 = vpop.permute.xlu1 %1764  ;;  %1845 = vst.msk [vmem:[#allocation3 + $0x1e0] sm:$0xff] %vm1824_vm11, %v1769_v55 }
 0x284   : > { %1843 = vst.msk [vmem:[#allocation3 + $0x1b0] sm:$0xff] %vm1824_vm11, %v1765_v56 }
 0x287   : > { %2116 = vrot.lane.b32.xlu2 %v2052_v57, %s10453_s18 }
 0x288   : > { %2118 = vrot.lane.b32.xlu0 %v8585_v61, %s10453_s18 }
 0x289   : > { %1984 = vrot.lane.b32.xlu1 %v1889_v62, %s7884_s16  ;;  %v1791_v63 = vpop.permute.xlu2 %1790  ;;  %s10461_s16 = smov 72  }
 0x28a   : > { %1857 = vst.msk [vmem:[#allocation3 + $0x2e8] sm:$0xf] %vm1856_vm13, %v1791_v63  ;;  %v1775_v1 = vpop.permute.xlu0 %1774  ;;  %vm10480_vm13 = vcmask 687744  }
 0x28b   : > { %v1771_v2 = vpop.permute.xlu1 %1770  ;;  %1848 = vst.msk [vmem:[#allocation3 + $0x228] sm:$0xff] %vm1824_vm11, %v1775_v1 }
 0x28c   : > { %1846 = vst.msk [vmem:[#allocation3 + $0x1f8] sm:$0xff] %vm1824_vm11, %v1771_v2  ;;  %v2831_v2 = vld [vmem:[#allocation2 + $0x24] sm:$0xff] }
 0x28f   : > { %2122 = vrot.lane.b32.xlu2 %v8593_v3, %s10453_s18 }
 0x290   : > { %2124 = vrot.lane.b32.xlu0 %v8595_v4, %s10453_s18 }
 0x291   : > { %2120 = vrot.lane.b32.xlu1 %v8597_v5, %s10453_s18  ;;  %v1927_v6 = vpop.permute.xlu2 %1926 }
 0x292   : > { %2021 = vst.msk [vmem:[#allocation3 + $0x30] sm:$0xff] %vm2018_vm14, %v1927_v6  ;;  %v1781_v7 = vpop.permute.xlu0 %1780 }
 0x293   : > { %v1777_v8 = vpop.permute.xlu1 %1776  ;;  %1851 = vst.msk [vmem:[#allocation3 + $0x270] sm:$0xff] %vm1824_vm11, %v1781_v7 }
 0x294   : > { %1849 = vst.msk [vmem:[#allocation3 + $0x240] sm:$0xff] %vm1824_vm11, %v1777_v8 }
 0x297   : > { %2128 = vrot.lane.b32.xlu2 %v8608_v9, %s10453_s18 }
 0x298   : > { %2130 = vrot.lane.b32.xlu0 %v8610_v10, %s10453_s18 }
 0x299   : > { %2126 = vrot.lane.b32.xlu1 %v8612_v11, %s10453_s18  ;;  %v1933_v12 = vpop.permute.xlu2 %1932 }
 0x29a   : > { %2024 = vst.msk [vmem:[#allocation3 + $0x78] sm:$0xff] %vm2018_vm14, %v1933_v12  ;;  %v1787_v13 = vpop.permute.xlu0 %1786  ;;  %v3025_v12 = vld [vmem:[#allocation2 + $0x25] sm:$0xff] }
 0x29b   : > { %v1783_v14 = vpop.permute.xlu1 %1782  ;;  %1854 = vst.msk [vmem:[#allocation3 + $0x2b8] sm:$0xff] %vm1824_vm11, %v1787_v13  ;;  %v3024_v13 = vld [vmem:[#allocation2 + $0x1d] sm:$0xff] }
 0x29c   : > { %1852 = vst.msk [vmem:[#allocation3 + $0x288] sm:$0xff] %vm1824_vm11, %v1783_v14 }
 0x29f   : > { %2310 = vrot.lane.b32.xlu2 %v2246_v15, %s10463_s20 }
 0x2a0   : > { %2312 = vrot.lane.b32.xlu0 %v2247_v16, %s10463_s20 }
 0x2a1   : > { %2132 = vrot.lane.b32.xlu1 %v8623_v17, %s10453_s18  ;;  %v1939_v18 = vpop.permute.xlu2 %1938  ;;  %s10459_s18 = smov 76  }
 0x2a2   : > { %2027 = vst.msk [vmem:[#allocation3 + $0xc0] sm:$0xff] %vm2018_vm14, %v1939_v18  ;;  %v1923_v19 = vpop.permute.xlu0 %1922 }
 0x2a3   : > { %v1789_v20 = vpop.permute.xlu1 %1788  ;;  %2019 = vst.msk [vmem:[#allocation3] sm:$0xff] %vm2018_vm14, %v1923_v19 }
 0x2a4   : > { %1855 = vst.msk [vmem:[#allocation3 + $0x2d0] sm:$0xff] %vm1824_vm11, %v1789_v20  ;;  %vm4152_vm11 = vcmask 622144  }
 0x2a7   : > { %2506 = vrot.lane.b32.xlu2 %v2441_v21, %s10465_s21 }
 0x2a8   : > { %2698 = vrot.lane.b32.xlu0 %v2634_v22, %s10475_s24 }
 0x2a9   : > { %2504 = vrot.lane.b32.xlu1 %v2440_v24, %s10465_s21  ;;  %v1945_v25 = vpop.permute.xlu2 %1944 }
 0x2aa   : > { %2030 = vst.msk [vmem:[#allocation3 + $0x108] sm:$0xff] %vm2018_vm14, %v1945_v25  ;;  %v1929_v26 = vpop.permute.xlu0 %1928 }
 0x2ab   : > { %v1925_v27 = vpop.permute.xlu1 %1924  ;;  %2022 = vst.msk [vmem:[#allocation3 + $0x48] sm:$0xff] %vm2018_vm14, %v1929_v26 }
 0x2ac   : > { %2020 = vst.msk [vmem:[#allocation3 + $0x18] sm:$0xff] %vm2018_vm14, %v1925_v27 }
 0x2af   : > { %2892 = vrot.lane.b32.xlu2 %v2828_v28, %s10467_s29  ;;  %v8732_v28 = vld [vmem:[#allocation2 + $0x31] sm:$0xff] }
 0x2b0   : > { %2894 = vrot.lane.b32.xlu0 %v2829_v29, %s10467_s29 }
 0x2b1   : > { %2700 = vrot.lane.b32.xlu1 %v2635_v30, %s10475_s24  ;;  %v1951_v31 = vpop.permute.xlu2 %1950 }
 0x2b2   : > { %2033 = vst.msk [vmem:[#allocation3 + $0x150] sm:$0xff] %vm2018_vm14, %v1951_v31  ;;  %v1935_v0 = vpop.permute.xlu0 %1934  ;;  %v4632_v31 = vld [vmem:[%s10498_s1 + $0x28] sm:$0x3] }
 0x2b3   : > { %v1931_v32 = vpop.permute.xlu1 %1930  ;;  %2025 = vst.msk [vmem:[#allocation3 + $0x90] sm:$0xff] %vm2018_vm14, %v1935_v0 }
 0x2b4   : > { %2023 = vst.msk [vmem:[#allocation3 + $0x60] sm:$0xff] %vm2018_vm14, %v1931_v32  ;;  %v4658_v32 = vunpack.c.l.b16 %v4632_v31 }
 0x2b7   : > { %3088 = vrot.lane.b32.xlu2 %v8368_v49, %s10457_s30 }
 0x2b8   : > { %3280 = vrot.lane.b32.xlu0 %v8431_v44, %s10477_s17 }
 0x2b9   : > { %3086 = vrot.lane.b32.xlu1 %v8359_v42, %s10457_s30  ;;  %v1957_v33 = vpop.permute.xlu2 %1956 }
 0x2ba   : > { %2036 = vst.msk [vmem:[#allocation3 + $0x198] sm:$0xff] %vm2018_vm14, %v1957_v33  ;;  %v1941_v34 = vpop.permute.xlu0 %1940 }
 0x2bb   : > { %v1937_v35 = vpop.permute.xlu1 %1936  ;;  %2028 = vst.msk [vmem:[#allocation3 + $0xd8] sm:$0xff] %vm2018_vm14, %v1941_v34  ;;  %v8743_v34 = vld [vmem:[#allocation2 + $0x32] sm:$0xff] }
 0x2bc   : > { %2026 = vst.msk [vmem:[#allocation3 + $0xa8] sm:$0xff] %vm2018_vm14, %v1937_v35  ;;  %v4664_v35 = vpack.c.b16 %v4658_v32, %v4658_v32 }
 0x2bf   : > { %3474 = vrot.lane.b32.xlu2 %v8512_v54, %s10471_s23 }
 0x2c0   : > { %3476 = vrot.lane.b32.xlu0 %v8508_v51, %s10471_s23 }
 0x2c1   : > { %3282 = vrot.lane.b32.xlu1 %v8433_v45, %s10477_s17  ;;  %v1963_v42 = vpop.permute.xlu2 %1962 }
 0x2c2   : > { %2039 = vst.msk [vmem:[#allocation3 + $0x1e0] sm:$0xff] %vm2018_vm14, %v1963_v42  ;;  %v1947_v49 = vpop.permute.xlu0 %1946  ;;  %v4721_v42 = vsel %vm10479_vm6, %v4664_v35, 0  ;;  %v3223_v35 = vld [vmem:[#allocation2 + $0x46] sm:$0xff]  ;;  %vm627_vm6 = vcmask 25600  }
 0x2c3   : > { %v1943_v44 = vpop.permute.xlu1 %1942  ;;  %2031 = vst.msk [vmem:[#allocation3 + $0x120] sm:$0xff] %vm2018_vm14, %v1947_v49  ;;  %4725 = vmatpush.bf16.msra.mxu0 %v4721_v42  ;;  %7631 = vmatpush.bf16.msra.mxu1 %v4721_v42 }
 0x2c4   : > { %2029 = vst.msk [vmem:[#allocation3 + $0xf0] sm:$0xff] %vm2018_vm14, %v1943_v44  ;;  %v7458_v44 = vld [vmem:[%s10498_s1 + $0x20] sm:$0xff]  ;;  %7632 = vmatpush.bf16.msra.mxu2 %v4721_v42 }
 0x2c7   : > { %3670 = vrot.lane.b32.xlu2 %v8597_v5, %s10455_s25  ;;  %v2637_v5 = vld [vmem:[#allocation2 + $0x23] sm:$0xff]  ;;  %4726 = vmatpush.bf16.msra.mxu0 %v7458_v44 }
 0x2c8   : > { %3862 = vrot.lane.b32.xlu0 %v2247_v16, %s10473_s26  ;;  %7633 = vmatpush.bf16.msra.mxu1 %v7458_v44 }
 0x2c9   : > { %3668 = vrot.lane.b32.xlu1 %v8585_v61, %s10455_s25  ;;  %v1969_v45 = vpop.permute.xlu2 %1968  ;;  %s10469_s25 = smov 80   ;;  %v2443_v61 = vld [vmem:[#allocation2 + $0x22] sm:$0xff]  ;;  %7634 = vmatpush.bf16.msra.mxu2 %v7458_v44 }
 0x2ca   : > { %2042 = vst.msk [vmem:[#allocation3 + $0x228] sm:$0xff] %vm2018_vm14, %v1969_v45  ;;  %v1953_v51 = vpop.permute.xlu0 %1952 }
 0x2cb   : > { %v1949_v54 = vpop.permute.xlu1 %1948  ;;  %2034 = vst.msk [vmem:[#allocation3 + $0x168] sm:$0xff] %vm2018_vm14, %v1953_v51 }
 0x2cc   : > { %2032 = vst.msk [vmem:[#allocation3 + $0x138] sm:$0xff] %vm2018_vm14, %v1949_v54  ;;  %v8757_v54 = vld [vmem:[#allocation2 + $0x34] sm:$0xff] }
 0x2cf   : > { %4056 = vrot.lane.b32.xlu2 %v2441_v21, %s10461_s16  ;;  %v3801_v21 = vld [vmem:[#allocation2 + $0x29] sm:$0xff] }
 0x2d0   : > { %4058 = vrot.lane.b32.xlu0 %v3993_v36, %s10461_s16 }
 0x2d1   : > { %3864 = vrot.lane.b32.xlu1 %v3799_v37, %s10473_s26  ;;  %v1975_v38 = vpop.permute.xlu2 %1974 }
 0x2d2   : > { %2045 = vst.msk [vmem:[#allocation3 + $0x270] sm:$0xff] %vm2018_vm14, %v1975_v38  ;;  %v1959_v39 = vpop.permute.xlu0 %1958 }
 0x2d3   : > { %v1955_v40 = vpop.permute.xlu1 %1954  ;;  %2037 = vst.msk [vmem:[#allocation3 + $0x1b0] sm:$0xff] %vm2018_vm14, %v1959_v39  ;;  %v7456_v39 = vld [vmem:[%s10498_s1 + $0x10] sm:$0xff] }
 0x2d4   : > { %2035 = vst.msk [vmem:[#allocation3 + $0x180] sm:$0xff] %vm2018_vm14, %v1955_v40 }
 0x2d7   : > { %4252 = vrot.lane.b32.xlu2 %v4187_v41, %s10459_s18 }
 0x2d8   : > { %4444 = vrot.lane.b32.xlu0 %v2829_v29, %s10469_s25  ;;  %v4383_v29 = vld [vmem:[#allocation2 + $0x2c] sm:$0xff] }
 0x2d9   : > { %4250 = vrot.lane.b32.xlu1 %v2635_v30, %s10459_s18  ;;  %v1981_v43 = vpop.permute.xlu2 %1980 }
 0x2da   : > { %2048 = vst.msk [vmem:[#allocation3 + $0x2b8] sm:$0xff] %vm2018_vm14, %v1981_v43  ;;  %v1965_v46 = vpop.permute.xlu0 %1964  ;;  %v3027_v43 = vld [vmem:[#allocation2 + $0x35] sm:$0xff] }
 0x2db   : > { %v1961_v47 = vpop.permute.xlu1 %1960  ;;  %2040 = vst.msk [vmem:[#allocation3 + $0x1f8] sm:$0xff] %vm2018_vm14, %v1965_v46  ;;  %v3220_v46 = vld [vmem:[#allocation2 + $0x2e] sm:$0xff] }
 0x2dc   : > { %2038 = vst.msk [vmem:[#allocation3 + $0x1c8] sm:$0xff] %vm2018_vm14, %v1961_v47  ;;  %v7455_v47 = vld [vmem:[%s10498_s1 + $0x8] sm:$0xff] }
 0x2df   : > { %2314 = vrot.lane.b32.xlu2 %v3799_v37, %s10463_s20  ;;  %v8762_v37 = vld [vmem:[#allocation2 + $0x33] sm:$0xff] }
 0x2e0   : > { %2316 = vrot.lane.b32.xlu0 %v2249_v48, %s10463_s20 }
 0x2e1   : > { %4446 = vrot.lane.b32.xlu1 %v4381_v23, %s10469_s25  ;;  %v2117_v55 = vpop.permute.xlu2 %2116 }
 0x2e2   : > { %2213 = vst.msk [vmem:[#allocation3] sm:$0xff] %vm2212_vm15, %v2117_v55  ;;  %v1971_v56 = vpop.permute.xlu0 %1970  ;;  %v7454_v55 = vld [vmem:[%s10498_s1] sm:$0xff] }
 0x2e3   : > { %v1967_v57 = vpop.permute.xlu1 %1966  ;;  %2043 = vst.msk [vmem:[#allocation3 + $0x240] sm:$0xff] %vm2018_vm14, %v1971_v56 }
 0x2e4   : > { %2041 = vst.msk [vmem:[#allocation3 + $0x210] sm:$0xff] %vm2018_vm14, %v1967_v57 }
 0x2e7   : > { %2510 = vrot.lane.b32.xlu2 %v2443_v61, %s10465_s21 }
 0x2e8   : > { %2702 = vrot.lane.b32.xlu0 %v4187_v41, %s10475_s24 }
 0x2e9   : > { %2508 = vrot.lane.b32.xlu1 %v3993_v36, %s10465_s21  ;;  %v2123_v62 = vpop.permute.xlu2 %2122  ;;  %v7457_v36 = vld [vmem:[%s10498_s1 + $0x18] sm:$0xff]  ;;  %s10510_s1 = smov 56  }
 0x2ea   : > { %2216 = vst.msk [vmem:[#allocation3 + $0x48] sm:$0xff] %vm2212_vm15, %v2123_v62  ;;  %v1977_v63 = vpop.permute.xlu0 %1976  ;;  %4727 = vmatpush.bf16.msra.mxu0 %v7457_v36  ;;  %7635 = vmatpush.bf16.msra.mxu1 %v7457_v36 }
 0x2eb   : > { %v1973_v1 = vpop.permute.xlu1 %1972  ;;  %2046 = vst.msk [vmem:[#allocation3 + $0x288] sm:$0xff] %vm2018_vm14, %v1977_v63  ;;  %7636 = vmatpush.bf16.msra.mxu2 %v7457_v36  ;;  %v3999_v36 = vld [vmem:[#allocation2 + $0x4a] sm:$0xff] }
 0x2ec   : > { %2044 = vst.msk [vmem:[#allocation3 + $0x258] sm:$0xff] %vm2018_vm14, %v1973_v1 }
 0x2ee   : > { %4728 = vmatpush.bf16.msra.mxu0 %v7456_v39  ;;  %7637 = vmatpush.bf16.msra.mxu1 %v7456_v39 }
 0x2ef   : > { %2896 = vrot.lane.b32.xlu2 %v4381_v23, %s10467_s29  ;;  %7638 = vmatpush.bf16.msra.mxu2 %v7456_v39 }
 0x2f0   : > { %2898 = vrot.lane.b32.xlu0 %v2831_v2, %s10467_s29 }
 0x2f1   : > { %2704 = vrot.lane.b32.xlu1 %v2637_v5, %s10475_s24  ;;  %v2129_v6 = vpop.permute.xlu2 %2128 }
 0x2f2   : > { %2219 = vst.msk [vmem:[#allocation3 + $0x90] sm:$0xff] %vm2212_vm15, %v2129_v6  ;;  %v1983_v7 = vpop.permute.xlu0 %1982  ;;  %4729 = vmatpush.bf16.msra.mxu0 %v7455_v47  ;;  %7639 = vmatpush.bf16.msra.mxu1 %v7455_v47  ;;  %v3803_v6 = vld [vmem:[#allocation2 + $0x39] sm:$0xff] }
 0x2f3   : > { %v1979_v8 = vpop.permute.xlu1 %1978  ;;  %2049 = vst.msk [vmem:[#allocation3 + $0x2d0] sm:$0xff] %vm2018_vm14, %v1983_v7  ;;  %7640 = vmatpush.bf16.msra.mxu2 %v7455_v47 }
 0x2f4   : > { %2047 = vst.msk [vmem:[#allocation3 + $0x2a0] sm:$0xff] %vm2018_vm14, %v1979_v8  ;;  %v4191_v8 = vld [vmem:[#allocation2 + $0x3b] sm:$0xff]  ;;  %vm4670_vm14 = vcmask 687104  }
 0x2f6   : > { %4730 = vmatpush.bf16.msra.mxu0 %v7454_v55  ;;  %7641 = vmatpush.bf16.msra.mxu1 %v7454_v55 }
 0x2f7   : > { %3092 = vrot.lane.b32.xlu2 %v3025_v12, %s10457_s30  ;;  %7642 = vmatpush.bf16.msra.mxu2 %v7454_v55  ;;  %v4387_v55 = vld [vmem:[#allocation2 + $0x4c] sm:$0xff] }
 0x2f8   : > { %3284 = vrot.lane.b32.xlu0 %v8445_v52, %s10477_s17 }
 0x2f9   : > { %3090 = vrot.lane.b32.xlu1 %v3024_v13, %s10457_s30  ;;  %v2311_v14 = vpop.permute.xlu2 %2310  ;;  %s10497_s30 = smov 64  }
 0x2fa   : > { %2407 = vst.msk [vmem:[#allocation3] sm:$0xff] %vm2406_vm0, %v2311_v14  ;;  %v2119_v15 = vpop.permute.xlu0 %2118 }
 0x2fb   : > { %v1985_v16 = vpop.permute.xlu1 %1984  ;;  %2214 = vst.msk [vmem:[#allocation3 + $0x18] sm:$0xff] %vm2212_vm15, %v2119_v15 }
 0x2fc   : > { %2051 = vst.msk [vmem:[#allocation3 + $0x2e8] sm:$0xf] %vm2050_vm1, %v1985_v16  ;;  %vm4844_vm1 = vcmask 261120  }
 0x2ff   : > { %3478 = vrot.lane.b32.xlu2 %v8510_v53, %s10471_s23 }
 0x300   : > { %3480 = vrot.lane.b32.xlu0 %v8527_v60, %s10471_s23 }
 0x301   : > { %3286 = vrot.lane.b32.xlu1 %v8443_v50, %s10477_s17  ;;  %v2507_v52 = vpop.permute.xlu2 %2506  ;;  %v3995_v50 = vld [vmem:[#allocation2 + $0x2a] sm:$0xff] }
 0x302   : > { %v2125_v18 = vpop.permute.xlu0 %2124 }
 0x303   : > { %v2121_v19 = vpop.permute.xlu1 %2120  ;;  %2217 = vst.msk [vmem:[#allocation3 + $0x60] sm:$0xff] %vm2212_vm15, %v2125_v18  ;;  %v2253_v18 = vld [vmem:[#allocation2 + $0x41] sm:$0xff] }
 0x304   : > { %2215 = vst.msk [vmem:[#allocation3 + $0x30] sm:$0xff] %vm2212_vm15, %v2121_v19  ;;  %v4385_v19 = vld [vmem:[#allocation2 + $0x3c] sm:$0xff] }
 0x307   : > { %3674 = vrot.lane.b32.xlu2 %v8595_v4, %s10497_s30 }
 0x308   : > { %3866 = vrot.lane.b32.xlu0 %v2249_v48, %s10473_s26  ;;  %v3026_v48 = vld [vmem:[#allocation2 + $0x2d] sm:$0xff] }
 0x309   : > { %3672 = vrot.lane.b32.xlu1 %v8593_v3, %s10497_s30  ;;  %v2893_v53 = vpop.permute.xlu2 %2892  ;;  %v4189_v3 = vld [vmem:[#allocation2 + $0x2b] sm:$0xff] }
 0x30a   : > { %v2131_v60 = vpop.permute.xlu0 %2130 }
 0x30b   : > { %v2127_v20 = vpop.permute.xlu1 %2126  ;;  %2220 = vst.msk [vmem:[#allocation3 + $0xa8] sm:$0xff] %vm2212_vm15, %v2131_v60 }
 0x30c   : > { %2218 = vst.msk [vmem:[#allocation3 + $0x78] sm:$0xff] %vm2212_vm15, %v2127_v20 }
 0x30f   : > { %4060 = vrot.lane.b32.xlu2 %v2443_v61, %s10461_s16  ;;  %v3221_v61 = vld [vmem:[#allocation2 + $0x36] sm:$0xff] }
 0x310   : > { %4062 = vrot.lane.b32.xlu0 %v3995_v50, %s10461_s16  ;;  %s10503_s16 = smov 40  }
 0x311   : > { %3868 = vrot.lane.b32.xlu1 %v3801_v21, %s10473_s26  ;;  %v3089_v4 = vpop.permute.xlu2 %3088 }
 0x312   : > { %v2313_v22 = vpop.permute.xlu0 %2312 }
 0x313   : > { %v2133_v24 = vpop.permute.xlu1 %2132  ;;  %2408 = vst.msk [vmem:[#allocation3 + $0x18] sm:$0xff] %vm2406_vm0, %v2313_v22 }
 0x314   : > { %2221 = vst.msk [vmem:[#allocation3 + $0xc0] sm:$0xff] %vm2212_vm15, %v2133_v24  ;;  %v2835_v24 = vld [vmem:[#allocation2 + $0x44] sm:$0xff] }
 0x315   : > { %2602 = vst.msk [vmem:[#allocation3 + $0x18] sm:$0xff] %vm2600_vm2, %v2507_v52 }
 0x317   : > { %4256 = vrot.lane.b32.xlu2 %v4189_v3, %s10459_s18 }
 0x318   : > { %4448 = vrot.lane.b32.xlu0 %v2831_v2, %s10469_s25 }
 0x319   : > { %4254 = vrot.lane.b32.xlu1 %v2637_v5, %s10459_s18  ;;  %v3475_v25 = vpop.permute.xlu2 %3474  ;;  %s10499_s18 = smov 52   ;;  %v3997_v5 = vld [vmem:[#allocation2 + $0x3a] sm:$0xff] }
 0x31a   : > { %v2699_v26 = vpop.permute.xlu0 %2698 }
 0x31b   : > { %v2505_v27 = vpop.permute.xlu1 %2504 }
 0x31c   : > { %2601 = vst.msk [vmem:[#allocation3] sm:$0xff] %vm2600_vm2, %v2505_v27 }
 0x31d   : > { %2795 = vst.msk [vmem:[#allocation3] sm:$0xff] %vm2794_vm3, %v2699_v26 }
 0x31e   : > { %2989 = vst.msk [vmem:[#allocation3] sm:$0xff] %vm2988_vm4, %v2893_v53 }
 0x31f   : > { %2318 = vrot.lane.b32.xlu2 %v3801_v21, %s10463_s20 }
 0x320   : > { %2320 = vrot.lane.b32.xlu0 %v8732_v28, %s10463_s20  ;;  %s10501_s20 = smov 76  }
 0x321   : > { %4450 = vrot.lane.b32.xlu1 %v4383_v29, %s10469_s25  ;;  %v3671_v30 = vpop.permute.xlu2 %3670 }
 0x322   : > { %v2895_v0 = vpop.permute.xlu0 %2894 }
 0x323   : > { %v2701_v33 = vpop.permute.xlu1 %2700 }
 0x324   : > { %2796 = vst.msk [vmem:[#allocation3 + $0x18] sm:$0xff] %vm2794_vm3, %v2701_v33  ;;  %v3416_v33 = vld [vmem:[#allocation2 + $0x3f] sm:$0xff] }
 0x325   : > { %2990 = vst.msk [vmem:[#allocation3 + $0x18] sm:$0xff] %vm2988_vm4, %v2895_v0 }
 0x326   : > { %3184 = vst.msk [vmem:[#allocation3 + $0x18] sm:$0xff] %vm3182_vm5, %v3089_v4 }
 0x327   : > { %2514 = vrot.lane.b32.xlu2 %v8743_v34, %s10465_s21 }
 0x328   : > { %2706 = vrot.lane.b32.xlu0 %v4189_v3, %s10475_s24  ;;  %v2641_v3 = vld [vmem:[#allocation2 + $0x43] sm:$0xff] }
 0x329   : > { %2512 = vrot.lane.b32.xlu1 %v3995_v50, %s10465_s21  ;;  %v4057_v49 = vpop.permute.xlu2 %4056  ;;  %s10502_s21 = smov 36   ;;  %v2447_v50 = vld [vmem:[#allocation2 + $0x42] sm:$0xff] }
 0x32a   : > { %v3281_v45 = vpop.permute.xlu0 %3280 }
 0x32b   : > { %v3087_v51 = vpop.permute.xlu1 %3086 }
 0x32c   : > { %3183 = vst.msk [vmem:[#allocation3] sm:$0xff] %vm3182_vm5, %v3087_v51 }
 0x32d   : > { %3377 = vst.msk [vmem:[#allocation3] sm:$0xff] %vm3376_vm7, %v3281_v45 }
 0x32e   : > { %3571 = vst.msk [vmem:[#allocation3] sm:$0xff] %vm3570_vm8, %v3475_v25 }
 0x32f   : > { %2900 = vrot.lane.b32.xlu2 %v4383_v29, %s10467_s29  ;;  %v3222_v29 = vld [vmem:[#allocation2 + $0x3e] sm:$0xff] }
 0x330   : > { %2902 = vrot.lane.b32.xlu0 %v8757_v54, %s10467_s29  ;;  %s10500_s29 = smov 72  }
 0x331   : > { %2708 = vrot.lane.b32.xlu1 %v8762_v37, %s10475_s24  ;;  %v4253_v38 = vpop.permute.xlu2 %4252 }
 0x332   : > { %v3477_v40 = vpop.permute.xlu0 %3476 }
 0x333   : > { %v3283_v41 = vpop.permute.xlu1 %3282 }
 0x334   : > { %3378 = vst.msk [vmem:[#allocation3 + $0x18] sm:$0xff] %vm3376_vm7, %v3283_v41 }
 0x335   : > { %3572 = vst.msk [vmem:[#allocation3 + $0x18] sm:$0xff] %vm3570_vm8, %v3477_v40 }
 0x336   : > { %3766 = vst.msk [vmem:[#allocation3 + $0x18] sm:$0xff] %vm3764_vm9, %v3671_v30  ;;  %v3028_v30 = vld [vmem:[#allocation2 + $0x3d] sm:$0xff] }
 0x337   : > { %3096 = vrot.lane.b32.xlu2 %v3027_v43, %s10499_s18 }
 0x338   : > { %3288 = vrot.lane.b32.xlu0 %v3220_v46, %s10477_s17 }
 0x339   : > { %3094 = vrot.lane.b32.xlu1 %v3026_v48, %s10499_s18  ;;  %v2315_v23 = vpop.permute.xlu2 %2314 }
 0x33a   : > { %2409 = vst.msk [vmem:[#allocation3 + $0x30] sm:$0xff] %vm2406_vm0, %v2315_v23  ;;  %v3863_v56 = vpop.permute.xlu0 %3862  ;;  %v2061_v23 = vld [vmem:[#allocation2 + $0x50] sm:$0xff] }
 0x33b   : > { %v3669_v57 = vpop.permute.xlu1 %3668 }
 0x33c   : > { %3765 = vst.msk [vmem:[#allocation3] sm:$0xff] %vm3764_vm9, %v3669_v57 }
 0x33d   : > { %3959 = vst.msk [vmem:[#allocation3] sm:$0xff] %vm3958_vm10, %v3863_v56 }
 0x33e   : > { %4153 = vst.msk [vmem:[#allocation3] sm:$0xff] %vm4152_vm11, %v4057_v49 }
 0x33f   : > { %3482 = vrot.lane.b32.xlu2 %v8523_v58, %s10471_s23 }
 0x340   : > { %3484 = vrot.lane.b32.xlu0 %v8525_v59, %s10471_s23 }
 0x341   : > { %3290 = vrot.lane.b32.xlu1 %v3221_v61, %s10477_s17  ;;  %v2511_v62 = vpop.permute.xlu2 %2510 }
 0x342   : > { %v4059_v63 = vpop.permute.xlu0 %4058 }
 0x343   : > { %v3865_v1 = vpop.permute.xlu1 %3864 }
 0x344   : > { %3960 = vst.msk [vmem:[#allocation3 + $0x18] sm:$0xff] %vm3958_vm10, %v3865_v1 }
 0x345   : > { %4154 = vst.msk [vmem:[#allocation3 + $0x18] sm:$0xff] %vm4152_vm11, %v4059_v63  ;;  %v2255_v63 = vld [vmem:[#allocation2 + $0x51] sm:$0xff] }
 0x346   : > { %4348 = vst.msk [vmem:[#allocation3 + $0x18] sm:$0xff] %vm4346_vm12, %v4253_v38 }
 0x347   : > { %3678 = vrot.lane.b32.xlu2 %v8608_v9, %s10497_s30 }
 0x348   : > { %3870 = vrot.lane.b32.xlu0 %v8732_v28, %s10473_s26  ;;  %v3029_v28 = vld [vmem:[#allocation2 + $0x45] sm:$0xff] }
 0x349   : > { %3676 = vrot.lane.b32.xlu1 %v8612_v11, %s10497_s30  ;;  %v2897_v58 = vpop.permute.xlu2 %2896 }
 0x34a   : > { %v4445_v59 = vpop.permute.xlu0 %4444 }
 0x34b   : > { %v4251_v2 = vpop.permute.xlu1 %4250 }
 0x34c   : > { %4347 = vst.msk [vmem:[#allocation3] sm:$0xff] %vm4346_vm12, %v4251_v2  ;;  %v2643_v2 = vld [vmem:[#allocation2 + $0x53] sm:$0xff] }
 0x34d   : > { %4541 = vst.msk [vmem:[#allocation3] sm:$0xff] %vm10480_vm13, %v4445_v59 }
 0x34f   : > { %4064 = vrot.lane.b32.xlu2 %v8743_v34, %s10500_s29  ;;  %v3417_v34 = vld [vmem:[#allocation2 + $0x47] sm:$0xff] }
 0x350   : > { %4066 = vrot.lane.b32.xlu0 %v3997_v5, %s10500_s29 }
 0x351   : > { %3872 = vrot.lane.b32.xlu1 %v3803_v6, %s10473_s26  ;;  %v3093_v9 = vpop.permute.xlu2 %3092 }
 0x352   : > { %v2317_v7 = vpop.permute.xlu0 %2316 }
 0x353   : > { %v4447_v11 = vpop.permute.xlu1 %4446  ;;  %2410 = vst.msk [vmem:[#allocation3 + $0x48] sm:$0xff] %vm2406_vm0, %v2317_v7  ;;  %v3030_v7 = vld [vmem:[#allocation2 + $0x4d] sm:$0xff] }
 0x354   : > { %4542 = vst.msk [vmem:[#allocation3 + $0x18] sm:$0xff] %vm10480_vm13, %v4447_v11  ;;  %v4574_v15 = vld [vmem:[#allocation3] sm:$0xff] }
 0x355   : > { %2604 = vst.msk [vmem:[#allocation3 + $0x48] sm:$0xff] %vm2600_vm2, %v2511_v62  ;;  %v2449_v62 = vld [vmem:[#allocation2 + $0x52] sm:$0xff] }
 0x356   : > { %v3031_v11 = vld [vmem:[#allocation2 + $0x55] sm:$0xff] }
 0x357   : > { %4260 = vrot.lane.b32.xlu2 %v4191_v8, %s10501_s20 }
 0x358   : > { %4452 = vrot.lane.b32.xlu0 %v8757_v54, %s10469_s25 }
 0x359   : > { %4258 = vrot.lane.b32.xlu1 %v8762_v37, %s10501_s20  ;;  %v3479_v12 = vpop.permute.xlu2 %3478  ;;  %v3805_v37 = vld [vmem:[#allocation2 + $0x49] sm:$0xff] }
 0x35a   : > { %v2703_v13 = vpop.permute.xlu0 %2702 }
 0x35b   : > { %v2509_v14 = vpop.permute.xlu1 %2508  ;;  %v4575_v16 = vld [vmem:[#allocation3 + $0x18] sm:$0xff] }
 0x35c   : > { %2603 = vst.msk [vmem:[#allocation3 + $0x30] sm:$0xff] %vm2600_vm2, %v2509_v14  ;;  %v4606_v52 = vpack.c.bf16 %v4575_v16, %v4574_v15  ;;  %v3225_v15 = vld [vmem:[#allocation2 + $0x56] sm:$0xff] }
 0x35d   : > { %2797 = vst.msk [vmem:[#allocation3 + $0x30] sm:$0xff] %vm2794_vm3, %v2703_v13  ;;  %v3418_v16 = vld [vmem:[#allocation2 + $0x4f] sm:$0xff] }
 0x35e   : > { %2991 = vst.msk [vmem:[#allocation3 + $0x30] sm:$0xff] %vm2988_vm4, %v2897_v58  ;;  %7035 = vmatmul.msk.bf16.vlgmr.msra.gmra.mxu0 %vm4670_vm14, %v4606_v52  ;;  %v3224_v52 = vld [vmem:[#allocation2 + $0x4e] sm:$0xff] }
 0x35f   : > { %2322 = vrot.lane.b32.xlu2 %v3803_v6, %s10502_s21 }
 0x360   : > { %2324 = vrot.lane.b32.xlu0 %v2253_v18, %s10502_s21 }
 0x361   : > { %4454 = vrot.lane.b32.xlu1 %v4385_v19, %s10469_s25  ;;  %v3675_v53 = vpop.permute.xlu2 %3674  ;;  %s10504_s25 = smov 48  }
 0x362   : > { %v2899_v60 = vpop.permute.xlu0 %2898 }
 0x363   : > { %v2705_v20 = vpop.permute.xlu1 %2704 }
 0x364   : > { %2798 = vst.msk [vmem:[#allocation3 + $0x48] sm:$0xff] %vm2794_vm3, %v2705_v20  ;;  %v3419_v20 = vld [vmem:[#allocation2 + $0x57] sm:$0xff] }
 0x365   : > { %2992 = vst.msk [vmem:[#allocation3 + $0x48] sm:$0xff] %vm2988_vm4, %v2899_v60  ;;  %v3613_v60 = vld [vmem:[#allocation2 + $0x58] sm:$0xff] }
 0x366   : > { %3186 = vst.msk [vmem:[#allocation3 + $0x48] sm:$0xff] %vm3182_vm5, %v3093_v9 }
 0x367   : > { %2518 = vrot.lane.b32.xlu2 %v2447_v50, %s10503_s16 }
 0x368   : > { %2710 = vrot.lane.b32.xlu0 %v4191_v8, %s10475_s24  ;;  %v8890_v8 = vld [vmem:[#allocation2 + $0x54] sm:$0xff] }
 0x369   : > { %2516 = vrot.lane.b32.xlu1 %v3997_v5, %s10503_s16  ;;  %v4061_v21 = vpop.permute.xlu2 %4060 }
 0x36a   : > { %v3285_v4 = vpop.permute.xlu0 %3284 }
 0x36b   : > { %v3091_v22 = vpop.permute.xlu1 %3090 }
 0x36c   : > { %3185 = vst.msk [vmem:[#allocation3 + $0x30] sm:$0xff] %vm3182_vm5, %v3091_v22  ;;  %v3807_v22 = vld [vmem:[#allocation2 + $0x59] sm:$0xff] }
 0x36d   : > { %3379 = vst.msk [vmem:[#allocation3 + $0x30] sm:$0xff] %vm3376_vm7, %v3285_v4 }
 0x36e   : > { %3573 = vst.msk [vmem:[#allocation3 + $0x30] sm:$0xff] %vm3570_vm8, %v3479_v12 }
 0x36f   : > { %2904 = vrot.lane.b32.xlu2 %v4385_v19, %s10504_s25 }
 0x370   : > { %2906 = vrot.lane.b32.xlu0 %v2835_v24, %s10504_s25 }
 0x371   : > { %2712 = vrot.lane.b32.xlu1 %v2641_v3, %s10475_s24  ;;  %v4257_v25 = vpop.permute.xlu2 %4256 }
 0x372   : > { %v3481_v26 = vpop.permute.xlu0 %3480 }
 0x373   : > { %v3287_v27 = vpop.permute.xlu1 %3286 }
 0x374   : > { %3380 = vst.msk [vmem:[#allocation3 + $0x48] sm:$0xff] %vm3376_vm7, %v3287_v27  ;;  %v4001_v27 = vld [vmem:[#allocation2 + $0x5a] sm:$0xff] }
 0x375   : > { %3574 = vst.msk [vmem:[#allocation3 + $0x48] sm:$0xff] %vm3570_vm8, %v3481_v26  ;;  %v4195_v26 = vld [vmem:[#allocation2 + $0x5b] sm:$0xff] }
 0x376   : > { %3768 = vst.msk [vmem:[#allocation3 + $0x48] sm:$0xff] %vm3764_vm9, %v3675_v53 }
 0x377   : > { %3100 = vrot.lane.b32.xlu2 %v3029_v28, %s10499_s18  ;;  %v8922_v28 = vld [vmem:[%s10433_s2] ss:$0 sm:$0xff] }
 0x378   : > { %3292 = vrot.lane.b32.xlu0 %v3222_v29, %s10477_s17 }
 0x379   : > { %3098 = vrot.lane.b32.xlu1 %v3028_v30, %s10499_s18  ;;  %v2319_v31 = vpop.permute.xlu2 %2318 }
 0x37a   : > { %2411 = vst.msk [vmem:[#allocation3 + $0x60] sm:$0xff] %vm2406_vm0, %v2319_v31  ;;  %v3867_v0 = vpop.permute.xlu0 %3866 }
 0x37b   : > { %v3673_v32 = vpop.permute.xlu1 %3672 }
 0x37c   : > { %3767 = vst.msk [vmem:[#allocation3 + $0x30] sm:$0xff] %vm3764_vm9, %v3673_v32 }
 0x37d   : > { %3961 = vst.msk [vmem:[#allocation3 + $0x30] sm:$0xff] %vm3958_vm10, %v3867_v0 }
 0x37e   : > { %4155 = vst.msk [vmem:[#allocation3 + $0x30] sm:$0xff] %vm4152_vm11, %v4061_v21 }
 0x37f   : > { %3486 = vrot.lane.b32.xlu2 %v3416_v33, %s10471_s23 }
 0x380   : > { %3488 = vrot.lane.b32.xlu0 %v3417_v34, %s10471_s23  ;;  %s10505_s23 = smov 80  }
 0x381   : > { %3294 = vrot.lane.b32.xlu1 %v3223_v35, %s10477_s17  ;;  %v2515_v42 = vpop.permute.xlu2 %2514 }
 0x382   : > { %v4063_v49 = vpop.permute.xlu0 %4062 }
 0x383   : > { %v3869_v44 = vpop.permute.xlu1 %3868 }
 0x384   : > { %3962 = vst.msk [vmem:[#allocation3 + $0x48] sm:$0xff] %vm3958_vm10, %v3869_v44 }
 0x385   : > { %4156 = vst.msk [vmem:[#allocation3 + $0x48] sm:$0xff] %vm4152_vm11, %v4063_v49 }
 0x386   : > { %4350 = vst.msk [vmem:[#allocation3 + $0x48] sm:$0xff] %vm4346_vm12, %v4257_v25 }
 0x387   : > { %3682 = vrot.lane.b32.xlu2 %v8623_v17, %s10497_s30 }
 0x388   : > { %3874 = vrot.lane.b32.xlu0 %v2253_v18, %s10473_s26 }
 0x389   : > { %3680 = vrot.lane.b32.xlu1 %v8610_v10, %s10497_s30  ;;  %v2901_v45 = vpop.permute.xlu2 %2900  ;;  %v4193_v10 = vld [vmem:[#allocation2 + $0x4b] sm:$0xff] }
 0x38a   : > { %v4449_v51 = vpop.permute.xlu0 %4448 }
 0x38b   : > { %v4255_v54 = vpop.permute.xlu1 %4254 }
 0x38c   : > { %4349 = vst.msk [vmem:[#allocation3 + $0x30] sm:$0xff] %vm4346_vm12, %v4255_v54 }
 0x38d   : > { %4543 = vst.msk [vmem:[#allocation3 + $0x30] sm:$0xff] %vm10480_vm13, %v4449_v51 }
 0x38f   : > { %4068 = vrot.lane.b32.xlu2 %v2447_v50, %s10500_s29 }
 0x390   : > { %4070 = vrot.lane.b32.xlu0 %v3999_v36, %s10500_s29 }
 0x391   : > { %3876 = vrot.lane.b32.xlu1 %v3805_v37, %s10473_s26  ;;  %v3097_v17 = vpop.permute.xlu2 %3096  ;;  %s10506_s26 = smov 32  }
 0x392   : > { %v2321_v38 = vpop.permute.xlu0 %2320 }
 0x393   : > { %v4451_v39 = vpop.permute.xlu1 %4450  ;;  %2412 = vst.msk [vmem:[#allocation3 + $0x78] sm:$0xff] %vm2406_vm0, %v2321_v38 }
 0x394   : > { %4544 = vst.msk [vmem:[#allocation3 + $0x48] sm:$0xff] %vm10480_vm13, %v4451_v39  ;;  %v4576_v46 = vld [vmem:[#allocation3 + $0x30] sm:$0xff] }
 0x395   : > { %2606 = vst.msk [vmem:[#allocation3 + $0x78] sm:$0xff] %vm2600_vm2, %v2515_v42  ;;  %v4389_v42 = vld [vmem:[#allocation2 + $0x5c] sm:$0xff] }
 0x396   : > { %v3032_v39 = vld [vmem:[#allocation2 + $0x5d] sm:$0xff] }
 0x397   : > { %4264 = vrot.lane.b32.xlu2 %v4193_v10, %s10501_s20 }
 0x398   : > { %4456 = vrot.lane.b32.xlu0 %v2835_v24, %s10505_s23 }
 0x399   : > { %4262 = vrot.lane.b32.xlu1 %v2641_v3, %s10501_s20  ;;  %v3483_v40 = vpop.permute.xlu2 %3482 }
 0x39a   : > { %v2707_v41 = vpop.permute.xlu0 %2706 }
 0x39b   : > { %v2513_v43 = vpop.permute.xlu1 %2512  ;;  %v4577_v47 = vld [vmem:[#allocation3 + $0x48] sm:$0xff] }
 0x39c   : > { %2605 = vst.msk [vmem:[#allocation3 + $0x60] sm:$0xff] %vm2600_vm2, %v2513_v43  ;;  %v4607_v48 = vpack.c.bf16 %v4577_v47, %v4576_v46 }
 0x39d   : > { %2799 = vst.msk [vmem:[#allocation3 + $0x60] sm:$0xff] %vm2794_vm3, %v2707_v41  ;;  %v8942_v41 = vld [vmem:[#allocation2 + $0x105] sm:$0xff] }
 0x39e   : > { %2993 = vst.msk [vmem:[#allocation3 + $0x60] sm:$0xff] %vm2988_vm4, %v2901_v45  ;;  %7036 = vmatmul.msk.bf16.gmra.mxu0 %vm4670_vm14, %v4607_v48  ;;  %v2451_v48 = vld [vmem:[#allocation2 + $0x62] sm:$0xff] }
 0x39f   : > { %2134 = vrot.lane.b32.xlu2 %v2061_v23, %s10506_s26 }
 0x3a0   : > { %2326 = vrot.lane.b32.xlu0 %v3805_v37, %s10502_s21  ;;  %v8938_v37 = vld [vmem:[#allocation2 + $0x60] sm:$0xff] }
 0x3a1   : > { %4458 = vrot.lane.b32.xlu1 %v4387_v55, %s10505_s23  ;;  %v3679_v56 = vpop.permute.xlu2 %3678 }
 0x3a2   : > { %v2903_v57 = vpop.permute.xlu0 %2902 }
 0x3a3   : > { %v2709_v61 = vpop.permute.xlu1 %2708 }
 0x3a4   : > { %2800 = vst.msk [vmem:[#allocation3 + $0x78] sm:$0xff] %vm2794_vm3, %v2709_v61  ;;  %v2645_v61 = vld [vmem:[#allocation2 + $0x63] sm:$0xff] }
 0x3a5   : > { %2994 = vst.msk [vmem:[#allocation3 + $0x78] sm:$0xff] %vm2988_vm4, %v2903_v57  ;;  %v8957_v57 = vld [vmem:[#allocation2 + $0x64] sm:$0xff] }
 0x3a6   : > { %3188 = vst.msk [vmem:[#allocation3 + $0x78] sm:$0xff] %vm3182_vm5, %v3097_v17  ;;  %v2257_v17 = vld [vmem:[#allocation2 + $0x61] sm:$0xff] }
 0x3a7   : > { %2520 = vrot.lane.b32.xlu2 %v3999_v36, %s10503_s16 }
 0x3a8   : > { %2522 = vrot.lane.b32.xlu0 %v2449_v62, %s10503_s16 }
 0x3a9   : > { %2328 = vrot.lane.b32.xlu1 %v2255_v63, %s10502_s21  ;;  %v4065_v1 = vpop.permute.xlu2 %4064 }
 0x3aa   : > { %v3289_v58 = vpop.permute.xlu0 %3288 }
 0x3ab   : > { %v3095_v59 = vpop.permute.xlu1 %3094 }
 0x3ac   : > { %3187 = vst.msk [vmem:[#allocation3 + $0x60] sm:$0xff] %vm3182_vm5, %v3095_v59 }
 0x3ad   : > { %3381 = vst.msk [vmem:[#allocation3 + $0x60] sm:$0xff] %vm3376_vm7, %v3289_v58  ;;  %v3033_v58 = vld [vmem:[#allocation2 + $0x65] sm:$0xff] }
 0x3ae   : > { %3575 = vst.msk [vmem:[#allocation3 + $0x60] sm:$0xff] %vm3570_vm8, %v3483_v40  ;;  %v3420_v40 = vld [vmem:[#allocation2 + $0x5f] sm:$0xff] }
 0x3af   : > { %2716 = vrot.lane.b32.xlu2 %v2643_v2, %s10475_s24 }
 0x3b0   : > { %2908 = vrot.lane.b32.xlu0 %v4387_v55, %s10504_s25 }
 0x3b1   : > { %2714 = vrot.lane.b32.xlu1 %v4193_v10, %s10475_s24  ;;  %v4261_v5 = vpop.permute.xlu2 %4260  ;;  %s10507_s24 = smov 60   ;;  %v3226_v10 = vld [vmem:[#allocation2 + $0x5e] sm:$0xff] }
 0x3b2   : > { %v3485_v6 = vpop.permute.xlu0 %3484  ;;  %4966 = vst [vmem:[#allocation2 + $0x5a] sm:$0x3f] %v8942_v41 }
 0x3b3   : > { %v3291_v9 = vpop.permute.xlu1 %3290 }
 0x3b4   : > { %3382 = vst.msk [vmem:[#allocation3 + $0x78] sm:$0xff] %vm3376_vm7, %v3291_v9  ;;  %v3227_v9 = vld [vmem:[#allocation2 + $0x66] sm:$0xff] }
 0x3b5   : > { %3576 = vst.msk [vmem:[#allocation3 + $0x78] sm:$0xff] %vm3570_vm8, %v3485_v6  ;;  %v3421_v6 = vld [vmem:[#allocation2 + $0x67] sm:$0xff] }
 0x3b6   : > { %3770 = vst.msk [vmem:[#allocation3 + $0x78] sm:$0xff] %vm3764_vm9, %v3679_v56 }
 0x3b7   : > { %3102 = vrot.lane.b32.xlu2 %v3030_v7, %s10499_s18 }
 0x3b8   : > { %3104 = vrot.lane.b32.xlu0 %v3031_v11, %s10499_s18 }
 0x3b9   : > { %2910 = vrot.lane.b32.xlu1 %v8890_v8, %s10504_s25  ;;  %v2323_v12 = vpop.permute.xlu2 %2322 }
 0x3ba   : > { %2413 = vst.msk [vmem:[#allocation3 + $0x90] sm:$0xff] %vm2406_vm0, %v2323_v12  ;;  %v3871_v13 = vpop.permute.xlu0 %3870  ;;  %v3615_v12 = vld [vmem:[#allocation2 + $0x68] sm:$0xff] }
 0x3bb   : > { %v3677_v14 = vpop.permute.xlu1 %3676 }
 0x3bc   : > { %3769 = vst.msk [vmem:[#allocation3 + $0x60] sm:$0xff] %vm3764_vm9, %v3677_v14 }
 0x3bd   : > { %3963 = vst.msk [vmem:[#allocation3 + $0x60] sm:$0xff] %vm3958_vm10, %v3871_v13 }
 0x3be   : > { %4157 = vst.msk [vmem:[#allocation3 + $0x60] sm:$0xff] %vm4152_vm11, %v4065_v1 }
 0x3bf   : > { %3298 = vrot.lane.b32.xlu2 %v3225_v15, %s10477_s17 }
 0x3c0   : > { %3490 = vrot.lane.b32.xlu0 %v3418_v16, %s10507_s24  ;;  %v4003_v16 = vld [vmem:[#allocation2 + $0x6a] sm:$0xff] }
 0x3c1   : > { %3296 = vrot.lane.b32.xlu1 %v3224_v52, %s10477_s17  ;;  %v2519_v18 = vpop.permute.xlu2 %2518  ;;  %s10508_s17 = smov 68   ;;  %v3809_v52 = vld [vmem:[#allocation2 + $0x69] sm:$0xff] }
 0x3c2   : > { %v4067_v19 = vpop.permute.xlu0 %4066 }
 0x3c3   : > { %v3873_v53 = vpop.permute.xlu1 %3872 }
 0x3c4   : > { %3964 = vst.msk [vmem:[#allocation3 + $0x78] sm:$0xff] %vm3958_vm10, %v3873_v53 }
 0x3c5   : > { %4158 = vst.msk [vmem:[#allocation3 + $0x78] sm:$0xff] %vm4152_vm11, %v4067_v19 }
 0x3c6   : > { %4352 = vst.msk [vmem:[#allocation3 + $0x78] sm:$0xff] %vm4346_vm12, %v4261_v5 }
 0x3c7   : > { %3684 = vrot.lane.b32.xlu2 %v2061_v23, %s10497_s30 }
 0x3c8   : > { %3686 = vrot.lane.b32.xlu0 %v3613_v60, %s10497_s30 }
 0x3c9   : > { %3492 = vrot.lane.b32.xlu1 %v3419_v20, %s10507_s24  ;;  %v2905_v50 = vpop.permute.xlu2 %2904 }
 0x3ca   : > { %v4453_v21 = vpop.permute.xlu0 %4452 }
 0x3cb   : > { %v4259_v4 = vpop.permute.xlu1 %4258 }
 0x3cc   : > { %4351 = vst.msk [vmem:[#allocation3 + $0x60] sm:$0xff] %vm4346_vm12, %v4259_v4 }
 0x3cd   : > { %4545 = vst.msk [vmem:[#allocation3 + $0x60] sm:$0xff] %vm10480_vm13, %v4453_v21 }
 0x3cf   : > { %3880 = vrot.lane.b32.xlu2 %v3807_v22, %s10508_s17 }
 0x3d0   : > { %4072 = vrot.lane.b32.xlu0 %v2449_v62, %s10500_s29 }
 0x3d1   : > { %3878 = vrot.lane.b32.xlu1 %v2255_v63, %s10508_s17  ;;  %v3101_v24 = vpop.permute.xlu2 %3100 }
 0x3d2   : > { %v2325_v3 = vpop.permute.xlu0 %2324 }
 0x3d3   : > { %v4455_v25 = vpop.permute.xlu1 %4454  ;;  %2414 = vst.msk [vmem:[#allocation3 + $0xa8] sm:$0xff] %vm2406_vm0, %v2325_v3 }
 0x3d4   : > { %4546 = vst.msk [vmem:[#allocation3 + $0x78] sm:$0xff] %vm10480_vm13, %v4455_v25  ;;  %v4578_v32 = vld [vmem:[#allocation3 + $0x60] sm:$0xff] }
 0x3d5   : > { %2608 = vst.msk [vmem:[#allocation3 + $0xa8] sm:$0xff] %vm2600_vm2, %v2519_v18 }
 0x3d7   : > { %4266 = vrot.lane.b32.xlu2 %v2643_v2, %s10501_s20 }
 0x3d8   : > { %4268 = vrot.lane.b32.xlu0 %v4195_v26, %s10501_s20 }
 0x3d9   : > { %4074 = vrot.lane.b32.xlu1 %v4001_v27, %s10500_s29  ;;  %v3487_v29 = vpop.permute.xlu2 %3486 }
 0x3da   : > { %v2711_v30 = vpop.permute.xlu0 %2710 }
 0x3db   : > { %v2517_v31 = vpop.permute.xlu1 %2516  ;;  %v4732_v0 = vpop.f32.mrf.mxu0  ;;  %v4579_v33 = vld [vmem:[#allocation3 + $0x78] sm:$0xff] }
 0x3dc   : > { %2607 = vst.msk [vmem:[#allocation3 + $0x90] sm:$0xff] %vm2600_vm2, %v2517_v31  ;;  %v4733_v34 = vadd.f32 %v8922_v28, %v4732_v0  ;;  %v4608_v35 = vpack.c.bf16 %v4579_v33, %v4578_v32  ;;  %v4391_v0 = vld [vmem:[#allocation2 + $0x6c] sm:$0xff] }
 0x3dd   : > { %2801 = vst.msk [vmem:[#allocation3 + $0x90] sm:$0xff] %vm2794_vm3, %v2711_v30  ;;  %v9002_v30 = vld [vmem:[#allocation2 + $0x70] sm:$0xff] }
 0x3de   : > { %2995 = vst.msk [vmem:[#allocation3 + $0x90] sm:$0xff] %vm2988_vm4, %v2905_v50  ;;  %v4812_v49 = vmax.f32 %v4733_v34, 0.0  ;;  %7037 = vmatmul.msk.bf16.gmra.mxu0 %vm4670_vm14, %v4608_v35 }
 0x3df   : > { %4462 = vrot.lane.b32.xlu2 %v4389_v42, %s10505_s23 }
 0x3e0   : > { %4845 = vst.msk [vmem:[#allocation4] sm:$0xff] %vm4844_vm1, %v4812_v49  ;;  %2136 = vrot.lane.b32.xlu0 %v3613_v60, %s10506_s26 }
 0x3e1   : > { %4460 = vrot.lane.b32.xlu1 %v8890_v8, %s10505_s23  ;;  %v3683_v44 = vpop.permute.xlu2 %3682 }
 0x3e2   : > { %v2907_v45 = vpop.permute.xlu0 %2906 }
 0x3e3   : > { %v2713_v51 = vpop.permute.xlu1 %2712  ;;  %v4734_v54 = vpop.f32.mrf.mxu0 }
 0x3e4   : > { %2802 = vst.msk [vmem:[#allocation3 + $0xa8] sm:$0xff] %vm2794_vm3, %v2713_v51  ;;  %v4735_v36 = vadd.f32 %v8922_v28, %v4734_v54  ;;  %v9011_v51 = vld [vmem:[#allocation2 + $0x71] sm:$0xff] }
 0x3e5   : > { %2996 = vst.msk [vmem:[#allocation3 + $0xa8] sm:$0xff] %vm2988_vm4, %v2907_v45 }
 0x3e6   : > { %3190 = vst.msk [vmem:[#allocation3 + $0xa8] sm:$0xff] %vm3182_vm5, %v3101_v24  ;;  %v4813_v38 = vmax.f32 %v4735_v36, 0.0 }
 0x3e7   : > { %2330 = vrot.lane.b32.xlu2 %v3807_v22, %s10502_s21  ;;  %v4197_v22 = vld [vmem:[#allocation2 + $0x6b] sm:$0xff] }
 0x3e8   : > { %4846 = vst.msk [vmem:[#allocation4 + $0x8] sm:$0xff] %vm4844_vm1, %v4813_v38  ;;  %2332 = vrot.lane.b32.xlu0 %v2257_v17, %s10502_s21  ;;  %v9022_v38 = vld [vmem:[#allocation2 + $0x73] sm:$0xff] }
 0x3e9   : > { %2138 = vrot.lane.b32.xlu1 %v8938_v37, %s10506_s26  ;;  %v4069_v43 = vpop.permute.xlu2 %4068 }
 0x3ea   : > { %v3293_v46 = vpop.permute.xlu0 %3292 }
 0x3eb   : > { %v3099_v47 = vpop.permute.xlu1 %3098 }
 0x3ec   : > { %3189 = vst.msk [vmem:[#allocation3 + $0x90] sm:$0xff] %vm3182_vm5, %v3099_v47 }
 0x3ed   : > { %3383 = vst.msk [vmem:[#allocation3 + $0x90] sm:$0xff] %vm3376_vm7, %v3293_v46 }
 0x3ee   : > { %3577 = vst.msk [vmem:[#allocation3 + $0x90] sm:$0xff] %vm3570_vm8, %v3487_v29 }
 0x3ef   : > { %2526 = vrot.lane.b32.xlu2 %v2451_v48, %s10503_s16 }
 0x3f0   : > { %2718 = vrot.lane.b32.xlu0 %v4195_v26, %s10509_s0 }
 0x3f1   : > { %2524 = vrot.lane.b32.xlu1 %v4001_v27, %s10503_s16  ;;  %v4265_v23 = vpop.permute.xlu2 %4264 }
 0x3f2   : > { %v3489_v55 = vpop.permute.xlu0 %3488 }
 0x3f3   : > { %v3295_v56 = vpop.permute.xlu1 %3294 }
 0x3f4   : > { %3384 = vst.msk [vmem:[#allocation3 + $0xa8] sm:$0xff] %vm3376_vm7, %v3295_v56 }
 0x3f5   : > { %3578 = vst.msk [vmem:[#allocation3 + $0xa8] sm:$0xff] %vm3570_vm8, %v3489_v55 }
 0x3f6   : > { %3772 = vst.msk [vmem:[#allocation3 + $0xa8] sm:$0xff] %vm3764_vm9, %v3683_v44 }
 0x3f7   : > { %2912 = vrot.lane.b32.xlu2 %v4389_v42, %s10504_s25 }
 0x3f8   : > { %2914 = vrot.lane.b32.xlu0 %v8957_v57, %s10504_s25 }
 0x3f9   : > { %2720 = vrot.lane.b32.xlu1 %v2645_v61, %s10509_s0  ;;  %v2135_v62 = vpop.permute.xlu2 %2134 }
 0x3fa   : > { %2222 = vst.msk [vmem:[#allocation3 + $0xd8] sm:$0xff] %vm2212_vm15, %v2135_v62  ;;  %v3875_v63 = vpop.permute.xlu0 %3874  ;;  %v3035_v62 = vld [vmem:[#allocation2 + $0x75] sm:$0xff] }
 0x3fb   : > { %v3681_v1 = vpop.permute.xlu1 %3680 }
 0x3fc   : > { %3771 = vst.msk [vmem:[#allocation3 + $0x90] sm:$0xff] %vm3764_vm9, %v3681_v1 }
 0x3fd   : > { %3965 = vst.msk [vmem:[#allocation3 + $0x90] sm:$0xff] %vm3958_vm10, %v3875_v63 }
 0x3fe   : > { %4159 = vst.msk [vmem:[#allocation3 + $0x90] sm:$0xff] %vm4152_vm11, %v4069_v43 }
 0x3ff   : > { %3108 = vrot.lane.b32.xlu2 %v3033_v58, %s10499_s18 }
 0x400   : > { %3300 = vrot.lane.b32.xlu0 %v3226_v10, %s10510_s1  ;;  %v9025_v10 = vld [vmem:[#allocation2 + $0x72] sm:$0xff] }
 0x401   : > { %3106 = vrot.lane.b32.xlu1 %v3032_v39, %s10499_s18  ;;  %v2521_v59 = vpop.permute.xlu2 %2520 }
 0x402   : > { %v4071_v2 = vpop.permute.xlu0 %4070 }
 0x403   : > { %v3877_v5 = vpop.permute.xlu1 %3876 }
 0x404   : > { %3966 = vst.msk [vmem:[#allocation3 + $0xa8] sm:$0xff] %vm3958_vm10, %v3877_v5 }
 0x405   : > { %4160 = vst.msk [vmem:[#allocation3 + $0xa8] sm:$0xff] %vm4152_vm11, %v4071_v2  ;;  %v3422_v2 = vld [vmem:[#allocation2 + $0x6f] sm:$0xff] }
 0x406   : > { %4354 = vst.msk [vmem:[#allocation3 + $0xa8] sm:$0xff] %vm4346_vm12, %v4265_v23  ;;  %v3034_v23 = vld [vmem:[#allocation2 + $0x6d] sm:$0xff] }
 0x407   : > { %3494 = vrot.lane.b32.xlu2 %v3420_v40, %s10507_s24 }
 0x408   : > { %3496 = vrot.lane.b32.xlu0 %v3421_v6, %s10507_s24 }
 0x409   : > { %3302 = vrot.lane.b32.xlu1 %v3227_v9, %s10510_s1  ;;  %v2717_v7 = vpop.permute.xlu2 %2716 }
 0x40a   : > { %v4457_v11 = vpop.permute.xlu0 %4456 }
 0x40b   : > { %v4263_v8 = vpop.permute.xlu1 %4262 }
 0x40c   : > { %4353 = vst.msk [vmem:[#allocation3 + $0x90] sm:$0xff] %vm4346_vm12, %v4263_v8 }
 0x40d   : > { %4547 = vst.msk [vmem:[#allocation3 + $0x90] sm:$0xff] %vm10480_vm13, %v4457_v11  ;;  %v3617_v11 = vld [vmem:[#allocation2 + $0x78] sm:$0xff] }
 0x40f   : > { %3690 = vrot.lane.b32.xlu2 %v3615_v12, %s10497_s30 }
 0x410   : > { %3882 = vrot.lane.b32.xlu0 %v2257_v17, %s10508_s17 }
 0x411   : > { %3688 = vrot.lane.b32.xlu1 %v8938_v37, %s10497_s30  ;;  %v3103_v13 = vpop.permute.xlu2 %3102 }
 0x412   : > { %v2327_v14 = vpop.permute.xlu0 %2326 }
 0x413   : > { %v4459_v15 = vpop.permute.xlu1 %4458  ;;  %2415 = vst.msk [vmem:[#allocation3 + $0xc0] sm:$0xff] %vm2406_vm0, %v2327_v14 }
 0x414   : > { %4548 = vst.msk [vmem:[#allocation3 + $0xa8] sm:$0xff] %vm10480_vm13, %v4459_v15  ;;  %v4580_v20 = vld [vmem:[#allocation3 + $0x90] sm:$0xff] }
 0x415   : > { %2609 = vst.msk [vmem:[#allocation3 + $0xc0] sm:$0xff] %vm2600_vm2, %v2521_v59  ;;  %v3423_v59 = vld [vmem:[#allocation2 + $0x77] sm:$0xff] }
 0x417   : > { %4076 = vrot.lane.b32.xlu2 %v2451_v48, %s10500_s29  ;;  %v9038_v48 = vld [vmem:[#allocation2 + $0x74] sm:$0xff] }
 0x418   : > { %4078 = vrot.lane.b32.xlu0 %v4003_v16, %s10500_s29 }
 0x419   : > { %3884 = vrot.lane.b32.xlu1 %v3809_v52, %s10508_s17  ;;  %v3299_v18 = vpop.permute.xlu2 %3298 }
 0x41a   : > { %v2523_v19 = vpop.permute.xlu0 %2522 }
 0x41b   : > { %v2329_v53 = vpop.permute.xlu1 %2328  ;;  %v4737_v60 = vpop.f32.mrf.mxu0  ;;  %v4581_v50 = vld [vmem:[#allocation3 + $0xa8] sm:$0xff] }
 0x41c   : > { %2416 = vst.msk [vmem:[#allocation3 + $0xd8] sm:$0xff] %vm2406_vm0, %v2329_v53  ;;  %v4738_v21 = vadd.f32 %v8922_v28, %v4737_v60  ;;  %v4609_v4 = vpack.c.bf16 %v4581_v50, %v4580_v20 }
 0x41d   : > { %2610 = vst.msk [vmem:[#allocation3 + $0xd8] sm:$0xff] %vm2600_vm2, %v2523_v19  ;;  %v4005_v19 = vld [vmem:[#allocation2 + $0x7a] sm:$0xff] }
 0x41e   : > { %2804 = vst.msk [vmem:[#allocation3 + $0xd8] sm:$0xff] %vm2794_vm3, %v2717_v7  ;;  %v4814_v24 = vmax.f32 %v4738_v21, 0.0  ;;  %7038 = vmatmul.msk.bf16.gmra.mxu0 %vm4670_vm14, %v4609_v4  ;;  %v3811_v7 = vld [vmem:[#allocation2 + $0x79] sm:$0xff] }
 0x41f   : > { %4272 = vrot.lane.b32.xlu2 %v4197_v22, %s10501_s20 }
 0x420   : > { %4847 = vst.msk [vmem:[#allocation4 + $0x10] sm:$0xff] %vm4844_vm1, %v4814_v24  ;;  %4464 = vrot.lane.b32.xlu0 %v8957_v57, %s10505_s23  ;;  %v3228_v57 = vld [vmem:[#allocation2 + $0x6e] sm:$0xff] }
 0x421   : > { %4270 = vrot.lane.b32.xlu1 %v2645_v61, %s10501_s20  ;;  %v3685_v3 = vpop.permute.xlu2 %3684  ;;  %v3229_v61 = vld [vmem:[#allocation2 + $0x76] sm:$0xff] }
 0x422   : > { %v2909_v25 = vpop.permute.xlu0 %2908 }
 0x423   : > { %v2715_v26 = vpop.permute.xlu1 %2714  ;;  %v4739_v27 = vpop.f32.mrf.mxu0 }
 0x424   : > { %2803 = vst.msk [vmem:[#allocation3 + $0xc0] sm:$0xff] %vm2794_vm3, %v2715_v26  ;;  %v4740_v29 = vadd.f32 %v8922_v28, %v4739_v27 }
 0x425   : > { %2997 = vst.msk [vmem:[#allocation3 + $0xc0] sm:$0xff] %vm2988_vm4, %v2909_v25 }
 0x426   : > { %3191 = vst.msk [vmem:[#allocation3 + $0xc0] sm:$0xff] %vm3182_vm5, %v3103_v13  ;;  %v4815_v31 = vmax.f32 %v4740_v29, 0.0  ;;  %v9087_v29 = vld [vmem:[#allocation2 + $0x80] sm:$0xff] }
 0x427   : > { %v4878_v32 = vld [vmem:[#allocation4] ss:$3 sm:$0xff]  ;;  %v4900_v33 = vld [vmem:[#allocation4 + $0x1] ss:$3 sm:$0xff]  ;;  %2140 = vrot.lane.b32.xlu2 %v3615_v12, %s10506_s26  ;;  %v4922_v35 = vld [vmem:[#allocation4 + $0x2] ss:$3 sm:$0xff] }
 0x428   : > { %v4943_v34 = vmax.f32 %v4878_v32, %v4900_v33  ;;  %4848 = vst.msk [vmem:[#allocation4 + $0x18] sm:$0xff] %vm4844_vm1, %v4815_v31  ;;  %2142 = vrot.lane.b32.xlu0 %v9002_v30, %s10506_s26 }
 0x429   : > { %4466 = vrot.lane.b32.xlu1 %v4391_v0, %s10505_s23  ;;  %v3881_v42 = vpop.permute.xlu2 %3880 }
 0x42a   : > { %v4954_v49 = vmax.f32 %v4943_v34, %v4922_v35  ;;  %v3105_v44 = vpop.permute.xlu0 %3104 }
 0x42b   : > { %v2911_v45 = vpop.permute.xlu1 %2910 }
 0x42c   : > { %4967 = vst.msk [vmem:[#allocation2 + $0x6] sm:$0xff] %vm4844_vm1, %v4954_v49  ;;  %v9097_v49 = vld [vmem:[#allocation2 + $0x82] sm:$0xff] }
 0x42d   : > { %2998 = vst.msk [vmem:[#allocation3 + $0xd8] sm:$0xff] %vm2988_vm4, %v2911_v45 }
 0x42e   : > { %3192 = vst.msk [vmem:[#allocation3 + $0xd8] sm:$0xff] %vm3182_vm5, %v3105_v44  ;;  %v9100_v44 = vld [vmem:[#allocation2 + $0x81] sm:$0xff] }
 0x42f   : > { %3386 = vst.msk [vmem:[#allocation3 + $0xd8] sm:$0xff] %vm3376_vm7, %v3299_v18  ;;  %2336 = vrot.lane.b32.xlu2 %v9011_v51, %s10502_s21 }
 0x430   : > { %2528 = vrot.lane.b32.xlu0 %v4003_v16, %s10503_s16 }
 0x431   : > { %2334 = vrot.lane.b32.xlu1 %v3809_v52, %s10502_s21  ;;  %v4267_v54 = vpop.permute.xlu2 %4266 }
 0x432   : > { %v3491_v36 = vpop.permute.xlu0 %3490 }
 0x433   : > { %v3297_v37 = vpop.permute.xlu1 %3296  ;;  %v5205_v17 = vld [vmem:[#allocation2 + $0x4] sm:$0xff] }
 0x434   : > { %3385 = vst.msk [vmem:[#allocation3 + $0xc0] sm:$0xff] %vm3376_vm7, %v3297_v37  ;;  %v4978_v39 = vld [vmem:[#allocation2] sm:$0xff] }
 0x435   : > { %3579 = vst.msk [vmem:[#allocation3 + $0xc0] sm:$0xff] %vm3570_vm8, %v3491_v36  ;;  %v9031_v40 = vld [vmem:[#allocation2 + $0x1] sm:$0xff] }
 0x436   : > { %3773 = vst.msk [vmem:[#allocation3 + $0xc0] sm:$0xff] %vm3764_vm9, %v3685_v3  ;;  %v4199_v3 = vld [vmem:[#allocation2 + $0x7b] sm:$0xff]  ;;  %v9109_v36 = vld [vmem:[#allocation2 + $0x83] sm:$0xff] }
 0x437   : > { %2722 = vrot.lane.b32.xlu2 %v4197_v22, %s10509_s0  ;;  %5216 = vst.msk [vmem:[#allocation3 + $0x8] sm:$0xff] %vm4844_vm1, %v5205_v17  ;;  %v4393_v22 = vld [vmem:[#allocation2 + $0x7c] sm:$0xff] }
 0x438   : > { %2724 = vrot.lane.b32.xlu0 %v9022_v38, %s10509_s0  ;;  %4989 = vst.msk [vmem:[#allocation3] sm:$0xff] %vm4844_vm1, %v4978_v39 }
 0x439   : > { %2530 = vrot.lane.b32.xlu1 %v9025_v10, %s10503_s16  ;;  %v4463_v43 = vpop.permute.xlu2 %4462  ;;  %5987 = vst [vmem:[#allocation2] sm:$0x3] %v8942_v41 }
 0x43a   : > { %v3687_v46 = vpop.permute.xlu0 %3686 }
 0x43b   : > { %v3493_v47 = vpop.permute.xlu1 %3492 }
 0x43c   : > { %3580 = vst.msk [vmem:[#allocation3 + $0xd8] sm:$0xff] %vm3570_vm8, %v3493_v47  ;;  %v9124_v47 = vld [vmem:[#allocation2 + $0x84] sm:$0xff] }
 0x43d   : > { %3774 = vst.msk [vmem:[#allocation3 + $0xd8] sm:$0xff] %vm3764_vm9, %v3687_v46  ;;  %v3037_v46 = vld [vmem:[#allocation2 + $0x85] sm:$0xff] }
 0x43e   : > { %3968 = vst.msk [vmem:[#allocation3 + $0xd8] sm:$0xff] %vm3958_vm10, %v3881_v42 }
 0x43f   : > { %2918 = vrot.lane.b32.xlu2 %v9038_v48, %s10504_s25 }
 0x440   : > { %3110 = vrot.lane.b32.xlu0 %v3034_v23, %s10499_s18 }
 0x441   : > { %2916 = vrot.lane.b32.xlu1 %v4391_v0, %s10504_s25  ;;  %v2331_v55 = vpop.permute.xlu2 %2330 }
 0x442   : > { %v4073_v41 = vpop.permute.xlu0 %4072 }
 0x443   : > { %v3879_v56 = vpop.permute.xlu1 %3878 }
 0x444   : > { %3967 = vst.msk [vmem:[#allocation3 + $0xc0] sm:$0xff] %vm3958_vm10, %v3879_v56  ;;  %v3424_v56 = vld [vmem:[#allocation2 + $0x7f] sm:$0xff] }
 0x445   : > { %4161 = vst.msk [vmem:[#allocation3 + $0xc0] sm:$0xff] %vm4152_vm11, %v4073_v41  ;;  %v3231_v41 = vld [vmem:[#allocation2 + $0x86] sm:$0xff] }
 0x446   : > { %4355 = vst.msk [vmem:[#allocation3 + $0xc0] sm:$0xff] %vm4346_vm12, %v4267_v54 }
 0x447   : > { %3304 = vrot.lane.b32.xlu2 %v3228_v57, %s10510_s1  ;;  %v3230_v57 = vld [vmem:[#allocation2 + $0x7e] sm:$0xff] }
 0x448   : > { %3306 = vrot.lane.b32.xlu0 %v3229_v61, %s10510_s1 }
 0x449   : > { %3112 = vrot.lane.b32.xlu1 %v3035_v62, %s10499_s18  ;;  %v2527_v63 = vpop.permute.xlu2 %2526 }
 0x44a   : > { %v4269_v1 = vpop.permute.xlu0 %4268 }
 0x44b   : > { %v4075_v58 = vpop.permute.xlu1 %4074 }
 0x44c   : > { %4162 = vst.msk [vmem:[#allocation3 + $0xd8] sm:$0xff] %vm4152_vm11, %v4075_v58  ;;  %v3425_v58 = vld [vmem:[#allocation2 + $0x87] sm:$0xff] }
 0x44d   : > { %4356 = vst.msk [vmem:[#allocation3 + $0xd8] sm:$0xff] %vm4346_vm12, %v4269_v1  ;;  %v3619_v1 = vld [vmem:[#allocation2 + $0x88] sm:$0xff] }
 0x44e   : > { %4550 = vst.msk [vmem:[#allocation3 + $0xd8] sm:$0xff] %vm10480_vm13, %v4463_v43  ;;  %v3036_v43 = vld [vmem:[#allocation2 + $0x7d] sm:$0xff] }
 0x44f   : > { %3500 = vrot.lane.b32.xlu2 %v3423_v59, %s10507_s24 }
 0x450   : > { %3692 = vrot.lane.b32.xlu0 %v9002_v30, %s10497_s30 }
 0x451   : > { %3498 = vrot.lane.b32.xlu1 %v3422_v2, %s10507_s24  ;;  %v2913_v5 = vpop.permute.xlu2 %2912 }
 0x452   : > { %v2137_v6 = vpop.permute.xlu0 %2136 }
 0x453   : > { %v4461_v9 = vpop.permute.xlu1 %4460  ;;  %2223 = vst.msk [vmem:[#allocation3 + $0xf0] sm:$0xff] %vm2212_vm15, %v2137_v6 }
 0x454   : > { %4549 = vst.msk [vmem:[#allocation3 + $0xc0] sm:$0xff] %vm10480_vm13, %v4461_v9 }
 0x455   : > { %2417 = vst.msk [vmem:[#allocation3 + $0xf0] sm:$0xff] %vm2406_vm0, %v2331_v55  ;;  %v4583_v12 = vld [vmem:[#allocation3 + $0xd8] sm:$0xff] }
 0x457   : > { %3886 = vrot.lane.b32.xlu2 %v9011_v51, %s10508_s17 }
 0x458   : > { %3888 = vrot.lane.b32.xlu0 %v3811_v7, %s10508_s17 }
 0x459   : > { %3694 = vrot.lane.b32.xlu1 %v3617_v11, %s10497_s30  ;;  %v3109_v8 = vpop.permute.xlu2 %3108 }
 0x45a   : > { %v2333_v13 = vpop.permute.xlu0 %2332 }
 0x45b   : > { %v2139_v14 = vpop.permute.xlu1 %2138  ;;  %v4742_v15 = vpop.f32.mrf.mxu0  ;;  %v4582_v16 = vld [vmem:[#allocation3 + $0xc0] sm:$0xff] }
 0x45c   : > { %2224 = vst.msk [vmem:[#allocation3 + $0x108] sm:$0xff] %vm2212_vm15, %v2139_v14  ;;  %v4743_v52 = vadd.f32 %v8922_v28, %v4742_v15  ;;  %v4610_v18 = vpack.c.bf16 %v4583_v12, %v4582_v16 }
 0x45d   : > { %2418 = vst.msk [vmem:[#allocation3 + $0x108] sm:$0xff] %vm2406_vm0, %v2333_v13 }
 0x45e   : > { %2612 = vst.msk [vmem:[#allocation3 + $0x108] sm:$0xff] %vm2600_vm2, %v2527_v63  ;;  %v4816_v53 = vmax.f32 %v4743_v52, 0.0  ;;  %7039 = vmatmul.msk.bf16.gmra.mxu0 %vm4670_vm14, %v4610_v18 }
 0x45f   : > { %4082 = vrot.lane.b32.xlu2 %v4005_v19, %s10500_s29 }
 0x460   : > { %4849 = vst.msk [vmem:[#allocation4 + $0x20] sm:$0xff] %vm4844_vm1, %v4816_v53  ;;  %4274 = vrot.lane.b32.xlu0 %v9022_v38, %s10501_s20 }
 0x461   : > { %4080 = vrot.lane.b32.xlu1 %v9025_v10, %s10500_s29  ;;  %v3495_v60 = vpop.permute.xlu2 %3494 }
 0x462   : > { %v2719_v20 = vpop.permute.xlu0 %2718 }
 0x463   : > { %v2525_v50 = vpop.permute.xlu1 %2524  ;;  %v4744_v21 = vpop.f32.mrf.mxu0 }
 0x464   : > { %2611 = vst.msk [vmem:[#allocation3 + $0xf0] sm:$0xff] %vm2600_vm2, %v2525_v50  ;;  %v4745_v4 = vadd.f32 %v8922_v28, %v4744_v21 }
 0x465   : > { %2805 = vst.msk [vmem:[#allocation3 + $0xf0] sm:$0xff] %vm2794_vm3, %v2719_v20 }
 0x466   : > { %2999 = vst.msk [vmem:[#allocation3 + $0xf0] sm:$0xff] %vm2988_vm4, %v2913_v5  ;;  %v4817_v24 = vmax.f32 %v4745_v4, 0.0  ;;  %v4395_v4 = vld [vmem:[#allocation2 + $0x8c] sm:$0xff] }
 0x467   : > { %4468 = vrot.lane.b32.xlu2 %v9038_v48, %s10505_s23 }
 0x468   : > { %4850 = vst.msk [vmem:[#allocation4 + $0x28] sm:$0xff] %vm4844_vm1, %v4817_v24  ;;  %4470 = vrot.lane.b32.xlu0 %v4393_v22, %s10505_s23 }
 0x469   : > { %4276 = vrot.lane.b32.xlu1 %v4199_v3, %s10501_s20  ;;  %v3691_v25 = vpop.permute.xlu2 %3690 }
 0x46a   : > { %v2915_v26 = vpop.permute.xlu0 %2914 }
 0x46b   : > { %v2721_v27 = vpop.permute.xlu1 %2720 }
 0x46c   : > { %2806 = vst.msk [vmem:[#allocation3 + $0x108] sm:$0xff] %vm2794_vm3, %v2721_v27 }
 0x46d   : > { %3000 = vst.msk [vmem:[#allocation3 + $0x108] sm:$0xff] %vm2988_vm4, %v2915_v26  ;;  %v2069_v26 = vld [vmem:[#allocation2 + $0x90] sm:$0xff] }
 0x46e   : > { %3194 = vst.msk [vmem:[#allocation3 + $0x108] sm:$0xff] %vm3182_vm5, %v3109_v8 }
 0x46f   : > { %v4880_v30 = vld [vmem:[#allocation4 + $0x18] ss:$3 sm:$0xff]  ;;  %v4902_v31 = vld [vmem:[#allocation4 + $0x19] ss:$3 sm:$0xff]  ;;  %2146 = vrot.lane.b32.xlu2 %v9087_v29, %s10506_s26  ;;  %v4924_v32 = vld [vmem:[#allocation4 + $0x1a] ss:$3 sm:$0xff] }
 0x470   : > { %v4944_v0 = vmax.f32 %v4880_v30, %v4902_v31  ;;  %2338 = vrot.lane.b32.xlu0 %v3811_v7, %s10502_s21  ;;  %v3813_v7 = vld [vmem:[#allocation2 + $0x89] sm:$0xff]  ;;  %v9179_v31 = vld [vmem:[#allocation2 + $0x92] sm:$0xff] }
 0x471   : > { %2144 = vrot.lane.b32.xlu1 %v3617_v11, %s10506_s26  ;;  %v4077_v33 = vpop.permute.xlu2 %4076 }
 0x472   : > { %v4955_v34 = vmax.f32 %v4944_v0, %v4924_v32  ;;  %v3301_v35 = vpop.permute.xlu0 %3300 }
 0x473   : > { %v3107_v42 = vpop.permute.xlu1 %3106 }
 0x474   : > { %4968 = vst.msk [vmem:[#allocation2 + $0xe] sm:$0xff] %vm4844_vm1, %v4955_v34  ;;  %v9189_v34 = vld [vmem:[#allocation2 + $0x94] sm:$0xff] }
 0x475   : > { %3193 = vst.msk [vmem:[#allocation3 + $0xf0] sm:$0xff] %vm3182_vm5, %v3107_v42 }
 0x476   : > { %3387 = vst.msk [vmem:[#allocation3 + $0xf0] sm:$0xff] %vm3376_vm7, %v3301_v35  ;;  %v9192_v35 = vld [vmem:[#allocation2 + $0x93] sm:$0xff] }
 0x477   : > { %3581 = vst.msk [vmem:[#allocation3 + $0xf0] sm:$0xff] %vm3570_vm8, %v3495_v60  ;;  %2532 = vrot.lane.b32.xlu2 %v4005_v19, %s10503_s16  ;;  %v4201_v19 = vld [vmem:[#allocation2 + $0x8b] sm:$0xff] }
 0x478   : > { %2534 = vrot.lane.b32.xlu0 %v9097_v49, %s10503_s16  ;;  %v4007_v60 = vld [vmem:[#allocation2 + $0x8a] sm:$0xff] }
 0x479   : > { %2340 = vrot.lane.b32.xlu1 %v9100_v44, %s10502_s21  ;;  %v4273_v45 = vpop.permute.xlu2 %4272 }
 0x47a   : > { %v3497_v51 = vpop.permute.xlu0 %3496 }
 0x47b   : > { %v3303_v54 = vpop.permute.xlu1 %3302  ;;  %v5206_v37 = vld [vmem:[#allocation2 + $0xc] sm:$0xff] }
 0x47c   : > { %3388 = vst.msk [vmem:[#allocation3 + $0x108] sm:$0xff] %vm3376_vm7, %v3303_v54  ;;  %v5425_v17 = vld [vmem:[#allocation2 + $0x8] sm:$0xff] }
 0x47d   : > { %3582 = vst.msk [vmem:[#allocation3 + $0x108] sm:$0xff] %vm3570_vm8, %v3497_v51  ;;  %v3232_v51 = vld [vmem:[#allocation2 + $0x8e] sm:$0xff] }
 0x47e   : > { %3776 = vst.msk [vmem:[#allocation3 + $0x108] sm:$0xff] %vm3764_vm9, %v3691_v25  ;;  %v9171_v25 = vld [vmem:[#allocation2 + $0x91] sm:$0xff] }
 0x47f   : > { %2728 = vrot.lane.b32.xlu2 %v9109_v36, %s10509_s0  ;;  %5217 = vst.msk [vmem:[#allocation3 + $0x20] sm:$0xff] %vm4844_vm1, %v5206_v37  ;;  %v3038_v54 = vld [vmem:[#allocation2 + $0x8d] sm:$0xff] }
 0x480   : > { %2920 = vrot.lane.b32.xlu0 %v4393_v22, %s10504_s25  ;;  %5436 = vst.msk [vmem:[#allocation3 + $0x10] sm:$0xff] %vm4844_vm1, %v5425_v17 }
 0x481   : > { %2726 = vrot.lane.b32.xlu1 %v4199_v3, %s10509_s0  ;;  %v2141_v38 = vpop.permute.xlu2 %2140  ;;  %4990 = vst.msk [vmem:[#allocation3 + $0x18] sm:$0xff] %vm4844_vm1, %v5425_v17 }
 0x482   : > { %2225 = vst.msk [vmem:[#allocation3 + $0x120] sm:$0xff] %vm2212_vm15, %v2141_v38  ;;  %v3883_v39 = vpop.permute.xlu0 %3882  ;;  %v3426_v38 = vld [vmem:[#allocation2 + $0x8f] sm:$0xff] }
 0x483   : > { %v3689_v10 = vpop.permute.xlu1 %3688 }
 0x484   : > { %3775 = vst.msk [vmem:[#allocation3 + $0xf0] sm:$0xff] %vm3764_vm9, %v3689_v10  ;;  %v3233_v10 = vld [vmem:[#allocation2 + $0x96] sm:$0xff] }
 0x485   : > { %3969 = vst.msk [vmem:[#allocation3 + $0xf0] sm:$0xff] %vm3958_vm10, %v3883_v39  ;;  %v3427_v39 = vld [vmem:[#allocation2 + $0x97] sm:$0xff] }
 0x486   : > { %4163 = vst.msk [vmem:[#allocation3 + $0xf0] sm:$0xff] %vm4152_vm11, %v4077_v33 }
 0x487   : > { %3114 = vrot.lane.b32.xlu2 %v3036_v43, %s10499_s18 }
 0x488   : > { %3116 = vrot.lane.b32.xlu0 %v3037_v46, %s10499_s18 }
 0x489   : > { %2922 = vrot.lane.b32.xlu1 %v9124_v47, %s10504_s25  ;;  %v2337_v48 = vpop.permute.xlu2 %2336 }
 0x48a   : > { %v4079_v23 = vpop.permute.xlu0 %4078 }
 0x48b   : > { %v3885_v55 = vpop.permute.xlu1 %3884 }
 0x48c   : > { %3970 = vst.msk [vmem:[#allocation3 + $0x108] sm:$0xff] %vm3958_vm10, %v3885_v55  ;;  %v3621_v55 = vld [vmem:[#allocation2 + $0x98] sm:$0xff] }
 0x48d   : > { %4164 = vst.msk [vmem:[#allocation3 + $0x108] sm:$0xff] %vm4152_vm11, %v4079_v23 }
 0x48e   : > { %4358 = vst.msk [vmem:[#allocation3 + $0x108] sm:$0xff] %vm4346_vm12, %v4273_v45  ;;  %v3039_v45 = vld [vmem:[#allocation2 + $0x95] sm:$0xff] }
 0x48f   : > { %3310 = vrot.lane.b32.xlu2 %v3231_v41, %s10510_s1 }
 0x490   : > { %3502 = vrot.lane.b32.xlu0 %v3424_v56, %s10507_s24 }
 0x491   : > { %3308 = vrot.lane.b32.xlu1 %v3230_v57, %s10510_s1  ;;  %v2723_v61 = vpop.permute.xlu2 %2722 }
 0x492   : > { %v4465_v62 = vpop.permute.xlu0 %4464 }
 0x493   : > { %v4271_v63 = vpop.permute.xlu1 %4270 }
 0x494   : > { %4357 = vst.msk [vmem:[#allocation3 + $0xf0] sm:$0xff] %vm4346_vm12, %v4271_v63 }
 0x495   : > { %4551 = vst.msk [vmem:[#allocation3 + $0xf0] sm:$0xff] %vm10480_vm13, %v4465_v62 }
 0x497   : > { %3696 = vrot.lane.b32.xlu2 %v9087_v29, %s10497_s30 }
 0x498   : > { %3698 = vrot.lane.b32.xlu0 %v3619_v1, %s10497_s30 }
 0x499   : > { %3504 = vrot.lane.b32.xlu1 %v3425_v58, %s10507_s24  ;;  %v2919_v59 = vpop.permute.xlu2 %2918 }
 0x49a   : > { %v2143_v2 = vpop.permute.xlu0 %2142 }
 0x49b   : > { %v4467_v5 = vpop.permute.xlu1 %4466  ;;  %2226 = vst.msk [vmem:[#allocation3 + $0x138] sm:$0xff] %vm2212_vm15, %v2143_v2  ;;  %v4747_v6 = vpop.f32.mrf.mxu0  ;;  %v4009_v2 = vld [vmem:[#allocation2 + $0x9a] sm:$0xff] }
 0x49c   : > { %4552 = vst.msk [vmem:[#allocation3 + $0x108] sm:$0xff] %vm10480_vm13, %v4467_v5  ;;  %v4748_v9 = vadd.f32 %v8922_v28, %v4747_v6  ;;  %v4584_v15 = vld [vmem:[#allocation3 + $0xf0] sm:$0xff] }
 0x49d   : > { %2420 = vst.msk [vmem:[#allocation3 + $0x138] sm:$0xff] %vm2406_vm0, %v2337_v48  ;;  %v3815_v6 = vld [vmem:[#allocation2 + $0x99] sm:$0xff] }
 0x49e   : > { %v4818_v11 = vmax.f32 %v4748_v9, 0.0 }
 0x49f   : > { %3892 = vrot.lane.b32.xlu2 %v3813_v7, %s10508_s17 }
 0x4a0   : > { %4851 = vst.msk [vmem:[#allocation4 + $0x30] sm:$0xff] %vm4844_vm1, %v4818_v11  ;;  %4084 = vrot.lane.b32.xlu0 %v9097_v49, %s10500_s29 }
 0x4a1   : > { %3890 = vrot.lane.b32.xlu1 %v9100_v44, %s10508_s17  ;;  %v3305_v8 = vpop.permute.xlu2 %3304 }
 0x4a2   : > { %v2529_v12 = vpop.permute.xlu0 %2528 }
 0x4a3   : > { %v2335_v13 = vpop.permute.xlu1 %2334  ;;  %v4749_v14 = vpop.f32.mrf.mxu0  ;;  %v4585_v16 = vld [vmem:[#allocation3 + $0x108] sm:$0xff] }
 0x4a4   : > { %2419 = vst.msk [vmem:[#allocation3 + $0x120] sm:$0xff] %vm2406_vm0, %v2335_v13  ;;  %v4750_v52 = vadd.f32 %v8922_v28, %v4749_v14  ;;  %v4611_v18 = vpack.c.bf16 %v4585_v16, %v4584_v15  ;;  %v4203_v15 = vld [vmem:[#allocation2 + $0x9b] sm:$0xff] }
 0x4a5   : > { %2613 = vst.msk [vmem:[#allocation3 + $0x120] sm:$0xff] %vm2600_vm2, %v2529_v12 }
 0x4a6   : > { %2807 = vst.msk [vmem:[#allocation3 + $0x120] sm:$0xff] %vm2794_vm3, %v2723_v61  ;;  %v4819_v53 = vmax.f32 %v4750_v52, 0.0  ;;  %7040 = vmatmul.msk.bf16.gmra.mxu0 %vm4670_vm14, %v4611_v18 }
 0x4a7   : > { %4278 = vrot.lane.b32.xlu2 %v9109_v36, %s10501_s20 }
 0x4a8   : > { %4852 = vst.msk [vmem:[#allocation4 + $0x38] sm:$0xff] %vm4844_vm1, %v4819_v53  ;;  %4280 = vrot.lane.b32.xlu0 %v4201_v19, %s10501_s20 }
 0x4a9   : > { %4086 = vrot.lane.b32.xlu1 %v4007_v60, %s10500_s29  ;;  %v3501_v20 = vpop.permute.xlu2 %3500 }
 0x4aa   : > { %v2725_v50 = vpop.permute.xlu0 %2724 }
 0x4ab   : > { %v2531_v21 = vpop.permute.xlu1 %2530 }
 0x4ac   : > { %2614 = vst.msk [vmem:[#allocation3 + $0x138] sm:$0xff] %vm2600_vm2, %v2531_v21 }
 0x4ad   : > { %2808 = vst.msk [vmem:[#allocation3 + $0x138] sm:$0xff] %vm2794_vm3, %v2725_v50 }
 0x4ae   : > { %3002 = vst.msk [vmem:[#allocation3 + $0x138] sm:$0xff] %vm2988_vm4, %v2919_v59 }
 0x4af   : > { %4474 = vrot.lane.b32.xlu2 %v4395_v4, %s10505_s23 }
 0x4b0   : > { %2148 = vrot.lane.b32.xlu0 %v3619_v1, %s10506_s26 }
 0x4b1   : > { %4472 = vrot.lane.b32.xlu1 %v9124_v47, %s10505_s23  ;;  %v3887_v22 = vpop.permute.xlu2 %3886 }
 0x4b2   : > { %v3111_v24 = vpop.permute.xlu0 %3110 }
 0x4b3   : > { %v2917_v3 = vpop.permute.xlu1 %2916 }
 0x4b4   : > { %3001 = vst.msk [vmem:[#allocation3 + $0x120] sm:$0xff] %vm2988_vm4, %v2917_v3 }
 0x4b5   : > { %3195 = vst.msk [vmem:[#allocation3 + $0x120] sm:$0xff] %vm3182_vm5, %v3111_v24 }
 0x4b6   : > { %3389 = vst.msk [vmem:[#allocation3 + $0x120] sm:$0xff] %vm3376_vm7, %v3305_v8 }
 0x4b7   : > { %2342 = vrot.lane.b32.xlu2 %v3813_v7, %s10502_s21 }
 0x4b8   : > { %2344 = vrot.lane.b32.xlu0 %v9171_v25, %s10502_s21 }
 0x4b9   : > { %2150 = vrot.lane.b32.xlu1 %v2069_v26, %s10506_s26  ;;  %v4083_v27 = vpop.permute.xlu2 %4082 }
 0x4ba   : > { %v3307_v29 = vpop.permute.xlu0 %3306 }
 0x4bb   : > { %v3113_v30 = vpop.permute.xlu1 %3112 }
 0x4bc   : > { %3196 = vst.msk [vmem:[#allocation3 + $0x138] sm:$0xff] %vm3182_vm5, %v3113_v30 }
 0x4bd   : > { %3390 = vst.msk [vmem:[#allocation3 + $0x138] sm:$0xff] %vm3376_vm7, %v3307_v29 }
 0x4be   : > { %3584 = vst.msk [vmem:[#allocation3 + $0x138] sm:$0xff] %vm3570_vm8, %v3501_v20  ;;  %v4397_v20 = vld [vmem:[#allocation2 + $0x9c] sm:$0xff] }
 0x4bf   : > { %2538 = vrot.lane.b32.xlu2 %v9179_v31, %s10503_s16 }
 0x4c0   : > { %2730 = vrot.lane.b32.xlu0 %v4201_v19, %s10509_s0  ;;  %v9241_v19 = vld [vmem:[#allocation2 + $0xa0] sm:$0xff] }
 0x4c1   : > { %2536 = vrot.lane.b32.xlu1 %v4007_v60, %s10503_s16  ;;  %v4469_v0 = vpop.permute.xlu2 %4468 }
 0x4c2   : > { %v3693_v32 = vpop.permute.xlu0 %3692 }
 0x4c3   : > { %v3499_v33 = vpop.permute.xlu1 %3498 }
 0x4c4   : > { %3583 = vst.msk [vmem:[#allocation3 + $0x120] sm:$0xff] %vm3570_vm8, %v3499_v33 }
 0x4c5   : > { %3777 = vst.msk [vmem:[#allocation3 + $0x120] sm:$0xff] %vm3764_vm9, %v3693_v32  ;;  %v3040_v32 = vld [vmem:[#allocation2 + $0x9d] sm:$0xff] }
 0x4c6   : > { %3971 = vst.msk [vmem:[#allocation3 + $0x120] sm:$0xff] %vm3958_vm10, %v3887_v22  ;;  %v2265_v22 = vld [vmem:[#allocation2 + $0xa1] sm:$0xff] }
 0x4c7   : > { %2924 = vrot.lane.b32.xlu2 %v4395_v4, %s10504_s25 }
 0x4c8   : > { %2926 = vrot.lane.b32.xlu0 %v9189_v34, %s10504_s25 }
 0x4c9   : > { %2732 = vrot.lane.b32.xlu1 %v9192_v35, %s10509_s0  ;;  %v2147_v42 = vpop.permute.xlu2 %2146 }
 0x4ca   : > { %2228 = vst.msk [vmem:[#allocation3 + $0x168] sm:$0xff] %vm2212_vm15, %v2147_v42  ;;  %v3889_v49 = vpop.permute.xlu0 %3888  ;;  %v3234_v42 = vld [vmem:[#allocation2 + $0x9e] sm:$0xff] }
 0x4cb   : > { %v3695_v44 = vpop.permute.xlu1 %3694 }
 0x4cc   : > { %3778 = vst.msk [vmem:[#allocation3 + $0x138] sm:$0xff] %vm3764_vm9, %v3695_v44  ;;  %v3041_v44 = vld [vmem:[#allocation2 + $0xa5] sm:$0xff] }
 0x4cd   : > { %3972 = vst.msk [vmem:[#allocation3 + $0x138] sm:$0xff] %vm3958_vm10, %v3889_v49  ;;  %v3235_v49 = vld [vmem:[#allocation2 + $0xa6] sm:$0xff] }
 0x4ce   : > { %4166 = vst.msk [vmem:[#allocation3 + $0x138] sm:$0xff] %vm4152_vm11, %v4083_v27  ;;  %v9262_v27 = vld [vmem:[#allocation2 + $0xa2] sm:$0xff] }
 0x4cf   : > { %3120 = vrot.lane.b32.xlu2 %v3039_v45, %s10499_s18 }
 0x4d0   : > { %3312 = vrot.lane.b32.xlu0 %v3232_v51, %s10510_s1 }
 0x4d1   : > { %3118 = vrot.lane.b32.xlu1 %v3038_v54, %s10499_s18  ;;  %v2533_v36 = vpop.permute.xlu2 %2532 }
 0x4d2   : > { %v4275_v37 = vpop.permute.xlu0 %4274 }
 0x4d3   : > { %v4081_v17 = vpop.permute.xlu1 %4080 }
 0x4d4   : > { %4165 = vst.msk [vmem:[#allocation3 + $0x120] sm:$0xff] %vm4152_vm11, %v4081_v17 }
 0x4d5   : > { %4359 = vst.msk [vmem:[#allocation3 + $0x120] sm:$0xff] %vm4346_vm12, %v4275_v37  ;;  %v3428_v37 = vld [vmem:[#allocation2 + $0x9f] sm:$0xff] }
 0x4d6   : > { %4553 = vst.msk [vmem:[#allocation3 + $0x120] sm:$0xff] %vm10480_vm13, %v4469_v0  ;;  %v9270_v0 = vld [vmem:[#allocation2 + $0xa4] sm:$0xff] }
 0x4d7   : > { %3506 = vrot.lane.b32.xlu2 %v3426_v38, %s10507_s24 }
 0x4d8   : > { %3508 = vrot.lane.b32.xlu0 %v3427_v39, %s10507_s24 }
 0x4d9   : > { %3314 = vrot.lane.b32.xlu1 %v3233_v10, %s10510_s1  ;;  %v2729_v43 = vpop.permute.xlu2 %2728 }
 0x4da   : > { %v4471_v46 = vpop.permute.xlu0 %4470 }
 0x4db   : > { %v4277_v47 = vpop.permute.xlu1 %4276  ;;  %v4752_v48 = vpop.f32.mrf.mxu0 }
 0x4dc   : > { %4360 = vst.msk [vmem:[#allocation3 + $0x138] sm:$0xff] %vm4346_vm12, %v4277_v47  ;;  %v4753_v23 = vadd.f32 %v8922_v28, %v4752_v48  ;;  %v3817_v47 = vld [vmem:[#allocation2 + $0xa9] sm:$0xff] }
 0x4dd   : > { %4554 = vst.msk [vmem:[#allocation3 + $0x138] sm:$0xff] %vm10480_vm13, %v4471_v46  ;;  %v4586_v61 = vld [vmem:[#allocation3 + $0x120] sm:$0xff] }
 0x4de   : > { %v4820_v41 = vmax.f32 %v4753_v23, 0.0  ;;  %v3623_v23 = vld [vmem:[#allocation2 + $0xa8] sm:$0xff] }
 0x4df   : > { %3702 = vrot.lane.b32.xlu2 %v3621_v55, %s10497_s30 }
 0x4e0   : > { %4853 = vst.msk [vmem:[#allocation4 + $0x40] sm:$0xff] %vm4844_vm1, %v4820_v41  ;;  %3894 = vrot.lane.b32.xlu0 %v9171_v25, %s10508_s17 }
 0x4e1   : > { %3700 = vrot.lane.b32.xlu1 %v2069_v26, %s10497_s30  ;;  %v3115_v56 = vpop.permute.xlu2 %3114  ;;  %v9259_v26 = vld [vmem:[#allocation2 + $0xa3] sm:$0xff] }
 0x4e2   : > { %v2339_v57 = vpop.permute.xlu0 %2338 }
 0x4e3   : > { %v2145_v62 = vpop.permute.xlu1 %2144  ;;  %v4754_v63 = vpop.f32.mrf.mxu0 }
 0x4e4   : > { %2227 = vst.msk [vmem:[#allocation3 + $0x150] sm:$0xff] %vm2212_vm15, %v2145_v62  ;;  %v4755_v1 = vadd.f32 %v8922_v28, %v4754_v63  ;;  %v4587_v58 = vld [vmem:[#allocation3 + $0x138] sm:$0xff] }
 0x4e5   : > { %2421 = vst.msk [vmem:[#allocation3 + $0x150] sm:$0xff] %vm2406_vm0, %v2339_v57  ;;  %v4612_v59 = vpack.c.bf16 %v4587_v58, %v4586_v61  ;;  %v4011_v58 = vld [vmem:[#allocation2 + $0xaa] sm:$0xff] }
 0x4e6   : > { %2615 = vst.msk [vmem:[#allocation3 + $0x150] sm:$0xff] %vm2600_vm2, %v2533_v36  ;;  %v4821_v5 = vmax.f32 %v4755_v1, 0.0  ;;  %v3429_v36 = vld [vmem:[#allocation2 + $0xa7] sm:$0xff] }
 0x4e7   : > { %v4882_v9 = vld [vmem:[#allocation4 + $0x30] ss:$3 sm:$0xff]  ;;  %v4904_v7 = vld [vmem:[#allocation4 + $0x31] ss:$3 sm:$0xff]  ;;  %7041 = vmatmul.msk.bf16.gmra.mxu0 %vm4670_vm14, %v4612_v59  ;;  %4088 = vrot.lane.b32.xlu2 %v9179_v31, %s10500_s29  ;;  %v4926_v28 = vld [vmem:[#allocation4 + $0x32] ss:$3 sm:$0xff] }
 0x4e8   : > { %v4945_v11 = vmax.f32 %v4882_v9, %v4904_v7  ;;  %4854 = vst.msk [vmem:[#allocation4 + $0x48] sm:$0xff] %vm4844_vm1, %v4821_v5  ;;  %4090 = vrot.lane.b32.xlu0 %v4009_v2, %s10500_s29  ;;  %v4399_v9 = vld [vmem:[#allocation2 + $0xac] sm:$0xff] }
 0x4e9   : > { %3896 = vrot.lane.b32.xlu1 %v3815_v6, %s10508_s17  ;;  %v3311_v8 = vpop.permute.xlu2 %3310  ;;  %v4205_v7 = vld [vmem:[#allocation2 + $0xab] sm:$0xff] }
 0x4ea   : > { %v4956_v12 = vmax.f32 %v4945_v11, %v4926_v28  ;;  %v2535_v13 = vpop.permute.xlu0 %2534 }
 0x4eb   : > { %v2341_v14 = vpop.permute.xlu1 %2340 }
 0x4ec   : > { %4969 = vst.msk [vmem:[#allocation2 + $0x16] sm:$0xff] %vm4844_vm1, %v4956_v12 }
 0x4ed   : > { %2422 = vst.msk [vmem:[#allocation3 + $0x168] sm:$0xff] %vm2406_vm0, %v2341_v14 }
 0x4ee   : > { %2616 = vst.msk [vmem:[#allocation3 + $0x168] sm:$0xff] %vm2600_vm2, %v2535_v13 }
 0x4ef   : > { %2810 = vst.msk [vmem:[#allocation3 + $0x168] sm:$0xff] %vm2794_vm3, %v2729_v43  ;;  %4284 = vrot.lane.b32.xlu2 %v4203_v15, %s10501_s20  ;;  %v9296_v43 = vld [vmem:[%s10433_s2] ss:$0 sm:$0xff] }
 0x4f0   : > { %4476 = vrot.lane.b32.xlu0 %v9189_v34, %s10505_s23 }
 0x4f1   : > { %4282 = vrot.lane.b32.xlu1 %v9192_v35, %s10501_s20  ;;  %v3697_v16 = vpop.permute.xlu2 %3696 }
 0x4f2   : > { %v2921_v52 = vpop.permute.xlu0 %2920 }
 0x4f3   : > { %v2727_v18 = vpop.permute.xlu1 %2726  ;;  %v5426_v53 = vld [vmem:[#allocation2 + $0x10] sm:$0xff] }
 0x4f4   : > { %2809 = vst.msk [vmem:[#allocation3 + $0x150] sm:$0xff] %vm2794_vm3, %v2727_v18  ;;  %v5207_v60 = vld [vmem:[#allocation2 + $0x14] sm:$0xff] }
 0x4f5   : > { %3003 = vst.msk [vmem:[#allocation3 + $0x150] sm:$0xff] %vm2988_vm4, %v2921_v52  ;;  %v9323_v52 = vld [vmem:[#allocation2 + $0xb0] sm:$0xff] }
 0x4f6   : > { %3197 = vst.msk [vmem:[#allocation3 + $0x150] sm:$0xff] %vm3182_vm5, %v3115_v56 }
 0x4f7   : > { %2152 = vrot.lane.b32.xlu2 %v3621_v55, %s10506_s26  ;;  %5437 = vst.msk [vmem:[#allocation3 + $0x28] sm:$0xff] %vm4844_vm1, %v5426_v53 }
 0x4f8   : > { %2154 = vrot.lane.b32.xlu0 %v9241_v19, %s10506_s26  ;;  %5218 = vst.msk [vmem:[#allocation3 + $0x38] sm:$0xff] %vm4844_vm1, %v5207_v60  ;;  %v9334_v60 = vld [vmem:[#allocation2 + $0xb2] sm:$0xff] }
 0x4f9   : > { %4478 = vrot.lane.b32.xlu1 %v4397_v20, %s10505_s23  ;;  %v3893_v50 = vpop.permute.xlu2 %3892  ;;  %4991 = vst.msk [vmem:[#allocation3 + $0x30] sm:$0xff] %vm4844_vm1, %v5426_v53 }
 0x4fa   : > { %v3117_v21 = vpop.permute.xlu0 %3116 }
 0x4fb   : > { %v2923_v4 = vpop.permute.xlu1 %2922 }
 0x4fc   : > { %3004 = vst.msk [vmem:[#allocation3 + $0x168] sm:$0xff] %vm2988_vm4, %v2923_v4 }
 0x4fd   : > { %3198 = vst.msk [vmem:[#allocation3 + $0x168] sm:$0xff] %vm3182_vm5, %v3117_v21 }
 0x4fe   : > { %3392 = vst.msk [vmem:[#allocation3 + $0x168] sm:$0xff] %vm3376_vm7, %v3311_v8 }
 0x4ff   : > { %2348 = vrot.lane.b32.xlu2 %v2265_v22, %s10502_s21 }
 0x500   : > { %2540 = vrot.lane.b32.xlu0 %v4009_v2, %s10503_s16 }
 0x501   : > { %2346 = vrot.lane.b32.xlu1 %v3815_v6, %s10502_s21  ;;  %v4279_v24 = vpop.permute.xlu2 %4278 }
 0x502   : > { %v3503_v3 = vpop.permute.xlu0 %3502 }
 0x503   : > { %v3309_v25 = vpop.permute.xlu1 %3308 }
 0x504   : > { %3391 = vst.msk [vmem:[#allocation3 + $0x150] sm:$0xff] %vm3376_vm7, %v3309_v25 }
 0x505   : > { %3585 = vst.msk [vmem:[#allocation3 + $0x150] sm:$0xff] %vm3570_vm8, %v3503_v3  ;;  %v9348_v3 = vld [vmem:[#allocation2 + $0xb3] sm:$0xff] }
 0x506   : > { %3779 = vst.msk [vmem:[#allocation3 + $0x150] sm:$0xff] %vm3764_vm9, %v3697_v16 }
 0x507   : > { %2734 = vrot.lane.b32.xlu2 %v4203_v15, %s10509_s0 }
 0x508   : > { %2736 = vrot.lane.b32.xlu0 %v9259_v26, %s10509_s0 }
 0x509   : > { %2542 = vrot.lane.b32.xlu1 %v9262_v27, %s10503_s16  ;;  %v4475_v29 = vpop.permute.xlu2 %4474 }
 0x50a   : > { %v3699_v30 = vpop.permute.xlu0 %3698 }
 0x50b   : > { %v3505_v31 = vpop.permute.xlu1 %3504 }
 0x50c   : > { %3586 = vst.msk [vmem:[#allocation3 + $0x168] sm:$0xff] %vm3570_vm8, %v3505_v31  ;;  %v9360_v31 = vld [vmem:[#allocation2 + $0xb4] sm:$0xff] }
 0x50d   : > { %3780 = vst.msk [vmem:[#allocation3 + $0x168] sm:$0xff] %vm3764_vm9, %v3699_v30  ;;  %v3043_v30 = vld [vmem:[#allocation2 + $0xb5] sm:$0xff] }
 0x50e   : > { %3974 = vst.msk [vmem:[#allocation3 + $0x168] sm:$0xff] %vm3958_vm10, %v3893_v50  ;;  %v9337_v50 = vld [vmem:[#allocation2 + $0xb1] sm:$0xff] }
 0x50f   : > { %2930 = vrot.lane.b32.xlu2 %v9270_v0, %s10504_s25 }
 0x510   : > { %3122 = vrot.lane.b32.xlu0 %v3040_v32, %s10499_s18 }
 0x511   : > { %2928 = vrot.lane.b32.xlu1 %v4397_v20, %s10504_s25  ;;  %v2343_v33 = vpop.permute.xlu2 %2342 }
 0x512   : > { %v4085_v34 = vpop.permute.xlu0 %4084 }
 0x513   : > { %v3891_v35 = vpop.permute.xlu1 %3890 }
 0x514   : > { %3973 = vst.msk [vmem:[#allocation3 + $0x150] sm:$0xff] %vm3958_vm10, %v3891_v35  ;;  %v3430_v35 = vld [vmem:[#allocation2 + $0xaf] sm:$0xff] }
 0x515   : > { %4167 = vst.msk [vmem:[#allocation3 + $0x150] sm:$0xff] %vm4152_vm11, %v4085_v34  ;;  %v3237_v34 = vld [vmem:[#allocation2 + $0xb6] sm:$0xff] }
 0x516   : > { %4361 = vst.msk [vmem:[#allocation3 + $0x150] sm:$0xff] %vm4346_vm12, %v4279_v24 }
 0x517   : > { %3316 = vrot.lane.b32.xlu2 %v3234_v42, %s10510_s1  ;;  %v3236_v42 = vld [vmem:[#allocation2 + $0xae] sm:$0xff] }
 0x518   : > { %3318 = vrot.lane.b32.xlu0 %v3235_v49, %s10510_s1 }
 0x519   : > { %3124 = vrot.lane.b32.xlu1 %v3041_v44, %s10499_s18  ;;  %v2539_v45 = vpop.permute.xlu2 %2538 }
 0x51a   : > { %v4281_v51 = vpop.permute.xlu0 %4280 }
 0x51b   : > { %v4087_v54 = vpop.permute.xlu1 %4086 }
 0x51c   : > { %4168 = vst.msk [vmem:[#allocation3 + $0x168] sm:$0xff] %vm4152_vm11, %v4087_v54 }
 0x51d   : > { %4362 = vst.msk [vmem:[#allocation3 + $0x168] sm:$0xff] %vm4346_vm12, %v4281_v51 }
 0x51e   : > { %4556 = vst.msk [vmem:[#allocation3 + $0x168] sm:$0xff] %vm10480_vm13, %v4475_v29  ;;  %v3042_v29 = vld [vmem:[#allocation2 + $0xad] sm:$0xff] }
 0x51f   : > { %3512 = vrot.lane.b32.xlu2 %v3429_v36, %s10507_s24  ;;  %v3625_v36 = vld [vmem:[#allocation2 + $0xb8] sm:$0xff] }
 0x520   : > { %3704 = vrot.lane.b32.xlu0 %v9241_v19, %s10497_s30 }
 0x521   : > { %3510 = vrot.lane.b32.xlu1 %v3428_v37, %s10507_s24  ;;  %v2925_v17 = vpop.permute.xlu2 %2924  ;;  %v3431_v37 = vld [vmem:[#allocation2 + $0xb7] sm:$0xff] }
 0x522   : > { %v2149_v38 = vpop.permute.xlu0 %2148 }
 0x523   : > { %v4473_v39 = vpop.permute.xlu1 %4472  ;;  %2229 = vst.msk [vmem:[#allocation3 + $0x180] sm:$0xff] %vm2212_vm15, %v2149_v38  ;;  %v4757_v10 = vpop.f32.mrf.mxu0 }
 0x524   : > { %4555 = vst.msk [vmem:[#allocation3 + $0x150] sm:$0xff] %vm10480_vm13, %v4473_v39  ;;  %v4758_v46 = vadd.f32 %v9296_v43, %v4757_v10 }
 0x525   : > { %2423 = vst.msk [vmem:[#allocation3 + $0x180] sm:$0xff] %vm2406_vm0, %v2343_v33  ;;  %v4589_v41 = vld [vmem:[#allocation3 + $0x168] sm:$0xff] }
 0x526   : > { %v4822_v48 = vmax.f32 %v4758_v46, 0.0 }
 0x527   : > { %3898 = vrot.lane.b32.xlu2 %v2265_v22, %s10508_s17 }
 0x528   : > { %4855 = vst.msk [vmem:[#allocation4 + $0x50] sm:$0xff] %vm4844_vm1, %v4822_v48  ;;  %3900 = vrot.lane.b32.xlu0 %v3817_v47, %s10508_s17 }
 0x529   : > { %3706 = vrot.lane.b32.xlu1 %v3623_v23, %s10497_s30  ;;  %v3121_v55 = vpop.permute.xlu2 %3120 }
 0x52a   : > { %v2345_v56 = vpop.permute.xlu0 %2344 }
 0x52b   : > { %v2151_v57 = vpop.permute.xlu1 %2150  ;;  %v4759_v61 = vpop.f32.mrf.mxu0  ;;  %v4588_v62 = vld [vmem:[#allocation3 + $0x150] sm:$0xff] }
 0x52c   : > { %2230 = vst.msk [vmem:[#allocation3 + $0x198] sm:$0xff] %vm2212_vm15, %v2151_v57  ;;  %v4760_v63 = vadd.f32 %v9296_v43, %v4759_v61  ;;  %v4613_v1 = vpack.c.bf16 %v4589_v41, %v4588_v62 }
 0x52d   : > { %2424 = vst.msk [vmem:[#allocation3 + $0x198] sm:$0xff] %vm2406_vm0, %v2345_v56 }
 0x52e   : > { %2618 = vst.msk [vmem:[#allocation3 + $0x198] sm:$0xff] %vm2600_vm2, %v2539_v45  ;;  %v4823_v59 = vmax.f32 %v4760_v63, 0.0  ;;  %7042 = vmatmul.msk.bf16.gmra.mxu0 %vm4670_vm14, %v4613_v1  ;;  %v4207_v63 = vld [vmem:[#allocation2 + $0xbb] sm:$0xff] }
 0x52f   : > { %4094 = vrot.lane.b32.xlu2 %v4011_v58, %s10500_s29  ;;  %v4013_v1 = vld [vmem:[#allocation2 + $0xba] sm:$0xff] }
 0x530   : > { %4856 = vst.msk [vmem:[#allocation4 + $0x58] sm:$0xff] %vm4844_vm1, %v4823_v59  ;;  %4286 = vrot.lane.b32.xlu0 %v9259_v26, %s10501_s20 }
 0x531   : > { %4092 = vrot.lane.b32.xlu1 %v9262_v27, %s10500_s29  ;;  %v3507_v2 = vpop.permute.xlu2 %3506 }
 0x532   : > { %v2731_v5 = vpop.permute.xlu0 %2730 }
 0x533   : > { %v2537_v6 = vpop.permute.xlu1 %2536 }
 0x534   : > { %2617 = vst.msk [vmem:[#allocation3 + $0x180] sm:$0xff] %vm2600_vm2, %v2537_v6 }
 0x535   : > { %2811 = vst.msk [vmem:[#allocation3 + $0x180] sm:$0xff] %vm2794_vm3, %v2731_v5  ;;  %v4401_v5 = vld [vmem:[#allocation2 + $0xbc] sm:$0xff] }
 0x536   : > { %3005 = vst.msk [vmem:[#allocation3 + $0x180] sm:$0xff] %vm2988_vm4, %v2925_v17 }
 0x537   : > { %v4884_v11 = vld [vmem:[#allocation4 + $0x48] ss:$3 sm:$0xff]  ;;  %v4906_v28 = vld [vmem:[#allocation4 + $0x49] ss:$3 sm:$0xff]  ;;  %4480 = vrot.lane.b32.xlu2 %v9270_v0, %s10505_s23  ;;  %v4928_v12 = vld [vmem:[#allocation4 + $0x4a] ss:$3 sm:$0xff] }
 0x538   : > { %v4946_v8 = vmax.f32 %v4884_v11, %v4906_v28  ;;  %4482 = vrot.lane.b32.xlu0 %v4399_v9, %s10505_s23  ;;  %v9407_v11 = vld [vmem:[#allocation2 + $0xc1] sm:$0xff] }
 0x539   : > { %4288 = vrot.lane.b32.xlu1 %v4205_v7, %s10501_s20  ;;  %v3703_v13 = vpop.permute.xlu2 %3702  ;;  %v2075_v28 = vld [vmem:[#allocation2 + $0xc0] sm:$0xff] }
 0x53a   : > { %v4957_v14 = vmax.f32 %v4946_v8, %v4928_v12  ;;  %v2927_v15 = vpop.permute.xlu0 %2926 }
 0x53b   : > { %v2733_v16 = vpop.permute.xlu1 %2732 }
 0x53c   : > { %4970 = vst.msk [vmem:[#allocation2 + $0x1e] sm:$0xff] %vm4844_vm1, %v4957_v14  ;;  %v9415_v14 = vld [vmem:[#allocation2 + $0xc2] sm:$0xff] }
 0x53d   : > { %2812 = vst.msk [vmem:[#allocation3 + $0x198] sm:$0xff] %vm2794_vm3, %v2733_v16 }
 0x53e   : > { %3006 = vst.msk [vmem:[#allocation3 + $0x198] sm:$0xff] %vm2988_vm4, %v2927_v15 }
 0x53f   : > { %3200 = vst.msk [vmem:[#allocation3 + $0x198] sm:$0xff] %vm3182_vm5, %v3121_v55  ;;  %2158 = vrot.lane.b32.xlu2 %v9323_v52, %s10506_s26 }
 0x540   : > { %2350 = vrot.lane.b32.xlu0 %v3817_v47, %s10502_s21  ;;  %v3819_v47 = vld [vmem:[#allocation2 + $0xb9] sm:$0xff] }
 0x541   : > { %2156 = vrot.lane.b32.xlu1 %v3623_v23, %s10506_s26  ;;  %v4089_v18 = vpop.permute.xlu2 %4088 }
 0x542   : > { %v3313_v19 = vpop.permute.xlu0 %3312 }
 0x543   : > { %v3119_v53 = vpop.permute.xlu1 %3118  ;;  %v5427_v20 = vld [vmem:[#allocation2 + $0x18] sm:$0xff] }
 0x544   : > { %3199 = vst.msk [vmem:[#allocation3 + $0x180] sm:$0xff] %vm3182_vm5, %v3119_v53  ;;  %v5208_v21 = vld [vmem:[#allocation2 + $0x1c] sm:$0xff] }
 0x545   : > { %3393 = vst.msk [vmem:[#allocation3 + $0x180] sm:$0xff] %vm3376_vm7, %v3313_v19  ;;  %v9428_v19 = vld [vmem:[#allocation2 + $0xc3] sm:$0xff] }
 0x546   : > { %3587 = vst.msk [vmem:[#allocation3 + $0x180] sm:$0xff] %vm3570_vm8, %v3507_v2 }
 0x547   : > { %2544 = vrot.lane.b32.xlu2 %v4011_v58, %s10503_s16  ;;  %5438 = vst.msk [vmem:[#allocation3 + $0x40] sm:$0xff] %vm4844_vm1, %v5427_v20 }
 0x548   : > { %2546 = vrot.lane.b32.xlu0 %v9334_v60, %s10503_s16  ;;  %4992 = vst.msk [vmem:[#allocation3 + $0x48] sm:$0xff] %vm4844_vm1, %v5427_v20 }
 0x549   : > { %2352 = vrot.lane.b32.xlu1 %v9337_v50, %s10502_s21  ;;  %v4285_v4 = vpop.permute.xlu2 %4284  ;;  %5219 = vst.msk [vmem:[#allocation3 + $0x50] sm:$0xff] %vm4844_vm1, %v5208_v21  ;;  %v3238_v21 = vld [vmem:[#allocation2 + $0xbe] sm:$0xff] }
 0x54a   : > { %v3509_v22 = vpop.permute.xlu0 %3508 }
 0x54b   : > { %v3315_v24 = vpop.permute.xlu1 %3314 }
 0x54c   : > { %3394 = vst.msk [vmem:[#allocation3 + $0x198] sm:$0xff] %vm3376_vm7, %v3315_v24 }
 0x54d   : > { %3588 = vst.msk [vmem:[#allocation3 + $0x198] sm:$0xff] %vm3570_vm8, %v3509_v22 }
 0x54e   : > { %3782 = vst.msk [vmem:[#allocation3 + $0x198] sm:$0xff] %vm3764_vm9, %v3703_v13 }
 0x54f   : > { %2740 = vrot.lane.b32.xlu2 %v9348_v3, %s10509_s0 }
 0x550   : > { %2932 = vrot.lane.b32.xlu0 %v4399_v9, %s10504_s25 }
 0x551   : > { %2738 = vrot.lane.b32.xlu1 %v4205_v7, %s10509_s0  ;;  %v2153_v25 = vpop.permute.xlu2 %2152 }
 0x552   : > { %2231 = vst.msk [vmem:[#allocation3 + $0x1b0] sm:$0xff] %vm2212_vm15, %v2153_v25  ;;  %v3895_v26 = vpop.permute.xlu0 %3894  ;;  %v3432_v25 = vld [vmem:[#allocation2 + $0xbf] sm:$0xff] }
 0x553   : > { %v3701_v27 = vpop.permute.xlu1 %3700 }
 0x554   : > { %3781 = vst.msk [vmem:[#allocation3 + $0x180] sm:$0xff] %vm3764_vm9, %v3701_v27  ;;  %v3239_v27 = vld [vmem:[#allocation2 + $0xc6] sm:$0xff] }
 0x555   : > { %3975 = vst.msk [vmem:[#allocation3 + $0x180] sm:$0xff] %vm3958_vm10, %v3895_v26  ;;  %v3433_v26 = vld [vmem:[#allocation2 + $0xc7] sm:$0xff] }
 0x556   : > { %4169 = vst.msk [vmem:[#allocation3 + $0x180] sm:$0xff] %vm4152_vm11, %v4089_v18  ;;  %v9425_v18 = vld [vmem:[#allocation2 + $0xc4] sm:$0xff] }
 0x557   : > { %3126 = vrot.lane.b32.xlu2 %v3042_v29, %s10499_s18 }
 0x558   : > { %3128 = vrot.lane.b32.xlu0 %v3043_v30, %s10499_s18 }
 0x559   : > { %2934 = vrot.lane.b32.xlu1 %v9360_v31, %s10504_s25  ;;  %v2349_v0 = vpop.permute.xlu2 %2348 }
 0x55a   : > { %v4091_v32 = vpop.permute.xlu0 %4090 }
 0x55b   : > { %v3897_v33 = vpop.permute.xlu1 %3896 }
 0x55c   : > { %3976 = vst.msk [vmem:[#allocation3 + $0x198] sm:$0xff] %vm3958_vm10, %v3897_v33  ;;  %v9450_v33 = vld [vmem:[#allocation2 + $0xc8] sm:$0xff] }
 0x55d   : > { %4170 = vst.msk [vmem:[#allocation3 + $0x198] sm:$0xff] %vm4152_vm11, %v4091_v32 }
 0x55e   : > { %4364 = vst.msk [vmem:[#allocation3 + $0x198] sm:$0xff] %vm4346_vm12, %v4285_v4  ;;  %v3044_v4 = vld [vmem:[#allocation2 + $0xbd] sm:$0xff] }
 0x55f   : > { %3322 = vrot.lane.b32.xlu2 %v3237_v34, %s10510_s1 }
 0x560   : > { %3514 = vrot.lane.b32.xlu0 %v3430_v35, %s10507_s24 }
 0x561   : > { %3320 = vrot.lane.b32.xlu1 %v3236_v42, %s10510_s1  ;;  %v2735_v49 = vpop.permute.xlu2 %2734 }
 0x562   : > { %v4477_v44 = vpop.permute.xlu0 %4476 }
 0x563   : > { %v4283_v45 = vpop.permute.xlu1 %4282 }
 0x564   : > { %4363 = vst.msk [vmem:[#allocation3 + $0x180] sm:$0xff] %vm4346_vm12, %v4283_v45  ;;  %v4762_v51 = vpop.f32.mrf.mxu0 }
 0x565   : > { %4557 = vst.msk [vmem:[#allocation3 + $0x180] sm:$0xff] %vm10480_vm13, %v4477_v44  ;;  %v4763_v54 = vadd.f32 %v9296_v43, %v4762_v51 }
 0x567   : > { %v4824_v17 = vmax.f32 %v4763_v54, 0.0  ;;  %3708 = vrot.lane.b32.xlu2 %v9323_v52, %s10497_s30 }
 0x568   : > { %3710 = vrot.lane.b32.xlu0 %v3625_v36, %s10497_s30 }
 0x569   : > { %4857 = vst.msk [vmem:[#allocation4 + $0x60] sm:$0xff] %vm4844_vm1, %v4824_v17  ;;  %3516 = vrot.lane.b32.xlu1 %v3431_v37, %s10507_s24  ;;  %v2931_v38 = vpop.permute.xlu2 %2930  ;;  %v9462_v37 = vld [vmem:[#allocation2 + $0xca] sm:$0xff] }
 0x56a   : > { %v2155_v39 = vpop.permute.xlu0 %2154 }
 0x56b   : > { %v4479_v10 = vpop.permute.xlu1 %4478  ;;  %2232 = vst.msk [vmem:[#allocation3 + $0x1c8] sm:$0xff] %vm2212_vm15, %v2155_v39 }
 0x56c   : > { %4558 = vst.msk [vmem:[#allocation3 + $0x198] sm:$0xff] %vm10480_vm13, %v4479_v10  ;;  %v4764_v46 = vpop.f32.mrf.mxu0  ;;  %v4590_v57 = vld [vmem:[#allocation3 + $0x180] sm:$0xff] }
 0x56d   : > { %2426 = vst.msk [vmem:[#allocation3 + $0x1c8] sm:$0xff] %vm2406_vm0, %v2349_v0  ;;  %v4765_v48 = vadd.f32 %v9296_v43, %v4764_v46 }
 0x56f   : > { %v4825_v23 = vmax.f32 %v4765_v48, 0.0  ;;  %3904 = vrot.lane.b32.xlu2 %v3819_v47, %s10508_s17 }
 0x570   : > { %4096 = vrot.lane.b32.xlu0 %v9334_v60, %s10500_s29 }
 0x571   : > { %4858 = vst.msk [vmem:[#allocation4 + $0x68] sm:$0xff] %vm4844_vm1, %v4825_v23  ;;  %3902 = vrot.lane.b32.xlu1 %v9337_v50, %s10508_s17  ;;  %v3317_v55 = vpop.permute.xlu2 %3316  ;;  %v3045_v50 = vld [vmem:[#allocation2 + $0xc5] sm:$0xff] }
 0x572   : > { %v2541_v41 = vpop.permute.xlu0 %2540 }
 0x573   : > { %v2347_v56 = vpop.permute.xlu1 %2346  ;;  %v4591_v61 = vld [vmem:[#allocation3 + $0x198] sm:$0xff] }
 0x574   : > { %2425 = vst.msk [vmem:[#allocation3 + $0x1b0] sm:$0xff] %vm2406_vm0, %v2347_v56  ;;  %v4614_v62 = vpack.c.bf16 %v4591_v61, %v4590_v57  ;;  %v9476_v56 = vld [vmem:[#allocation2 + $0xcb] sm:$0xff] }
 0x575   : > { %2619 = vst.msk [vmem:[#allocation3 + $0x1b0] sm:$0xff] %vm2600_vm2, %v2541_v41 }
 0x576   : > { %2813 = vst.msk [vmem:[#allocation3 + $0x1b0] sm:$0xff] %vm2794_vm3, %v2735_v49  ;;  %7043 = vmatmul.msk.bf16.gmra.mxu0 %vm4670_vm14, %v4614_v62 }
 0x577   : > { %4290 = vrot.lane.b32.xlu2 %v9348_v3, %s10501_s20 }
 0x578   : > { %4292 = vrot.lane.b32.xlu0 %v4207_v63, %s10501_s20 }
 0x579   : > { %4098 = vrot.lane.b32.xlu1 %v4013_v1, %s10500_s29  ;;  %v3513_v58 = vpop.permute.xlu2 %3512 }
 0x57a   : > { %v2737_v59 = vpop.permute.xlu0 %2736 }
 0x57b   : > { %v2543_v2 = vpop.permute.xlu1 %2542 }
 0x57c   : > { %2620 = vst.msk [vmem:[#allocation3 + $0x1c8] sm:$0xff] %vm2600_vm2, %v2543_v2  ;;  %v9496_v2 = vld [vmem:[#allocation2 + $0x19] sm:$0xff] }
 0x57d   : > { %2814 = vst.msk [vmem:[#allocation3 + $0x1c8] sm:$0xff] %vm2794_vm3, %v2737_v59  ;;  %v9494_v59 = vld [vmem:[#allocation2 + $0x17] sm:$0xff] }
 0x57e   : > { %3008 = vst.msk [vmem:[#allocation3 + $0x1c8] sm:$0xff] %vm2988_vm4, %v2931_v38  ;;  %v9465_v38 = vld [vmem:[#allocation2 + $0xc9] sm:$0xff] }
 0x57f   : > { %4486 = vrot.lane.b32.xlu2 %v4401_v5, %s10505_s23 }
 0x580   : > { %2160 = vrot.lane.b32.xlu0 %v3625_v36, %s10506_s26 }
 0x581   : > { %4484 = vrot.lane.b32.xlu1 %v9360_v31, %s10505_s23  ;;  %v3899_v6 = vpop.permute.xlu2 %3898 }
 0x582   : > { %v3123_v9 = vpop.permute.xlu0 %3122 }
 0x583   : > { %v2929_v7 = vpop.permute.xlu1 %2928 }
 0x584   : > { %3007 = vst.msk [vmem:[#allocation3 + $0x1b0] sm:$0xff] %vm2988_vm4, %v2929_v7  ;;  %v9504_v7 = vld [vmem:[#allocation2 + $0xcc] sm:$0xff] }
 0x585   : > { %3201 = vst.msk [vmem:[#allocation3 + $0x1b0] sm:$0xff] %vm3182_vm5, %v3123_v9 }
 0x586   : > { %3395 = vst.msk [vmem:[#allocation3 + $0x1b0] sm:$0xff] %vm3376_vm7, %v3317_v55 }
 0x587   : > { %2354 = vrot.lane.b32.xlu2 %v3819_v47, %s10502_s21 }
 0x588   : > { %2356 = vrot.lane.b32.xlu0 %v9407_v11, %s10502_s21 }
 0x589   : > { %2162 = vrot.lane.b32.xlu1 %v2075_v28, %s10506_s26  ;;  %v4095_v8 = vpop.permute.xlu2 %4094 }
 0x58a   : > { %v3319_v12 = vpop.permute.xlu0 %3318 }
 0x58b   : > { %v3125_v13 = vpop.permute.xlu1 %3124 }
 0x58c   : > { %3202 = vst.msk [vmem:[#allocation3 + $0x1c8] sm:$0xff] %vm3182_vm5, %v3125_v13 }
 0x58d   : > { %3396 = vst.msk [vmem:[#allocation3 + $0x1c8] sm:$0xff] %vm3376_vm7, %v3319_v12 }
 0x58e   : > { %3590 = vst.msk [vmem:[#allocation3 + $0x1c8] sm:$0xff] %vm3570_vm8, %v3513_v58  ;;  %v9492_v58 = vld [vmem:[#allocation2 + $0x1e] sm:$0xff] }
 0x58f   : > { %2550 = vrot.lane.b32.xlu2 %v9415_v14, %s10503_s16 }
 0x590   : > { %2742 = vrot.lane.b32.xlu0 %v4207_v63, %s10509_s0  ;;  %v9488_v63 = vld [vmem:[#allocation2 + $0xd8] sm:$0xff] }
 0x591   : > { %2548 = vrot.lane.b32.xlu1 %v4013_v1, %s10503_s16  ;;  %v4481_v15 = vpop.permute.xlu2 %4480  ;;  %v9490_v1 = vld [vmem:[#allocation2 + $0x1d] sm:$0xff] }
 0x592   : > { %v3705_v16 = vpop.permute.xlu0 %3704 }
 0x593   : > { %v3511_v52 = vpop.permute.xlu1 %3510 }
 0x594   : > { %3589 = vst.msk [vmem:[#allocation3 + $0x1b0] sm:$0xff] %vm3570_vm8, %v3511_v52  ;;  %v9524_v52 = vld [vmem:[#allocation2 + $0xd9] sm:$0xff] }
 0x595   : > { %3783 = vst.msk [vmem:[#allocation3 + $0x1b0] sm:$0xff] %vm3764_vm9, %v3705_v16  ;;  %v9520_v16 = vld [vmem:[#allocation2 + $0xe1] sm:$0xff] }
 0x596   : > { %3977 = vst.msk [vmem:[#allocation3 + $0x1b0] sm:$0xff] %vm3958_vm10, %v3899_v6  ;;  %v9501_v6 = vld [vmem:[#allocation2 + $0x1a] sm:$0xff] }
 0x597   : > { %2936 = vrot.lane.b32.xlu2 %v4401_v5, %s10504_s25  ;;  %v9499_v5 = vld [vmem:[#allocation2 + $0xe0] sm:$0xff] }
 0x598   : > { %2938 = vrot.lane.b32.xlu0 %v9425_v18, %s10504_s25 }
 0x599   : > { %2744 = vrot.lane.b32.xlu1 %v9428_v19, %s10509_s0  ;;  %v2159_v53 = vpop.permute.xlu2 %2158 }
 0x59a   : > { %2234 = vst.msk [vmem:[#allocation3 + $0x1f8] sm:$0xff] %vm2212_vm15, %v2159_v53  ;;  %v3901_v60 = vpop.permute.xlu0 %3900 }
 0x59b   : > { %v3707_v20 = vpop.permute.xlu1 %3706 }
 0x59c   : > { %3784 = vst.msk [vmem:[#allocation3 + $0x1c8] sm:$0xff] %vm3764_vm9, %v3707_v20  ;;  %v9536_v20 = vld [vmem:[#allocation2 + $0xe2] sm:$0xff] }
 0x59d   : > { %3978 = vst.msk [vmem:[#allocation3 + $0x1c8] sm:$0xff] %vm3958_vm10, %v3901_v60  ;;  %v9533_v60 = vld [vmem:[#allocation2 + $0xda] sm:$0xff] }
 0x59e   : > { %4172 = vst.msk [vmem:[#allocation3 + $0x1c8] sm:$0xff] %vm4152_vm11, %v4095_v8  ;;  %v7737_v8 = vld [vmem:[#allocation2 + $0x105] sm:$0xff] }
 0x59f   : > { %3132 = vrot.lane.b32.xlu2 %v3045_v50, %s10499_s18  ;;  %v9539_v50 = vld [vmem:[#allocation2 + $0xd0] sm:$0xff] }
 0x5a0   : > { %3324 = vrot.lane.b32.xlu0 %v3238_v21, %s10510_s1 }
 0x5a1   : > { %3130 = vrot.lane.b32.xlu1 %v3044_v4, %s10499_s18  ;;  %v2545_v22 = vpop.permute.xlu2 %2544 }
 0x5a2   : > { %v4287_v24 = vpop.permute.xlu0 %4286 }
 0x5a3   : > { %v4093_v3 = vpop.permute.xlu1 %4092 }
 0x5a4   : > { %4171 = vst.msk [vmem:[#allocation3 + $0x1b0] sm:$0xff] %vm4152_vm11, %v4093_v3  ;;  %v9551_v3 = vld [vmem:[#allocation2 + $0xdb] sm:$0xff] }
 0x5a5   : > { %4365 = vst.msk [vmem:[#allocation3 + $0x1b0] sm:$0xff] %vm4346_vm12, %v4287_v24  ;;  %v9548_v24 = vld [vmem:[#allocation2 + $0xd1] sm:$0xff] }
 0x5a6   : > { %4559 = vst.msk [vmem:[#allocation3 + $0x1b0] sm:$0xff] %vm10480_vm13, %v4481_v15 }
 0x5a7   : > { %3518 = vrot.lane.b32.xlu2 %v3432_v25, %s10507_s24 }
 0x5a8   : > { %3520 = vrot.lane.b32.xlu0 %v3433_v26, %s10507_s24 }
 0x5a9   : > { %3326 = vrot.lane.b32.xlu1 %v3239_v27, %s10510_s1  ;;  %v2741_v29 = vpop.permute.xlu2 %2740 }
 0x5aa   : > { %v4483_v30 = vpop.permute.xlu0 %4482 }
 0x5ab   : > { %v4289_v31 = vpop.permute.xlu1 %4288  ;;  %v4767_v0 = vpop.f32.mrf.mxu0 }
 0x5ac   : > { %4366 = vst.msk [vmem:[#allocation3 + $0x1c8] sm:$0xff] %vm4346_vm12, %v4289_v31  ;;  %v4768_v32 = vadd.f32 %v9296_v43, %v4767_v0 }
 0x5ad   : > { %4560 = vst.msk [vmem:[#allocation3 + $0x1c8] sm:$0xff] %vm10480_vm13, %v4483_v30  ;;  %v4592_v49 = vld [vmem:[#allocation3 + $0x1b0] sm:$0xff] }
 0x5ae   : > { %v4826_v34 = vmax.f32 %v4768_v32, 0.0  ;;  %v9565_v30 = vld [vmem:[#allocation2 + $0xe3] sm:$0xff] }
 0x5af   : > { %3714 = vrot.lane.b32.xlu2 %v9450_v33, %s10497_s30 }
 0x5b0   : > { %4859 = vst.msk [vmem:[#allocation4 + $0x70] sm:$0xff] %vm4844_vm1, %v4826_v34  ;;  %3906 = vrot.lane.b32.xlu0 %v9407_v11, %s10508_s17  ;;  %v9578_v34 = vld [vmem:[#allocation2 + $0xdc] sm:$0xff] }
 0x5b1   : > { %3712 = vrot.lane.b32.xlu1 %v2075_v28, %s10497_s30  ;;  %v3127_v35 = vpop.permute.xlu2 %3126  ;;  %v9508_v28 = vld [vmem:[#allocation2 + $0x1b] sm:$0xff] }
 0x5b2   : > { %v2351_v42 = vpop.permute.xlu0 %2350 }
 0x5b3   : > { %v2157_v44 = vpop.permute.xlu1 %2156  ;;  %v4769_v45 = vpop.f32.mrf.mxu0 }
 0x5b4   : > { %2233 = vst.msk [vmem:[#allocation3 + $0x1e0] sm:$0xff] %vm2212_vm15, %v2157_v44  ;;  %v4770_v51 = vadd.f32 %v9296_v43, %v4769_v45  ;;  %v4593_v54 = vld [vmem:[#allocation3 + $0x1c8] sm:$0xff] }
 0x5b5   : > { %2427 = vst.msk [vmem:[#allocation3 + $0x1e0] sm:$0xff] %vm2406_vm0, %v2351_v42  ;;  %v4615_v36 = vpack.c.bf16 %v4593_v54, %v4592_v49  ;;  %v3049_v54 = vld [vmem:[#allocation2 + $0xe5] sm:$0xff] }
 0x5b6   : > { %2621 = vst.msk [vmem:[#allocation3 + $0x1e0] sm:$0xff] %vm2600_vm2, %v2545_v22  ;;  %v4827_v17 = vmax.f32 %v4770_v51, 0.0  ;;  %v3048_v51 = vld [vmem:[#allocation2 + $0xdd] sm:$0xff] }
 0x5b7   : > { %v4886_v39 = vld [vmem:[#allocation4 + $0x60] ss:$3 sm:$0xff]  ;;  %v4908_v10 = vld [vmem:[#allocation4 + $0x61] ss:$3 sm:$0xff]  ;;  %7044 = vmatmul.msk.bf16.gmra.mxu0 %vm4670_vm14, %v4615_v36  ;;  %4100 = vrot.lane.b32.xlu2 %v9415_v14, %s10500_s29  ;;  %v4930_v47 = vld [vmem:[#allocation4 + $0x62] ss:$3 sm:$0xff] }
 0x5b8   : > { %v4947_v46 = vmax.f32 %v4886_v39, %v4908_v10  ;;  %4860 = vst.msk [vmem:[#allocation4 + $0x78] sm:$0xff] %vm4844_vm1, %v4827_v17  ;;  %4102 = vrot.lane.b32.xlu0 %v9462_v37, %s10500_s29 }
 0x5b9   : > { %3908 = vrot.lane.b32.xlu1 %v9465_v38, %s10508_s17  ;;  %v3323_v48 = vpop.permute.xlu2 %3322 }
 0x5ba   : > { %v4958_v23 = vmax.f32 %v4947_v46, %v4930_v47  ;;  %v2547_v55 = vpop.permute.xlu0 %2546 }
 0x5bb   : > { %v2353_v41 = vpop.permute.xlu1 %2352 }
 0x5bc   : > { %4971 = vst.msk [vmem:[#allocation2 + $0x26] sm:$0xff] %vm4844_vm1, %v4958_v23 }
 0x5bd   : > { %2428 = vst.msk [vmem:[#allocation3 + $0x1f8] sm:$0xff] %vm2406_vm0, %v2353_v41  ;;  %v3242_v41 = vld [vmem:[#allocation2 + $0xde] sm:$0xff] }
 0x5be   : > { %2622 = vst.msk [vmem:[#allocation3 + $0x1f8] sm:$0xff] %vm2600_vm2, %v2547_v55  ;;  %v9599_v55 = vld [vmem:[#allocation2 + $0xd4] sm:$0xff] }
 0x5bf   : > { %2816 = vst.msk [vmem:[#allocation3 + $0x1f8] sm:$0xff] %vm2794_vm3, %v2741_v29  ;;  %4296 = vrot.lane.b32.xlu2 %v9476_v56, %s10501_s20  ;;  %v9562_v29 = vld [vmem:[#allocation2 + $0xd2] sm:$0xff] }
 0x5c0   : > { %4488 = vrot.lane.b32.xlu0 %v9425_v18, %s10505_s23 }
 0x5c1   : > { %4294 = vrot.lane.b32.xlu1 %v9428_v19, %s10501_s20  ;;  %v3709_v57 = vpop.permute.xlu2 %3708 }
 0x5c2   : > { %v2933_v61 = vpop.permute.xlu0 %2932 }
 0x5c3   : > { %v2739_v62 = vpop.permute.xlu1 %2738  ;;  %v5428_v9 = vld [vmem:[#allocation2 + $0x20] sm:$0xff] }
 0x5c4   : > { %2815 = vst.msk [vmem:[#allocation3 + $0x1e0] sm:$0xff] %vm2794_vm3, %v2739_v62  ;;  %v9506_v11 = vld [vmem:[#allocation2 + $0x1f] sm:$0xff] }
 0x5c5   : > { %3009 = vst.msk [vmem:[#allocation3 + $0x1e0] sm:$0xff] %vm2988_vm4, %v2933_v61  ;;  %v5209_v12 = vld [vmem:[#allocation2 + $0x24] sm:$0xff] }
 0x5c6   : > { %3203 = vst.msk [vmem:[#allocation3 + $0x1e0] sm:$0xff] %vm3182_vm5, %v3127_v35 }
 0x5c7   : > { %2168 = vrot.lane.b32.xlu2 %v9488_v63, %s10506_s26  ;;  %5988 = vst [vmem:[#allocation2 + $0x1e] sm:$0x3] %v7737_v8  ;;  %v3047_v8 = vld [vmem:[#allocation2 + $0xd5] sm:$0xff] }
 0x5c8   : > { %2170 = vrot.lane.b32.xlu0 %v9499_v5, %s10506_s26  ;;  %5439 = vst.msk [vmem:[#allocation3 + $0x58] sm:$0xff] %vm4844_vm1, %v5428_v9 }
 0x5c9   : > { %4490 = vrot.lane.b32.xlu1 %v9504_v7, %s10505_s23  ;;  %v3905_v13 = vpop.permute.xlu2 %3904  ;;  %4993 = vst.msk [vmem:[#allocation3 + $0x60] sm:$0xff] %vm4844_vm1, %v5428_v9  ;;  %v3046_v9 = vld [vmem:[#allocation2 + $0xcd] sm:$0xff] }
 0x5ca   : > { %v3129_v14 = vpop.permute.xlu0 %3128  ;;  %5220 = vst.msk [vmem:[#allocation3 + $0x68] sm:$0xff] %vm4844_vm1, %v5209_v12  ;;  %v3243_v12 = vld [vmem:[#allocation2 + $0xe6] sm:$0xff] }
 0x5cb   : > { %v2935_v15 = vpop.permute.xlu1 %2934 }
 0x5cc   : > { %3010 = vst.msk [vmem:[#allocation3 + $0x1f8] sm:$0xff] %vm2988_vm4, %v2935_v15 }
 0x5cd   : > { %3204 = vst.msk [vmem:[#allocation3 + $0x1f8] sm:$0xff] %vm3182_vm5, %v3129_v14 }
 0x5ce   : > { %3398 = vst.msk [vmem:[#allocation3 + $0x1f8] sm:$0xff] %vm3376_vm7, %v3323_v48 }
 0x5cf   : > { %2364 = vrot.lane.b32.xlu2 %v9520_v16, %s10502_s21 }
 0x5d0   : > { %2164 = vrot.lane.b32.xlu0 %v9450_v33, %s10506_s26  ;;  %v9574_v33 = vld [vmem:[#allocation2 + $0xe4] sm:$0xff] }
 0x5d1   : > { %2362 = vrot.lane.b32.xlu1 %v9524_v52, %s10502_s21  ;;  %v4291_v18 = vpop.permute.xlu2 %4290 }
 0x5d2   : > { %v3515_v19 = vpop.permute.xlu0 %3514 }
 0x5d3   : > { %v3321_v53 = vpop.permute.xlu1 %3320 }
 0x5d4   : > { %3397 = vst.msk [vmem:[#allocation3 + $0x1e0] sm:$0xff] %vm3376_vm7, %v3321_v53 }
 0x5d5   : > { %3591 = vst.msk [vmem:[#allocation3 + $0x1e0] sm:$0xff] %vm3570_vm8, %v3515_v19 }
 0x5d6   : > { %3785 = vst.msk [vmem:[#allocation3 + $0x1e0] sm:$0xff] %vm3764_vm9, %v3709_v57 }
 0x5d7   : > { %2556 = vrot.lane.b32.xlu2 %v9533_v60, %s10503_s16 }
 0x5d8   : > { %2558 = vrot.lane.b32.xlu0 %v9536_v20, %s10503_s16 }
 0x5d9   : > { %2166 = vrot.lane.b32.xlu1 %v9539_v50, %s10506_s26  ;;  %v4487_v21 = vpop.permute.xlu2 %4486 }
 0x5da   : > { %v3711_v4 = vpop.permute.xlu0 %3710 }
 0x5db   : > { %v3517_v22 = vpop.permute.xlu1 %3516 }
 0x5dc   : > { %3592 = vst.msk [vmem:[#allocation3 + $0x1f8] sm:$0xff] %vm3570_vm8, %v3517_v22  ;;  %v3240_v22 = vld [vmem:[#allocation2 + $0xce] sm:$0xff] }
 0x5dd   : > { %3786 = vst.msk [vmem:[#allocation3 + $0x1f8] sm:$0xff] %vm3764_vm9, %v3711_v4  ;;  %v3437_v4 = vld [vmem:[#allocation2 + $0xe7] sm:$0xff] }
 0x5de   : > { %3980 = vst.msk [vmem:[#allocation3 + $0x1f8] sm:$0xff] %vm3958_vm10, %v3905_v13 }
 0x5df   : > { %2360 = vrot.lane.b32.xlu2 %v9548_v24, %s10502_s21 }
 0x5e0   : > { %2750 = vrot.lane.b32.xlu0 %v9551_v3, %s10509_s0 }
 0x5e1   : > { %2358 = vrot.lane.b32.xlu1 %v9465_v38, %s10502_s21  ;;  %v2355_v25 = vpop.permute.xlu2 %2354 }
 0x5e2   : > { %v4097_v26 = vpop.permute.xlu0 %4096 }
 0x5e3   : > { %v3903_v27 = vpop.permute.xlu1 %3902 }
 0x5e4   : > { %3979 = vst.msk [vmem:[#allocation3 + $0x1e0] sm:$0xff] %vm3958_vm10, %v3903_v27 }
 0x5e5   : > { %4173 = vst.msk [vmem:[#allocation3 + $0x1e0] sm:$0xff] %vm4152_vm11, %v4097_v26 }
 0x5e6   : > { %4367 = vst.msk [vmem:[#allocation3 + $0x1e0] sm:$0xff] %vm4346_vm12, %v4291_v18 }
 0x5e7   : > { %2552 = vrot.lane.b32.xlu2 %v9462_v37, %s10503_s16  ;;  %v9590_v37 = vld [vmem:[#allocation2 + $0xd3] sm:$0xff] }
 0x5e8   : > { %2554 = vrot.lane.b32.xlu0 %v9562_v29, %s10503_s16 }
 0x5e9   : > { %2752 = vrot.lane.b32.xlu1 %v9565_v30, %s10509_s0  ;;  %v2551_v31 = vpop.permute.xlu2 %2550 }
 0x5ea   : > { %v4293_v0 = vpop.permute.xlu0 %4292 }
 0x5eb   : > { %v4099_v32 = vpop.permute.xlu1 %4098 }
 0x5ec   : > { %4174 = vst.msk [vmem:[#allocation3 + $0x1f8] sm:$0xff] %vm4152_vm11, %v4099_v32 }
 0x5ed   : > { %4368 = vst.msk [vmem:[#allocation3 + $0x1f8] sm:$0xff] %vm4346_vm12, %v4293_v0  ;;  %v9625_v0 = vld [vmem:[#allocation2 + $0xe8] sm:$0xff] }
 0x5ee   : > { %4562 = vst.msk [vmem:[#allocation3 + $0x1f8] sm:$0xff] %vm10480_vm13, %v4487_v21 }
 0x5ef   : > { %2946 = vrot.lane.b32.xlu2 %v9574_v33, %s10504_s25 }
 0x5f0   : > { %2746 = vrot.lane.b32.xlu0 %v9476_v56, %s10509_s0 }
 0x5f1   : > { %2944 = vrot.lane.b32.xlu1 %v9578_v34, %s10504_s25  ;;  %v2937_v35 = vpop.permute.xlu2 %2936 }
 0x5f2   : > { %v2161_v42 = vpop.permute.xlu0 %2160 }
 0x5f3   : > { %v4485_v49 = vpop.permute.xlu1 %4484  ;;  %2235 = vst.msk [vmem:[#allocation3 + $0x210] sm:$0xff] %vm2212_vm15, %v2161_v42  ;;  %v4772_v44 = vpop.f32.mrf.mxu0  ;;  %v3241_v42 = vld [vmem:[#allocation2 + $0xd6] sm:$0xff] }
 0x5f4   : > { %4561 = vst.msk [vmem:[#allocation3 + $0x1e0] sm:$0xff] %vm10480_vm13, %v4485_v49  ;;  %v4773_v45 = vadd.f32 %v9296_v43, %v4772_v44  ;;  %v558_v49 = vld [vmem:[%s8062_s27 + $0x7c] sm:$0x1]  ;;  %s7898_s27 = smov 96  }
 0x5f5   : > { %2429 = vst.msk [vmem:[#allocation3 + $0x210] sm:$0xff] %vm2406_vm0, %v2355_v25  ;;  %v4595_v38 = vld [vmem:[#allocation3 + $0x1f8] sm:$0xff]  ;;  %v3436_v25 = vld [vmem:[#allocation2 + $0xdf] sm:$0xff]  ;;  %v590_v44 = vunpack.c.l.bf16 %v558_v49 }
 0x5f6   : > { %v4828_v36 = vmax.f32 %v4773_v45, 0.0 }
 0x5f7   : > { %3138 = vrot.lane.b32.xlu2 %v3048_v51, %s10499_s18  ;;  %628 = vst.msk [vmem:[#allocation2 + $0x103] sm:$0x3] %vm627_vm6, %v590_v44  ;;  %v9737_v44 = vld [vmem:[#allocation2 + $0xf0] sm:$0xff]  ;;  %vm2244_vm6 = vcmask 290048  }
 0x5f8   : > { %4861 = vst.msk [vmem:[#allocation4 + $0x80] sm:$0xff] %vm4844_vm1, %v4828_v36  ;;  %3140 = vrot.lane.b32.xlu0 %v3049_v54, %s10499_s18  ;;  %v3434_v36 = vld [vmem:[#allocation2 + $0xcf] sm:$0xff] }
 0x5f9   : > { %2748 = vrot.lane.b32.xlu1 %v9590_v37, %s10509_s0  ;;  %v3133_v17 = vpop.permute.xlu2 %3132 }
 0x5fa   : > { %v2357_v39 = vpop.permute.xlu0 %2356 }
 0x5fb   : > { %v2163_v10 = vpop.permute.xlu1 %2162  ;;  %v4774_v46 = vpop.f32.mrf.mxu0  ;;  %v4594_v47 = vld [vmem:[#allocation3 + $0x1e0] sm:$0xff] }
 0x5fc   : > { %2236 = vst.msk [vmem:[#allocation3 + $0x228] sm:$0xff] %vm2212_vm15, %v2163_v10  ;;  %v4775_v48 = vadd.f32 %v9296_v43, %v4774_v46  ;;  %v4616_v23 = vpack.c.bf16 %v4595_v38, %v4594_v47  ;;  %v9648_v10 = vld [vmem:[#allocation2 + $0xe9] sm:$0xff] }
 0x5fd   : > { %2430 = vst.msk [vmem:[#allocation3 + $0x228] sm:$0xff] %vm2406_vm0, %v2357_v39 }
 0x5fe   : > { %2624 = vst.msk [vmem:[#allocation3 + $0x228] sm:$0xff] %vm2600_vm2, %v2551_v31  ;;  %v4829_v56 = vmax.f32 %v4775_v48, 0.0  ;;  %7045 = vmatmul.msk.bf16.gmra.mxu0 %vm4670_vm14, %v4616_v23  ;;  %v9657_v48 = vld [vmem:[#allocation2 + $0xea] sm:$0xff] }
 0x5ff   : > { %2942 = vrot.lane.b32.xlu2 %v9599_v55, %s10504_s25 }
 0x600   : > { %4862 = vst.msk [vmem:[#allocation4 + $0x88] sm:$0xff] %vm4844_vm1, %v4829_v56  ;;  %3332 = vrot.lane.b32.xlu0 %v3242_v41, %s10510_s1 }
 0x601   : > { %2940 = vrot.lane.b32.xlu1 %v9504_v7, %s10504_s25  ;;  %v3519_v57 = vpop.permute.xlu2 %3518 }
 0x602   : > { %v2743_v61 = vpop.permute.xlu0 %2742 }
 0x603   : > { %v2549_v62 = vpop.permute.xlu1 %2548 }
 0x604   : > { %2623 = vst.msk [vmem:[#allocation3 + $0x210] sm:$0xff] %vm2600_vm2, %v2549_v62 }
 0x605   : > { %2817 = vst.msk [vmem:[#allocation3 + $0x210] sm:$0xff] %vm2794_vm3, %v2743_v61 }
 0x606   : > { %3011 = vst.msk [vmem:[#allocation3 + $0x210] sm:$0xff] %vm2988_vm4, %v2937_v35 }
 0x607   : > { %v4888_v13 = vld [vmem:[#allocation4 + $0x78] ss:$3 sm:$0xff]  ;;  %v4910_v14 = vld [vmem:[#allocation4 + $0x79] ss:$3 sm:$0xff]  ;;  %3134 = vrot.lane.b32.xlu2 %v3046_v9, %s10499_s18  ;;  %v4932_v7 = vld [vmem:[#allocation4 + $0x7a] ss:$3 sm:$0xff] }
 0x608   : > { %v4948_v15 = vmax.f32 %v4888_v13, %v4910_v14  ;;  %3136 = vrot.lane.b32.xlu0 %v3047_v8, %s10499_s18  ;;  %v2083_v8 = vld [vmem:[#allocation2 + $0x100] sm:$0xf] }
 0x609   : > { %3334 = vrot.lane.b32.xlu1 %v3243_v12, %s10510_s1  ;;  %v3715_v18 = vpop.permute.xlu2 %3714  ;;  %v9683_v12 = vld [vmem:[#allocation2 + $0xf8] sm:$0xff] }
 0x60a   : > { %v4959_v19 = vmax.f32 %v4948_v15, %v4932_v7  ;;  %v2939_v53 = vpop.permute.xlu0 %2938 }
 0x60b   : > { %v2745_v21 = vpop.permute.xlu1 %2744 }
 0x60c   : > { %4972 = vst.msk [vmem:[#allocation2 + $0x2e] sm:$0xff] %vm4844_vm1, %v4959_v19  ;;  %v9694_v19 = vld [vmem:[#allocation2 + $0xec] sm:$0xff] }
 0x60d   : > { %2818 = vst.msk [vmem:[#allocation3 + $0x228] sm:$0xff] %vm2794_vm3, %v2745_v21 }
 0x60e   : > { %3012 = vst.msk [vmem:[#allocation3 + $0x228] sm:$0xff] %vm2988_vm4, %v2939_v53 }
 0x60f   : > { %3206 = vst.msk [vmem:[#allocation3 + $0x228] sm:$0xff] %vm3182_vm5, %v3133_v17  ;;  %3528 = vrot.lane.b32.xlu2 %v3437_v4, %s10507_s24  ;;  %v2277_v4 = vld [vmem:[#allocation2 + $0x101] sm:$0xf] }
 0x610   : > { %3328 = vrot.lane.b32.xlu0 %v3240_v22, %s10510_s1  ;;  %v9706_v22 = vld [vmem:[#allocation2 + $0xf9] sm:$0xff] }
 0x611   : > { %3526 = vrot.lane.b32.xlu1 %v3436_v25, %s10507_s24  ;;  %v4101_v26 = vpop.permute.xlu2 %4100 }
 0x612   : > { %v3325_v27 = vpop.permute.xlu0 %3324 }
 0x613   : > { %v3131_v31 = vpop.permute.xlu1 %3130  ;;  %v5210_v32 = vld [vmem:[#allocation2 + $0x2c] sm:$0xff] }
 0x614   : > { %3205 = vst.msk [vmem:[#allocation3 + $0x210] sm:$0xff] %vm3182_vm5, %v3131_v31  ;;  %v5429_v35 = vld [vmem:[#allocation2 + $0x28] sm:$0xff] }
 0x615   : > { %3399 = vst.msk [vmem:[#allocation3 + $0x210] sm:$0xff] %vm3376_vm7, %v3325_v27  ;;  %v2471_v27 = vld [vmem:[#allocation2 + $0x102] sm:$0xf] }
 0x616   : > { %3593 = vst.msk [vmem:[#allocation3 + $0x210] sm:$0xff] %vm3570_vm8, %v3519_v57  ;;  %v9670_v57 = vld [vmem:[#allocation2 + $0xeb] sm:$0xff] }
 0x617   : > { %3720 = vrot.lane.b32.xlu2 %v9499_v5, %s10497_s30  ;;  %5221 = vst.msk [vmem:[#allocation3 + $0x80] sm:$0xff] %vm4844_vm1, %v5210_v32  ;;  %v3435_v5 = vld [vmem:[#allocation2 + $0xd7] sm:$0xff] }
 0x618   : > { %3722 = vrot.lane.b32.xlu0 %v9625_v0, %s10497_s30  ;;  %5440 = vst.msk [vmem:[#allocation3 + $0x70] sm:$0xff] %vm4844_vm1, %v5429_v35 }
 0x619   : > { %3330 = vrot.lane.b32.xlu1 %v3241_v42, %s10510_s1  ;;  %v4297_v45 = vpop.permute.xlu2 %4296  ;;  %4994 = vst.msk [vmem:[#allocation3 + $0x78] sm:$0xff] %vm4844_vm1, %v5429_v35  ;;  %v9726_v35 = vld [vmem:[#allocation2 + $0xfb] sm:$0xff] }
 0x61a   : > { %v3521_v51 = vpop.permute.xlu0 %3520 }
 0x61b   : > { %v3327_v54 = vpop.permute.xlu1 %3326 }
 0x61c   : > { %3400 = vst.msk [vmem:[#allocation3 + $0x228] sm:$0xff] %vm3376_vm7, %v3327_v54  ;;  %v2859_v54 = vld [vmem:[#allocation2 + $0x104] sm:$0xf] }
 0x61d   : > { %3594 = vst.msk [vmem:[#allocation3 + $0x228] sm:$0xff] %vm3570_vm8, %v3521_v51 }
 0x61e   : > { %3788 = vst.msk [vmem:[#allocation3 + $0x228] sm:$0xff] %vm3764_vm9, %v3715_v18 }
 0x61f   : > { %3524 = vrot.lane.b32.xlu2 %v3435_v5, %s10507_s24  ;;  %v9747_v5 = vld [vmem:[#allocation2 + $0xfc] sm:$0xff] }
 0x620   : > { %3914 = vrot.lane.b32.xlu0 %v9520_v16, %s10508_s17 }
 0x621   : > { %3522 = vrot.lane.b32.xlu1 %v3434_v36, %s10507_s24  ;;  %v2169_v17 = vpop.permute.xlu2 %2168 }
 0x622   : > { %2239 = vst.msk [vmem:[#allocation3 + $0x270] sm:$0xff] %vm2212_vm15, %v2169_v17  ;;  %v3907_v38 = vpop.permute.xlu0 %3906 }
 0x623   : > { %v3713_v39 = vpop.permute.xlu1 %3712 }
 0x624   : > { %3787 = vst.msk [vmem:[#allocation3 + $0x210] sm:$0xff] %vm3764_vm9, %v3713_v39  ;;  %v3053_v39 = vld [vmem:[#allocation2 + $0x105] sm:$0xf] }
 0x625   : > { %3981 = vst.msk [vmem:[#allocation3 + $0x210] sm:$0xff] %vm3958_vm10, %v3907_v38  ;;  %v3052_v38 = vld [vmem:[#allocation2 + $0xfd] sm:$0xff] }
 0x626   : > { %4175 = vst.msk [vmem:[#allocation3 + $0x210] sm:$0xff] %vm4152_vm11, %v4101_v26  ;;  %v9715_v26 = vld [vmem:[#allocation2 + $0xfa] sm:$0xff] }
 0x627   : > { %3716 = vrot.lane.b32.xlu2 %v9539_v50, %s10497_s30 }
 0x628   : > { %3718 = vrot.lane.b32.xlu0 %v9488_v63, %s10497_s30 }
 0x629   : > { %3916 = vrot.lane.b32.xlu1 %v9648_v10, %s10508_s17  ;;  %v2365_v16 = vpop.permute.xlu2 %2364 }
 0x62a   : > { %v4103_v46 = vpop.permute.xlu0 %4102 }
 0x62b   : > { %v3909_v47 = vpop.permute.xlu1 %3908 }
 0x62c   : > { %3982 = vst.msk [vmem:[#allocation3 + $0x228] sm:$0xff] %vm3958_vm10, %v3909_v47 }
 0x62d   : > { %4176 = vst.msk [vmem:[#allocation3 + $0x228] sm:$0xff] %vm4152_vm11, %v4103_v46 }
 0x62e   : > { %4370 = vst.msk [vmem:[#allocation3 + $0x228] sm:$0xff] %vm4346_vm12, %v4297_v45  ;;  %v2665_v45 = vld [vmem:[#allocation2 + $0x103] sm:$0xf] }
 0x62f   : > { %4110 = vrot.lane.b32.xlu2 %v9657_v48, %s10500_s29 }
 0x630   : > { %3910 = vrot.lane.b32.xlu0 %v9548_v24, %s10508_s17 }
 0x631   : > { %4108 = vrot.lane.b32.xlu1 %v9536_v20, %s10500_s29  ;;  %v2557_v63 = vpop.permute.xlu2 %2556 }
 0x632   : > { %v4489_v50 = vpop.permute.xlu0 %4488 }
 0x633   : > { %v4295_v23 = vpop.permute.xlu1 %4294 }
 0x634   : > { %4369 = vst.msk [vmem:[#allocation3 + $0x210] sm:$0xff] %vm4346_vm12, %v4295_v23  ;;  %v4777_v41 = vpop.f32.mrf.mxu0 }
 0x635   : > { %4563 = vst.msk [vmem:[#allocation3 + $0x210] sm:$0xff] %vm10480_vm13, %v4489_v50  ;;  %v4778_v56 = vadd.f32 %v9296_v43, %v4777_v41  ;;  %v9768_v50 = vld [vmem:[%s10433_s2] ss:$0 sm:$0xff]  ;;  %v9771_v41 = vld [vmem:[#allocation2 + $0xf2] sm:$0xff] }
 0x637   : > { %v4830_v61 = vmax.f32 %v4778_v56, 0.0  ;;  %4302 = vrot.lane.b32.xlu2 %v9565_v30, %s10501_s20  ;;  %v3246_v56 = vld [vmem:[#allocation2 + $0xfe] sm:$0xff] }
 0x638   : > { %4304 = vrot.lane.b32.xlu0 %v9670_v57, %s10501_s20 }
 0x639   : > { %4863 = vst.msk [vmem:[#allocation4 + $0x90] sm:$0xff] %vm4844_vm1, %v4830_v61  ;;  %3912 = vrot.lane.b32.xlu1 %v9524_v52, %s10508_s17  ;;  %v2361_v20 = vpop.permute.xlu2 %2360 }
 0x63a   : > { %v2171_v24 = vpop.permute.xlu0 %2170 }
 0x63b   : > { %v4491_v62 = vpop.permute.xlu1 %4490  ;;  %2240 = vst.msk [vmem:[#allocation3 + $0x288] sm:$0xff] %vm2212_vm15, %v2171_v24 }
 0x63c   : > { %4564 = vst.msk [vmem:[#allocation3 + $0x228] sm:$0xff] %vm10480_vm13, %v4491_v62  ;;  %v4779_v9 = vpop.f32.mrf.mxu0  ;;  %v4596_v7 = vld [vmem:[#allocation3 + $0x210] sm:$0xff] }
 0x63d   : > { %2434 = vst.msk [vmem:[#allocation3 + $0x288] sm:$0xff] %vm2406_vm0, %v2365_v16  ;;  %v4780_v30 = vadd.f32 %v9296_v43, %v4779_v9  ;;  %v9757_v16 = vld [vmem:[#allocation2 + $0xf1] sm:$0xff] }
 0x63f   : > { %v4831_v13 = vmax.f32 %v4780_v30, 0.0  ;;  %2178 = vrot.lane.b32.xlu2 %v2083_v8, %s10506_s26  ;;  %v9784_v30 = vld [vmem:[#allocation2 + $0xf3] sm:$0xff] }
 0x640   : > { %4104 = vrot.lane.b32.xlu0 %v9562_v29, %s10500_s29 }
 0x641   : > { %4864 = vst.msk [vmem:[#allocation4 + $0x98] sm:$0xff] %vm4844_vm1, %v4831_v13  ;;  %2176 = vrot.lane.b32.xlu1 %v9683_v12, %s10506_s26  ;;  %v2553_v52 = vpop.permute.xlu2 %2552 }
 0x642   : > { %v2165_v14 = vpop.permute.xlu0 %2164 }
 0x643   : > { %v2363_v15 = vpop.permute.xlu1 %2362  ;;  %2237 = vst.msk [vmem:[#allocation3 + $0x240] sm:$0xff] %vm2212_vm15, %v2165_v14  ;;  %v4597_v43 = vld [vmem:[#allocation3 + $0x228] sm:$0xff] }
 0x644   : > { %2433 = vst.msk [vmem:[#allocation3 + $0x270] sm:$0xff] %vm2406_vm0, %v2363_v15  ;;  %v4617_v18 = vpack.c.bf16 %v4597_v43, %v4596_v7 }
 0x645   : > { %2627 = vst.msk [vmem:[#allocation3 + $0x270] sm:$0xff] %vm2600_vm2, %v2557_v63 }
 0x646   : > { %7046 = vmatmul.msk.bf16.gmra.mxu0 %vm4670_vm14, %v4617_v18 }
 0x647   : > { %4496 = vrot.lane.b32.xlu2 %v9574_v33, %s10505_s23 }
 0x648   : > { %4498 = vrot.lane.b32.xlu0 %v9694_v19, %s10505_s23 }
 0x649   : > { %4106 = vrot.lane.b32.xlu1 %v9533_v60, %s10500_s29  ;;  %v2947_v29 = vpop.permute.xlu2 %2946 }
 0x64a   : > { %v2559_v53 = vpop.permute.xlu0 %2558 }
 0x64b   : > { %v2167_v21 = vpop.permute.xlu1 %2166  ;;  %2628 = vst.msk [vmem:[#allocation3 + $0x288] sm:$0xff] %vm2600_vm2, %v2559_v53 }
 0x64c   : > { %2238 = vst.msk [vmem:[#allocation3 + $0x258] sm:$0xff] %vm2212_vm15, %v2167_v21  ;;  %v3441_v21 = vld [vmem:[#allocation2 + $0x107] sm:$0xf] }
 0x64d   : > { %2432 = vst.msk [vmem:[#allocation3 + $0x258] sm:$0xff] %vm2406_vm0, %v2361_v20 }
 0x64f   : > { %2372 = vrot.lane.b32.xlu2 %v2277_v4, %s10502_s21 }
 0x650   : > { %4298 = vrot.lane.b32.xlu0 %v9590_v37, %s10501_s20 }
 0x651   : > { %2370 = vrot.lane.b32.xlu1 %v9706_v22, %s10502_s21  ;;  %v3139_v60 = vpop.permute.xlu2 %3138 }
 0x652   : > { %v2751_v33 = vpop.permute.xlu0 %2750 }
 0x653   : > { %v2359_v25 = vpop.permute.xlu1 %2358  ;;  %2821 = vst.msk [vmem:[#allocation3 + $0x270] sm:$0xff] %vm2794_vm3, %v2751_v33 }
 0x654   : > { %2431 = vst.msk [vmem:[#allocation3 + $0x240] sm:$0xff] %vm2406_vm0, %v2359_v25  ;;  %v3634_v25 = vld [vmem:[#allocation2 + $0x100] sm:$0xff] }
 0x655   : > { %2625 = vst.msk [vmem:[#allocation3 + $0x240] sm:$0xff] %vm2600_vm2, %v2553_v52  ;;  %v3247_v52 = vld [vmem:[#allocation2 + $0x106] sm:$0xf] }
 0x657   : > { %2564 = vrot.lane.b32.xlu2 %v9715_v26, %s10503_s16 }
 0x658   : > { %2566 = vrot.lane.b32.xlu0 %v2471_v27, %s10503_s16  ;;  %v3635_v27 = vld [vmem:[#allocation2 + $0x108] sm:$0xf] }
 0x659   : > { %4300 = vrot.lane.b32.xlu1 %v9551_v3, %s10501_s20  ;;  %v2943_v37 = vpop.permute.xlu2 %2942 }
 0x65a   : > { %v2555_v31 = vpop.permute.xlu0 %2554 }
 0x65b   : > { %v2753_v32 = vpop.permute.xlu1 %2752  ;;  %2626 = vst.msk [vmem:[#allocation3 + $0x258] sm:$0xff] %vm2600_vm2, %v2555_v31 }
 0x65c   : > { %2822 = vst.msk [vmem:[#allocation3 + $0x288] sm:$0xff] %vm2794_vm3, %v2753_v32  ;;  %v9803_v32 = vld [vmem:[#allocation2 + $0xf4] sm:$0xff] }
 0x65d   : > { %3016 = vst.msk [vmem:[#allocation3 + $0x288] sm:$0xff] %vm2988_vm4, %v2947_v29 }
 0x65f   : > { %4494 = vrot.lane.b32.xlu2 %v9578_v34, %s10505_s23 }
 0x660   : > { %2758 = vrot.lane.b32.xlu0 %v9726_v35, %s10509_s0 }
 0x661   : > { %4492 = vrot.lane.b32.xlu1 %v9599_v55, %s10505_s23  ;;  %v3135_v3 = vpop.permute.xlu2 %3134 }
 0x662   : > { %v2747_v42 = vpop.permute.xlu0 %2746 }
 0x663   : > { %v2945_v49 = vpop.permute.xlu1 %2944  ;;  %2819 = vst.msk [vmem:[#allocation3 + $0x240] sm:$0xff] %vm2794_vm3, %v2747_v42 }
 0x664   : > { %3015 = vst.msk [vmem:[#allocation3 + $0x270] sm:$0xff] %vm2988_vm4, %v2945_v49  ;;  %v3051_v49 = vld [vmem:[#allocation2 + $0xf5] sm:$0xff] }
 0x665   : > { %3209 = vst.msk [vmem:[#allocation3 + $0x270] sm:$0xff] %vm3182_vm5, %v3139_v60 }
 0x667   : > { %2172 = vrot.lane.b32.xlu2 %v9625_v0, %s10506_s26 }
 0x668   : > { %2174 = vrot.lane.b32.xlu0 %v9737_v44, %s10506_s26 }
 0x669   : > { %2760 = vrot.lane.b32.xlu1 %v2665_v45, %s10509_s0  ;;  %v3529_v34 = vpop.permute.xlu2 %3528  ;;  %v3828_v45 = vld [vmem:[#allocation2 + $0x101] sm:$0xff] }
 0x66a   : > { %v3141_v55 = vpop.permute.xlu0 %3140 }
 0x66b   : > { %v2749_v51 = vpop.permute.xlu1 %2748  ;;  %3210 = vst.msk [vmem:[#allocation3 + $0x288] sm:$0xff] %vm3182_vm5, %v3141_v55 }
 0x66c   : > { %2820 = vst.msk [vmem:[#allocation3 + $0x258] sm:$0xff] %vm2794_vm3, %v2749_v51 }
 0x66d   : > { %3014 = vst.msk [vmem:[#allocation3 + $0x258] sm:$0xff] %vm2988_vm4, %v2943_v37 }
 0x66f   : > { %2954 = vrot.lane.b32.xlu2 %v2859_v54, %s10504_s25 }
 0x670   : > { %2366 = vrot.lane.b32.xlu0 %v9648_v10, %s10502_s21 }
 0x671   : > { %2952 = vrot.lane.b32.xlu1 %v9747_v5, %s10504_s25  ;;  %v3721_v0 = vpop.permute.xlu2 %3720 }
 0x672   : > { %v3333_v36 = vpop.permute.xlu0 %3332 }
 0x673   : > { %v2941_v17 = vpop.permute.xlu1 %2940  ;;  %3403 = vst.msk [vmem:[#allocation3 + $0x270] sm:$0xff] %vm3376_vm7, %v3333_v36  ;;  %v3245_v36 = vld [vmem:[#allocation2 + $0xf6] sm:$0xff] }
 0x674   : > { %3013 = vst.msk [vmem:[#allocation3 + $0x240] sm:$0xff] %vm2988_vm4, %v2941_v17  ;;  %v3829_v17 = vld [vmem:[#allocation2 + $0x109] sm:$0xf] }
 0x675   : > { %3207 = vst.msk [vmem:[#allocation3 + $0x240] sm:$0xff] %vm3182_vm5, %v3135_v3 }
 0x677   : > { %3146 = vrot.lane.b32.xlu2 %v3052_v38, %s10499_s18 }
 0x678   : > { %3148 = vrot.lane.b32.xlu0 %v3053_v39, %s10499_s18 }
 0x679   : > { %2368 = vrot.lane.b32.xlu1 %v9757_v16, %s10502_s21  ;;  %v3525_v10 = vpop.permute.xlu2 %3524  ;;  %s6924_s21 = scalar_lea.hbm %s10446_s15, %s8001_s22 }
 0x67a   : > { %v3137_v46 = vpop.permute.xlu0 %3136  ;;  %s6928_s9 = sshll.u32 %s6924_s21, 4  ;;  %s6929_s9 = int_to_ptr.hbm [resolvable:$true] %s6928_s9 }
 0x67b   : > { %v3335_v47 = vpop.permute.xlu1 %3334  ;;  %3208 = vst.msk [vmem:[#allocation3 + $0x258] sm:$0xff] %vm3182_vm5, %v3137_v46  ;;  %v4782_v63 = vpop.f32.mrf.mxu0  ;;  %v4023_v46 = vld [vmem:[#allocation2 + $0x10a] sm:$0xf] }
 0x67c   : > { %3404 = vst.msk [vmem:[#allocation3 + $0x288] sm:$0xff] %vm3376_vm7, %v3335_v47  ;;  %v4783_v23 = vadd.f32 %v9768_v50, %v4782_v63  ;;  %v3438_v47 = vld [vmem:[#allocation2 + $0xef] sm:$0xff]  ;;  %v4022_v63 = vld [vmem:[#allocation2 + $0x102] sm:$0xff] }
 0x67d   : > { %3598 = vst.msk [vmem:[#allocation3 + $0x288] sm:$0xff] %vm3570_vm8, %v3529_v34  ;;  %v3050_v34 = vld [vmem:[#allocation2 + $0xed] sm:$0xff] }
 0x67e   : > { %v4832_v61 = vmax.f32 %v4783_v23, 0.0 }
 0x67f   : > { %2562 = vrot.lane.b32.xlu2 %v9771_v41, %s10503_s16 }
 0x680   : > { %4865 = vst.msk [vmem:[#allocation4 + $0xa0] sm:$0xff] %vm4844_vm1, %v4832_v61  ;;  %3340 = vrot.lane.b32.xlu0 %v3246_v56, %s10510_s1 }
 0x681   : > { %2560 = vrot.lane.b32.xlu1 %v9657_v48, %s10503_s16  ;;  %v3717_v20 = vpop.permute.xlu2 %3716 }
 0x682   : > { %v3329_v24 = vpop.permute.xlu0 %3328 }
 0x683   : > { %v3527_v62 = vpop.permute.xlu1 %3526  ;;  %3401 = vst.msk [vmem:[#allocation3 + $0x240] sm:$0xff] %vm3376_vm7, %v3329_v24  ;;  %v4784_v9 = vpop.f32.mrf.mxu0  ;;  %v4217_v24 = vld [vmem:[#allocation2 + $0x10b] sm:$0xf] }
 0x684   : > { %3597 = vst.msk [vmem:[#allocation3 + $0x270] sm:$0xff] %vm3570_vm8, %v3527_v62  ;;  %v4785_v8 = vadd.f32 %v9768_v50, %v4784_v9  ;;  %v3439_v62 = vld [vmem:[#allocation2 + $0xf7] sm:$0xff] }
 0x685   : > { %3791 = vst.msk [vmem:[#allocation3 + $0x270] sm:$0xff] %vm3764_vm9, %v3721_v0  ;;  %v3244_v0 = vld [vmem:[#allocation2 + $0xee] sm:$0xff] }
 0x686   : > { %v4833_v13 = vmax.f32 %v4785_v8, 0.0 }
 0x687   : > { %v4890_v14 = vld [vmem:[#allocation4 + $0x90] ss:$3 sm:$0xff]  ;;  %v4912_v15 = vld [vmem:[#allocation4 + $0x91] ss:$3 sm:$0xff]  ;;  %2754 = vrot.lane.b32.xlu2 %v9670_v57, %s10509_s0  ;;  %v4934_v7 = vld [vmem:[#allocation4 + $0x92] ss:$3 sm:$0xff] }
 0x688   : > { %v4949_v48 = vmax.f32 %v4890_v14, %v4912_v15  ;;  %4866 = vst.msk [vmem:[#allocation4 + $0xa8] sm:$0xff] %vm4844_vm1, %v4833_v13  ;;  %2756 = vrot.lane.b32.xlu0 %v9784_v30, %s10509_s0  ;;  %v3440_v57 = vld [vmem:[#allocation2 + $0xff] sm:$0xff] }
 0x689   : > { %3342 = vrot.lane.b32.xlu1 %v3247_v52, %s10510_s1  ;;  %v4111_v43 = vpop.permute.xlu2 %4110  ;;  %v4410_v52 = vld [vmem:[#allocation2 + $0x104] sm:$0xff] }
 0x68a   : > { %v4960_v18 = vmax.f32 %v4949_v48, %v4934_v7  ;;  %v3723_v29 = vpop.permute.xlu0 %3722 }
 0x68b   : > { %v3331_v53 = vpop.permute.xlu1 %3330  ;;  %3792 = vst.msk [vmem:[#allocation3 + $0x288] sm:$0xff] %vm3764_vm9, %v3723_v29 }
 0x68c   : > { %4973 = vst.msk [vmem:[#allocation2 + $0x36] sm:$0xff] %vm4844_vm1, %v4960_v18 }
 0x68d   : > { %3402 = vst.msk [vmem:[#allocation3 + $0x258] sm:$0xff] %vm3376_vm7, %v3331_v53 }
 0x68e   : > { %3596 = vst.msk [vmem:[#allocation3 + $0x258] sm:$0xff] %vm3570_vm8, %v3525_v10 }
 0x68f   : > { %3536 = vrot.lane.b32.xlu2 %v3441_v21, %s10507_s24 }
 0x690   : > { %2948 = vrot.lane.b32.xlu0 %v9694_v19, %s10504_s25 }
 0x691   : > { %3534 = vrot.lane.b32.xlu1 %v3440_v57, %s10507_s24  ;;  %v4303_v4 = vpop.permute.xlu2 %4302 }
 0x692   : > { %v3915_v60 = vpop.permute.xlu0 %3914 }
 0x693   : > { %v3523_v33 = vpop.permute.xlu1 %3522  ;;  %3985 = vst.msk [vmem:[#allocation3 + $0x270] sm:$0xff] %vm3958_vm10, %v3915_v60  ;;  %v5430_v37 = vld [vmem:[#allocation2 + $0x30] sm:$0xff] }
 0x694   : > { %3595 = vst.msk [vmem:[#allocation3 + $0x240] sm:$0xff] %vm3570_vm8, %v3523_v33  ;;  %v5211_v31 = vld [vmem:[#allocation2 + $0x34] sm:$0xff] }
 0x695   : > { %3789 = vst.msk [vmem:[#allocation3 + $0x240] sm:$0xff] %vm3764_vm9, %v3717_v20  ;;  %v4216_v20 = vld [vmem:[#allocation2 + $0x103] sm:$0xff] }
 0x696   : > { %5441 = vst.msk [vmem:[#allocation3 + $0x88] sm:$0xff] %vm4844_vm1, %v5430_v37 }
 0x697   : > { %3728 = vrot.lane.b32.xlu2 %v3634_v25, %s10497_s30  ;;  %5222 = vst.msk [vmem:[#allocation3 + $0x98] sm:$0xff] %vm4844_vm1, %v5211_v31 }
 0x698   : > { %3730 = vrot.lane.b32.xlu0 %v3635_v27, %s10497_s30  ;;  %4995 = vst.msk [vmem:[#allocation3 + $0x90] sm:$0xff] %vm4844_vm1, %v5430_v37 }
 0x699   : > { %2950 = vrot.lane.b32.xlu1 %v9803_v32, %s10504_s25  ;;  %v2179_v19 = vpop.permute.xlu2 %2178 }
 0x69a   : > { %2245 = vst.msk [vmem:[#allocation3 + $0x2e8] sm:$0xf] %vm2244_vm6, %v2179_v19  ;;  %v3719_v3 = vpop.permute.xlu0 %3718  ;;  %vm2438_vm6 = vcmask 322848  }
 0x69b   : > { %v3917_v42 = vpop.permute.xlu1 %3916  ;;  %3790 = vst.msk [vmem:[#allocation3 + $0x258] sm:$0xff] %vm3764_vm9, %v3719_v3 }
 0x69c   : > { %3986 = vst.msk [vmem:[#allocation3 + $0x288] sm:$0xff] %vm3958_vm10, %v3917_v42 }
 0x69d   : > { %4180 = vst.msk [vmem:[#allocation3 + $0x288] sm:$0xff] %vm4152_vm11, %v4111_v43 }
 0x69f   : > { %3144 = vrot.lane.b32.xlu2 %v3051_v49, %s10499_s18 }
 0x6a0   : > { %3922 = vrot.lane.b32.xlu0 %v3828_v45, %s10508_s17 }
 0x6a1   : > { %3142 = vrot.lane.b32.xlu1 %v3050_v34, %s10499_s18  ;;  %v4497_v55 = vpop.permute.xlu2 %4496  ;;  %v5293_v34 = vld [vmem:[#allocation2 + $0x6] sm:$0xff]  ;;  %s519_s18 = sand.u32 1, %s7863_s19  }
 0x6a2   : > { %v3911_v51 = vpop.permute.xlu0 %3910 }
 0x6a3   : > { %v4109_v54 = vpop.permute.xlu1 %4108  ;;  %3983 = vst.msk [vmem:[#allocation3 + $0x240] sm:$0xff] %vm3958_vm10, %v3911_v51 }
 0x6a4   : > { %4179 = vst.msk [vmem:[#allocation3 + $0x270] sm:$0xff] %vm4152_vm11, %v4109_v54 }
 0x6a5   : > { %4373 = vst.msk [vmem:[#allocation3 + $0x270] sm:$0xff] %vm4346_vm12, %v4303_v4 }
 0x6a6   : > { %4567 = vst.msk [vmem:[#allocation3 + $0x270] sm:$0xff] %vm10480_vm13, %v4497_v55 }
 0x6a7   : > { %3336 = vrot.lane.b32.xlu2 %v3244_v0, %s10510_s1 }
 0x6a8   : > { %3338 = vrot.lane.b32.xlu0 %v3245_v36, %s10510_s1  ;;  %s520_s1 = scalar_lea.vmem [#allocation10], %s519_s18 }
 0x6a9   : > { %3924 = vrot.lane.b32.xlu1 %v3829_v17, %s10508_s17  ;;  %v2373_v38 = vpop.permute.xlu2 %2372  ;;  %v5359_v17 = vld [vmem:[#allocation2 + $0x7] sm:$0xff]  ;;  %s6926_s3 = sshll.u32 %s520_s1, 4  ;;  %s6927_s3 = int_to_ptr.vmem [resolvable:$true] %s6926_s3 }
 0x6aa   : > { %2439 = vst.msk [vmem:[#allocation3 + $0x2e8] sm:$0xf] %vm2438_vm6, %v2373_v38  ;;  %v4305_v39 = vpop.permute.xlu0 %4304  ;;  %vm2632_vm6 = vcmask 355648   ;;  %v5360_v38 = vld [vmem:[#allocation2 + $0xf] sm:$0xff] }
 0x6ab   : > { %v3913_v10 = vpop.permute.xlu1 %3912  ;;  %4374 = vst.msk [vmem:[#allocation3 + $0x288] sm:$0xff] %vm4346_vm12, %v4305_v39  ;;  %v5294_v39 = vld [vmem:[#allocation2 + $0xe] sm:$0xff] }
 0x6ac   : > { %3984 = vst.msk [vmem:[#allocation3 + $0x258] sm:$0xff] %vm3958_vm10, %v3913_v10 }
 0x6ad   : > { %v4600_v14 = vld [vmem:[#allocation3 + $0x270] sm:$0xff] }
 0x6af   : > { %4118 = vrot.lane.b32.xlu2 %v4023_v46, %s10500_s29 }
 0x6b0   : > { %3530 = vrot.lane.b32.xlu0 %v3438_v47, %s10507_s24 }
 0x6b1   : > { %4116 = vrot.lane.b32.xlu1 %v4022_v63, %s10500_s29  ;;  %v2565_v23 = vpop.permute.xlu2 %2564  ;;  %v9889_v63 = vld [vmem:[#allocation2 + $0x11] sm:$0xff] }
 0x6b2   : > { %v4105_v56 = vpop.permute.xlu0 %4104 }
 0x6b3   : > { %v2177_v61 = vpop.permute.xlu1 %2176  ;;  %4177 = vst.msk [vmem:[#allocation3 + $0x240] sm:$0xff] %vm4152_vm11, %v4105_v56 }
 0x6b4   : > { %2243 = vst.msk [vmem:[#allocation3 + $0x2d0] sm:$0xff] %vm2212_vm15, %v2177_v61 }
 0x6b7   : > { %4310 = vrot.lane.b32.xlu2 %v4216_v20, %s10501_s20 }
 0x6b8   : > { %4312 = vrot.lane.b32.xlu0 %v4217_v24, %s10501_s20  ;;  %v5513_v24 = vld [vmem:[#allocation2 + $0xa] sm:$0xff] }
 0x6b9   : > { %3532 = vrot.lane.b32.xlu1 %v3439_v62, %s10507_s24  ;;  %v4495_v9 = vpop.permute.xlu2 %4494  ;;  %v9900_v62 = vld [vmem:[#allocation2 + $0x12] sm:$0xff] }
 0x6ba   : > { %v4499_v8 = vpop.permute.xlu0 %4498 }
 0x6bb   : > { %v4107_v13 = vpop.permute.xlu1 %4106  ;;  %4568 = vst.msk [vmem:[#allocation3 + $0x288] sm:$0xff] %vm10480_vm13, %v4499_v8 }
 0x6bc   : > { %4178 = vst.msk [vmem:[#allocation3 + $0x258] sm:$0xff] %vm4152_vm11, %v4107_v13  ;;  %v5137_v13 = vld [vmem:[#allocation2 + $0x3] sm:$0xff] }
 0x6bf   : > { %3726 = vrot.lane.b32.xlu2 %v9683_v12, %s10497_s30 }
 0x6c0   : > { %4504 = vrot.lane.b32.xlu0 %v4410_v52, %s10505_s23  ;;  %v5069_v52 = vld [vmem:[#allocation2 + $0x2] sm:$0xff] }
 0x6c1   : > { %3724 = vrot.lane.b32.xlu1 %v9737_v44, %s10497_s30  ;;  %v2173_v15 = vpop.permute.xlu2 %2172  ;;  %v4411_v44 = vld [vmem:[#allocation2 + $0x10c] sm:$0xf] }
 0x6c2   : > { %2241 = vst.msk [vmem:[#allocation3 + $0x2a0] sm:$0xff] %vm2212_vm15, %v2173_v15  ;;  %v4299_v48 = vpop.permute.xlu0 %4298  ;;  %v4601_v7 = vld [vmem:[#allocation3 + $0x288] sm:$0xff] }
 0x6c3   : > { %v2371_v43 = vpop.permute.xlu1 %2370  ;;  %4371 = vst.msk [vmem:[#allocation3 + $0x240] sm:$0xff] %vm4346_vm12, %v4299_v48  ;;  %v4787_v18 = vpop.f32.mrf.mxu0  ;;  %v4619_v29 = vpack.c.bf16 %v4601_v7, %v4600_v14  ;;  %v5229_v7 = vld [vmem:[#allocation2 + $0x15] sm:$0xff] }
 0x6c4   : > { %2437 = vst.msk [vmem:[#allocation3 + $0x2d0] sm:$0xff] %vm2406_vm0, %v2371_v43  ;;  %v4788_v12 = vadd.f32 %v9768_v50, %v4787_v18  ;;  %v5138_v43 = vld [vmem:[#allocation2 + $0xb] sm:$0xff] }
 0x6c5   : > { %2631 = vst.msk [vmem:[#allocation3 + $0x2d0] sm:$0xff] %vm2600_vm2, %v2565_v23  ;;  %7048 = vmatmul.msk.bf16.vlgmr.msra.gmra.mxu1 %vm4670_vm14, %v4619_v29  ;;  %v5447_v23 = vld [vmem:[#allocation2 + $0x9] sm:$0xff] }
 0x6c6   : > { %v4834_v53 = vmax.f32 %v4788_v12, 0.0 }
 0x6c7   : > { %3918 = vrot.lane.b32.xlu2 %v9757_v16, %s10508_s17 }
 0x6c8   : > { %4867 = vst.msk [vmem:[#allocation4 + $0xb0] sm:$0xff] %vm4844_vm1, %v4834_v53  ;;  %3920 = vrot.lane.b32.xlu0 %v9706_v22, %s10508_s17  ;;  %v5295_v53 = vld [vmem:[#allocation2 + $0x16] sm:$0xff] }
 0x6c9   : > { %4506 = vrot.lane.b32.xlu1 %v4411_v44, %s10505_s23  ;;  %v2955_v21 = vpop.permute.xlu2 %2954 }
 0x6ca   : > { %v2567_v57 = vpop.permute.xlu0 %2566 }
 0x6cb   : > { %v4301_v4 = vpop.permute.xlu1 %4300  ;;  %2633 = vst.msk [vmem:[#allocation3 + $0x2e8] sm:$0xf] %vm2632_vm6, %v2567_v57  ;;  %v4789_v60 = vpop.f32.mrf.mxu0  ;;  %vm2826_vm6 = vcmask 388448   ;;  %v9928_v57 = vld [vmem:[#allocation2 + $0x21] sm:$0xff] }
 0x6cc   : > { %4372 = vst.msk [vmem:[#allocation3 + $0x258] sm:$0xff] %vm4346_vm12, %v4301_v4  ;;  %v4790_v33 = vadd.f32 %v9768_v50, %v4789_v60 }
 0x6cd   : > { %4566 = vst.msk [vmem:[#allocation3 + $0x258] sm:$0xff] %vm10480_vm13, %v4495_v9 }
 0x6ce   : > { %v4835_v16 = vmax.f32 %v4790_v33, 0.0 }
 0x6cf   : > { %4114 = vrot.lane.b32.xlu2 %v9715_v26, %s10500_s29 }
 0x6d0   : > { %4868 = vst.msk [vmem:[#allocation4 + $0xb8] sm:$0xff] %vm4844_vm1, %v4835_v16  ;;  %4306 = vrot.lane.b32.xlu0 %v9784_v30, %s10501_s20  ;;  %v7474_v16 = vld [vmem:[#allocation5 + $0x78] sm:$0xff] }
 0x6d1   : > { %4112 = vrot.lane.b32.xlu1 %v9771_v41, %s10500_s29  ;;  %v3147_v22 = vpop.permute.xlu2 %3146  ;;  %5867 = vmatpush.bf16.msrb.mxu2 %v7474_v16 }
 0x6d2   : > { %v2759_v25 = vpop.permute.xlu0 %2758 }
 0x6d3   : > { %v4493_v27 = vpop.permute.xlu1 %4492  ;;  %2825 = vst.msk [vmem:[#allocation3 + $0x2d0] sm:$0xff] %vm2794_vm3, %v2759_v25 }
 0x6d4   : > { %4565 = vst.msk [vmem:[#allocation3 + $0x240] sm:$0xff] %vm10480_vm13, %v4493_v27  ;;  %v4599_v19 = vld [vmem:[#allocation3 + $0x258] sm:$0xff]  ;;  %vm3020_vm13 = vcmask 421248  }
 0x6d7   : > { %v4892_v37 = vld [vmem:[#allocation4 + $0xa8] ss:$3 sm:$0xff]  ;;  %v4914_v31 = vld [vmem:[#allocation4 + $0xa9] ss:$3 sm:$0xff]  ;;  %4500 = vrot.lane.b32.xlu2 %v9803_v32, %s10505_s23  ;;  %v4936_v30 = vld [vmem:[#allocation4 + $0xaa] ss:$3 sm:$0xff] }
 0x6d8   : > { %v4950_v26 = vmax.f32 %v4892_v37, %v4914_v31  ;;  %4502 = vrot.lane.b32.xlu0 %v9747_v5, %s10505_s23  ;;  %v5228_v5 = vld [vmem:[#allocation2 + $0xd] sm:$0xff]  ;;  %v7473_v37 = vld [vmem:[#allocation5 + $0x70] sm:$0xff]  ;;  %s7821_s23 = scalar_lea.hbm %s10446_s15, 2 }
 0x6d9   : > { %4308 = vrot.lane.b32.xlu1 %v9726_v35, %s10501_s20  ;;  %v2563_v41 = vpop.permute.xlu2 %2562  ;;  %v5227_v35 = vld [vmem:[#allocation2 + $0x5] sm:$0xff]  ;;  %5868 = vmatpush.bf16.msrb.mxu2 %v7473_v37 }
 0x6da   : > { %v4961_v3 = vmax.f32 %v4950_v26, %v4936_v30  ;;  %v2175_v42 = vpop.permute.xlu0 %2174  ;;  %v5231_v31 = vld [vmem:[#allocation2 + $0x25] sm:$0xff]  ;;  %v5139_v26 = vld [vmem:[#allocation2 + $0x13] sm:$0xff] }
 0x6db   : > { %v2761_v49 = vpop.permute.xlu1 %2760  ;;  %2242 = vst.msk [vmem:[#allocation3 + $0x2b8] sm:$0xff] %vm2212_vm15, %v2175_v42  ;;  %v4598_v45 = vld [vmem:[#allocation3 + $0x240] sm:$0xff]  ;;  %vm3214_vm15 = vcmask 454048   ;;  %v7461_v37 = vld [vmem:[#allocation5 + $0x10] sm:$0xff] }
 0x6dc   : > { %4974 = vst.msk [vmem:[#allocation2 + $0x3e] sm:$0xff] %vm4844_vm1, %v4961_v3  ;;  %v4618_v32 = vpack.c.bf16 %v4599_v19, %v4598_v45  ;;  %v7471_v3 = vld [vmem:[#allocation5 + $0x60] sm:$0xff] }
 0x6dd   : > { %2827 = vst.msk [vmem:[#allocation3 + $0x2e8] sm:$0xf] %vm2826_vm6, %v2761_v49  ;;  %v5298_v42 = vld [vmem:[#allocation2 + $0x2e] sm:$0xff]  ;;  %vm4572_vm6 = vcmask 683648  }
 0x6de   : > { %7047 = vmatmul.msk.bf16.gmra.mxu0 %vm4670_vm14, %v4618_v32  ;;  %3021 = vst.msk [vmem:[#allocation3 + $0x2e8] sm:$0xf] %vm3020_vm13, %v2955_v21  ;;  %vm3602_vm13 = vcmask 519648   ;;  %v7470_v49 = vld [vmem:[#allocation5 + $0x58] sm:$0xff] }
 0x6df   : > { %5251 = vrot.lane.b32.xlu2 %v5228_v5, %s10506_s26  ;;  %v5232_v45 = vld [vmem:[#allocation2 + $0x2d] sm:$0xff] }
 0x6e0   : > { %5315 = vrot.lane.b32.xlu0 %v5293_v34, %s10497_s30 }
 0x6e1   : > { %5249 = vrot.lane.b32.xlu1 %v5227_v35, %s10506_s26  ;;  %v2755_v55 = vpop.permute.xlu2 %2754  ;;  %v7469_v35 = vld [vmem:[#allocation5 + $0x50] sm:$0xff] }
 0x6e2   : > { %v2367_v51 = vpop.permute.xlu0 %2366 }
 0x6e3   : > { %v2953_v54 = vpop.permute.xlu1 %2952  ;;  %2435 = vst.msk [vmem:[#allocation3 + $0x2a0] sm:$0xff] %vm2406_vm0, %v2367_v51  ;;  %v5212_v0 = vld [vmem:[#allocation2 + $0x3c] sm:$0xff]  ;;  %v5451_v51 = vld [vmem:[#allocation2 + $0x29] sm:$0xff] }
 0x6e4   : > { %3019 = vst.msk [vmem:[#allocation3 + $0x2d0] sm:$0xff] %vm2988_vm4, %v2953_v54  ;;  %v5431_v36 = vld [vmem:[#allocation2 + $0x38] sm:$0xff]  ;;  %v5363_v54 = vld [vmem:[#allocation2 + $0x27] sm:$0xff] }
 0x6e5   : > { %3213 = vst.msk [vmem:[#allocation3 + $0x2d0] sm:$0xff] %vm3182_vm5, %v3147_v22 }
 0x6e6   : > { %5223 = vst.msk [vmem:[#allocation3 + $0xb0] sm:$0xff] %vm4844_vm1, %v5212_v0  ;;  %v7480_v0 = vld [vmem:[#allocation5 + $0xa8] sm:$0xff] }
 0x6e7   : > { %5381 = vrot.lane.b32.xlu2 %v5359_v17, %s7898_s27  ;;  %5442 = vst.msk [vmem:[#allocation3 + $0xa0] sm:$0xff] %vm4844_vm1, %v5431_v36  ;;  %5907 = vmatpush.bf16.msra.mxu3 %v7480_v0 }
 0x6e8   : > { %5383 = vrot.lane.b32.xlu0 %v5360_v38, %s7898_s27  ;;  %4996 = vst.msk [vmem:[#allocation3 + $0xa8] sm:$0xff] %vm4844_vm1, %v5431_v36  ;;  %v7468_v36 = vld [vmem:[#allocation5 + $0x48] sm:$0xff] }
 0x6e9   : > { %5317 = vrot.lane.b32.xlu1 %v5294_v39, %s10497_s30  ;;  %v3537_v10 = vpop.permute.xlu2 %3536 }
 0x6ea   : > { %v3149_v46 = vpop.permute.xlu0 %3148 }
 0x6eb   : > { %v2369_v47 = vpop.permute.xlu1 %2368  ;;  %3215 = vst.msk [vmem:[#allocation3 + $0x2e8] sm:$0xf] %vm3214_vm15, %v3149_v46  ;;  %vm4876_vm15 = vcmask 257024  }
 0x6ec   : > { %2436 = vst.msk [vmem:[#allocation3 + $0x2b8] sm:$0xff] %vm2406_vm0, %v2369_v47  ;;  %vm3408_vm0 = vcmask 486848  }
 0x6ed   : > { %2630 = vst.msk [vmem:[#allocation3 + $0x2b8] sm:$0xff] %vm2600_vm2, %v2563_v41 }
 0x6ef   : > { %5471 = vrot.lane.b32.xlu2 %v9889_v63, %s10506_s26 }
 0x6f0   : > { %5023 = vrot.lane.b32.xlu0 %v9031_v40, %s10506_s26 }
 0x6f1   : > { %5469 = vrot.lane.b32.xlu1 %v5447_v23, %s10506_s26  ;;  %v3729_v56 = vpop.permute.xlu2 %3728 }
 0x6f2   : > { %v3341_v61 = vpop.permute.xlu0 %3340 }
 0x6f3   : > { %v2561_v20 = vpop.permute.xlu1 %2560  ;;  %3407 = vst.msk [vmem:[#allocation3 + $0x2d0] sm:$0xff] %vm3376_vm7, %v3341_v61 }
 0x6f4   : > { %2629 = vst.msk [vmem:[#allocation3 + $0x2a0] sm:$0xff] %vm2600_vm2, %v2561_v20  ;;  %vm3796_vm2 = vcmask 552448   ;;  %v7467_v20 = vld [vmem:[#allocation5 + $0x40] sm:$0xff] }
 0x6f5   : > { %2823 = vst.msk [vmem:[#allocation3 + $0x2a0] sm:$0xff] %vm2794_vm3, %v2755_v55  ;;  %v5364_v55 = vld [vmem:[#allocation2 + $0x2f] sm:$0xff] }
 0x6f7   : > { %5535 = vrot.lane.b32.xlu2 %v5513_v24, %s10497_s30 }
 0x6f8   : > { %5537 = vrot.lane.b32.xlu0 %v9900_v62, %s10497_s30 }
 0x6f9   : > { %5025 = vrot.lane.b32.xlu1 %v5447_v23, %s10506_s26  ;;  %v3145_v40 = vpop.permute.xlu2 %3144 }
 0x6fa   : > { %v2757_v9 = vpop.permute.xlu0 %2756 }
 0x6fb   : > { %v3343_v8 = vpop.permute.xlu1 %3342  ;;  %2824 = vst.msk [vmem:[#allocation3 + $0x2b8] sm:$0xff] %vm2794_vm3, %v2757_v9  ;;  %vm3990_vm3 = vcmask 585248   ;;  %v7478_v9 = vld [vmem:[#allocation5 + $0x98] sm:$0xff] }
 0x6fc   : > { %3409 = vst.msk [vmem:[#allocation3 + $0x2e8] sm:$0xf] %vm3408_vm0, %v3343_v8  ;;  %vm4999_vm0 = vcmask 259072  }
 0x6fd   : > { %3603 = vst.msk [vmem:[#allocation3 + $0x2e8] sm:$0xf] %vm3602_vm13, %v3537_v10  ;;  %vm5067_vm13 = vcmask 521472  }
 0x6ff   : > { %5093 = vrot.lane.b32.xlu2 %v5513_v24, %s10497_s30  ;;  %v9980_v24 = vld [vmem:[#allocation2 + $0x31] sm:$0xff] }
 0x700   : > { %5159 = vrot.lane.b32.xlu0 %v5137_v13, %s7898_s27 }
 0x701   : > { %5091 = vrot.lane.b32.xlu1 %v5069_v52, %s10497_s30  ;;  %v3337_v14 = vpop.permute.xlu2 %3336 }
 0x702   : > { %v2949_v15 = vpop.permute.xlu0 %2948 }
 0x703   : > { %v3535_v48 = vpop.permute.xlu1 %3534  ;;  %3017 = vst.msk [vmem:[#allocation3 + $0x2a0] sm:$0xff] %vm2988_vm4, %v2949_v15 }
 0x704   : > { %3601 = vst.msk [vmem:[#allocation3 + $0x2d0] sm:$0xff] %vm3570_vm8, %v3535_v48  ;;  %v7465_v48 = vld [vmem:[#allocation5 + $0x30] sm:$0xff] }
 0x705   : > { %3795 = vst.msk [vmem:[#allocation3 + $0x2d0] sm:$0xff] %vm3764_vm9, %v3729_v56  ;;  %v7479_v56 = vld [vmem:[#allocation5 + $0xa0] sm:$0xff] }
 0x706   : > { %5908 = vmatpush.bf16.msra.mxu3 %v7479_v56 }
 0x707   : > { %5253 = vrot.lane.b32.xlu2 %v5229_v7, %s10506_s26  ;;  %v7477_v7 = vld [vmem:[#allocation5 + $0x90] sm:$0xff] }
 0x708   : > { %5255 = vrot.lane.b32.xlu0 %v9490_v1, %s10506_s26 }
 0x709   : > { %5161 = vrot.lane.b32.xlu1 %v5138_v43, %s7898_s27  ;;  %v4119_v18 = vpop.permute.xlu2 %4118  ;;  %v9989_v43 = vld [vmem:[#allocation2 + $0x32] sm:$0xff] }
 0x70a   : > { %v3731_v29 = vpop.permute.xlu0 %3730  ;;  %5909 = vmatpush.bf16.msra.mxu3 %v7478_v9 }
 0x70b   : > { %v2951_v12 = vpop.permute.xlu1 %2950  ;;  %3797 = vst.msk [vmem:[#allocation3 + $0x2e8] sm:$0xf] %vm3796_vm2, %v3731_v29  ;;  %vm5135_vm2 = vcmask 783872  }
 0x70c   : > { %3018 = vst.msk [vmem:[#allocation3 + $0x2b8] sm:$0xff] %vm2988_vm4, %v2951_v12  ;;  %vm4184_vm4 = vcmask 618048  }
 0x70d   : > { %3212 = vst.msk [vmem:[#allocation3 + $0x2b8] sm:$0xff] %vm3182_vm5, %v3145_v40  ;;  %v7466_v40 = vld [vmem:[#allocation5 + $0x38] sm:$0xff] }
 0x70e   : > { %5829 = vmatpush.bf16.msrb.mxu1 %v7466_v40  ;;  %5910 = vmatpush.bf16.msra.mxu3 %v7477_v7 }
 0x70f   : > { %5321 = vrot.lane.b32.xlu2 %v9492_v58, %s10497_s30 }
 0x710   : > { %5385 = vrot.lane.b32.xlu0 %v9494_v59, %s7898_s27 }
 0x711   : > { %5319 = vrot.lane.b32.xlu1 %v5295_v53, %s10497_s30  ;;  %v4311_v1 = vpop.permute.xlu2 %4310 }
 0x712   : > { %v3923_v44 = vpop.permute.xlu0 %3922  ;;  %5830 = vmatpush.bf16.msrb.mxu1 %v7465_v48 }
 0x713   : > { %v3143_v21 = vpop.permute.xlu1 %3142  ;;  %3989 = vst.msk [vmem:[#allocation3 + $0x2d0] sm:$0xff] %vm3958_vm10, %v3923_v44  ;;  %v7476_v44 = vld [vmem:[#allocation5 + $0x88] sm:$0xff] }
 0x714   : > { %3211 = vst.msk [vmem:[#allocation3 + $0x2a0] sm:$0xff] %vm3182_vm5, %v3143_v21  ;;  %vm4378_vm5 = vcmask 650848   ;;  %5911 = vmatpush.bf16.msra.mxu3 %v7476_v44 }
 0x715   : > { %3405 = vst.msk [vmem:[#allocation3 + $0x2a0] sm:$0xff] %vm3376_vm7, %v3337_v14 }
 0x717   : > { %5473 = vrot.lane.b32.xlu2 %v9496_v2, %s10506_s26 }
 0x718   : > { %5475 = vrot.lane.b32.xlu0 %v9928_v57, %s10506_s26 }
 0x719   : > { %5387 = vrot.lane.b32.xlu1 %v9506_v11, %s7898_s27  ;;  %v3727_v58 = vpop.permute.xlu2 %3726 }
 0x71a   : > { %v3339_v59 = vpop.permute.xlu0 %3338 }
 0x71b   : > { %v3925_v4 = vpop.permute.xlu1 %3924  ;;  %3406 = vst.msk [vmem:[#allocation3 + $0x2b8] sm:$0xff] %vm3376_vm7, %v3339_v59  ;;  %vm10511_vm7 = vcmask 687744  }
 0x71c   : > { %3991 = vst.msk [vmem:[#allocation3 + $0x2e8] sm:$0xf] %vm3990_vm3, %v3925_v4  ;;  %v7475_v4 = vld [vmem:[#allocation5 + $0x80] sm:$0xff]  ;;  %vm5203_vm3 = vcmask 1046272  }
 0x71d   : > { %4185 = vst.msk [vmem:[#allocation3 + $0x2e8] sm:$0xf] %vm4184_vm4, %v4119_v18  ;;  %v5517_v18 = vld [vmem:[#allocation2 + $0x2a] sm:$0xff]  ;;  %5912 = vmatpush.bf16.msra.mxu3 %v7475_v4  ;;  %v5143_v4 = vld [vmem:[#allocation2 + $0x33] sm:$0xff]  ;;  %vm6022_vm4 = vcmask 1048064  }
 0x71f   : > { %5029 = vrot.lane.b32.xlu2 %v9496_v2, %s10506_s26  ;;  %v9946_v2 = vld [vmem:[#allocation2 + $0x22] sm:$0xff] }
 0x720   : > { %5539 = vrot.lane.b32.xlu0 %v9501_v6, %s10497_s30 }
 0x721   : > { %5027 = vrot.lane.b32.xlu1 %v9889_v63, %s10506_s26  ;;  %v3919_v60 = vpop.permute.xlu2 %3918 }
 0x722   : > { %v3531_v11 = vpop.permute.xlu0 %3530 }
 0x723   : > { %v4117_v33 = vpop.permute.xlu1 %4116  ;;  %3599 = vst.msk [vmem:[#allocation3 + $0x2a0] sm:$0xff] %vm3570_vm8, %v3531_v11  ;;  %v5142_v11 = vld [vmem:[#allocation2 + $0x2b] sm:$0xff] }
 0x724   : > { %4183 = vst.msk [vmem:[#allocation3 + $0x2d0] sm:$0xff] %vm4152_vm11, %v4117_v33  ;;  %v7462_v33 = vld [vmem:[#allocation5 + $0x18] sm:$0xff] }
 0x725   : > { %4377 = vst.msk [vmem:[#allocation3 + $0x2d0] sm:$0xff] %vm4346_vm12, %v4311_v1  ;;  %v7464_v1 = vld [vmem:[#allocation5 + $0x28] sm:$0xff] }
 0x726   : > { %5831 = vmatpush.bf16.msrb.mxu1 %v7464_v1  ;;  %v5144_v1 = vld [vmem:[#allocation2 + $0x3b] sm:$0xff] }
 0x727   : > { %5095 = vrot.lane.b32.xlu2 %v9900_v62, %s10497_s30 }
 0x728   : > { %5097 = vrot.lane.b32.xlu0 %v9501_v6, %s10497_s30  ;;  %v7472_v6 = vld [vmem:[#allocation5 + $0x68] sm:$0xff] }
 0x729   : > { %5541 = vrot.lane.b32.xlu1 %v9946_v2, %s10497_s30  ;;  %v4115_v22 = vpop.permute.xlu2 %4114  ;;  %5869 = vmatpush.bf16.msrb.mxu2 %v7472_v6  ;;  %v5234_v6 = vld [vmem:[#allocation2 + $0x3d] sm:$0xff] }
 0x72a   : > { %v4313_v25 = vpop.permute.xlu0 %4312 }
 0x72b   : > { %v3533_v27 = vpop.permute.xlu1 %3532  ;;  %4379 = vst.msk [vmem:[#allocation3 + $0x2e8] sm:$0xf] %vm4378_vm5, %v4313_v25  ;;  %vm5965_vm5 = vcmask 521216  }
 0x72c   : > { %3600 = vst.msk [vmem:[#allocation3 + $0x2b8] sm:$0xff] %vm3570_vm8, %v3533_v27  ;;  %vm5056_vm8 = vcmask 523520  }
 0x72d   : > { %3794 = vst.msk [vmem:[#allocation3 + $0x2b8] sm:$0xff] %vm3764_vm9, %v3727_v58  ;;  %5870 = vmatpush.bf16.msrb.mxu2 %v7471_v3  ;;  %v7463_v58 = vld [vmem:[#allocation5 + $0x20] sm:$0xff] }
 0x72e   : > { %5832 = vmatpush.bf16.msrb.mxu1 %v7463_v58 }
 0x72f   : > { %5165 = vrot.lane.b32.xlu2 %v9508_v28, %s7898_s27  ;;  %v5297_v28 = vld [vmem:[#allocation2 + $0x26] sm:$0xff] }
 0x730   : > { %5257 = vrot.lane.b32.xlu0 %v5231_v31, %s10506_s26 }
 0x731   : > { %5163 = vrot.lane.b32.xlu1 %v5139_v26, %s7898_s27  ;;  %v4501_v30 = vpop.permute.xlu2 %4500  ;;  %5871 = vmatpush.bf16.msrb.mxu2 %v7470_v49  ;;  %v5299_v26 = vld [vmem:[#allocation2 + $0x36] sm:$0xff] }
 0x732   : > { %v4505_v41 = vpop.permute.xlu0 %4504  ;;  %5833 = vmatpush.bf16.msrb.mxu1 %v7462_v33 }
 0x733   : > { %v3725_v19 = vpop.permute.xlu1 %3724  ;;  %4571 = vst.msk [vmem:[#allocation3 + $0x2d0] sm:$0xff] %vm10511_vm7, %v4505_v41  ;;  %v7460_v41 = vld [vmem:[#allocation5 + $0x8] sm:$0xff] }
 0x734   : > { %3793 = vst.msk [vmem:[#allocation3 + $0x2a0] sm:$0xff] %vm3764_vm9, %v3725_v19  ;;  %vm10512_vm9 = vmmov %vm10511_vm7 }
 0x735   : > { %3987 = vst.msk [vmem:[#allocation3 + $0x2a0] sm:$0xff] %vm3958_vm10, %v3919_v60  ;;  %5872 = vmatpush.bf16.msrb.mxu2 %v7469_v35  ;;  %v5141_v60 = vld [vmem:[#allocation2 + $0x23] sm:$0xff] }
 0x736   : > { %5834 = vmatpush.bf16.msrb.mxu1 %v7461_v37 }
 0x737   : > { %5323 = vrot.lane.b32.xlu2 %v5297_v28, %s10497_s30 }
 0x738   : > { %5325 = vrot.lane.b32.xlu0 %v5298_v42, %s10497_s30 }
 0x739   : > { %5259 = vrot.lane.b32.xlu1 %v5232_v45, %s10506_s26  ;;  %v5252_v32 = vpop.permute.xlu2 %5251  ;;  %5873 = vmatpush.bf16.msrb.mxu2 %v7468_v36 }
 0x73a   : > { %v3921_v5 = vpop.permute.xlu0 %3920  ;;  %5283 = vst.msk [vmem:[#allocation3 + $0x20] sm:$0xff] %vm5056_vm8, %v5252_v32  ;;  %v4604_v47 = vld [vmem:[#allocation3 + $0x2d0] sm:$0xff]  ;;  %5835 = vmatpush.bf16.msrb.mxu1 %v7460_v41 }
 0x73b   : > { %v4507_v34 = vpop.permute.xlu1 %4506  ;;  %3988 = vst.msk [vmem:[#allocation3 + $0x2b8] sm:$0xff] %vm3958_vm10, %v3921_v5  ;;  %vm10513_vm10 = vmmov %vm10511_vm7  ;;  %v7459_v5 = vld [vmem:[#allocation5] sm:$0xff]  ;;  %vm5992_vm7 = vcmask 519168  }
 0x73c   : > { %4573 = vst.msk [vmem:[#allocation3 + $0x2e8] sm:$0xf] %vm4572_vm6, %v4507_v34  ;;  %vm10514_vm6 = vcmask 1041408  }
 0x73d   : > { %4182 = vst.msk [vmem:[#allocation3 + $0x2b8] sm:$0xff] %vm4152_vm11, %v4115_v22  ;;  %5874 = vmatpush.bf16.msrb.mxu2 %v7467_v20 }
 0x73e   : > { %5836 = vmatpush.bf16.msrb.mxu1 %v7459_v5 }
 0x73f   : > { %5391 = vrot.lane.b32.xlu2 %v5364_v55, %s7898_s27  ;;  %v5365_v55 = vld [vmem:[#allocation2 + $0x37] sm:$0xff] }
 0x740   : > { %5477 = vrot.lane.b32.xlu0 %v5451_v51, %s10506_s26 }
 0x741   : > { %5389 = vrot.lane.b32.xlu1 %v5363_v54, %s7898_s27  ;;  %v9970_v17 = vpop.permute.xlu2 %5381 }
 0x742   : > { %v4797_v38 = vpop.f32.mrf.mxu1  ;;  %v4307_v39 = vpop.permute.xlu0 %4306 }
 0x743   : > { %v4113_v10 = vpop.permute.xlu1 %4112  ;;  %v4798_v46 = vadd.f32 %v9768_v50, %v4797_v38  ;;  %v4605_v63 = vld [vmem:[#allocation3 + $0x2e8] sm:$0xf] }
 0x744   : > { %4181 = vst.msk [vmem:[#allocation3 + $0x2a0] sm:$0xff] %vm4152_vm11, %v4113_v10  ;;  %v4621_v23 = vpack.c.bf16 %v4605_v63, %v4604_v47  ;;  %vm5124_vm11 = vcmask 785920  }
 0x745   : > { %v4838_v61 = vmax.f32 %v4798_v46, 0.0  ;;  %4375 = vst.msk [vmem:[#allocation3 + $0x2a0] sm:$0xff] %vm4346_vm12, %v4307_v39  ;;  %v5453_v39 = vld [vmem:[#allocation2 + $0x39] sm:$0xff] }
 0x746   : > { %4569 = vst.msk [vmem:[#allocation3 + $0x2a0] sm:$0xff] %vm10512_vm9, %v4501_v30  ;;  %7050 = vmatmul.msk.bf16.vlgmr.msra.gmra.mxu2 %vm4670_vm14, %v4621_v23  ;;  %v5233_v30 = vld [vmem:[#allocation2 + $0x35] sm:$0xff] }
 0x747   : > { %4871 = vst.msk [vmem:[#allocation4 + $0xd0] sm:$0xff] %vm4844_vm1, %v4838_v61  ;;  %5031 = vrot.lane.b32.xlu2 %v9928_v57, %s10506_s26 }
 0x748   : > { %5033 = vrot.lane.b32.xlu0 %v5451_v51, %s10506_s26  ;;  %v5300_v51 = vld [vmem:[#allocation2 + $0x3e] sm:$0xff] }
 0x749   : > { %5479 = vrot.lane.b32.xlu1 %v9980_v24, %s10506_s26  ;;  %v5472_v62 = vpop.permute.xlu2 %5471 }
 0x74a   : > { %v4799_v8 = vpop.f32.mrf.mxu1  ;;  %v4503_v13 = vpop.permute.xlu0 %4502  ;;  %5503 = vst.msk [vmem:[#allocation3 + $0x28] sm:$0xff] %vm5056_vm8, %v5472_v62 }
 0x74b   : > { %v4309_v52 = vpop.permute.xlu1 %4308  ;;  %v4800_v14 = vadd.f32 %v9768_v50, %v4799_v8 }
 0x74c   : > { %4376 = vst.msk [vmem:[#allocation3 + $0x2b8] sm:$0xff] %vm4346_vm12, %v4309_v52  ;;  %vm5192_vm12 = vcmask 1048320  }
 0x74d   : > { %v4839_v15 = vmax.f32 %v4800_v14, 0.0  ;;  %4570 = vst.msk [vmem:[#allocation3 + $0x2b8] sm:$0xff] %vm10513_vm10, %v4503_v13  ;;  %v4602_v53 = vld [vmem:[#allocation3 + $0x2a0] sm:$0xff]  ;;  %vm6913_vm10 = vcmask 8192  }
 0x74f   : > { %4872 = vst.msk [vmem:[#allocation4 + $0xd8] sm:$0xff] %vm4844_vm1, %v4839_v15  ;;  %5545 = vrot.lane.b32.xlu2 %v9989_v43, %s10497_s30 }
 0x750   : > { %5099 = vrot.lane.b32.xlu0 %v9946_v2, %s10497_s30 }
 0x751   : > { %5543 = vrot.lane.b32.xlu1 %v5517_v18, %s10497_s30  ;;  %v5536_v29 = vpop.permute.xlu2 %5535 }
 0x752   : > { %v5316_v12 = vpop.permute.xlu0 %5315 }
 0x753   : > { %v5250_v21 = vpop.permute.xlu1 %5249 }
 0x754   : > { %5282 = vst.msk [vmem:[#allocation3 + $0x8] sm:$0xff] %vm5056_vm8, %v5250_v21  ;;  %v4603_v57 = vld [vmem:[#allocation3 + $0x2b8] sm:$0xff] }
 0x755   : > { %5348 = vst.msk [vmem:[#allocation3 + $0x8] sm:$0xff] %vm5124_vm11, %v5316_v12  ;;  %v4620_v59 = vpack.c.bf16 %v4603_v57, %v4602_v53 }
 0x756   : > { %5414 = vst.msk [vmem:[#allocation3 + $0x8] sm:$0xff] %vm5192_vm12, %v9970_v17 }
 0x757   : > { %7049 = vmatmul.msk.bf16.gmra.mxu1 %vm4670_vm14, %v4620_v59  ;;  %5167 = vrot.lane.b32.xlu2 %v5141_v60, %s7898_s27  ;;  %vm5810_vm14 = vcmask 785408  }
 0x758   : > { %5169 = vrot.lane.b32.xlu0 %v5142_v11, %s7898_s27 }
 0x759   : > { %5101 = vrot.lane.b32.xlu1 %v5517_v18, %s10497_s30  ;;  %v5094_v16 = vpop.permute.xlu2 %5093  ;;  %v5519_v18 = vld [vmem:[#allocation2 + $0x3a] sm:$0xff] }
 0x75a   : > { %v5384_v2 = vpop.permute.xlu0 %5383 }
 0x75b   : > { %v4792_v22 = vpop.f32.mrf.mxu0  ;;  %v5318_v25 = vpop.permute.xlu1 %5317 }
 0x75c   : > { %v4793_v27 = vadd.f32 %v9768_v50, %v4792_v22  ;;  %5349 = vst.msk [vmem:[#allocation3 + $0x20] sm:$0xff] %vm5124_vm11, %v5318_v25 }
 0x75d   : > { %5415 = vst.msk [vmem:[#allocation3 + $0x20] sm:$0xff] %vm5192_vm12, %v5384_v2  ;;  %v5580_v45 = vld [vmem:[#allocation3 + $0x8] sm:$0xff] }
 0x75e   : > { %v4836_v31 = vmax.f32 %v4793_v27, 0.0 }
 0x75f   : > { %5263 = vrot.lane.b32.xlu2 %v5234_v6, %s10506_s26 }
 0x760   : > { %4869 = vst.msk [vmem:[#allocation4 + $0xc0] sm:$0xff] %vm4844_vm1, %v4836_v31  ;;  %5327 = vrot.lane.b32.xlu0 %v5299_v26, %s10497_s30 }
 0x761   : > { %5261 = vrot.lane.b32.xlu1 %v5233_v30, %s10506_s26  ;;  %v5254_v19 = vpop.permute.xlu2 %5253 }
 0x762   : > { %5284 = vst.msk [vmem:[#allocation3 + $0x38] sm:$0xff] %vm5056_vm8, %v5254_v19  ;;  %v5024_v3 = vpop.permute.xlu0 %5023 }
 0x763   : > { %v4794_v28 = vpop.f32.mrf.mxu0  ;;  %v5470_v42 = vpop.permute.xlu1 %5469  ;;  %5057 = vst.msk [vmem:[#allocation3] sm:$0xff] %vm5056_vm8, %v5024_v3 }
 0x764   : > { %v4795_v49 = vadd.f32 %v9768_v50, %v4794_v28  ;;  %5502 = vst.msk [vmem:[#allocation3 + $0x10] sm:$0xff] %vm5056_vm8, %v5470_v42  ;;  %v5583_v32 = vld [vmem:[#allocation3 + $0x20] sm:$0xff] }
 0x765   : > { %5568 = vst.msk [vmem:[#allocation3 + $0x10] sm:$0xff] %vm5124_vm11, %v5536_v29  ;;  %v5613_v34 = vpack.c.bf16 %v5583_v32, %v5580_v45 }
 0x766   : > { %v4837_v35 = vmax.f32 %v4795_v49, 0.0 }
 0x767   : > { %5875 = vmatmul.bf16.vlgmr.msrb.gmra.mxu2 %v5613_v34  ;;  %5393 = vrot.lane.b32.xlu2 %v5365_v55, %s7898_s27 }
 0x768   : > { %4870 = vst.msk [vmem:[#allocation4 + $0xc8] sm:$0xff] %vm4844_vm1, %v4837_v35 }
 0x769   : > { %5329 = vrot.lane.b32.xlu1 %v5300_v51, %s10497_s30  ;;  %v5322_v50 = vpop.permute.xlu2 %5321 }
 0x76a   : > { %v5538_v54 = vpop.permute.xlu0 %5537 }
 0x76b   : > { %v5026_v0 = vpop.permute.xlu1 %5025  ;;  %5569 = vst.msk [vmem:[#allocation3 + $0x28] sm:$0xff] %vm5124_vm11, %v5538_v54 }
 0x76c   : > { %5058 = vst.msk [vmem:[#allocation3 + $0x18] sm:$0xff] %vm5056_vm8, %v5026_v0  ;;  %v5581_v23 = vld [vmem:[#allocation3 + $0x10] sm:$0xff] }
 0x76d   : > { %5126 = vst.msk [vmem:[#allocation3 + $0x18] sm:$0xff] %vm5124_vm11, %v5094_v16 }
 0x76f   : > { %v4894_v36 = vld [vmem:[#allocation4 + $0xc0] ss:$3 sm:$0xff]  ;;  %v4916_v17 = vld [vmem:[#allocation4 + $0xc1] ss:$3 sm:$0xff]  ;;  %v4938_v10 = vld [vmem:[#allocation4 + $0xc2] ss:$3 sm:$0xff] }
 0x770   : > { %v4951_v38 = vmax.f32 %v4894_v36, %v4916_v17 }
 0x771   : > { %5481 = vrot.lane.b32.xlu1 %v5453_v39, %s10506_s26  ;;  %v5474_v46 = vpop.permute.xlu2 %5473 }
 0x772   : > { %v4962_v47 = vmax.f32 %v4951_v38, %v4938_v10  ;;  %5504 = vst.msk [vmem:[#allocation3 + $0x40] sm:$0xff] %vm5056_vm8, %v5474_v46  ;;  %v5160_v63 = vpop.permute.xlu0 %5159  ;;  %v5584_v56 = vld [vmem:[#allocation3 + $0x28] sm:$0xff] }
 0x773   : > { %v5092_v61 = vpop.permute.xlu1 %5091  ;;  %v5614_v20 = vpack.c.bf16 %v5584_v56, %v5581_v23 }
 0x774   : > { %4975 = vst.msk [vmem:[#allocation2 + $0x46] sm:$0xff] %vm4844_vm1, %v4962_v47 }
 0x775   : > { %5125 = vst.msk [vmem:[#allocation3] sm:$0xff] %vm5124_vm11, %v5092_v61  ;;  %7139 = vmatmul.msk.bf16.vlgmr.msra.gmra.mxu3 %vm5810_vm14, %v5614_v20 }
 0x776   : > { %5193 = vst.msk [vmem:[#allocation3] sm:$0xff] %vm5192_vm12, %v5160_v63 }
 0x779   : > { %5037 = vrot.lane.b32.xlu1 %v5453_v39, %s10506_s26  ;;  %v5030_v62 = vpop.permute.xlu2 %5029  ;;  %v7739_v39 = vld [vmem:[%s10433_s2] ss:$0 sm:$0xff] }
 0x77a   : > { %5060 = vst.msk [vmem:[#allocation3 + $0x48] sm:$0xff] %vm5056_vm8, %v5030_v62  ;;  %v5256_v40 = vpop.permute.xlu0 %5255 }
 0x77b   : > { %v5162_v9 = vpop.permute.xlu1 %5161  ;;  %5285 = vst.msk [vmem:[#allocation3 + $0x50] sm:$0xff] %vm5056_vm8, %v5256_v40  ;;  %v10032_v8 = vld [vmem:[#allocation2 + $0x41] sm:$0xff] }
 0x77c   : > { %v5366_v13 = vld [vmem:[#allocation2 + $0x3f] sm:$0xff]  ;;  %5194 = vst.msk [vmem:[#allocation3 + $0x18] sm:$0xff] %vm5192_vm12, %v5162_v9  ;;  %5483 = vrot.lane.b32.xlu2 %v10032_v8, %s10506_s26 }
 0x77d   : > { %5395 = vrot.lane.b32.xlu0 %v5366_v13, %s7898_s27  ;;  %v5432_v52 = vld [vmem:[#allocation2 + $0x40] sm:$0xff]  ;;  %5351 = vst.msk [vmem:[#allocation3 + $0x50] sm:$0xff] %vm5124_vm11, %v5322_v50  ;;  %v5579_v29 = vld [vmem:[#allocation3] sm:$0xff] }
 0x77e   : > { %v5213_v14 = vld [vmem:[#allocation2 + $0x44] sm:$0xff]  ;;  %5443 = vst.msk [vmem:[#allocation3 + $0xb8] sm:$0xff] %vm4844_vm1, %v5432_v52 }
 0x77f   : > { %5224 = vst.msk [vmem:[#allocation3 + $0xc8] sm:$0xff] %vm4844_vm1, %v5213_v14  ;;  %v10051_v57 = vld [vmem:[#allocation2 + $0x42] sm:$0xff] }
 0x780   : > { %4997 = vst.msk [vmem:[#allocation3 + $0xc0] sm:$0xff] %vm4844_vm1, %v5432_v52  ;;  %v5235_v11 = vld [vmem:[#allocation2 + $0x45] sm:$0xff] }
 0x781   : > { %5103 = vrot.lane.b32.xlu1 %v9989_v43, %s10497_s30  ;;  %v5096_v15 = vpop.permute.xlu2 %5095 }
 0x782   : > { %v5386_v48 = vpop.permute.xlu0 %5385 }
 0x783   : > { %v5320_v7 = vpop.permute.xlu1 %5319  ;;  %v5582_v12 = vld [vmem:[#allocation3 + $0x18] sm:$0xff] }
 0x784   : > { %5350 = vst.msk [vmem:[#allocation3 + $0x38] sm:$0xff] %vm5124_vm11, %v5320_v7  ;;  %5547 = vrot.lane.b32.xlu2 %v5519_v18, %s10497_s30  ;;  %v5612_v53 = vpack.c.bf16 %v5582_v12, %v5579_v29 }
 0x785   : > { %5035 = vrot.lane.b32.xlu0 %v9980_v24, %s10506_s26  ;;  %5416 = vst.msk [vmem:[#allocation3 + $0x38] sm:$0xff] %vm5192_vm12, %v5386_v48  ;;  %v5301_v24 = vld [vmem:[#allocation2 + $0x46] sm:$0xff] }
 0x786   : > { %5837 = vmatmul.bf16.vlgmr.msrb.gmra.mxu1 %v5612_v53 }
 0x789   : > { %5173 = vrot.lane.b32.xlu1 %v5144_v1, %s7898_s27  ;;  %v5166_v43 = vpop.permute.xlu2 %5165 }
 0x78a   : > { %v5476_v44 = vpop.permute.xlu0 %5475 }
 0x78b   : > { %v5388_v21 = vpop.permute.xlu1 %5387  ;;  %5505 = vst.msk [vmem:[#allocation3 + $0x58] sm:$0xff] %vm5056_vm8, %v5476_v44 }
 0x78c   : > { %5417 = vst.msk [vmem:[#allocation3 + $0x50] sm:$0xff] %vm5192_vm12, %v5388_v21  ;;  %5105 = vrot.lane.b32.xlu2 %v5519_v18, %s10497_s30  ;;  %v5586_v33 = vld [vmem:[#allocation3 + $0x38] sm:$0xff] }
 0x78d   : > { %5549 = vrot.lane.b32.xlu0 %v10051_v57, %s10497_s30 }
 0x791   : > { %5331 = vrot.lane.b32.xlu1 %v5301_v24, %s10497_s30  ;;  %v5324_v58 = vpop.permute.xlu2 %5323 }
 0x792   : > { %v5540_v59 = vpop.permute.xlu0 %5539 }
 0x793   : > { %v5028_v60 = vpop.permute.xlu1 %5027  ;;  %5570 = vst.msk [vmem:[#allocation3 + $0x40] sm:$0xff] %vm5124_vm11, %v5540_v59  ;;  %v5589_v16 = vld [vmem:[#allocation3 + $0x50] sm:$0xff] }
 0x794   : > { %5059 = vst.msk [vmem:[#allocation3 + $0x30] sm:$0xff] %vm5056_vm8, %v5028_v60  ;;  %5265 = vrot.lane.b32.xlu2 %v5235_v11, %s10506_s26  ;;  %v5616_v2 = vpack.c.bf16 %v5589_v16, %v5586_v33 }
 0x795   : > { %5171 = vrot.lane.b32.xlu0 %v5143_v4, %s7898_s27  ;;  %5127 = vst.msk [vmem:[#allocation3 + $0x30] sm:$0xff] %vm5124_vm11, %v5096_v15 }
 0x796   : > { %5880 = vmatmul.bf16.gmra.mxu2 %v5616_v2 }
 0x799   : > { %v5392_v22 = vpop.permute.xlu2 %5391 }
 0x79a   : > { %v5098_v25 = vpop.permute.xlu0 %5097  ;;  %v5587_v26 = vld [vmem:[#allocation3 + $0x40] sm:$0xff] }
 0x79b   : > { %v5542_v27 = vpop.permute.xlu1 %5541  ;;  %5128 = vst.msk [vmem:[#allocation3 + $0x48] sm:$0xff] %vm5124_vm11, %v5098_v25 }
 0x79c   : > { %5571 = vst.msk [vmem:[#allocation3 + $0x58] sm:$0xff] %vm5124_vm11, %v5542_v27 }
 0x79d   : > { %5196 = vst.msk [vmem:[#allocation3 + $0x48] sm:$0xff] %vm5192_vm12, %v5166_v43 }
 0x7a1   : > { %v5032_v37 = vpop.permute.xlu2 %5031 }
 0x7a2   : > { %5061 = vst.msk [vmem:[#allocation3 + $0x60] sm:$0xff] %vm5056_vm8, %v5032_v37  ;;  %v5258_v31 = vpop.permute.xlu0 %5257 }
 0x7a3   : > { %v5164_v6 = vpop.permute.xlu1 %5163  ;;  %5286 = vst.msk [vmem:[#allocation3 + $0x68] sm:$0xff] %vm5056_vm8, %v5258_v31  ;;  %v5590_v30 = vld [vmem:[#allocation3 + $0x58] sm:$0xff] }
 0x7a4   : > { %5195 = vst.msk [vmem:[#allocation3 + $0x30] sm:$0xff] %vm5192_vm12, %v5164_v6  ;;  %v5617_v41 = vpack.c.bf16 %v5590_v30, %v5587_v26  ;;  %v5588_v49 = vld [vmem:[#allocation3 + $0x48] sm:$0xff] }
 0x7a5   : > { %5352 = vst.msk [vmem:[#allocation3 + $0x68] sm:$0xff] %vm5124_vm11, %v5324_v58 }
 0x7a6   : > { %7140 = vmatmul.msk.bf16.gmra.mxu3 %vm5810_vm14, %v5617_v41 }
 0x7a9   : > { %v5546_v19 = vpop.permute.xlu2 %5545 }
 0x7aa   : > { %v5326_v3 = vpop.permute.xlu0 %5325 }
 0x7ab   : > { %v5260_v28 = vpop.permute.xlu1 %5259  ;;  %v5585_v42 = vld [vmem:[#allocation3 + $0x30] sm:$0xff] }
 0x7ac   : > { %5287 = vst.msk [vmem:[#allocation3 + $0x80] sm:$0xff] %vm5056_vm8, %v5260_v28  ;;  %v5615_v45 = vpack.c.bf16 %v5588_v49, %v5585_v42 }
 0x7ad   : > { %5353 = vst.msk [vmem:[#allocation3 + $0x80] sm:$0xff] %vm5124_vm11, %v5326_v3 }
 0x7ae   : > { %5419 = vst.msk [vmem:[#allocation3 + $0x80] sm:$0xff] %vm5192_vm12, %v5392_v22  ;;  %5842 = vmatmul.bf16.gmra.mxu1 %v5615_v45 }
 0x7b1   : > { %v5168_v32 = vpop.permute.xlu2 %5167 }
 0x7b2   : > { %v5478_v5 = vpop.permute.xlu0 %5477 }
 0x7b3   : > { %v5390_v34 = vpop.permute.xlu1 %5389  ;;  %5506 = vst.msk [vmem:[#allocation3 + $0x70] sm:$0xff] %vm5056_vm8, %v5478_v5 }
 0x7b4   : > { %5418 = vst.msk [vmem:[#allocation3 + $0x68] sm:$0xff] %vm5192_vm12, %v5390_v34 }
 0x7b5   : > { %v5595_v54 = vld [vmem:[#allocation3 + $0x80] sm:$0xff] }
 0x7b9   : > { %v5264_v35 = vpop.permute.xlu2 %5263 }
 0x7ba   : > { %5289 = vst.msk [vmem:[#allocation3 + $0xb0] sm:$0xff] %vm5056_vm8, %v5264_v35  ;;  %v5034_v55 = vpop.permute.xlu0 %5033 }
 0x7bb   : > { %v5480_v51 = vpop.permute.xlu1 %5479  ;;  %5062 = vst.msk [vmem:[#allocation3 + $0x78] sm:$0xff] %vm5056_vm8, %v5034_v55  ;;  %v5592_v50 = vld [vmem:[#allocation3 + $0x68] sm:$0xff] }
 0x7bc   : > { %5507 = vst.msk [vmem:[#allocation3 + $0x88] sm:$0xff] %vm5056_vm8, %v5480_v51  ;;  %v5619_v0 = vpack.c.bf16 %v5595_v54, %v5592_v50 }
 0x7bd   : > { %5573 = vst.msk [vmem:[#allocation3 + $0x88] sm:$0xff] %vm5124_vm11, %v5546_v19 }
 0x7be   : > { %5885 = vmatmul.bf16.gmra.mxu2 %v5619_v0 }
 0x7c1   : > { %v5394_v20 = vpop.permute.xlu2 %5393 }
 0x7c2   : > { %v5100_v36 = vpop.permute.xlu0 %5099 }
 0x7c3   : > { %v5544_v17 = vpop.permute.xlu1 %5543  ;;  %5129 = vst.msk [vmem:[#allocation3 + $0x60] sm:$0xff] %vm5124_vm11, %v5100_v36  ;;  %v10126_v36 = vld [vmem:[%s10435_s4] ss:$0 sm:$0xff] }
 0x7c4   : > { %5572 = vst.msk [vmem:[#allocation3 + $0x70] sm:$0xff] %vm5124_vm11, %v5544_v17  ;;  %v5596_v23 = vld [vmem:[#allocation3 + $0x88] sm:$0xff] }
 0x7c5   : > { %5197 = vst.msk [vmem:[#allocation3 + $0x60] sm:$0xff] %vm5192_vm12, %v5168_v32 }
 0x7c9   : > { %v4807_v38 = vpop.f32.mrf.mxu2 }
 0x7ca   : > { %v4808_v10 = vadd.f32 %v7739_v39, %v4807_v38  ;;  %v5170_v46 = vpop.permute.xlu0 %5169 }
 0x7cb   : > { %v5102_v47 = vpop.permute.xlu1 %5101  ;;  %v5593_v63 = vld [vmem:[#allocation3 + $0x70] sm:$0xff] }
 0x7cc   : > { %v4842_v56 = vmax.f32 %v4808_v10, 0.0  ;;  %5130 = vst.msk [vmem:[#allocation3 + $0x78] sm:$0xff] %vm5124_vm11, %v5102_v47  ;;  %v5620_v61 = vpack.c.bf16 %v5596_v23, %v5593_v63  ;;  %v5591_v15 = vld [vmem:[#allocation3 + $0x60] sm:$0xff] }
 0x7cd   : > { %5198 = vst.msk [vmem:[#allocation3 + $0x78] sm:$0xff] %vm5192_vm12, %v5170_v46 }
 0x7ce   : > { %4875 = vst.msk [vmem:[#allocation4 + $0xf0] sm:$0xff] %vm4844_vm1, %v4842_v56  ;;  %7141 = vmatmul.msk.bf16.gmra.mxu3 %vm5810_vm14, %v5620_v61 }
 0x7d1   : > { %v4809_v62 = vpop.f32.mrf.mxu2 }
 0x7d2   : > { %v4810_v40 = vadd.f32 %v7739_v39, %v4809_v62  ;;  %v5328_v9 = vpop.permute.xlu0 %5327 }
 0x7d3   : > { %v5262_v13 = vpop.permute.xlu1 %5261 }
 0x7d4   : > { %v4843_v52 = vmax.f32 %v4810_v40, 0.0  ;;  %5288 = vst.msk [vmem:[#allocation3 + $0x98] sm:$0xff] %vm5056_vm8, %v5262_v13  ;;  %v4802_v14 = vpop.f32.mrf.mxu1  ;;  %v5594_v48 = vld [vmem:[#allocation3 + $0x78] sm:$0xff] }
 0x7d5   : > { %5354 = vst.msk [vmem:[#allocation3 + $0x98] sm:$0xff] %vm5124_vm11, %v5328_v9  ;;  %v4803_v7 = vadd.f32 %v7739_v39, %v4802_v14  ;;  %v5618_v18 = vpack.c.bf16 %v5594_v48, %v5591_v15 }
 0x7d6   : > { %4877 = vst.msk [vmem:[#allocation4 + $0xf8] sm:$0xf] %vm4876_vm15, %v4843_v52  ;;  %v5484_v29 = vpop.permute.xlu2 %5483  ;;  %v5145_v52 = vld [vmem:[#allocation2 + $0x43] sm:$0xff] }
 0x7d7   : > { %5420 = vst.msk [vmem:[#allocation3 + $0x98] sm:$0xff] %vm5192_vm12, %v5394_v20  ;;  %v4840_v12 = vmax.f32 %v4803_v7, 0.0  ;;  %5847 = vmatmul.bf16.gmra.mxu1 %v5618_v18 }
 0x7d8   : > { %5509 = vst.msk [vmem:[#allocation3 + $0xb8] sm:$0xff] %vm5056_vm8, %v5484_v29 }
 0x7d9   : > { %4873 = vst.msk [vmem:[#allocation4 + $0xe0] sm:$0xff] %vm4844_vm1, %v4840_v12 }
 0x7db   : > { %v5330_v53 = vpop.permute.xlu1 %5329 }
 0x7dc   : > { %5355 = vst.msk [vmem:[#allocation3 + $0xb0] sm:$0xff] %vm5124_vm11, %v5330_v53  ;;  %v4804_v1 = vpop.f32.mrf.mxu1 }
 0x7dd   : > { %v4898_v43 = vld [vmem:[#allocation4 + $0xf0] ss:$3 sm:$0xf]  ;;  %v4920_v44 = vld [vmem:[#allocation4 + $0xf1] ss:$3 sm:$0xf]  ;;  %v4805_v21 = vadd.f32 %v7739_v39, %v4804_v1 }
 0x7de   : > { %v4953_v24 = vmax.f32 %v4898_v43, %v4920_v44  ;;  %v5548_v58 = vpop.permute.xlu2 %5547  ;;  %v4942_v59 = vld [vmem:[#allocation4 + $0xf2] ss:$3 sm:$0xf] }
 0x7df   : > { %v4841_v4 = vmax.f32 %v4805_v21, 0.0  ;;  %v5598_v42 = vld [vmem:[#allocation3 + $0x98] sm:$0xff] }
 0x7e0   : > { %v4964_v60 = vmax.f32 %v4953_v24, %v4942_v59 }
 0x7e1   : > { %4874 = vst.msk [vmem:[#allocation4 + $0xe8] sm:$0xff] %vm4844_vm1, %v4841_v4 }
 0x7e2   : > { %4977 = vst.msk [vmem:[#allocation2 + $0x56] sm:$0xf] %vm4876_vm15, %v4964_v60 }
 0x7e3   : > { %v5482_v11 = vpop.permute.xlu1 %5481 }
 0x7e4   : > { %5508 = vst.msk [vmem:[#allocation3 + $0xa0] sm:$0xff] %vm5056_vm8, %v5482_v11 }
 0x7e5   : > { %5574 = vst.msk [vmem:[#allocation3 + $0xa0] sm:$0xff] %vm5124_vm11, %v5548_v58  ;;  %v5523_v58 = vld [vmem:[#allocation2 + $0x5a] sm:$0x3f] }
 0x7e6   : > { %v5106_v33 = vpop.permute.xlu2 %5105 }
 0x7e8   : > { %v4896_v16 = vld [vmem:[#allocation4 + $0xd8] ss:$3 sm:$0xff]  ;;  %v4918_v2 = vld [vmem:[#allocation4 + $0xd9] ss:$3 sm:$0xff]  ;;  %v4940_v25 = vld [vmem:[#allocation4 + $0xda] ss:$3 sm:$0xff] }
 0x7e9   : > { %v4952_v22 = vmax.f32 %v4896_v16, %v4918_v2  ;;  %v5435_v27 = vld [vmem:[#allocation2 + $0x58] sm:$0x3f] }
 0x7ea   : > { %5446 = vst.msk [vmem:[#allocation3 + $0x100] sm:$0x3f] %vm4999_vm0, %v5435_v27  ;;  %v5876_v17 = vpop.f32.mrf.mxu2  ;;  %v5303_v44 = vld [vmem:[#allocation2 + $0x56] sm:$0x3f] }
 0x7eb   : > { %v4963_v37 = vmax.f32 %v4952_v22, %v4940_v25  ;;  %v5038_v31 = vpop.permute.xlu1 %5037  ;;  %v5457_v4 = vld [vmem:[#allocation2 + $0x59] sm:$0x3f] }
 0x7ec   : > { %5064 = vst.msk [vmem:[#allocation3 + $0xa8] sm:$0xff] %vm5056_vm8, %v5038_v31  ;;  %v5599_v56 = vld [vmem:[#allocation3 + $0xa0] sm:$0xff] }
 0x7ed   : > { %4976 = vst.msk [vmem:[#allocation2 + $0x4e] sm:$0xff] %vm4844_vm1, %v4963_v37 }
 0x7ee   : > { %5132 = vst.msk [vmem:[#allocation3 + $0xa8] sm:$0xff] %vm5124_vm11, %v5106_v33  ;;  %v5266_v6 = vpop.permute.xlu2 %5265 }
 0x7ef   : > { %v5396_v26 = vpop.permute.xlu0 %5395  ;;  %5290 = vst.msk [vmem:[#allocation3 + $0xc8] sm:$0xff] %vm5056_vm8, %v5266_v6 }
 0x7f0   : > { %5421 = vst.msk [vmem:[#allocation3 + $0xb0] sm:$0xff] %vm5192_vm12, %v5396_v26 }
 0x7f2   : > { %v5878_v14 = vpop.f32.mrf.mxu2 }
 0x7f3   : > { %v5104_v30 = vpop.permute.xlu1 %5103 }
 0x7f4   : > { %v5302_v41 = vld [vmem:[#allocation2 + $0x4e] sm:$0xff] }
 0x7f5   : > { %v5368_v19 = vld [vmem:[#allocation2 + $0x4f] sm:$0xff]  ;;  %5333 = vrot.lane.b32.xlu2 %v5302_v41, %s10497_s30  ;;  %v5367_v50 = vld [vmem:[#allocation2 + $0x47] sm:$0xff] }
 0x7f6   : > { %v5236_v3 = vld [vmem:[#allocation2 + $0x4d] sm:$0xff]  ;;  %5399 = vrot.lane.b32.xlu1 %v5368_v19, %s7898_s27  ;;  %v5237_v24 = vld [vmem:[#allocation2 + $0x55] sm:$0x3f] }
 0x7f7   : > { %5267 = vrot.lane.b32.xlu0 %v5236_v3, %s10506_s26  ;;  %v5036_v28 = vpop.permute.xlu0 %5035  ;;  %v5601_v49 = vld [vmem:[#allocation3 + $0xb0] sm:$0xff]  ;;  %v5433_v32 = vld [vmem:[#allocation2 + $0x48] sm:$0xff]  ;;  %v5434_v34 = vld [vmem:[#allocation2 + $0x50] sm:$0xff] }
 0x7f8   : > { %5063 = vst.msk [vmem:[#allocation3 + $0x90] sm:$0xff] %vm5056_vm8, %v5036_v28  ;;  %v5622_v45 = vpack.c.bf16 %v5601_v49, %v5598_v42  ;;  %v5214_v5 = vld [vmem:[#allocation2 + $0x4c] sm:$0xff]  ;;  %v5215_v54 = vld [vmem:[#allocation2 + $0x54] sm:$0x3f]  ;;  %v5914_v46 = vpop.f32.mrf.mxu3 }
 0x7f9   : > { %5131 = vst.msk [vmem:[#allocation3 + $0x90] sm:$0xff] %vm5124_vm11, %v5104_v30  ;;  %v4988_v55 = vld [vmem:[#allocation2 + $0x50] sm:$0x3f] }
 0x7fa   : > { %5444 = vst.msk [vmem:[#allocation3 + $0xd0] sm:$0xff] %vm4844_vm1, %v5433_v32  ;;  %5890 = vmatmul.bf16.gmra.mxu2 %v5622_v45  ;;  %v5455_v51 = vld [vmem:[#allocation2 + $0x49] sm:$0xff]  ;;  %v5522_v10 = vld [vmem:[#allocation2 + $0x52] sm:$0xff] }
 0x7fb   : > { %4998 = vst.msk [vmem:[#allocation3 + $0xd8] sm:$0xff] %vm4844_vm1, %v5433_v32  ;;  %v5174_v35 = vpop.permute.xlu1 %5173  ;;  %v5456_v47 = vld [vmem:[#allocation2 + $0x51] sm:$0xff] }
 0x7fc   : > { %5225 = vst.msk [vmem:[#allocation3 + $0xe0] sm:$0xff] %vm4844_vm1, %v5214_v5  ;;  %v5521_v15 = vld [vmem:[#allocation2 + $0x4a] sm:$0xff]  ;;  %v5147_v59 = vld [vmem:[#allocation2 + $0x53] sm:$0x3f] }
 0x7fd   : > { %5200 = vst.msk [vmem:[#allocation3 + $0xa8] sm:$0xff] %vm5192_vm12, %v5174_v35  ;;  %5485 = vrot.lane.b32.xlu2 %v5455_v51, %s10506_s26  ;;  %v5146_v43 = vld [vmem:[#allocation2 + $0x4b] sm:$0xff] }
 0x7fe   : > { %5039 = vrot.lane.b32.xlu1 %v10032_v8, %s10506_s26  ;;  %5445 = vst.msk [vmem:[#allocation3 + $0xe8] sm:$0xff] %vm4844_vm1, %v5434_v34  ;;  %vm5954_vm1 = vcmask 523264   ;;  %v5011_v21 = vld [vmem:[#allocation2 + $0x51] sm:$0x3f]  ;;  %v10160_v35 = vld [vmem:[#allocation2 + $0x105] sm:$0xff] }
 0x7ff   : > { %5397 = vrot.lane.b32.xlu0 %v5367_v50, %s7898_s27  ;;  %v5550_v0 = vpop.permute.xlu0 %5549  ;;  %5000 = vst.msk [vmem:[#allocation3 + $0xf0] sm:$0x3f] %vm4999_vm0, %v4988_v55  ;;  %v5079_v2 = vld [vmem:[#allocation2 + $0x52] sm:$0x3f] }
 0x800   : > { %5575 = vst.msk [vmem:[#allocation3 + $0xb8] sm:$0xff] %vm5124_vm11, %v5550_v0  ;;  %v5916_v29 = vpop.f32.mrf.mxu3 }
 0x801   : > { %5226 = vst.msk [vmem:[#allocation3 + $0xf8] sm:$0x3f] %vm4999_vm0, %v5215_v54 }
 0x803   : > { %v5332_v8 = vpop.permute.xlu1 %5331  ;;  %v5838_v38 = vpop.f32.mrf.mxu1 }
 0x804   : > { %5356 = vst.msk [vmem:[#allocation3 + $0xc8] sm:$0xff] %vm5124_vm11, %v5332_v8  ;;  %v5839_v39 = vadd.f32 %v10126_v36, %v5838_v38  ;;  %v5600_v18 = vld [vmem:[#allocation3 + $0xa8] sm:$0xff] }
 0x805   : > { %5041 = vrot.lane.b32.xlu2 %v5455_v51, %s10506_s26 }
 0x806   : > { %5553 = vrot.lane.b32.xlu1 %v5522_v10, %s10497_s30  ;;  %v5877_v63 = vadd.f32 %v5876_v17, %v5839_v39 }
 0x807   : > { %5487 = vrot.lane.b32.xlu0 %v5456_v47, %s10506_s26  ;;  %v5172_v23 = vpop.permute.xlu0 %5171  ;;  %v5602_v61 = vld [vmem:[#allocation3 + $0xb8] sm:$0xff] }
 0x808   : > { %5199 = vst.msk [vmem:[#allocation3 + $0x90] sm:$0xff] %vm5192_vm12, %v5172_v23  ;;  %v5623_v20 = vpack.c.bf16 %v5602_v61, %v5599_v56  ;;  %v5915_v62 = vadd.f32 %v5914_v46, %v5877_v63 }
 0x80a   : > { %7142 = vmatmul.msk.bf16.gmra.mxu3 %vm5810_vm14, %v5623_v20  ;;  %v5943_v40 = vmax.f32 %v5915_v62, 0.0 }
 0x80b   : > { %v5840_v9 = vpop.f32.mrf.mxu1 }
 0x80c   : > { %5955 = vst.msk [vmem:[#allocation4] sm:$0xff] %vm5954_vm1, %v5943_v40  ;;  %v5841_v13 = vadd.f32 %v10126_v36, %v5840_v9 }
 0x80d   : > { %5107 = vrot.lane.b32.xlu2 %v10051_v57, %s10497_s30  ;;  %v5369_v57 = vld [vmem:[#allocation2 + $0x57] sm:$0x3f] }
 0x80e   : > { %5175 = vrot.lane.b32.xlu1 %v5145_v52, %s7898_s27  ;;  %v5879_v48 = vadd.f32 %v5878_v14, %v5841_v13 }
 0x80f   : > { %5551 = vrot.lane.b32.xlu0 %v5521_v15, %s10497_s30  ;;  %v5597_v7 = vld [vmem:[#allocation3 + $0x90] sm:$0xff] }
 0x810   : > { %v5621_v12 = vpack.c.bf16 %v5600_v18, %v5597_v7  ;;  %v5917_v53 = vadd.f32 %v5916_v29, %v5879_v48 }
 0x812   : > { %5852 = vmatmul.bf16.gmra.mxu1 %v5621_v12  ;;  %v5944_v1 = vmax.f32 %v5917_v53, 0.0 }
 0x814   : > { %5956 = vst.msk [vmem:[#allocation4 + $0x8] sm:$0xff] %vm5954_vm1, %v5944_v1 }
 0x815   : > { %5177 = vrot.lane.b32.xlu2 %v5146_v43, %s7898_s27 }
 0x816   : > { %5335 = vrot.lane.b32.xlu1 %v5303_v44, %s10497_s30 }
 0x817   : > { %5109 = vrot.lane.b32.xlu0 %v5521_v15, %s10497_s30 }
 0x819   : > { %v5881_v60 = vpop.f32.mrf.mxu2 }
 0x81d   : > { %5401 = vrot.lane.b32.xlu2 %v5369_v57, %s7898_s27 }
 0x81e   : > { %5043 = vrot.lane.b32.xlu1 %v5011_v21, %s10506_s26 }
 0x81f   : > { %5269 = vrot.lane.b32.xlu0 %v5237_v24, %s10506_s26 }
 0x821   : > { %v5883_v6 = vpop.f32.mrf.mxu2 }
 0x825   : > { %5555 = vrot.lane.b32.xlu2 %v5523_v58, %s10497_s30 }
 0x826   : > { %5179 = vrot.lane.b32.xlu1 %v5147_v59, %s7898_s27  ;;  %s6916_s27 = scalar_lea.sflag [#allocation7], %s519_s18 }
 0x827   : > { %5489 = vrot.lane.b32.xlu0 %v5457_v4, %s10506_s26 }
 0x829   : > { %v5919_v16 = vpop.f32.mrf.mxu3 }
 0x82b   : > { %v5843_v11 = vpop.f32.mrf.mxu1 }
 0x82c   : > { %v5844_v33 = vadd.f32 %v10126_v36, %v5843_v11 }
 0x82e   : > { %v5882_v22 = vadd.f32 %v5881_v60, %v5844_v33 }
 0x82f   : > { %5111 = vrot.lane.b32.xlu0 %v5079_v2, %s10497_s30  ;;  %v7492_v2 = vld [vmem:[%s10436_s5 + $0x58] sm:$0xff] }
 0x830   : > { %v5920_v25 = vadd.f32 %v5919_v16, %v5882_v22  ;;  %6177 = vmatpush.bf16.msra.mxu1 %v7492_v2 }
 0x831   : > { %v5921_v30 = vpop.f32.mrf.mxu3 }
 0x832   : > { %v5945_v27 = vmax.f32 %v5920_v25, 0.0 }
 0x833   : > { %v5845_v37 = vpop.f32.mrf.mxu1 }
 0x834   : > { %5957 = vst.msk [vmem:[#allocation4 + $0x10] sm:$0xff] %vm5954_vm1, %v5945_v27  ;;  %v5846_v31 = vadd.f32 %v10126_v36, %v5845_v37  ;;  %v7491_v27 = vld [vmem:[%s10436_s5 + $0x50] sm:$0xff] }
 0x835   : > { %6178 = vmatpush.bf16.msra.mxu1 %v7491_v27 }
 0x836   : > { %v5884_v26 = vadd.f32 %v5883_v6, %v5846_v31 }
 0x838   : > { %v5922_v41 = vadd.f32 %v5921_v30, %v5884_v26 }
 0x83a   : > { %v5946_v19 = vmax.f32 %v5922_v41, 0.0 }
 0x83b   : > { %v5967_v3 = vld [vmem:[#allocation4] ss:$3 sm:$0xff]  ;;  %v5971_v28 = vld [vmem:[#allocation4 + $0x1] ss:$3 sm:$0xff]  ;;  %v5975_v49 = vld [vmem:[#allocation4 + $0x2] ss:$3 sm:$0xff] }
 0x83c   : > { %v5979_v42 = vmax.f32 %v5967_v3, %v5971_v28  ;;  %5958 = vst.msk [vmem:[#allocation4 + $0x18] sm:$0xff] %vm5954_vm1, %v5946_v19 }
 0x83e   : > { %v5983_v45 = vmax.f32 %v5979_v42, %v5975_v49  ;;  %v7490_v42 = vld [vmem:[%s10436_s5 + $0x48] sm:$0xff] }
 0x83f   : > { %6179 = vmatpush.bf16.msra.mxu1 %v7490_v42 }
 0x840   : > { %5989 = vst.msk [vmem:[#allocation2 + $0x2] sm:$0xff] %vm5954_vm1, %v5983_v45 }
 0x841   : > { %v5886_v51 = vpop.f32.mrf.mxu2 }
 0x847   : > { %v6002_v32 = vld [vmem:[#allocation2 + $0x1] sm:$0xff] }
 0x848   : > { %v5994_v5 = vld [vmem:[#allocation2] sm:$0xff]  ;;  %6010 = vrot.lane.b32.xlu2 %v6002_v32, %s10497_s30 }
 0x849   : > { %v6028_v34 = vld [vmem:[#allocation2 + $0x2] sm:$0xff]  ;;  %5998 = vst.msk [vmem:[#allocation3] sm:$0xff] %vm5954_vm1, %v5994_v5  ;;  %v5888_v47 = vpop.f32.mrf.mxu2 }
 0x84a   : > { %6210 = vst [vmem:[#allocation2] sm:$0x3] %v10160_v35  ;;  %v7489_v5 = vld [vmem:[%s10436_s5 + $0x40] sm:$0xff] }
 0x84b   : > { %6032 = vst.msk [vmem:[#allocation3 + $0x8] sm:$0xff] %vm5954_vm1, %v6028_v34  ;;  %6180 = vmatpush.bf16.msra.mxu1 %v7489_v5 }
 0x84f   : > { %v5334_v55 = vpop.permute.xlu2 %5333 }
 0x851   : > { %v5924_v0 = vpop.f32.mrf.mxu3 }
 0x854   : > { %v5848_v50 = vpop.f32.mrf.mxu1 }
 0x855   : > { %v5849_v54 = vadd.f32 %v10126_v36, %v5848_v50 }
 0x857   : > { %v5887_v17 = vadd.f32 %v5886_v51, %v5849_v54  ;;  %v5486_v8 = vpop.permute.xlu2 %5485 }
 0x858   : > { %5510 = vst.msk [vmem:[#allocation3 + $0xd0] sm:$0xff] %vm5056_vm8, %v5486_v8 }
 0x859   : > { %v5925_v38 = vadd.f32 %v5924_v0, %v5887_v17  ;;  %v5926_v56 = vpop.f32.mrf.mxu3 }
 0x85b   : > { %v5947_v39 = vmax.f32 %v5925_v38, 0.0 }
 0x85c   : > { %v5850_v10 = vpop.f32.mrf.mxu1 }
 0x85d   : > { %5959 = vst.msk [vmem:[#allocation4 + $0x20] sm:$0xff] %vm5954_vm1, %v5947_v39  ;;  %v5851_v46 = vadd.f32 %v10126_v36, %v5850_v10  ;;  %v7488_v39 = vld [vmem:[%s10436_s5 + $0x38] sm:$0xff] }
 0x85e   : > { %6154 = vmatpush.bf16.msrb.mxu3 %v7488_v39 }
 0x85f   : > { %v5889_v63 = vadd.f32 %v5888_v47, %v5851_v46  ;;  %v5042_v23 = vpop.permute.xlu2 %5041  ;;  %v7487_v46 = vld [vmem:[%s10436_s5 + $0x30] sm:$0xff] }
 0x860   : > { %5066 = vst.msk [vmem:[#allocation3 + $0xd8] sm:$0xff] %vm5056_vm8, %v5042_v23 }
 0x861   : > { %v5927_v61 = vadd.f32 %v5926_v56, %v5889_v63 }
 0x862   : > { %6155 = vmatpush.bf16.msrb.mxu3 %v7487_v46 }
 0x863   : > { %v5948_v20 = vmax.f32 %v5927_v61, 0.0 }
 0x865   : > { %5960 = vst.msk [vmem:[#allocation4 + $0x28] sm:$0xff] %vm5954_vm1, %v5948_v20  ;;  %v7486_v20 = vld [vmem:[%s10436_s5 + $0x28] sm:$0xff] }
 0x866   : > { %6156 = vmatpush.bf16.msrb.mxu3 %v7486_v20 }
 0x867   : > { %v5108_v18 = vpop.permute.xlu2 %5107 }
 0x868   : > { %v5400_v62 = vpop.permute.xlu1 %5399 }
 0x869   : > { %v5268_v40 = vpop.permute.xlu0 %5267 }
 0x86a   : > { %5291 = vst.msk [vmem:[#allocation3 + $0xe0] sm:$0xff] %vm5056_vm8, %v5268_v40 }
 0x86b   : > { %5357 = vst.msk [vmem:[#allocation3 + $0xe0] sm:$0xff] %vm5124_vm11, %v5334_v55 }
 0x86c   : > { %5423 = vst.msk [vmem:[#allocation3 + $0xe0] sm:$0xff] %vm5192_vm12, %v5400_v62  ;;  %v5968_v9 = vld [vmem:[#allocation4 + $0x18] ss:$3 sm:$0xff]  ;;  %v5972_v13 = vld [vmem:[#allocation4 + $0x19] ss:$3 sm:$0xff]  ;;  %v7485_v62 = vld [vmem:[%s10436_s5 + $0x20] sm:$0xff] }
 0x86d   : > { %v5980_v52 = vmax.f32 %v5968_v9, %v5972_v13  ;;  %v5976_v14 = vld [vmem:[#allocation4 + $0x1a] ss:$3 sm:$0xff]  ;;  %6157 = vmatpush.bf16.msrb.mxu3 %v7485_v62 }
 0x86e   : > { %v7484_v13 = vld [vmem:[%s10436_s5 + $0x18] sm:$0xff] }
 0x86f   : > { %v5984_v15 = vmax.f32 %v5980_v52, %v5976_v14  ;;  %v5178_v59 = vpop.permute.xlu2 %5177  ;;  %v7483_v52 = vld [vmem:[%s10436_s5 + $0x10] sm:$0xff] }
 0x870   : > { %v5040_v48 = vpop.permute.xlu1 %5039 }
 0x871   : > { %5065 = vst.msk [vmem:[#allocation3 + $0xc0] sm:$0xff] %vm5056_vm8, %v5040_v48  ;;  %v5398_v7 = vpop.permute.xlu0 %5397  ;;  %6158 = vmatpush.bf16.msrb.mxu3 %v7484_v13 }
 0x872   : > { %5990 = vst.msk [vmem:[#allocation2 + $0xa] sm:$0xff] %vm5954_vm1, %v5984_v15  ;;  %v6037_v15 = vld [vmem:[#allocation3 + $0x8] sm:$0xff] }
 0x873   : > { %5133 = vst.msk [vmem:[#allocation3 + $0xc0] sm:$0xff] %vm5124_vm11, %v5108_v18  ;;  %v5607_v57 = vld [vmem:[#allocation3 + $0xe0] sm:$0xff]  ;;  %v7481_v18 = vld [vmem:[%s10436_s5] sm:$0xff] }
 0x874   : > { %5422 = vst.msk [vmem:[#allocation3 + $0xc8] sm:$0xff] %vm5192_vm12, %v5398_v7  ;;  %v7482_v7 = vld [vmem:[%s10436_s5 + $0x8] sm:$0xff] }
 0x875   : > { %6159 = vmatpush.bf16.msrb.mxu3 %v7483_v52 }
 0x877   : > { %v5402_v37 = vpop.permute.xlu2 %5401 }
 0x878   : > { %v5554_v29 = vpop.permute.xlu1 %5553 }
 0x879   : > { %v5488_v12 = vpop.permute.xlu0 %5487  ;;  %v6003_v53 = vld [vmem:[#allocation2 + $0x9] sm:$0xff]  ;;  %6160 = vmatpush.bf16.msrb.mxu3 %v7482_v7 }
 0x87a   : > { %v6029_v1 = vld [vmem:[#allocation2 + $0xa] sm:$0xff]  ;;  %5511 = vst.msk [vmem:[#allocation3 + $0xe8] sm:$0xff] %vm5056_vm8, %v5488_v12  ;;  %6012 = vrot.lane.b32.xlu0 %v6003_v53, %s10497_s30  ;;  %vm6026_vm8 = vcmask 1046016  }
 0x87b   : > { %v5995_v43 = vld [vmem:[#allocation2 + $0x8] sm:$0xff]  ;;  %5577 = vst.msk [vmem:[#allocation3 + $0xe8] sm:$0xff] %vm5124_vm11, %v5554_v29  ;;  %v5604_v44 = vld [vmem:[#allocation3 + $0xc8] sm:$0xff] }
 0x87c   : > { %v5625_v21 = vpack.c.bf16 %v5607_v57, %v5604_v44  ;;  %6033 = vst.msk [vmem:[#allocation3 + $0x20] sm:$0xff] %vm5954_vm1, %v6029_v1 }
 0x87d   : > { %5999 = vst.msk [vmem:[#allocation3 + $0x18] sm:$0xff] %vm5954_vm1, %v5995_v43  ;;  %v5891_v22 = vpop.f32.mrf.mxu2  ;;  %6161 = vmatpush.bf16.msrb.mxu3 %v7481_v18 }
 0x87e   : > { %5895 = vmatmul.bf16.gmra.mxu2 %v5625_v21  ;;  %6211 = vst [vmem:[#allocation2 + $0xc] sm:$0x3] %v10160_v35 }
 0x87f   : > { %v5556_v55 = vpop.permute.xlu2 %5555 }
 0x880   : > { %v5176_v24 = vpop.permute.xlu1 %5175 }
 0x881   : > { %5201 = vst.msk [vmem:[#allocation3 + $0xc0] sm:$0xff] %vm5192_vm12, %v5176_v24  ;;  %v5552_v58 = vpop.permute.xlu0 %5551 }
 0x882   : > { %5576 = vst.msk [vmem:[#allocation3 + $0xd0] sm:$0xff] %vm5124_vm11, %v5552_v58  ;;  %v5608_v33 = vld [vmem:[#allocation3 + $0xe8] sm:$0xff] }
 0x883   : > { %v6039_v14 = vld [vmem:[#allocation3 + $0x20] sm:$0xff] }
 0x884   : > { %v6045_v48 = vpack.c.bf16 %v6039_v14, %v6037_v15 }
 0x885   : > { %v5893_v51 = vpop.f32.mrf.mxu2 }
 0x888   : > { %v5336_v4 = vpop.permute.xlu1 %5335  ;;  %v5603_v19 = vld [vmem:[#allocation3 + $0xc0] sm:$0xff] }
 0x889   : > { %v5110_v60 = vpop.permute.xlu0 %5109  ;;  %v5605_v11 = vld [vmem:[#allocation3 + $0xd0] sm:$0xff] }
 0x88a   : > { %5134 = vst.msk [vmem:[#allocation3 + $0xd8] sm:$0xff] %vm5124_vm11, %v5110_v60  ;;  %v5626_v16 = vpack.c.bf16 %v5608_v33, %v5605_v11 }
 0x88b   : > { %5202 = vst.msk [vmem:[#allocation3 + $0xd8] sm:$0xff] %vm5192_vm12, %v5178_v59 }
 0x88c   : > { %7143 = vmatmul.msk.bf16.gmra.mxu3 %vm5810_vm14, %v5626_v16 }
 0x88d   : > { %v5929_v26 = vpop.f32.mrf.mxu3 }
 0x88f   : > { %v5853_v25 = vpop.f32.mrf.mxu1 }
 0x890   : > { %v5854_v31 = vadd.f32 %v10126_v36, %v5853_v25  ;;  %v5044_v6 = vpop.permute.xlu1 %5043 }
 0x891   : > { %5068 = vst.msk [vmem:[#allocation3 + $0xf0] sm:$0x3f] %vm5067_vm13, %v5044_v6  ;;  %v5270_v30 = vpop.permute.xlu0 %5269 }
 0x892   : > { %v5892_v41 = vadd.f32 %v5891_v22, %v5854_v31  ;;  %5292 = vst.msk [vmem:[#allocation3 + $0xf8] sm:$0x3f] %vm5067_vm13, %v5270_v30  ;;  %v5606_v3 = vld [vmem:[#allocation3 + $0xd8] sm:$0xff] }
 0x893   : > { %5358 = vst.msk [vmem:[#allocation3 + $0xf8] sm:$0x3f] %vm5135_vm2, %v5336_v4  ;;  %v5624_v28 = vpack.c.bf16 %v5606_v3, %v5603_v19 }
 0x894   : > { %v5930_v49 = vadd.f32 %v5929_v26, %v5892_v41  ;;  %5424 = vst.msk [vmem:[#allocation3 + $0xf8] sm:$0x3f] %vm5203_vm3, %v5402_v37 }
 0x895   : > { %5857 = vmatmul.bf16.gmra.mxu1 %v5624_v28  ;;  %v5931_v0 = vpop.f32.mrf.mxu3 }
 0x896   : > { %v5949_v45 = vmax.f32 %v5930_v49, 0.0 }
 0x897   : > { %v5855_v32 = vpop.f32.mrf.mxu1 }
 0x898   : > { %5961 = vst.msk [vmem:[#allocation4 + $0x30] sm:$0xff] %vm5954_vm1, %v5949_v45  ;;  %v5856_v34 = vadd.f32 %v10126_v36, %v5855_v32  ;;  %v5180_v63 = vpop.permute.xlu1 %5179 }
 0x899   : > { %v5490_v50 = vpop.permute.xlu0 %5489 }
 0x89a   : > { %v5894_v54 = vadd.f32 %v5893_v51, %v5856_v34  ;;  %5512 = vst.msk [vmem:[#allocation3 + $0x100] sm:$0x3f] %vm5067_vm13, %v5490_v50 }
 0x89b   : > { %5578 = vst.msk [vmem:[#allocation3 + $0x100] sm:$0x3f] %vm5135_vm2, %v5556_v55  ;;  %v5610_v17 = vld [vmem:[#allocation3 + $0xf8] sm:$0x3f] }
 0x89c   : > { %v5932_v8 = vadd.f32 %v5931_v0, %v5894_v54  ;;  %v5628_v38 = vpack.c.bf16 %v5610_v17, %v5610_v17 }
 0x89e   : > { %v5950_v10 = vmax.f32 %v5932_v8, 0.0  ;;  %5900 = vmatmul.bf16.gmra.mxu2 %v5628_v38 }
 0x8a0   : > { %5962 = vst.msk [vmem:[#allocation4 + $0x38] sm:$0xff] %vm5954_vm1, %v5950_v10 }
 0x8a1   : > { %v5112_v47 = vpop.permute.xlu0 %5111 }
 0x8a2   : > { %5136 = vst.msk [vmem:[#allocation3 + $0xf0] sm:$0x3f] %vm5135_vm2, %v5112_v47  ;;  %v5611_v23 = vld [vmem:[#allocation3 + $0x100] sm:$0x3f]  ;;  %v6011_v56 = vpop.permute.xlu2 %6010  ;;  %v10257_v47 = vld [vmem:[%s10437_s6] ss:$0 sm:$0xff] }
 0x8a3   : > { %5204 = vst.msk [vmem:[#allocation3 + $0xf0] sm:$0x3f] %vm5203_vm3, %v5180_v63  ;;  %v5629_v61 = vpack.c.bf16 %v5611_v23, %v5611_v23 }
 0x8a4   : > { %6023 = vst.msk [vmem:[#allocation3] sm:$0xff] %vm6022_vm4, %v6011_v56 }
 0x8a5   : > { %7144 = vmatmul.msk.bf16.gmra.mxu3 %vm5810_vm14, %v5629_v61 }
 0x8aa   : > { %v5609_v40 = vld [vmem:[#allocation3 + $0xf0] sm:$0x3f] }
 0x8ab   : > { %v5627_v9 = vpack.c.bf16 %v5609_v40, %v5609_v40  ;;  %v6036_v12 = vld [vmem:[#allocation3] sm:$0xff] }
 0x8ad   : > { %5862 = vmatmul.bf16.gmra.mxu1 %v5627_v9 }
 0x8bd   : > { %7193 = vmatmul.msk.bf16.vlgmr.msra.gmra.mxu1 %vm5954_vm1, %v6045_v48 }
 0x8ec   : > { %v6013_v29 = vpop.permute.xlu0 %6012 }
 0x8ed   : > { %6024 = vst.msk [vmem:[#allocation3 + $0x18] sm:$0xff] %vm6022_vm4, %v6013_v29  ;;  %v7500_v29 = vld [vmem:[%s10438_s7 + $0x38] sm:$0xff] }
 0x8ee   : > { %6431 = vmatpush.bf16.msra.mxu2 %v7500_v29  ;;  %v7538_v29 = vld [vmem:[#allocation8 + $0xa8] sm:$0xff] }
 0x8f4   : > { %v6038_v53 = vld [vmem:[#allocation3 + $0x18] sm:$0xff] }
 0x8f5   : > { %v6044_v1 = vpack.c.bf16 %v6038_v53, %v6036_v12  ;;  %v7499_v12 = vld [vmem:[%s10438_s7 + $0x30] sm:$0xff]  ;;  %v7498_v53 = vld [vmem:[%s10438_s7 + $0x28] sm:$0xff] }
 0x8f6   : > { %6432 = vmatpush.bf16.msra.mxu2 %v7499_v12 }
 0x8f7   : > { %6162 = vmatmul.bf16.vlgmr.msrb.gmra.mxu3 %v6044_v1  ;;  %v7497_v1 = vld [vmem:[%s10438_s7 + $0x20] sm:$0xff] }
 0x8fa   : > { %6433 = vmatpush.bf16.msra.mxu2 %v7498_v53 }
 0x8fe   : > { %6434 = vmatpush.bf16.msra.mxu2 %v7497_v1 }
 0x901   : > { %v5896_v43 = vpop.f32.mrf.mxu2 }
 0x909   : > { %v5898_v59 = vpop.f32.mrf.mxu2 }
 0x90f   : > { %v5934_v21 = vpop.f32.mrf.mxu3 }
 0x912   : > { %v5858_v44 = vpop.f32.mrf.mxu1 }
 0x913   : > { %v5859_v57 = vadd.f32 %v10126_v36, %v5858_v44  ;;  %v7508_v44 = vld [vmem:[%s10438_s7 + $0x78] sm:$0xff] }
 0x914   : > { %6445 = vmatpush.bf16.msra.mxu3 %v7508_v44  ;;  %v7529_v44 = vld [vmem:[#allocation8 + $0x60] sm:$0xff] }
 0x915   : > { %v5897_v24 = vadd.f32 %v5896_v43, %v5859_v57  ;;  %v7496_v43 = vld [vmem:[%s10438_s7 + $0x18] sm:$0xff] }
 0x916   : > { %6435 = vmatpush.bf16.msra.mxu2 %v7496_v43  ;;  %v7516_v57 = vld [vmem:[%s10438_s7 + $0xb8] sm:$0xff]  ;;  %v7521_v43 = vld [vmem:[#allocation8 + $0x20] sm:$0xff] }
 0x917   : > { %v5935_v58 = vadd.f32 %v5934_v21, %v5897_v24  ;;  %v5936_v16 = vpop.f32.mrf.mxu3  ;;  %6459 = vmatpush.bf16.msrb.mxu1 %v7516_v57  ;;  %v7507_v21 = vld [vmem:[%s10438_s7 + $0x70] sm:$0xff] }
 0x918   : > { %v7515_v24 = vld [vmem:[%s10438_s7 + $0xb0] sm:$0xff]  ;;  %6446 = vmatpush.bf16.msra.mxu3 %v7507_v21  ;;  %v7537_v21 = vld [vmem:[#allocation8 + $0xa0] sm:$0xff] }
 0x919   : > { %v5951_v4 = vmax.f32 %v5935_v58, 0.0  ;;  %v7495_v58 = vld [vmem:[%s10438_s7 + $0x10] sm:$0xff] }
 0x91a   : > { %v5860_v60 = vpop.f32.mrf.mxu1  ;;  %6436 = vmatpush.bf16.msra.mxu2 %v7495_v58 }
 0x91b   : > { %5963 = vst.msk [vmem:[#allocation4 + $0x40] sm:$0xff] %vm5954_vm1, %v5951_v4  ;;  %v5861_v11 = vadd.f32 %v10126_v36, %v5860_v60  ;;  %6460 = vmatpush.bf16.msrb.mxu1 %v7515_v24  ;;  %v7514_v4 = vld [vmem:[%s10438_s7 + $0xa8] sm:$0xff] }
 0x91c   : > { %v7494_v60 = vld [vmem:[%s10438_s7 + $0x8] sm:$0xff] }
 0x91d   : > { %v5899_v33 = vadd.f32 %v5898_v59, %v5861_v11  ;;  %v7506_v59 = vld [vmem:[%s10438_s7 + $0x68] sm:$0xff]  ;;  %v7505_v11 = vld [vmem:[%s10438_s7 + $0x60] sm:$0xff] }
 0x91e   : > { %6447 = vmatpush.bf16.msra.mxu3 %v7506_v59  ;;  %6437 = vmatpush.bf16.msra.mxu2 %v7494_v60  ;;  %v7520_v59 = vld [vmem:[#allocation8 + $0x18] sm:$0xff] }
 0x91f   : > { %v5937_v2 = vadd.f32 %v5936_v16, %v5899_v33  ;;  %6461 = vmatpush.bf16.msrb.mxu1 %v7514_v4  ;;  %v7513_v33 = vld [vmem:[%s10438_s7 + $0xa0] sm:$0xff]  ;;  %v7528_v4 = vld [vmem:[#allocation8 + $0x58] sm:$0xff] }
 0x920   : > { %v7536_v60 = vld [vmem:[#allocation8 + $0x98] sm:$0xff] }
 0x921   : > { %v5952_v22 = vmax.f32 %v5937_v2, 0.0  ;;  %v5901_v25 = vpop.f32.mrf.mxu2 }
 0x922   : > { %v5969_v27 = vld [vmem:[#allocation4 + $0x30] ss:$3 sm:$0xff]  ;;  %v5973_v37 = vld [vmem:[#allocation4 + $0x31] ss:$3 sm:$0xff]  ;;  %v5977_v6 = vld [vmem:[#allocation4 + $0x32] ss:$3 sm:$0xff]  ;;  %6448 = vmatpush.bf16.msra.mxu3 %v7505_v11 }
 0x923   : > { %v5981_v31 = vmax.f32 %v5969_v27, %v5973_v37  ;;  %5964 = vst.msk [vmem:[#allocation4 + $0x48] sm:$0xff] %vm5954_vm1, %v5952_v22  ;;  %6462 = vmatpush.bf16.msrb.mxu1 %v7513_v33  ;;  %v7504_v37 = vld [vmem:[%s10438_s7 + $0x58] sm:$0xff] }
 0x925   : > { %v5985_v26 = vmax.f32 %v5981_v31, %v5977_v6  ;;  %v7512_v31 = vld [vmem:[%s10438_s7 + $0x98] sm:$0xff] }
 0x926   : > { %6449 = vmatpush.bf16.msra.mxu3 %v7504_v37 }
 0x927   : > { %5991 = vst.msk [vmem:[#allocation2 + $0x12] sm:$0xff] %vm5954_vm1, %v5985_v26  ;;  %6463 = vmatpush.bf16.msrb.mxu1 %v7512_v31  ;;  %v7503_v26 = vld [vmem:[%s10438_s7 + $0x50] sm:$0xff] }
 0x928   : > { %v5939_v30 = vpop.f32.mrf.mxu3 }
 0x929   : > { %v5903_v41 = vpop.f32.mrf.mxu2 }
 0x92a   : > { %v5863_v19 = vpop.f32.mrf.mxu1  ;;  %6450 = vmatpush.bf16.msra.mxu3 %v7503_v26  ;;  %v7518_v26 = vld [vmem:[#allocation8 + $0x8] sm:$0xff] }
 0x92b   : > { %v5864_v3 = vadd.f32 %v10126_v36, %v5863_v19 }
 0x92d   : > { %v5902_v28 = vadd.f32 %v5901_v25, %v5864_v3  ;;  %v7493_v25 = vld [vmem:[%s10438_s7] sm:$0xff] }
 0x92e   : > { %v6004_v42 = vld [vmem:[#allocation2 + $0x11] sm:$0xff]  ;;  %6438 = vmatpush.bf16.msra.mxu2 %v7493_v25 }
 0x92f   : > { %v6030_v49 = vld [vmem:[#allocation2 + $0x12] sm:$0xff]  ;;  %v5940_v32 = vadd.f32 %v5939_v30, %v5902_v28  ;;  %6014 = vrot.lane.b32.xlu1 %v6004_v42, %s10497_s30  ;;  %v7502_v42 = vld [vmem:[%s10438_s7 + $0x48] sm:$0xff] }
 0x930   : > { %v5996_v45 = vld [vmem:[#allocation2 + $0x10] sm:$0xff]  ;;  %6034 = vst.msk [vmem:[#allocation3 + $0x38] sm:$0xff] %vm5954_vm1, %v6030_v49  ;;  %v5941_v5 = vpop.f32.mrf.mxu3  ;;  %v7510_v49 = vld [vmem:[%s10438_s7 + $0x88] sm:$0xff]  ;;  %6451 = vmatpush.bf16.msra.mxu3 %v7502_v42  ;;  %v7533_v42 = vld [vmem:[#allocation8 + $0x80] sm:$0xff] }
 0x931   : > { %6000 = vst.msk [vmem:[#allocation3 + $0x30] sm:$0xff] %vm5954_vm1, %v5996_v45  ;;  %v5953_v34 = vmax.f32 %v5940_v32, 0.0  ;;  %v7511_v30 = vld [vmem:[%s10438_s7 + $0x90] sm:$0xff] }
 0x932   : > { %v5865_v55 = vpop.f32.mrf.mxu1  ;;  %6464 = vmatpush.bf16.msrb.mxu1 %v7511_v30  ;;  %v7526_v30 = vld [vmem:[#allocation8 + $0x48] sm:$0xff] }
 0x933   : > { %5966 = vst.msk [vmem:[#allocation4 + $0x50] sm:$0x3f] %vm5965_vm5, %v5953_v34  ;;  %v7501_v55 = vld [vmem:[%s10438_s7 + $0x40] sm:$0xff] }
 0x934   : > { %6452 = vmatpush.bf16.msra.mxu3 %v7501_v55 }
 0x936   : > { %6465 = vmatpush.bf16.msrb.mxu1 %v7510_v49 }
 0x937   : > { %v6041_v39 = vld [vmem:[#allocation3 + $0x38] sm:$0xff] }
 0x93a   : > { %v5970_v51 = vld [vmem:[#allocation4 + $0x48] ss:$3 sm:$0xf]  ;;  %v5974_v50 = vld [vmem:[#allocation4 + $0x49] ss:$3 sm:$0xf]  ;;  %v6182_v63 = vpop.f32.mrf.mxu1 }
 0x93b   : > { %v5982_v36 = vmax.f32 %v5970_v51, %v5974_v50  ;;  %v5978_v54 = vld [vmem:[#allocation4 + $0x4a] ss:$3 sm:$0xf] }
 0x93c   : > { %v7509_v51 = vld [vmem:[%s10438_s7 + $0x80] sm:$0xff] }
 0x93d   : > { %v5986_v0 = vmax.f32 %v5982_v36, %v5978_v54  ;;  %6466 = vmatpush.bf16.msrb.mxu1 %v7509_v51 }
 0x93f   : > { %5993 = vst.msk [vmem:[#allocation2 + $0x1a] sm:$0xf] %vm5992_vm7, %v5986_v0 }
 0x942   : > { %v6184_v9 = vpop.f32.mrf.mxu1 }
 0x946   : > { %v6005_v17 = vld [vmem:[#allocation2 + $0x19] sm:$0x3f] }
 0x947   : > { %v6031_v8 = vld [vmem:[#allocation2 + $0x1a] sm:$0x3f]  ;;  %6016 = vrot.lane.b32.xlu2 %v6005_v17, %s10497_s30  ;;  %s7815_s30 = sshra.s32 %s6929_s9, 4  ;;  %s7816_s30 = int_to_ptr.hbm [resolvable:$true] %s7815_s30 }
 0x948   : > { %v5997_v38 = vld [vmem:[#allocation2 + $0x18] sm:$0x3f]  ;;  %6035 = vst.msk [vmem:[#allocation3 + $0x50] sm:$0x3f] %vm5965_vm5, %v6031_v8  ;;  %s7817_s24 = scalar_lea.hbm %s7816_s30, 1  ;;  %p7822_p3 = scmp.lt.s32.totalorder %s7816_s30, %s10446_s15 }
 0x949   : > { %6001 = vst.msk [vmem:[#allocation3 + $0x48] sm:$0x3f] %vm5965_vm5, %v5997_v38  ;;  %p7818_p0 = scmp.ne.s32.totalorder %s7816_s30, %s7817_s24  ;;  %p7823_p4 = scmp.lt.s32.totalorder %s7821_s23, %s7817_s24 }
 0x94b   : > { %p7819_p1 = pnand %p7818_p0, %p8018_p5  ;;  %p7824_p7 = por %p7823_p4, %p7822_p3 }
 0x94d   : > { %p7820_p2 = pneg %p7819_p1 }
 0x94f   : > { %v6043_v10 = vld [vmem:[#allocation3 + $0x50] sm:$0x3f]  ;;  %p7825_p8 = pnand %p7824_p7, %p7820_p2 }
 0x950   : > { %v6047_v46 = vpack.c.bf16 %v6043_v10, %v6041_v39 }
 0x952   : > { %7194 = vmatmul.msk.bf16.gmra.mxu1 %vm5954_vm1, %v6047_v46 }
 0x97a   : > { %v6163_v23 = vpop.f32.mrf.mxu3 }
 0x97b   : > { %v6164_v56 = vadd.f32 %v10257_v47, %v6163_v23 }
 0x97d   : > { %v6183_v61 = vadd.f32 %v6182_v63, %v6164_v56 }
 0x97f   : > { %v6192_v20 = vmax.f32 %v6183_v61, 0.0 }
 0x981   : > { %6196 = vst [vmem:[#allocation4] sm:$0xff] %v6192_v20 }
 0x982   : > { %v6165_v62 = vpop.f32.mrf.mxu3 }
 0x983   : > { %v6166_v40 = vadd.f32 %v10257_v47, %v6165_v62 }
 0x985   : > { %v6185_v13 = vadd.f32 %v6184_v9, %v6166_v40  ;;  %v7524_v9 = vld [vmem:[#allocation8 + $0x38] sm:$0xff] }
 0x986   : > { %6693 = vmatpush.bf16.msrb.mxu2 %v7524_v9 }
 0x987   : > { %v6193_v52 = vmax.f32 %v6185_v13, 0.0  ;;  %v7532_v13 = vld [vmem:[#allocation8 + $0x78] sm:$0xff] }
 0x988   : > { %6706 = vmatpush.bf16.msrb.mxu3 %v7532_v13 }
 0x989   : > { %6197 = vst [vmem:[#allocation4 + $0x8] sm:$0xff] %v6193_v52  ;;  %v7540_v52 = vld [vmem:[#allocation8 + $0xb8] sm:$0xff] }
 0x98a   : > { %6719 = vmatpush.bf16.msra.mxu1 %v7540_v52  ;;  %v7541_v52 = vld [vmem:[%s10442_s11] sm:$0xff] }
 0x9a1   : > { %v6015_v14 = vpop.permute.xlu1 %6014  ;;  %v6017_v15 = vpop.permute.xlu2 %6016 }
 0x9a2   : > { %6025 = vst.msk [vmem:[#allocation3 + $0x30] sm:$0xff] %vm6022_vm4, %v6015_v14  ;;  %v7531_v14 = vld [vmem:[#allocation8 + $0x70] sm:$0xff] }
 0x9a3   : > { %6027 = vst.msk [vmem:[#allocation3 + $0x48] sm:$0x3f] %vm6026_vm8, %v6017_v15  ;;  %v7539_v15 = vld [vmem:[#allocation8 + $0xb0] sm:$0xff]  ;;  %6707 = vmatpush.bf16.msrb.mxu3 %v7531_v14 }
 0x9a4   : > { %6720 = vmatpush.bf16.msra.mxu1 %v7539_v15  ;;  %v7899_v15 = vmov 2.0  }
 0x9a5   : > { %7733 = vrcp.f32 %v7899_v15 }
 0x9a8   : > { %6721 = vmatpush.bf16.msra.mxu1 %v7538_v29  ;;  %v7555_v29 = vld [vmem:[%s10444_s13 + $0x30] sm:$0xff] }
 0x9a9   : > { %v6040_v48 = vld [vmem:[#allocation3 + $0x30] sm:$0xff] }
 0x9aa   : > { %v6042_v7 = vld [vmem:[#allocation3 + $0x48] sm:$0x3f] }
 0x9ab   : > { %v6046_v18 = vpack.c.bf16 %v6042_v7, %v6040_v48  ;;  %v7731_v48 = vld [vmem:[%s10439_s8] ss:$0 sm:$0xff]  ;;  %v7522_v7 = vld [vmem:[#allocation8 + $0x28] sm:$0xff] }
 0x9ac   : > { %6722 = vmatpush.bf16.msra.mxu1 %v7537_v21 }
 0x9ad   : > { %6167 = vmatmul.bf16.gmra.mxu3 %v6046_v18  ;;  %v7530_v18 = vld [vmem:[#allocation8 + $0x68] sm:$0xff] }
 0x9ae   : > { %6708 = vmatpush.bf16.msrb.mxu3 %v7530_v18 }
 0x9b0   : > { %6723 = vmatpush.bf16.msra.mxu1 %v7536_v60  ;;  %v7552_v60 = vld [vmem:[%s10444_s13 + $0x18] sm:$0xff] }
 0x9b2   : > { %6709 = vmatpush.bf16.msrb.mxu3 %v7529_v44  ;;  %v7553_v44 = vld [vmem:[%s10444_s13 + $0x20] sm:$0xff] }
 0x9b6   : > { %6710 = vmatpush.bf16.msrb.mxu3 %v7528_v4 }
 0x9cf   : > { %v6187_v16 = vpop.f32.mrf.mxu1 }
 0x9d7   : > { %v6189_v3 = vpop.f32.mrf.mxu1 }
 0xa30   : > { %v6168_v2 = vpop.f32.mrf.mxu3 }
 0xa31   : > { %v6169_v22 = vadd.f32 %v10257_v47, %v6168_v2  ;;  %v7519_v2 = vld [vmem:[#allocation8 + $0x10] sm:$0xff] }
 0xa33   : > { %v6188_v27 = vadd.f32 %v6187_v16, %v6169_v22  ;;  %v7527_v22 = vld [vmem:[#allocation8 + $0x50] sm:$0xff] }
 0xa34   : > { %6711 = vmatpush.bf16.msrb.mxu3 %v7527_v22  ;;  %v7551_v22 = vld [vmem:[%s10444_s13 + $0x10] sm:$0xff] }
 0xa35   : > { %v6194_v6 = vmax.f32 %v6188_v27, 0.0  ;;  %v7535_v27 = vld [vmem:[#allocation8 + $0x90] sm:$0xff] }
 0xa36   : > { %6724 = vmatpush.bf16.msra.mxu1 %v7535_v27 }
 0xa37   : > { %6198 = vst [vmem:[#allocation4 + $0x10] sm:$0xff] %v6194_v6 }
 0xa38   : > { %v6170_v41 = vpop.f32.mrf.mxu3  ;;  %6712 = vmatpush.bf16.msrb.mxu3 %v7526_v30 }
 0xa39   : > { %v6171_v19 = vadd.f32 %v10257_v47, %v6170_v41  ;;  %v7534_v41 = vld [vmem:[#allocation8 + $0x88] sm:$0xff] }
 0xa3a   : > { %6725 = vmatpush.bf16.msra.mxu1 %v7534_v41 }
 0xa3b   : > { %v6190_v28 = vadd.f32 %v6189_v3, %v6171_v19  ;;  %v7517_v3 = vld [vmem:[#allocation8] sm:$0xff] }
 0xa3d   : > { %v6195_v45 = vmax.f32 %v6190_v28, 0.0  ;;  %v7525_v28 = vld [vmem:[#allocation8 + $0x40] sm:$0xff] }
 0xa3e   : > { %v6200_v32 = vld [vmem:[#allocation4] ss:$3 sm:$0xff]  ;;  %v6202_v5 = vld [vmem:[#allocation4 + $0x1] ss:$3 sm:$0xff]  ;;  %v6204_v50 = vld [vmem:[#allocation4 + $0x2] ss:$3 sm:$0xff]  ;;  %6713 = vmatpush.bf16.msrb.mxu3 %v7525_v28  ;;  %6726 = vmatpush.bf16.msra.mxu1 %v7533_v42 }
 0xa3f   : > { %v6206_v34 = vmax.f32 %v6200_v32, %v6202_v5  ;;  %6199 = vst [vmem:[#allocation4 + $0x18] sm:$0x3f] %v6195_v45  ;;  %v6771_v28 = vld [vmem:[%s10443_s12] sm:$0x1] }
 0xa41   : > { %v6208_v36 = vmax.f32 %v6206_v34, %v6204_v50 }
 0xa43   : > { %6212 = vst [vmem:[#allocation2 + $0x2] sm:$0xff] %v6208_v36 }
 0xa44   : > { %6224 = vst [vmem:[#allocation3 + $0x10] sm:$0xff] %v6208_v36 }
 0xa46   : > { %v6201_v54 = vld [vmem:[#allocation4 + $0x18] ss:$3 sm:$0x3]  ;;  %v6203_v0 = vld [vmem:[#allocation4 + $0x19] ss:$3 sm:$0x3] }
 0xa47   : > { %v6207_v17 = vmax.f32 %v6201_v54, %v6203_v0  ;;  %v6205_v8 = vld [vmem:[#allocation4 + $0x1a] ss:$3 sm:$0x3] }
 0xa49   : > { %v6209_v38 = vmax.f32 %v6207_v17, %v6205_v8 }
 0xa4a   : > { %v6214_v39 = vld [vmem:[#allocation2] sm:$0xff] }
 0xa4b   : > { %v6218_v10 = vld [vmem:[#allocation2 + $0x1] sm:$0xff]  ;;  %6213 = vst [vmem:[#allocation2 + $0xa] sm:$0x3] %v6209_v38 }
 0xa4c   : > { %6216 = vst [vmem:[#allocation3] sm:$0xff] %v6214_v39 }
 0xa4d   : > { %6220 = vst [vmem:[#allocation3 + $0x8] sm:$0xff] %v6218_v10 }
 0xa4e   : > { %6482 = vst [vmem:[#allocation2] sm:$0x3] %v10160_v35 }
 0xa4f   : > { %6483 = vst [vmem:[#allocation2 + $0x6] sm:$0x3] %v10160_v35  ;;  %v7523_v35 = vld [vmem:[#allocation8 + $0x30] sm:$0xff] }
 0xa50   : > { %6694 = vmatpush.bf16.msrb.mxu2 %v7523_v35 }
 0xa52   : > { %v6215_v46 = vld [vmem:[#allocation2 + $0x8] sm:$0xf] }
 0xa53   : > { %v6219_v47 = vld [vmem:[#allocation2 + $0x9] sm:$0xf]  ;;  %6217 = vst [vmem:[#allocation3 + $0x18] sm:$0xf] %v6215_v46 }
 0xa54   : > { %v6223_v63 = vld [vmem:[#allocation2 + $0xa] sm:$0xf]  ;;  %6221 = vst [vmem:[#allocation3 + $0x20] sm:$0xf] %v6219_v47  ;;  %6695 = vmatpush.bf16.msrb.mxu2 %v7522_v7  ;;  %v7545_v47 = vld [vmem:[%s10442_s11 + $0x20] sm:$0xff] }
 0xa55   : > { %6225 = vst [vmem:[#allocation3 + $0x28] sm:$0xf] %v6223_v63  ;;  %v7546_v46 = vld [vmem:[%s10442_s11 + $0x28] sm:$0xff]  ;;  %v7544_v63 = vld [vmem:[%s10442_s11 + $0x18] sm:$0xff] }
 0xa58   : > { %6696 = vmatpush.bf16.msrb.mxu2 %v7521_v43 }
 0xa5a   : > { %v6229_v23 = vld [vmem:[#allocation3 + $0x18] sm:$0xf] }
 0xa5b   : > { %v6232_v56 = vpack.c.bf16 %v6229_v23, %v6214_v39  ;;  %v6230_v61 = vld [vmem:[#allocation3 + $0x20] sm:$0xf]  ;;  %v7548_v39 = vld [vmem:[%s10442_s11 + $0x38] sm:$0xff] }
 0xa5c   : > { %v6233_v20 = vpack.c.bf16 %v6230_v61, %v6218_v10  ;;  %v6231_v62 = vld [vmem:[#allocation3 + $0x28] sm:$0xf]  ;;  %6697 = vmatpush.bf16.msrb.mxu2 %v7520_v59  ;;  %v7547_v10 = vld [vmem:[%s10442_s11 + $0x30] sm:$0xff]  ;;  %v7732_v61 = vld [vmem:[%s10441_s10] ss:$0 sm:$0xff] }
 0xa5d   : > { %6439 = vmatmul.bf16.vlgmr.msra.gmra.mxu2 %v6232_v56  ;;  %v6234_v40 = vpack.c.bf16 %v6231_v62, %v6208_v36  ;;  %v7543_v23 = vld [vmem:[%s10442_s11 + $0x10] sm:$0xff] }
 0xa5e   : > { %6453 = vmatmul.bf16.vlgmr.msra.gmra.mxu3 %v6233_v20  ;;  %v7542_v20 = vld [vmem:[%s10442_s11 + $0x8] sm:$0xff] }
 0xa5f   : > { %6467 = vmatmul.bf16.vlgmr.msrb.gmra.mxu1 %v6234_v40 }
 0xa60   : > { %6698 = vmatpush.bf16.msrb.mxu2 %v7519_v2 }
 0xa64   : > { %6699 = vmatpush.bf16.msrb.mxu2 %v7518_v26 }
 0xa68   : > { %6700 = vmatpush.bf16.msrb.mxu2 %v7517_v3  ;;  %v7549_v3 = vld [vmem:[%s10444_s13] sm:$0xff] }
 0xa6c   : > { %6820 = vmatpush.bf16.msra.mxu2 %v7548_v39 }
 0xa70   : > { %6821 = vmatpush.bf16.msra.mxu2 %v7547_v10 }
 0xa74   : > { %6822 = vmatpush.bf16.msra.mxu2 %v7546_v46 }
 0xa78   : > { %6823 = vmatpush.bf16.msra.mxu2 %v7545_v47 }
 0xa7c   : > { %6824 = vmatpush.bf16.msra.mxu2 %v7544_v63 }
 0xa80   : > { %6825 = vmatpush.bf16.msra.mxu2 %v7543_v23 }
 0xa84   : > { %6826 = vmatpush.bf16.msra.mxu2 %v7542_v20 }
 0xa88   : > { %6827 = vmatpush.bf16.msra.mxu2 %v7541_v52 }
 0xadc   : > { %v6468_v57 = vpop.f32.mrf.mxu1 }
 0xae0   : > { %v6440_v12 = vpop.f32.mrf.mxu2 }
 0xae1   : > { %v6441_v53 = vadd.f32 %v7731_v48, %v6440_v12  ;;  %v6454_v1 = vpop.f32.mrf.mxu3 }
 0xae3   : > { %v6455_v24 = vadd.f32 %v6454_v1, %v6441_v53  ;;  %v7734_v53 = vpop.eup %7733  ;;  %v7554_v1 = vld [vmem:[%s10444_s13 + $0x28] sm:$0xff] }
 0xae4   : > { %v6470_v31 = vpop.f32.mrf.mxu1  ;;  %v6747_v43 = vmul.f32 2.0, %v7734_v53  ;;  %vm6751_vm9 = vweird.f32 %v7734_v53 }
 0xae5   : > { %v6469_v58 = vadd.f32 %v6468_v57, %v6455_v24 }
 0xae6   : > { %v6748_v4 = vsub.f32 1.0, %v6747_v43 }
 0xae7   : > { %v6473_v11 = vmax.f32 %v6469_v58, 0.0 }
 0xae8   : > { %v6442_v33 = vpop.f32.mrf.mxu2 }
 0xae9   : > { %6475 = vst [vmem:[#allocation4] sm:$0xff] %v6473_v11  ;;  %v6443_v16 = vadd.f32 %v7731_v48, %v6442_v33  ;;  %v6456_v25 = vpop.f32.mrf.mxu3  ;;  %v7556_v48 = vld [vmem:[%s10444_s13 + $0x38] sm:$0xff] }
 0xaea   : > { %6900 = vmatpush.bf16.msra.mxu3 %v7556_v48 }
 0xaeb   : > { %v6457_v37 = vadd.f32 %v6456_v25, %v6443_v16  ;;  %v6749_v16 = vmul.f32 %v7734_v53, %v6748_v4 }
 0xaed   : > { %v6471_v6 = vadd.f32 %v6470_v31, %v6457_v37  ;;  %v6750_v27 = vadd.f32 %v7734_v53, %v6749_v16 }
 0xaee   : > { %6901 = vmatpush.bf16.msra.mxu3 %v7555_v29 }
 0xaef   : > { %v6474_v19 = vmax.f32 %v6471_v6, 0.0  ;;  %v6752_v6 = vsel %vm6751_vm9, %v7734_v53, %v6750_v27 }
 0xaf1   : > { %6476 = vst [vmem:[#allocation4 + $0x8] sm:$0xf] %v6474_v19  ;;  %v7550_v19 = vld [vmem:[%s10444_s13 + $0x8] sm:$0xff] }
 0xaf2   : > { %6902 = vmatpush.bf16.msra.mxu3 %v7554_v1 }
 0xaf6   : > { %6903 = vmatpush.bf16.msra.mxu3 %v7553_v44 }
 0xaf8   : > { %v6477_v49 = vld [vmem:[#allocation4] ss:$3 sm:$0xf]  ;;  %v6478_v45 = vld [vmem:[#allocation4 + $0x1] ss:$3 sm:$0xf] }
 0xaf9   : > { %v6480_v32 = vmax.f32 %v6477_v49, %v6478_v45  ;;  %v6479_v5 = vld [vmem:[#allocation4 + $0x2] ss:$3 sm:$0xf] }
 0xafa   : > { %6904 = vmatpush.bf16.msra.mxu3 %v7552_v60 }
 0xafb   : > { %v6481_v34 = vmax.f32 %v6480_v32, %v6479_v5 }
 0xafd   : > { %6484 = vst [vmem:[#allocation2 + $0x2] sm:$0xf] %v6481_v34  ;;  %v6851_v34 = vld [vmem:[%s10445_s14] sm:$0x1] }
 0xafe   : > { %6905 = vmatpush.bf16.msra.mxu3 %v7551_v22 }
 0xb02   : > { %6906 = vmatpush.bf16.msra.mxu3 %v7550_v19 }
 0xb04   : > { %v6485_v55 = vld [vmem:[#allocation2] sm:$0x3f] }
 0xb05   : > { %v6487_v51 = vld [vmem:[#allocation2 + $0x1] sm:$0x3f]  ;;  %6486 = vst [vmem:[#allocation3] sm:$0x3f] %v6485_v55 }
 0xb06   : > { %v6489_v50 = vld [vmem:[#allocation2 + $0x2] sm:$0x3f]  ;;  %6488 = vst [vmem:[#allocation3 + $0x8] sm:$0x3f] %v6487_v51  ;;  %6907 = vmatpush.bf16.msra.mxu3 %v7549_v3 }
 0xb07   : > { %6490 = vst [vmem:[#allocation3 + $0x10] sm:$0x3f] %v6489_v50 }
 0xb0c   : > { %v6491_v36 = vld [vmem:[#allocation3] sm:$0x3f] }
 0xb0d   : > { %v6494_v54 = vpack.c.bf16 %v6491_v36, %v6491_v36  ;;  %v6492_v0 = vld [vmem:[#allocation3 + $0x8] sm:$0x3f] }
 0xb0e   : > { %v6495_v17 = vpack.c.bf16 %v6492_v0, %v6492_v0  ;;  %v6493_v8 = vld [vmem:[#allocation3 + $0x10] sm:$0x3f] }
 0xb0f   : > { %6701 = vmatmul.bf16.vlgmr.msrb.gmra.mxu2 %v6494_v54  ;;  %v6496_v38 = vpack.c.bf16 %v6493_v8, %v6493_v8 }
 0xb10   : > { %6714 = vmatmul.bf16.vlgmr.msrb.gmra.mxu3 %v6495_v17 }
 0xb11   : > { %6727 = vmatmul.bf16.vlgmr.msra.gmra.mxu1 %v6496_v38 }
 0xb8e   : > { %v6728_v56 = vpop.f32.mrf.mxu1 }
 0xb92   : > { %v6702_v62 = vpop.f32.mrf.mxu2 }
 0xb93   : > { %v6703_v40 = vadd.f32 %v7732_v61, %v6702_v62  ;;  %v6715_v9 = vpop.f32.mrf.mxu3 }
 0xb95   : > { %v6716_v13 = vadd.f32 %v6715_v9, %v6703_v40 }
 0xb96   : > { %v6730_v35 = vpop.f32.mrf.mxu1 }
 0xb97   : > { %v6729_v14 = vadd.f32 %v6728_v56, %v6716_v13 }
 0xb99   : > { %v6732_v7 = vmax.f32 %v6729_v14, 0.0 }
 0xb9a   : > { %v6704_v18 = vpop.f32.mrf.mxu2 }
 0xb9b   : > { %6733 = vst [vmem:[#allocation4] sm:$0x3f] %v6732_v7  ;;  %v6717_v12 = vpop.f32.mrf.mxu3 }
 0xba2   : > { %v6734_v57 = vld [vmem:[#allocation4] ss:$3 sm:$0x3]  ;;  %v6735_v21 = vld [vmem:[#allocation4 + $0x1] ss:$3 sm:$0x3] }
 0xba3   : > { %v6737_v24 = vmax.f32 %v6734_v57, %v6735_v21  ;;  %v6736_v58 = vld [vmem:[#allocation4 + $0x2] ss:$3 sm:$0x3] }
 0xba5   : > { %v6738_v59 = vmax.f32 %v6737_v24, %v6736_v58 }
 0xba7   : > { %v6739_v11 = vsel %vm10514_vm6, %v6738_v59, 0.0 }
 0xba8   : > { %v6740_v33 = vrot.slane %v6739_v11, 4 }
 0xbaa   : > { %v6741_v2 = vadd.f32 %v6740_v33, %v6739_v11 }
 0xbac   : > { %v6742_v25 = vrot.slane %v6741_v2, 2 }
 0xbae   : > { %v6743_v37 = vadd.f32 %v6742_v25, %v6741_v2 }
 0xbb0   : > { %v6744_v31 = vrot.slane %v6743_v37, 1 }
 0xbb2   : > { %v6745_v26 = vadd.f32 %v6744_v31, %v6743_v37 }
 0xbb4   : > { %v6753_v30 = vmul.f32 %v6752_v6, %v6745_v26 }
 0xbb6   : > { %v6754_v41 = vpack.c.bf16 %v6753_v30, %v6753_v30 }
 0xbb8   : > { %6828 = vmatmul.bf16.vlgmr.msra.gmra.mxu2 %v6754_v41 }
 0xc3b   : > { %v6829_v42 = vpop.f32.mrf.mxu2 }
 0xc3c   : > { %v6830_v49 = vadd.f32 %v6829_v42, %v6771_v28 }
 0xc3e   : > { %v6833_v45 = vmax.f32 %v6830_v49, 0.0 }
 0xc40   : > { %v6834_v32 = vpack.c.bf16 %v6833_v45, %v6833_v45 }
 0xc42   : > { %6908 = vmatmul.bf16.vlgmr.msra.gmra.mxu3 %v6834_v32 }
 0xc43   : > { %v6831_v5 = vpop.f32.mrf.mxu2 }
 0xcc5   : > { %v6909_v55 = vpop.f32.mrf.mxu3 }
 0xcc6   : > { %v6910_v51 = vadd.f32 %v6909_v55, %v6851_v34 }
 0xcc8   : > { %6914 = vst.msk [vmem:[%s520_s1] sm:$0x1] %vm6913_vm10, %v6910_v51 }
 0xcc9   : > { %7828 = shalt.err (!%p7825_p8)
}
 0xcca   : > { %7651 = dma.vmem_to_hbm [thread:$0]  (%p8018_p5), %s6927_s3, 16, %s6929_s9, %s6916_s27  }
 0xccd   : > { %v6911_v50 = vpop.f32.mrf.mxu3 }
 0xcce PF: > { %s10515_s18 = sld [smem:[#allocation16_spill]] }
 0xccf   : > { %s10516_s29 = sld [smem:[#allocation14_spill]] }
 0xcd4   : > { %p7668_p9 = scmp.ge.s32.totalorder %s10515_s18, 2 }
 0xcd5   : > { %s6940_s21 = sand.u32 1, %s10516_s29  }
 0xcd6   : > { %p7661_p10 = pnand %p7668_p9, %p8022_p6  ;;  %s6941_s16 = scalar_lea.sflag [#allocation7], %s6940_s21 }
 0xcd8   : > { %p7662_p11 = pneg %p7661_p10 }
 0xcda   : > { %7854 = dma.done.wait (%p7662_p11), %s6941_s16, 16  }
 0xcdb   : > { %7856 = vsyncadd (%p7662_p11), %s6941_s16, 4294967280  ;;  %s10518_s21 = sld [smem:[#allocation17_spill]]  ;;  %s10521_s18 = smov %s7863_s19 }
 0xcdc   : > { %s10519_s0 = sld [smem:[#allocation15_spill]] }
 0xcdd   : > { %s10520_s20 = sld [smem:[#allocation18_spill]] }
 0xce1   : > { %p27_p12 = scmp.ge.s32.totalorder %s10518_s21, 4  }
 0xce2   : > { %s10522_s19 = smov %s10519_s0 }
 0xce3   :  { %29 = sbr.rel (!%p27_p12) target bundleno = 10 (0xa), region = 156 }
 0xce8   :  { %6946 = vsyncpa [#allocation6], 1 }
 0xce9   :  { %6948 = vsyncpa [#allocation6 + $0x1], 1 }
 0xcea   :  { %6949 = vsyncpa [#allocation9], 1 }
 0xceb   :  { %6950 = vsyncpa [#allocation7], 1 }
 0xcec   :  { %6952 = vsyncpa [#allocation7 + $0x1], 1 }

</bundles_post_ra>
